<compile_context>
chip_gen: v6e
topology: v6e:2x2x1
jax: 0.10.0
libtpu: 0.0.40
codegen_flags: <defaults>
</compile_context>

<pallas_src>
import numpy as np
import jax
import jax.numpy as jnp
from jax import lax
from jax.experimental import pallas as pl
from jax.experimental.pallas import tpu as pltpu


# ----------------------------------------------------------------- utilities
def _round_up(x, m):
    return (x + m - 1) // m * m


def _fold_bn(gamma, beta, mean, var, eps=1e-5):
    scale = gamma / jnp.sqrt(var + eps)
    return scale, beta - mean * scale


# ------------------------------------------------ pltpu.roll direction probe
def _roll_probe_kernel(x_ref, o_ref):
    o_ref[...] = pltpu.roll(x_ref[...], 1, axis=1)


_ROLL_SIGN = None


def _roll_sign():
    """+1 if pltpu.roll matches np.roll on the sublane axis, -1 if reversed,
    0 if sublane rolls are unavailable (-> plain-slice fallback)."""
    global _ROLL_SIGN
    if _ROLL_SIGN is not None:
        return _ROLL_SIGN
    sign = 0
    try:
        shape = (16, 24, 128)
        x = (jnp.arange(np.prod(shape), dtype=jnp.float32) % 251.0
             ).reshape(shape).astype(jnp.bfloat16)
        y = pl.pallas_call(
            _roll_probe_kernel,
            out_shape=jax.ShapeDtypeStruct(shape, jnp.bfloat16))(x)
        y = np.asarray(jax.device_get(jax.block_until_ready(y))).astype(np.float32)
        xf = np.asarray(jax.device_get(x)).astype(np.float32)
        if np.array_equal(y, np.roll(xf, 1, axis=1)):
            sign = 1
        elif np.array_equal(y, np.roll(xf, -1, axis=1)):
            sign = -1
    except Exception:
        sign = 0
    _ROLL_SIGN = sign
    return sign


# ------------------------------------------------------------ fused kernel
def _make_kernel(H1, W1, Hp, Wp, Wpad, roll_sign):
    """Fused cbnr_1 + cbnr_2 + cbnr_3 + maxpool for one batch element."""

    def shift_w(v, dx):
        # t[:, w, :] = v[:, w + dx, :] for w in [0, W1)   (v: (H1+2, Wpad, C))
        if dx == 0 or roll_sign == 0:
            return v[:, dx:dx + W1, :]                 # fallback: plain slice
        amount = (-roll_sign * dx) % Wpad              # XLU rotate, free slot
        return pltpu.roll(v, amount, axis=1)[:, :W1, :]

    def conv3x3_bn_relu(scr_ref, w_ref, scale, shift):
        cout = w_ref.shape[-1]
        xv = scr_ref[...]                              # (H1+2, Wpad, Cin) bf16
        acc = jnp.zeros((H1, W1, cout), jnp.float32)
        for dx in range(3):
            t = shift_w(xv, dx)                        # (H1+2, W1, Cin)
            for dy in range(3):
                acc = acc + jnp.einsum(
                    'hwc,cd->hwd', t[dy:dy + H1], w_ref[dy * 3 + dx],
                    preferred_element_type=jnp.float32)
        return jnp.maximum(acc * scale + shift, 0.0)   # folded BN + ReLU (f32)

    def zero_pad_frame(ref, dtype):
        # Keep the 1-pixel zero halo (and the lane-padding slack) of a padded
        # VMEM scratch valid every grid step (safe under megacore splitting).
        c = ref.shape[-1]
        ref[0:1, :, :] = jnp.zeros((1, Wpad, c), dtype)
        ref[H1 + 1:H1 + 2, :, :] = jnp.zeros((1, Wpad, c), dtype)
        ref[1:H1 + 1, 0:1, :] = jnp.zeros((H1, 1, c), dtype)
        ref[1:H1 + 1, W1 + 1:Wpad, :] = jnp.zeros((H1, Wpad - W1 - 1, c), dtype)

    def kernel(xcol_ref, w1_ref, s1_ref, b1_ref,
               w2_ref, s2_ref, b2_ref,
               w3_ref, s3_ref, b3_ref,
               o_ref, xp2_ref, xp3_ref, p3_ref):
        zero_pad_frame(xp2_ref, jnp.bfloat16)
        zero_pad_frame(xp3_ref, jnp.bfloat16)
        zero_pad_frame(p3_ref, jnp.float32)

        # cbnr_1: 3x3/s2 conv as one (H1*W1, 27) x (27, 64) matmul (im2col'd
        # in the wrapper since Cin=3), + folded BN + ReLU.
        a1 = jnp.einsum('hwc,cd->hwd', xcol_ref[0], w1_ref[...],
                        preferred_element_type=jnp.float32)
        y1 = jnp.maximum(a1 * s1_ref[0] + b1_ref[0], 0.0)
        xp2_ref[1:H1 + 1, 1:W1 + 1, :] = y1.astype(jnp.bfloat16)

        # cbnr_2: 3x3/s1, 64 -> 64
        y2 = conv3x3_bn_relu(xp2_ref, w2_ref, s2_ref[0], b2_ref[0])
        xp3_ref[1:H1 + 1, 1:W1 + 1, :] = y2.astype(jnp.bfloat16)

        # cbnr_3: 3x3/s1, 64 -> 128
        y3 = conv3x3_bn_relu(xp3_ref, w3_ref, s3_ref[0], b3_ref[0])
        p3_ref[1:H1 + 1, 1:W1 + 1, :] = y3.astype(jnp.float32)

        # maxpool 3x3 / s2 / p1 : zero halo == -inf halo because y3 >= 0.
        pooled = None
        for dy in range(3):
            for dx in range(3):
                tap = p3_ref[pl.ds(dy, Hp, stride=2), pl.ds(dx, Wp, stride=2), :]
                pooled = tap if pooled is None else jnp.maximum(pooled, tap)
        o_ref[0] = pooled.astype(o_ref.dtype)

    return kernel


# ----------------------------------------------------------------- wrapper
def feature_map_convolution(x_nchw, params):
    N, Cin, H, W = x_nchw.shape
    C1 = params['w1'].shape[3]
    C2 = params['w2'].shape[3]
    C3 = params['w3'].shape[3]
    H1 = (H - 1) // 2 + 1           # conv1: k3 s2 p1
    W1 = (W - 1) // 2 + 1
    Hp = (H1 - 1) // 2 + 1          # maxpool: k3 s2 p1
    Wp = (W1 - 1) // 2 + 1
    Wpad = _round_up(W1 + 2, 8)     # sublane-friendly padded scratch width

    # Fold inference-mode BatchNorms into per-channel scale/shift (f32).
    s1, b1 = _fold_bn(params['g1'], params['be1'], params['m1'], params['v1'])
    s2, b2 = _fold_bn(params['g2'], params['be2'], params['m2'], params['v2'])
    s3, b3 = _fold_bn(params['g3'], params['be3'], params['m3'], params['v3'])

    # NCHW -> NHWC; stride-2 conv1 turned into an im2col matmul (input is the
    # tiny 3-channel tensor, so this wrapper-side gather is negligible).
    x = jnp.transpose(x_nchw, (0, 2, 3, 1))
    xpad = jnp.pad(x, ((0, 0), (1, 1), (1, 1), (0, 0)))
    cols = [xpad[:, dy:dy + 2 * H1 - 1:2, dx:dx + 2 * W1 - 1:2, :]
            for dy in range(3) for dx in range(3)]
    xcol = jnp.concatenate(cols, axis=-1).astype(jnp.bfloat16)   # (N,H1,W1,27)

    w1 = params['w1'].reshape(9 * Cin, C1).astype(jnp.bfloat16)  # (27, 64)
    w2 = params['w2'].reshape(9, C1, C2).astype(jnp.bfloat16)    # (9, 64, 64)
    w3 = params['w3'].reshape(9, C2, C3).astype(jnp.bfloat16)    # (9, 64, 128)

    kernel = _make_kernel(H1, W1, Hp, Wp, Wpad, _roll_sign())

    out_nhwc = pl.pallas_call(
        kernel,
        out_shape=jax.ShapeDtypeStruct((N, Hp, Wp, C3), x_nchw.dtype),
        grid=(N,),
        in_specs=[
            pl.BlockSpec((1, H1, W1, 9 * Cin), lambda n: (n, 0, 0, 0)),
            pl.BlockSpec((9 * Cin, C1), lambda n: (0, 0)),
            pl.BlockSpec((1, C1), lambda n: (0, 0)),
            pl.BlockSpec((1, C1), lambda n: (0, 0)),
            pl.BlockSpec((9, C1, C2), lambda n: (0, 0, 0)),
            pl.BlockSpec((1, C2), lambda n: (0, 0)),
            pl.BlockSpec((1, C2), lambda n: (0, 0)),
            pl.BlockSpec((9, C2, C3), lambda n: (0, 0, 0)),
            pl.BlockSpec((1, C3), lambda n: (0, 0)),
            pl.BlockSpec((1, C3), lambda n: (0, 0)),
        ],
        out_specs=pl.BlockSpec((1, Hp, Wp, C3), lambda n: (n, 0, 0, 0)),
        scratch_shapes=[
            pltpu.VMEM((H1 + 2, Wpad, C1), jnp.bfloat16),   # padded y1
            pltpu.VMEM((H1 + 2, Wpad, C2), jnp.bfloat16),   # padded y2
            pltpu.VMEM((H1 + 2, Wpad, C3), jnp.float32),    # padded y3 (pool in)
        ],
        compiler_params=pltpu.CompilerParams(
            dimension_semantics=("parallel",),
            vmem_limit_bytes=48 * 1024 * 1024),
    )(xcol, w1, s1[None, :], b1[None, :],
      w2, s2[None, :], b2[None, :],
      w3, s3[None, :], b3[None, :])

    return jnp.transpose(out_nhwc, (0, 3, 1, 2))            # back to NCHW


# ------------------------------------------------------------------- params
def init_params(key):
    ks = jax.random.split(key, 6)

    def conv_w(k, cin, cout):
        std = (2.0 / (9 * cin)) ** 0.5
        return std * jax.random.normal(k, (3, 3, cin, cout), jnp.float32)  # HWIO

    def bn_params(k, c):
        k1, k2, k3, k4 = jax.random.split(k, 4)
        return (jax.random.uniform(k1, (c,), jnp.float32, 0.5, 1.5),   # gamma
                0.1 * jax.random.normal(k2, (c,), jnp.float32),        # beta
                0.2 * jax.random.normal(k3, (c,), jnp.float32),        # run. mean
                jax.random.uniform(k4, (c,), jnp.float32, 0.5, 1.5))   # run. var

    p = {}
    p['w1'] = conv_w(ks[0], 3, 64)
    p['g1'], p['be1'], p['m1'], p['v1'] = bn_params(ks[1], 64)
    p['w2'] = conv_w(ks[2], 64, 64)
    p['g2'], p['be2'], p['m2'], p['v2'] = bn_params(ks[3], 64)
    p['w3'] = conv_w(ks[4], 64, 128)
    p['g3'], p['be3'], p['m3'], p['v3'] = bn_params(ks[5], 128)
    return p


# ---------------------------------------------------------------- reference
def reference(x_nchw, params, quantize_matmul_operands=False):
    """Pure-JAX reference of the same forward pass.  With
    quantize_matmul_operands=True the conv operands are rounded to bf16
    (mirroring the kernel's bf16-MXU / f32-accumulation numerics)."""
    eps = 1e-5
    q = ((lambda a: a.astype(jnp.bfloat16).astype(jnp.float32))
         if quantize_matmul_operands else (lambda a: a))

    def cbnr(x, w, g, b, m, v, stride):
        y = lax.conv_general_dilated(
            q(x), q(w), window_strides=(stride, stride),
            padding=((1, 1), (1, 1)),
            dimension_numbers=('NHWC', 'HWIO', 'NHWC'),
            preferred_element_type=jnp.float32)
        y = (y - m) / jnp.sqrt(v + eps) * g + b
        return jnp.maximum(y, 0.0)

    x = jnp.transpose(x_nchw, (0, 2, 3, 1)).astype(jnp.float32)
    y = cbnr(x, params['w1'], params['g1'], params['be1'], params['m1'], params['v1'], 2)
    y = cbnr(y, params['w2'], params['g2'], params['be2'], params['m2'], params['v2'], 1)
    y = cbnr(y, params['w3'], params['g3'], params['be3'], params['m3'], params['v3'], 1)
    pooled = lax.reduce_window(
        y, -jnp.inf, lax.max,
        window_dimensions=(1, 3, 3, 1), window_strides=(1, 2, 2, 1),
        padding=((0, 0), (1, 1), (1, 1), (0, 0)))
    return jnp.transpose(pooled, (0, 3, 1, 2))


# -------------------------------------------------------------------- main
if __name__ == "__main__":
    key = jax.random.PRNGKey(0)
    kx, kp = jax.random.split(key)

    N, Cin, H, W = 2, 3, 32, 32
    x = jax.random.normal(kx, (N, Cin, H, W), jnp.float32)   # NCHW input
    params = init_params(kp)

    out = feature_map_convolution(x, params)
    out = jax.block_until_ready(out)

    H1 = (H - 1) // 2 + 1
    Hp = (H1 - 1) // 2 + 1
    assert out.shape == (N, 128, Hp, Hp), out.shape

    # Tight check against a reference that mirrors the kernel's bf16-operand /
    # f32-accumulation numerics.
    ref_q = reference(x, params, quantize_matmul_operands=True)
    assert jnp.allclose(out, ref_q, rtol=1e-2, atol=1e-2), \
        float(jnp.max(jnp.abs(out - ref_q)))

    # Sanity check against the pure-f32 module (bf16 MXU error budget).
    ref_f = reference(x, params)
    rel = float(jnp.linalg.norm(out - ref_f) / jnp.linalg.norm(ref_f))
    assert rel < 5e-2, rel

    print("KERNEL_OK")
</pallas_src>

<mosaic_0001>
module attributes {stable_mosaic.version = 11 : i64} {
  func.func @_roll_probe_kernel(%arg0: memref<16x24x128xbf16, #tpu.memory_space<vmem>>, %arg1: memref<16x24x128xbf16, #tpu.memory_space<vmem>>) attributes {dimension_semantics = [], scalar_prefetch = 0 : i64, scratch_operands = 0 : i64, tpu.core_type = #tpu.core_type<tc>} {
    %c0 = arith.constant 0 : index
    %c0_0 = arith.constant 0 : index
    %c0_1 = arith.constant 0 : index
    %0 = vector.load %arg0[%c0, %c0_0, %c0_1] : memref<16x24x128xbf16, #tpu.memory_space<vmem>>, vector<16x24x128xbf16>
    %c1_i32 = arith.constant 1 : i32
    %1 = tpu.dynamic_rotate %0 by %c1_i32 dim 1 : vector<16x24x128xbf16>, i32 -> vector<16x24x128xbf16>
    %c0_2 = arith.constant 0 : index
    %c0_3 = arith.constant 0 : index
    %c0_4 = arith.constant 0 : index
    %2 = vector.load %arg1[%c0_2, %c0_3, %c0_4] : memref<16x24x128xbf16, #tpu.memory_space<vmem>>, vector<16x24x128xbf16>
    tpu.vector_store %arg1[%c0_2, %c0_3, %c0_4], %1 {strides = array<i32>} : memref<16x24x128xbf16, #tpu.memory_space<vmem>>, vector<16x24x128xbf16>,
    return
  }
}

module attributes {stable_mosaic.version = 11 : i64} {
  func.func @kernel(%arg0: i32, %arg1: memref<1x16x16x27xbf16, #tpu.memory_space<vmem>>, %arg2: memref<27x64xbf16, #tpu.memory_space<vmem>>, %arg3: memref<1x64xf32, #tpu.memory_space<vmem>>, %arg4: memref<1x64xf32, #tpu.memory_space<vmem>>, %arg5: memref<9x64x64xbf16, #tpu.memory_space<vmem>>, %arg6: memref<1x64xf32, #tpu.memory_space<vmem>>, %arg7: memref<1x64xf32, #tpu.memory_space<vmem>>, %arg8: memref<9x64x128xbf16, #tpu.memory_space<vmem>>, %arg9: memref<1x128xf32, #tpu.memory_space<vmem>>, %arg10: memref<1x128xf32, #tpu.memory_space<vmem>>, %arg11: memref<1x8x8x128xf32, #tpu.memory_space<vmem>>, %arg12: memref<18x24x64xbf16, #tpu.memory_space<vmem>>, %arg13: memref<18x24x64xbf16, #tpu.memory_space<vmem>>, %arg14: memref<18x24x128xf32, #tpu.memory_space<vmem>>) attributes {dimension_semantics = [#tpu.dimension_semantics<parallel>], iteration_bounds = array<i64: 2>, scalar_prefetch = 0 : i64, scratch_operands = 3 : i64, tpu.core_type = #tpu.core_type<tc>, window_params = [{transform_indices = @transform_0, window_bounds = array<i64: 1, 16, 16, 27>}, {pipeline_mode = #tpu.pipeline_mode<synchronous>, transform_indices = @transform_1, window_bounds = array<i64: 27, 64>}, {pipeline_mode = #tpu.pipeline_mode<synchronous>, transform_indices = @transform_2, window_bounds = array<i64: 1, 64>}, {pipeline_mode = #tpu.pipeline_mode<synchronous>, transform_indices = @transform_3, window_bounds = array<i64: 1, 64>}, {pipeline_mode = #tpu.pipeline_mode<synchronous>, transform_indices = @transform_4, window_bounds = array<i64: 9, 64, 64>}, {pipeline_mode = #tpu.pipeline_mode<synchronous>, transform_indices = @transform_5, window_bounds = array<i64: 1, 64>}, {pipeline_mode = #tpu.pipeline_mode<synchronous>, transform_indices = @transform_6, window_bounds = array<i64: 1, 64>}, {pipeline_mode = #tpu.pipeline_mode<synchronous>, transform_indices = @transform_7, window_bounds = array<i64: 9, 64, 128>}, {pipeline_mode = #tpu.pipeline_mode<synchronous>, transform_indices = @transform_8, window_bounds = array<i64: 1, 128>}, {pipeline_mode = #tpu.pipeline_mode<synchronous>, transform_indices = @transform_9, window_bounds = array<i64: 1, 128>}, {transform_indices = @transform_10, window_bounds = array<i64: 1, 8, 8, 128>}]} {
    %cst = arith.constant 0.000000e+00 : bf16
    %0 = vector.broadcast %cst : bf16 to vector<1x24x64xbf16>
    %c0 = arith.constant 0 : index
    %c0_0 = arith.constant 0 : index
    %c0_1 = arith.constant 0 : index
    %1 = vector.load %arg12[%c0, %c0_0, %c0_1] : memref<18x24x64xbf16, #tpu.memory_space<vmem>>, vector<1x24x64xbf16>
    tpu.vector_store %arg12[%c0, %c0_0, %c0_1], %0 {strides = array<i32>} : memref<18x24x64xbf16, #tpu.memory_space<vmem>>, vector<1x24x64xbf16>,
    %cst_2 = arith.constant 0.000000e+00 : bf16
    %2 = vector.broadcast %cst_2 : bf16 to vector<1x24x64xbf16>
    %c17 = arith.constant 17 : index
    %c0_3 = arith.constant 0 : index
    %c0_4 = arith.constant 0 : index
    %3 = vector.load %arg12[%c17, %c0_3, %c0_4] : memref<18x24x64xbf16, #tpu.memory_space<vmem>>, vector<1x24x64xbf16>
    tpu.vector_store %arg12[%c17, %c0_3, %c0_4], %2 {strides = array<i32>} : memref<18x24x64xbf16, #tpu.memory_space<vmem>>, vector<1x24x64xbf16>,
    %cst_5 = arith.constant 0.000000e+00 : bf16
    %4 = vector.broadcast %cst_5 : bf16 to vector<16x1x64xbf16>
    %c1 = arith.constant 1 : index
    %c0_6 = arith.constant 0 : index
    %c0_7 = arith.constant 0 : index
    %5 = vector.load %arg12[%c1, %c0_6, %c0_7] : memref<18x24x64xbf16, #tpu.memory_space<vmem>>, vector<16x1x64xbf16>
    tpu.vector_store %arg12[%c1, %c0_6, %c0_7], %4 {strides = array<i32>} : memref<18x24x64xbf16, #tpu.memory_space<vmem>>, vector<16x1x64xbf16>,
    %cst_8 = arith.constant 0.000000e+00 : bf16
    %6 = vector.broadcast %cst_8 : bf16 to vector<16x7x64xbf16>
    %c1_9 = arith.constant 1 : index
    %c17_10 = arith.constant 17 : index
    %c0_11 = arith.constant 0 : index
    %7 = vector.load %arg12[%c1_9, %c17_10, %c0_11] : memref<18x24x64xbf16, #tpu.memory_space<vmem>>, vector<16x7x64xbf16>
    tpu.vector_store %arg12[%c1_9, %c17_10, %c0_11], %6 {strides = array<i32>} : memref<18x24x64xbf16, #tpu.memory_space<vmem>>, vector<16x7x64xbf16>,
    %cst_12 = arith.constant 0.000000e+00 : bf16
    %8 = vector.broadcast %cst_12 : bf16 to vector<1x24x64xbf16>
    %c0_13 = arith.constant 0 : index
    %c0_14 = arith.constant 0 : index
    %c0_15 = arith.constant 0 : index
    %9 = vector.load %arg13[%c0_13, %c0_14, %c0_15] : memref<18x24x64xbf16, #tpu.memory_space<vmem>>, vector<1x24x64xbf16>
    tpu.vector_store %arg13[%c0_13, %c0_14, %c0_15], %8 {strides = array<i32>} : memref<18x24x64xbf16, #tpu.memory_space<vmem>>, vector<1x24x64xbf16>,
    %cst_16 = arith.constant 0.000000e+00 : bf16
    %10 = vector.broadcast %cst_16 : bf16 to vector<1x24x64xbf16>
    %c17_17 = arith.constant 17 : index
    %c0_18 = arith.constant 0 : index
    %c0_19 = arith.constant 0 : index
    %11 = vector.load %arg13[%c17_17, %c0_18, %c0_19] : memref<18x24x64xbf16, #tpu.memory_space<vmem>>, vector<1x24x64xbf16>
    tpu.vector_store %arg13[%c17_17, %c0_18, %c0_19], %10 {strides = array<i32>} : memref<18x24x64xbf16, #tpu.memory_space<vmem>>, vector<1x24x64xbf16>,
    %cst_20 = arith.constant 0.000000e+00 : bf16
    %12 = vector.broadcast %cst_20 : bf16 to vector<16x1x64xbf16>
    %c1_21 = arith.constant 1 : index
    %c0_22 = arith.constant 0 : index
    %c0_23 = arith.constant 0 : index
    %13 = vector.load %arg13[%c1_21, %c0_22, %c0_23] : memref<18x24x64xbf16, #tpu.memory_space<vmem>>, vector<16x1x64xbf16>
    tpu.vector_store %arg13[%c1_21, %c0_22, %c0_23], %12 {strides = array<i32>} : memref<18x24x64xbf16, #tpu.memory_space<vmem>>, vector<16x1x64xbf16>,
    %cst_24 = arith.constant 0.000000e+00 : bf16
    %14 = vector.broadcast %cst_24 : bf16 to vector<16x7x64xbf16>
    %c1_25 = arith.constant 1 : index
    %c17_26 = arith.constant 17 : index
    %c0_27 = arith.constant 0 : index
    %15 = vector.load %arg13[%c1_25, %c17_26, %c0_27] : memref<18x24x64xbf16, #tpu.memory_space<vmem>>, vector<16x7x64xbf16>
    tpu.vector_store %arg13[%c1_25, %c17_26, %c0_27], %14 {strides = array<i32>} : memref<18x24x64xbf16, #tpu.memory_space<vmem>>, vector<16x7x64xbf16>,
    %cst_28 = arith.constant 0.000000e+00 : f32
    %16 = vector.broadcast %cst_28 : f32 to vector<1x24x128xf32>
    %c0_29 = arith.constant 0 : index
    %c0_30 = arith.constant 0 : index
    %c0_31 = arith.constant 0 : index
    %17 = vector.load %arg14[%c0_29, %c0_30, %c0_31] : memref<18x24x128xf32, #tpu.memory_space<vmem>>, vector<1x24x128xf32>
    tpu.vector_store %arg14[%c0_29, %c0_30, %c0_31], %16 {strides = array<i32>} : memref<18x24x128xf32, #tpu.memory_space<vmem>>, vector<1x24x128xf32>,
    %cst_32 = arith.constant 0.000000e+00 : f32
    %18 = vector.broadcast %cst_32 : f32 to vector<1x24x128xf32>
    %c17_33 = arith.constant 17 : index
    %c0_34 = arith.constant 0 : index
    %c0_35 = arith.constant 0 : index
    %19 = vector.load %arg14[%c17_33, %c0_34, %c0_35] : memref<18x24x128xf32, #tpu.memory_space<vmem>>, vector<1x24x128xf32>
    tpu.vector_store %arg14[%c17_33, %c0_34, %c0_35], %18 {strides = array<i32>} : memref<18x24x128xf32, #tpu.memory_space<vmem>>, vector<1x24x128xf32>,
    %cst_36 = arith.constant 0.000000e+00 : f32
    %20 = vector.broadcast %cst_36 : f32 to vector<16x1x128xf32>
    %c1_37 = arith.constant 1 : index
    %c0_38 = arith.constant 0 : index
    %c0_39 = arith.constant 0 : index
    %21 = vector.load %arg14[%c1_37, %c0_38, %c0_39] : memref<18x24x128xf32, #tpu.memory_space<vmem>>, vector<16x1x128xf32>
    tpu.vector_store %arg14[%c1_37, %c0_38, %c0_39], %20 {strides = array<i32>} : memref<18x24x128xf32, #tpu.memory_space<vmem>>, vector<16x1x128xf32>,
    %cst_40 = arith.constant 0.000000e+00 : f32
    %22 = vector.broadcast %cst_40 : f32 to vector<16x7x128xf32>
    %c1_41 = arith.constant 1 : index
    %c17_42 = arith.constant 17 : index
    %c0_43 = arith.constant 0 : index
    %23 = vector.load %arg14[%c1_41, %c17_42, %c0_43] : memref<18x24x128xf32, #tpu.memory_space<vmem>>, vector<16x7x128xf32>
    tpu.vector_store %arg14[%c1_41, %c17_42, %c0_43], %22 {strides = array<i32>} : memref<18x24x128xf32, #tpu.memory_space<vmem>>, vector<16x7x128xf32>,
    %c0_44 = arith.constant 0 : index
    %c0_45 = arith.constant 0 : index
    %c0_46 = arith.constant 0 : index
    %c0_47 = arith.constant 0 : index
    %24 = vector.load %arg1[%c0_44, %c0_45, %c0_46, %c0_47] : memref<1x16x16x27xbf16, #tpu.memory_space<vmem>>, vector<1x16x16x27xbf16>
    %25 = vector.shape_cast %24 : vector<1x16x16x27xbf16> to vector<16x16x27xbf16>
    %c0_48 = arith.constant 0 : index
    %c0_49 = arith.constant 0 : index
    %26 = vector.load %arg2[%c0_48, %c0_49] : memref<27x64xbf16, #tpu.memory_space<vmem>>, vector<27x64xbf16>
    "tpu.trace_start"() <{level = 10 : i32, message = "hwc,cd->hwd"}> : () -> ()
    %cst_50 = arith.constant dense<0.000000e+00> : vector<16x16x64xf32>
    %27 = tpu.matmul %25, %26, %cst_50 {dimension_numbers = #tpu.dot_dimension_numbers<[2], [0], [0, 1], [1], [0, 0, 0, 1, 1, 1], [], []>} : vector<16x16x27xbf16>, vector<27x64xbf16>, vector<16x16x64xf32> -> vector<16x16x64xf32>
    "tpu.trace_stop"() : () -> ()
    %c0_51 = arith.constant 0 : index
    %c0_52 = arith.constant 0 : index
    %28 = vector.load %arg3[%c0_51, %c0_52] : memref<1x64xf32, #tpu.memory_space<vmem>>, vector<1x64xf32>
    %29 = vector.shape_cast %28 : vector<1x64xf32> to vector<64xf32>
    %30 = vector.shape_cast %29 : vector<64xf32> to vector<1x1x64xf32>
    %31 = vector.broadcast %30 : vector<1x1x64xf32> to vector<16x16x64xf32>
    %32 = arith.mulf %27, %31 : vector<16x16x64xf32>
    %c0_53 = arith.constant 0 : index
    %c0_54 = arith.constant 0 : index
    %33 = vector.load %arg4[%c0_53, %c0_54] : memref<1x64xf32, #tpu.memory_space<vmem>>, vector<1x64xf32>
    %34 = vector.shape_cast %33 : vector<1x64xf32> to vector<64xf32>
    %35 = vector.shape_cast %34 : vector<64xf32> to vector<1x1x64xf32>
    %36 = vector.broadcast %35 : vector<1x1x64xf32> to vector<16x16x64xf32>
    %37 = arith.addf %32, %36 : vector<16x16x64xf32>
    %cst_55 = arith.constant 0.000000e+00 : f32
    %38 = vector.broadcast %cst_55 : f32 to vector<16x16x64xf32>
    %39 = arith.maximumf %37, %38 : vector<16x16x64xf32>
    %40 = arith.truncf %39 : vector<16x16x64xf32> to vector<16x16x64xbf16>
    %c1_56 = arith.constant 1 : index
    %c1_57 = arith.constant 1 : index
    %c0_58 = arith.constant 0 : index
    %41 = vector.load %arg12[%c1_56, %c1_57, %c0_58] : memref<18x24x64xbf16, #tpu.memory_space<vmem>>, vector<16x16x64xbf16>
    tpu.vector_store %arg12[%c1_56, %c1_57, %c0_58], %40 {strides = array<i32>} : memref<18x24x64xbf16, #tpu.memory_space<vmem>>, vector<16x16x64xbf16>,
    %c0_59 = arith.constant 0 : index
    %c0_60 = arith.constant 0 : index
    %42 = vector.load %arg6[%c0_59, %c0_60] : memref<1x64xf32, #tpu.memory_space<vmem>>, vector<1x64xf32>
    %43 = vector.shape_cast %42 : vector<1x64xf32> to vector<64xf32>
    %c0_61 = arith.constant 0 : index
    %c0_62 = arith.constant 0 : index
    %44 = vector.load %arg7[%c0_61, %c0_62] : memref<1x64xf32, #tpu.memory_space<vmem>>, vector<1x64xf32>
    %45 = vector.shape_cast %44 : vector<1x64xf32> to vector<64xf32>
    %c0_63 = arith.constant 0 : index
    %c0_64 = arith.constant 0 : index
    %c0_65 = arith.constant 0 : index
    %46 = vector.load %arg12[%c0_63, %c0_64, %c0_65] : memref<18x24x64xbf16, #tpu.memory_space<vmem>>, vector<18x24x64xbf16>
    %cst_66 = arith.constant 0.000000e+00 : f32
    %47 = vector.broadcast %cst_66 : f32 to vector<16x16x64xf32>
    %48 = vector.extract_strided_slice %46 {offsets = [0, 0, 0], sizes = [18, 16, 64], strides = [1, 1, 1]} : vector<18x24x64xbf16> to vector<18x16x64xbf16>
    %49 = vector.extract_strided_slice %48 {offsets = [0, 0, 0], sizes = [16, 16, 64], strides = [1, 1, 1]} : vector<18x16x64xbf16> to vector<16x16x64xbf16>
    %c0_67 = arith.constant 0 : index
    %c0_68 = arith.constant 0 : index
    %c0_69 = arith.constant 0 : index
    %50 = vector.load %arg5[%c0_67, %c0_68, %c0_69] : memref<9x64x64xbf16, #tpu.memory_space<vmem>>, vector<1x64x64xbf16>
    %51 = vector.shape_cast %50 : vector<1x64x64xbf16> to vector<64x64xbf16>
    "tpu.trace_start"() <{level = 10 : i32, message = "hwc,cd->hwd"}> : () -> ()
    %cst_70 = arith.constant dense<0.000000e+00> : vector<16x16x64xf32>
    %52 = tpu.matmul %49, %51, %cst_70 {dimension_numbers = #tpu.dot_dimension_numbers<[2], [0], [0, 1], [1], [0, 0, 0, 1, 1, 1], [], []>} : vector<16x16x64xbf16>, vector<64x64xbf16>, vector<16x16x64xf32> -> vector<16x16x64xf32>
    "tpu.trace_stop"() : () -> ()
    %53 = arith.addf %47, %52 : vector<16x16x64xf32>
    %54 = vector.extract_strided_slice %48 {offsets = [1, 0, 0], sizes = [16, 16, 64], strides = [1, 1, 1]} : vector<18x16x64xbf16> to vector<16x16x64xbf16>
    %c3 = arith.constant 3 : index
    %c0_71 = arith.constant 0 : index
    %c0_72 = arith.constant 0 : index
    %55 = vector.load %arg5[%c3, %c0_71, %c0_72] : memref<9x64x64xbf16, #tpu.memory_space<vmem>>, vector<1x64x64xbf16>
    %56 = vector.shape_cast %55 : vector<1x64x64xbf16> to vector<64x64xbf16>
    "tpu.trace_start"() <{level = 10 : i32, message = "hwc,cd->hwd"}> : () -> ()
    %cst_73 = arith.constant dense<0.000000e+00> : vector<16x16x64xf32>
    %57 = tpu.matmul %54, %56, %cst_73 {dimension_numbers = #tpu.dot_dimension_numbers<[2], [0], [0, 1], [1], [0, 0, 0, 1, 1, 1], [], []>} : vector<16x16x64xbf16>, vector<64x64xbf16>, vector<16x16x64xf32> -> vector<16x16x64xf32>
    "tpu.trace_stop"() : () -> ()
    %58 = arith.addf %53, %57 : vector<16x16x64xf32>
    %59 = vector.extract_strided_slice %48 {offsets = [2, 0, 0], sizes = [16, 16, 64], strides = [1, 1, 1]} : vector<18x16x64xbf16> to vector<16x16x64xbf16>
    %c6 = arith.constant 6 : index
    %c0_74 = arith.constant 0 : index
    %c0_75 = arith.constant 0 : index
    %60 = vector.load %arg5[%c6, %c0_74, %c0_75] : memref<9x64x64xbf16, #tpu.memory_space<vmem>>, vector<1x64x64xbf16>
    %61 = vector.shape_cast %60 : vector<1x64x64xbf16> to vector<64x64xbf16>
    "tpu.trace_start"() <{level = 10 : i32, message = "hwc,cd->hwd"}> : () -> ()
    %cst_76 = arith.constant dense<0.000000e+00> : vector<16x16x64xf32>
    %62 = tpu.matmul %59, %61, %cst_76 {dimension_numbers = #tpu.dot_dimension_numbers<[2], [0], [0, 1], [1], [0, 0, 0, 1, 1, 1], [], []>} : vector<16x16x64xbf16>, vector<64x64xbf16>, vector<16x16x64xf32> -> vector<16x16x64xf32>
    "tpu.trace_stop"() : () -> ()
    %63 = arith.addf %58, %62 : vector<16x16x64xf32>
    %64 = vector.extract_strided_slice %46 {offsets = [0, 1, 0], sizes = [18, 16, 64], strides = [1, 1, 1]} : vector<18x24x64xbf16> to vector<18x16x64xbf16>
    %65 = vector.extract_strided_slice %64 {offsets = [0, 0, 0], sizes = [16, 16, 64], strides = [1, 1, 1]} : vector<18x16x64xbf16> to vector<16x16x64xbf16>
    %c1_77 = arith.constant 1 : index
    %c0_78 = arith.constant 0 : index
    %c0_79 = arith.constant 0 : index
    %66 = vector.load %arg5[%c1_77, %c0_78, %c0_79] : memref<9x64x64xbf16, #tpu.memory_space<vmem>>, vector<1x64x64xbf16>
    %67 = vector.shape_cast %66 : vector<1x64x64xbf16> to vector<64x64xbf16>
    "tpu.trace_start"() <{level = 10 : i32, message = "hwc,cd->hwd"}> : () -> ()
    %cst_80 = arith.constant dense<0.000000e+00> : vector<16x16x64xf32>
    %68 = tpu.matmul %65, %67, %cst_80 {dimension_numbers = #tpu.dot_dimension_numbers<[2], [0], [0, 1], [1], [0, 0, 0, 1, 1, 1], [], []>} : vector<16x16x64xbf16>, vector<64x64xbf16>, vector<16x16x64xf32> -> vector<16x16x64xf32>
    "tpu.trace_stop"() : () -> ()
    %69 = arith.addf %63, %68 : vector<16x16x64xf32>
    %70 = vector.extract_strided_slice %64 {offsets = [1, 0, 0], sizes = [16, 16, 64], strides = [1, 1, 1]} : vector<18x16x64xbf16> to vector<16x16x64xbf16>
    %c4 = arith.constant 4 : index
    %c0_81 = arith.constant 0 : index
    %c0_82 = arith.constant 0 : index
    %71 = vector.load %arg5[%c4, %c0_81, %c0_82] : memref<9x64x64xbf16, #tpu.memory_space<vmem>>, vector<1x64x64xbf16>
    %72 = vector.shape_cast %71 : vector<1x64x64xbf16> to vector<64x64xbf16>
    "tpu.trace_start"() <{level = 10 : i32, message = "hwc,cd->hwd"}> : () -> ()
    %cst_83 = arith.constant dense<0.000000e+00> : vector<16x16x64xf32>
    %73 = tpu.matmul %70, %72, %cst_83 {dimension_numbers = #tpu.dot_dimension_numbers<[2], [0], [0, 1], [1], [0, 0, 0, 1, 1, 1], [], []>} : vector<16x16x64xbf16>, vector<64x64xbf16>, vector<16x16x64xf32> -> vector<16x16x64xf32>
    "tpu.trace_stop"() : () -> ()
    %74 = arith.addf %69, %73 : vector<16x16x64xf32>
    %75 = vector.extract_strided_slice %64 {offsets = [2, 0, 0], sizes = [16, 16, 64], strides = [1, 1, 1]} : vector<18x16x64xbf16> to vector<16x16x64xbf16>
    %c7 = arith.constant 7 : index
    %c0_84 = arith.constant 0 : index
    %c0_85 = arith.constant 0 : index
    %76 = vector.load %arg5[%c7, %c0_84, %c0_85] : memref<9x64x64xbf16, #tpu.memory_space<vmem>>, vector<1x64x64xbf16>
    %77 = vector.shape_cast %76 : vector<1x64x64xbf16> to vector<64x64xbf16>
    "tpu.trace_start"() <{level = 10 : i32, message = "hwc,cd->hwd"}> : () -> ()
    %cst_86 = arith.constant dense<0.000000e+00> : vector<16x16x64xf32>
    %78 = tpu.matmul %75, %77, %cst_86 {dimension_numbers = #tpu.dot_dimension_numbers<[2], [0], [0, 1], [1], [0, 0, 0, 1, 1, 1], [], []>} : vector<16x16x64xbf16>, vector<64x64xbf16>, vector<16x16x64xf32> -> vector<16x16x64xf32>
    "tpu.trace_stop"() : () -> ()
    %79 = arith.addf %74, %78 : vector<16x16x64xf32>
    %80 = vector.extract_strided_slice %46 {offsets = [0, 2, 0], sizes = [18, 16, 64], strides = [1, 1, 1]} : vector<18x24x64xbf16> to vector<18x16x64xbf16>
    %81 = vector.extract_strided_slice %80 {offsets = [0, 0, 0], sizes = [16, 16, 64], strides = [1, 1, 1]} : vector<18x16x64xbf16> to vector<16x16x64xbf16>
    %c2 = arith.constant 2 : index
    %c0_87 = arith.constant 0 : index
    %c0_88 = arith.constant 0 : index
    %82 = vector.load %arg5[%c2, %c0_87, %c0_88] : memref<9x64x64xbf16, #tpu.memory_space<vmem>>, vector<1x64x64xbf16>
    %83 = vector.shape_cast %82 : vector<1x64x64xbf16> to vector<64x64xbf16>
    "tpu.trace_start"() <{level = 10 : i32, message = "hwc,cd->hwd"}> : () -> ()
    %cst_89 = arith.constant dense<0.000000e+00> : vector<16x16x64xf32>
    %84 = tpu.matmul %81, %83, %cst_89 {dimension_numbers = #tpu.dot_dimension_numbers<[2], [0], [0, 1], [1], [0, 0, 0, 1, 1, 1], [], []>} : vector<16x16x64xbf16>, vector<64x64xbf16>, vector<16x16x64xf32> -> vector<16x16x64xf32>
    "tpu.trace_stop"() : () -> ()
    %85 = arith.addf %79, %84 : vector<16x16x64xf32>
    %86 = vector.extract_strided_slice %80 {offsets = [1, 0, 0], sizes = [16, 16, 64], strides = [1, 1, 1]} : vector<18x16x64xbf16> to vector<16x16x64xbf16>
    %c5 = arith.constant 5 : index
    %c0_90 = arith.constant 0 : index
    %c0_91 = arith.constant 0 : index
    %87 = vector.load %arg5[%c5, %c0_90, %c0_91] : memref<9x64x64xbf16, #tpu.memory_space<vmem>>, vector<1x64x64xbf16>
    %88 = vector.shape_cast %87 : vector<1x64x64xbf16> to vector<64x64xbf16>
    "tpu.trace_start"() <{level = 10 : i32, message = "hwc,cd->hwd"}> : () -> ()
    %cst_92 = arith.constant dense<0.000000e+00> : vector<16x16x64xf32>
    %89 = tpu.matmul %86, %88, %cst_92 {dimension_numbers = #tpu.dot_dimension_numbers<[2], [0], [0, 1], [1], [0, 0, 0, 1, 1, 1], [], []>} : vector<16x16x64xbf16>, vector<64x64xbf16>, vector<16x16x64xf32> -> vector<16x16x64xf32>
    "tpu.trace_stop"() : () -> ()
    %90 = arith.addf %85, %89 : vector<16x16x64xf32>
    %91 = vector.extract_strided_slice %80 {offsets = [2, 0, 0], sizes = [16, 16, 64], strides = [1, 1, 1]} : vector<18x16x64xbf16> to vector<16x16x64xbf16>
    %c8 = arith.constant 8 : index
    %c0_93 = arith.constant 0 : index
    %c0_94 = arith.constant 0 : index
    %92 = vector.load %arg5[%c8, %c0_93, %c0_94] : memref<9x64x64xbf16, #tpu.memory_space<vmem>>, vector<1x64x64xbf16>
    %93 = vector.shape_cast %92 : vector<1x64x64xbf16> to vector<64x64xbf16>
    "tpu.trace_start"() <{level = 10 : i32, message = "hwc,cd->hwd"}> : () -> ()
    %cst_95 = arith.constant dense<0.000000e+00> : vector<16x16x64xf32>
    %94 = tpu.matmul %91, %93, %cst_95 {dimension_numbers = #tpu.dot_dimension_numbers<[2], [0], [0, 1], [1], [0, 0, 0, 1, 1, 1], [], []>} : vector<16x16x64xbf16>, vector<64x64xbf16>, vector<16x16x64xf32> -> vector<16x16x64xf32>
    "tpu.trace_stop"() : () -> ()
    %95 = arith.addf %90, %94 : vector<16x16x64xf32>
    %96 = vector.shape_cast %43 : vector<64xf32> to vector<1x1x64xf32>
    %97 = vector.broadcast %96 : vector<1x1x64xf32> to vector<16x16x64xf32>
    %98 = arith.mulf %95, %97 : vector<16x16x64xf32>
    %99 = vector.shape_cast %45 : vector<64xf32> to vector<1x1x64xf32>
    %100 = vector.broadcast %99 : vector<1x1x64xf32> to vector<16x16x64xf32>
    %101 = arith.addf %98, %100 : vector<16x16x64xf32>
    %cst_96 = arith.constant 0.000000e+00 : f32
    %102 = vector.broadcast %cst_96 : f32 to vector<16x16x64xf32>
    %103 = arith.maximumf %101, %102 : vector<16x16x64xf32>
    %104 = arith.truncf %103 : vector<16x16x64xf32> to vector<16x16x64xbf16>
    %c1_97 = arith.constant 1 : index
    %c1_98 = arith.constant 1 : index
    %c0_99 = arith.constant 0 : index
    %105 = vector.load %arg13[%c1_97, %c1_98, %c0_99] : memref<18x24x64xbf16, #tpu.memory_space<vmem>>, vector<16x16x64xbf16>
    tpu.vector_store %arg13[%c1_97, %c1_98, %c0_99], %104 {strides = array<i32>} : memref<18x24x64xbf16, #tpu.memory_space<vmem>>, vector<16x16x64xbf16>,
    %c0_100 = arith.constant 0 : index
    %c0_101 = arith.constant 0 : index
    %106 = vector.load %arg9[%c0_100, %c0_101] : memref<1x128xf32, #tpu.memory_space<vmem>>, vector<1x128xf32>
    %107 = vector.shape_cast %106 : vector<1x128xf32> to vector<128xf32>
    %c0_102 = arith.constant 0 : index
    %c0_103 = arith.constant 0 : index
    %108 = vector.load %arg10[%c0_102, %c0_103] : memref<1x128xf32, #tpu.memory_space<vmem>>, vector<1x128xf32>
    %109 = vector.shape_cast %108 : vector<1x128xf32> to vector<128xf32>
    %c0_104 = arith.constant 0 : index
    %c0_105 = arith.constant 0 : index
    %c0_106 = arith.constant 0 : index
    %110 = vector.load %arg13[%c0_104, %c0_105, %c0_106] : memref<18x24x64xbf16, #tpu.memory_space<vmem>>, vector<18x24x64xbf16>
    %cst_107 = arith.constant 0.000000e+00 : f32
    %111 = vector.broadcast %cst_107 : f32 to vector<16x16x128xf32>
    %112 = vector.extract_strided_slice %110 {offsets = [0, 0, 0], sizes = [18, 16, 64], strides = [1, 1, 1]} : vector<18x24x64xbf16> to vector<18x16x64xbf16>
    %113 = vector.extract_strided_slice %112 {offsets = [0, 0, 0], sizes = [16, 16, 64], strides = [1, 1, 1]} : vector<18x16x64xbf16> to vector<16x16x64xbf16>
    %c0_108 = arith.constant 0 : index
    %c0_109 = arith.constant 0 : index
    %c0_110 = arith.constant 0 : index
    %114 = vector.load %arg8[%c0_108, %c0_109, %c0_110] : memref<9x64x128xbf16, #tpu.memory_space<vmem>>, vector<1x64x128xbf16>
    %115 = vector.shape_cast %114 : vector<1x64x128xbf16> to vector<64x128xbf16>
    "tpu.trace_start"() <{level = 10 : i32, message = "hwc,cd->hwd"}> : () -> ()
    %cst_111 = arith.constant dense<0.000000e+00> : vector<16x16x128xf32>
    %116 = tpu.matmul %113, %115, %cst_111 {dimension_numbers = #tpu.dot_dimension_numbers<[2], [0], [0, 1], [1], [0, 0, 0, 1, 1, 1], [], []>} : vector<16x16x64xbf16>, vector<64x128xbf16>, vector<16x16x128xf32> -> vector<16x16x128xf32>
    "tpu.trace_stop"() : () -> ()
    %117 = arith.addf %111, %116 : vector<16x16x128xf32>
    %118 = vector.extract_strided_slice %112 {offsets = [1, 0, 0], sizes = [16, 16, 64], strides = [1, 1, 1]} : vector<18x16x64xbf16> to vector<16x16x64xbf16>
    %c3_112 = arith.constant 3 : index
    %c0_113 = arith.constant 0 : index
    %c0_114 = arith.constant 0 : index
    %119 = vector.load %arg8[%c3_112, %c0_113, %c0_114] : memref<9x64x128xbf16, #tpu.memory_space<vmem>>, vector<1x64x128xbf16>
    %120 = vector.shape_cast %119 : vector<1x64x128xbf16> to vector<64x128xbf16>
    "tpu.trace_start"() <{level = 10 : i32, message = "hwc,cd->hwd"}> : () -> ()
    %cst_115 = arith.constant dense<0.000000e+00> : vector<16x16x128xf32>
    %121 = tpu.matmul %118, %120, %cst_115 {dimension_numbers = #tpu.dot_dimension_numbers<[2], [0], [0, 1], [1], [0, 0, 0, 1, 1, 1], [], []>} : vector<16x16x64xbf16>, vector<64x128xbf16>, vector<16x16x128xf32> -> vector<16x16x128xf32>
    "tpu.trace_stop"() : () -> ()
    %122 = arith.addf %117, %121 : vector<16x16x128xf32>
    %123 = vector.extract_strided_slice %112 {offsets = [2, 0, 0], sizes = [16, 16, 64], strides = [1, 1, 1]} : vector<18x16x64xbf16> to vector<16x16x64xbf16>
    %c6_116 = arith.constant 6 : index
    %c0_117 = arith.constant 0 : index
    %c0_118 = arith.constant 0 : index
    %124 = vector.load %arg8[%c6_116, %c0_117, %c0_118] : memref<9x64x128xbf16, #tpu.memory_space<vmem>>, vector<1x64x128xbf16>
    %125 = vector.shape_cast %124 : vector<1x64x128xbf16> to vector<64x128xbf16>
    "tpu.trace_start"() <{level = 10 : i32, message = "hwc,cd->hwd"}> : () -> ()
    %cst_119 = arith.constant dense<0.000000e+00> : vector<16x16x128xf32>
    %126 = tpu.matmul %123, %125, %cst_119 {dimension_numbers = #tpu.dot_dimension_numbers<[2], [0], [0, 1], [1], [0, 0, 0, 1, 1, 1], [], []>} : vector<16x16x64xbf16>, vector<64x128xbf16>, vector<16x16x128xf32> -> vector<16x16x128xf32>
    "tpu.trace_stop"() : () -> ()
    %127 = arith.addf %122, %126 : vector<16x16x128xf32>
    %128 = vector.extract_strided_slice %110 {offsets = [0, 1, 0], sizes = [18, 16, 64], strides = [1, 1, 1]} : vector<18x24x64xbf16> to vector<18x16x64xbf16>
    %129 = vector.extract_strided_slice %128 {offsets = [0, 0, 0], sizes = [16, 16, 64], strides = [1, 1, 1]} : vector<18x16x64xbf16> to vector<16x16x64xbf16>
    %c1_120 = arith.constant 1 : index
    %c0_121 = arith.constant 0 : index
    %c0_122 = arith.constant 0 : index
    %130 = vector.load %arg8[%c1_120, %c0_121, %c0_122] : memref<9x64x128xbf16, #tpu.memory_space<vmem>>, vector<1x64x128xbf16>
    %131 = vector.shape_cast %130 : vector<1x64x128xbf16> to vector<64x128xbf16>
    "tpu.trace_start"() <{level = 10 : i32, message = "hwc,cd->hwd"}> : () -> ()
    %cst_123 = arith.constant dense<0.000000e+00> : vector<16x16x128xf32>
    %132 = tpu.matmul %129, %131, %cst_123 {dimension_numbers = #tpu.dot_dimension_numbers<[2], [0], [0, 1], [1], [0, 0, 0, 1, 1, 1], [], []>} : vector<16x16x64xbf16>, vector<64x128xbf16>, vector<16x16x128xf32> -> vector<16x16x128xf32>
    "tpu.trace_stop"() : () -> ()
    %133 = arith.addf %127, %132 : vector<16x16x128xf32>
    %134 = vector.extract_strided_slice %128 {offsets = [1, 0, 0], sizes = [16, 16, 64], strides = [1, 1, 1]} : vector<18x16x64xbf16> to vector<16x16x64xbf16>
    %c4_124 = arith.constant 4 : index
    %c0_125 = arith.constant 0 : index
    %c0_126 = arith.constant 0 : index
    %135 = vector.load %arg8[%c4_124, %c0_125, %c0_126] : memref<9x64x128xbf16, #tpu.memory_space<vmem>>, vector<1x64x128xbf16>
    %136 = vector.shape_cast %135 : vector<1x64x128xbf16> to vector<64x128xbf16>
    "tpu.trace_start"() <{level = 10 : i32, message = "hwc,cd->hwd"}> : () -> ()
    %cst_127 = arith.constant dense<0.000000e+00> : vector<16x16x128xf32>
    %137 = tpu.matmul %134, %136, %cst_127 {dimension_numbers = #tpu.dot_dimension_numbers<[2], [0], [0, 1], [1], [0, 0, 0, 1, 1, 1], [], []>} : vector<16x16x64xbf16>, vector<64x128xbf16>, vector<16x16x128xf32> -> vector<16x16x128xf32>
    "tpu.trace_stop"() : () -> ()
    %138 = arith.addf %133, %137 : vector<16x16x128xf32>
    %139 = vector.extract_strided_slice %128 {offsets = [2, 0, 0], sizes = [16, 16, 64], strides = [1, 1, 1]} : vector<18x16x64xbf16> to vector<16x16x64xbf16>
    %c7_128 = arith.constant 7 : index
    %c0_129 = arith.constant 0 : index
    %c0_130 = arith.constant 0 : index
    %140 = vector.load %arg8[%c7_128, %c0_129, %c0_130] : memref<9x64x128xbf16, #tpu.memory_space<vmem>>, vector<1x64x128xbf16>
    %141 = vector.shape_cast %140 : vector<1x64x128xbf16> to vector<64x128xbf16>
    "tpu.trace_start"() <{level = 10 : i32, message = "hwc,cd->hwd"}> : () -> ()
    %cst_131 = arith.constant dense<0.000000e+00> : vector<16x16x128xf32>
    %142 = tpu.matmul %139, %141, %cst_131 {dimension_numbers = #tpu.dot_dimension_numbers<[2], [0], [0, 1], [1], [0, 0, 0, 1, 1, 1], [], []>} : vector<16x16x64xbf16>, vector<64x128xbf16>, vector<16x16x128xf32> -> vector<16x16x128xf32>
    "tpu.trace_stop"() : () -> ()
    %143 = arith.addf %138, %142 : vector<16x16x128xf32>
    %144 = vector.extract_strided_slice %110 {offsets = [0, 2, 0], sizes = [18, 16, 64], strides = [1, 1, 1]} : vector<18x24x64xbf16> to vector<18x16x64xbf16>
    %145 = vector.extract_strided_slice %144 {offsets = [0, 0, 0], sizes = [16, 16, 64], strides = [1, 1, 1]} : vector<18x16x64xbf16> to vector<16x16x64xbf16>
    %c2_132 = arith.constant 2 : index
    %c0_133 = arith.constant 0 : index
    %c0_134 = arith.constant 0 : index
    %146 = vector.load %arg8[%c2_132, %c0_133, %c0_134] : memref<9x64x128xbf16, #tpu.memory_space<vmem>>, vector<1x64x128xbf16>
    %147 = vector.shape_cast %146 : vector<1x64x128xbf16> to vector<64x128xbf16>
    "tpu.trace_start"() <{level = 10 : i32, message = "hwc,cd->hwd"}> : () -> ()
    %cst_135 = arith.constant dense<0.000000e+00> : vector<16x16x128xf32>
    %148 = tpu.matmul %145, %147, %cst_135 {dimension_numbers = #tpu.dot_dimension_numbers<[2], [0], [0, 1], [1], [0, 0, 0, 1, 1, 1], [], []>} : vector<16x16x64xbf16>, vector<64x128xbf16>, vector<16x16x128xf32> -> vector<16x16x128xf32>
    "tpu.trace_stop"() : () -> ()
    %149 = arith.addf %143, %148 : vector<16x16x128xf32>
    %150 = vector.extract_strided_slice %144 {offsets = [1, 0, 0], sizes = [16, 16, 64], strides = [1, 1, 1]} : vector<18x16x64xbf16> to vector<16x16x64xbf16>
    %c5_136 = arith.constant 5 : index
    %c0_137 = arith.constant 0 : index
    %c0_138 = arith.constant 0 : index
    %151 = vector.load %arg8[%c5_136, %c0_137, %c0_138] : memref<9x64x128xbf16, #tpu.memory_space<vmem>>, vector<1x64x128xbf16>
    %152 = vector.shape_cast %151 : vector<1x64x128xbf16> to vector<64x128xbf16>
    "tpu.trace_start"() <{level = 10 : i32, message = "hwc,cd->hwd"}> : () -> ()
    %cst_139 = arith.constant dense<0.000000e+00> : vector<16x16x128xf32>
    %153 = tpu.matmul %150, %152, %cst_139 {dimension_numbers = #tpu.dot_dimension_numbers<[2], [0], [0, 1], [1], [0, 0, 0, 1, 1, 1], [], []>} : vector<16x16x64xbf16>, vector<64x128xbf16>, vector<16x16x128xf32> -> vector<16x16x128xf32>
    "tpu.trace_stop"() : () -> ()
    %154 = arith.addf %149, %153 : vector<16x16x128xf32>
    %155 = vector.extract_strided_slice %144 {offsets = [2, 0, 0], sizes = [16, 16, 64], strides = [1, 1, 1]} : vector<18x16x64xbf16> to vector<16x16x64xbf16>
    %c8_140 = arith.constant 8 : index
    %c0_141 = arith.constant 0 : index
    %c0_142 = arith.constant 0 : index
    %156 = vector.load %arg8[%c8_140, %c0_141, %c0_142] : memref<9x64x128xbf16, #tpu.memory_space<vmem>>, vector<1x64x128xbf16>
    %157 = vector.shape_cast %156 : vector<1x64x128xbf16> to vector<64x128xbf16>
    "tpu.trace_start"() <{level = 10 : i32, message = "hwc,cd->hwd"}> : () -> ()
    %cst_143 = arith.constant dense<0.000000e+00> : vector<16x16x128xf32>
    %158 = tpu.matmul %155, %157, %cst_143 {dimension_numbers = #tpu.dot_dimension_numbers<[2], [0], [0, 1], [1], [0, 0, 0, 1, 1, 1], [], []>} : vector<16x16x64xbf16>, vector<64x128xbf16>, vector<16x16x128xf32> -> vector<16x16x128xf32>
    "tpu.trace_stop"() : () -> ()
    %159 = arith.addf %154, %158 : vector<16x16x128xf32>
    %160 = vector.shape_cast %107 : vector<128xf32> to vector<1x1x128xf32>
    %161 = vector.broadcast %160 : vector<1x1x128xf32> to vector<16x16x128xf32>
    %162 = arith.mulf %159, %161 : vector<16x16x128xf32>
    %163 = vector.shape_cast %109 : vector<128xf32> to vector<1x1x128xf32>
    %164 = vector.broadcast %163 : vector<1x1x128xf32> to vector<16x16x128xf32>
    %165 = arith.addf %162, %164 : vector<16x16x128xf32>
    %cst_144 = arith.constant 0.000000e+00 : f32
    %166 = vector.broadcast %cst_144 : f32 to vector<16x16x128xf32>
    %167 = arith.maximumf %165, %166 : vector<16x16x128xf32>
    %c1_145 = arith.constant 1 : index
    %c1_146 = arith.constant 1 : index
    %c0_147 = arith.constant 0 : index
    %168 = vector.load %arg14[%c1_145, %c1_146, %c0_147] : memref<18x24x128xf32, #tpu.memory_space<vmem>>, vector<16x16x128xf32>
    tpu.vector_store %arg14[%c1_145, %c1_146, %c0_147], %167 {strides = array<i32>} : memref<18x24x128xf32, #tpu.memory_space<vmem>>, vector<16x16x128xf32>,
    %c0_148 = arith.constant 0 : index
    %c0_149 = arith.constant 0 : index
    %c0_150 = arith.constant 0 : index
    %169 = tpu.strided_load %arg14[%c0_148, %c0_149, %c0_150] {strides = array<i32: 2, 2, 1>} : memref<18x24x128xf32, #tpu.memory_space<vmem>>, vector<8x8x128xf32>
    %c0_151 = arith.constant 0 : index
    %c1_152 = arith.constant 1 : index
    %c0_153 = arith.constant 0 : index
    %170 = tpu.strided_load %arg14[%c0_151, %c1_152, %c0_153] {strides = array<i32: 2, 2, 1>} : memref<18x24x128xf32, #tpu.memory_space<vmem>>, vector<8x8x128xf32>
    %171 = arith.maximumf %169, %170 : vector<8x8x128xf32>
    %c0_154 = arith.constant 0 : index
    %c2_155 = arith.constant 2 : index
    %c0_156 = arith.constant 0 : index
    %172 = tpu.strided_load %arg14[%c0_154, %c2_155, %c0_156] {strides = array<i32: 2, 2, 1>} : memref<18x24x128xf32, #tpu.memory_space<vmem>>, vector<8x8x128xf32>
    %173 = arith.maximumf %171, %172 : vector<8x8x128xf32>
    %c1_157 = arith.constant 1 : index
    %c0_158 = arith.constant 0 : index
    %c0_159 = arith.constant 0 : index
    %174 = tpu.strided_load %arg14[%c1_157, %c0_158, %c0_159] {strides = array<i32: 2, 2, 1>} : memref<18x24x128xf32, #tpu.memory_space<vmem>>, vector<8x8x128xf32>
    %175 = arith.maximumf %173, %174 : vector<8x8x128xf32>
    %c1_160 = arith.constant 1 : index
    %c1_161 = arith.constant 1 : index
    %c0_162 = arith.constant 0 : index
    %176 = tpu.strided_load %arg14[%c1_160, %c1_161, %c0_162] {strides = array<i32: 2, 2, 1>} : memref<18x24x128xf32, #tpu.memory_space<vmem>>, vector<8x8x128xf32>
    %177 = arith.maximumf %175, %176 : vector<8x8x128xf32>
    %c1_163 = arith.constant 1 : index
    %c2_164 = arith.constant 2 : index
    %c0_165 = arith.constant 0 : index
    %178 = tpu.strided_load %arg14[%c1_163, %c2_164, %c0_165] {strides = array<i32: 2, 2, 1>} : memref<18x24x128xf32, #tpu.memory_space<vmem>>, vector<8x8x128xf32>
    %179 = arith.maximumf %177, %178 : vector<8x8x128xf32>
    %c2_166 = arith.constant 2 : index
    %c0_167 = arith.constant 0 : index
    %c0_168 = arith.constant 0 : index
    %180 = tpu.strided_load %arg14[%c2_166, %c0_167, %c0_168] {strides = array<i32: 2, 2, 1>} : memref<18x24x128xf32, #tpu.memory_space<vmem>>, vector<8x8x128xf32>
    %181 = arith.maximumf %179, %180 : vector<8x8x128xf32>
    %c2_169 = arith.constant 2 : index
    %c1_170 = arith.constant 1 : index
    %c0_171 = arith.constant 0 : index
    %182 = tpu.strided_load %arg14[%c2_169, %c1_170, %c0_171] {strides = array<i32: 2, 2, 1>} : memref<18x24x128xf32, #tpu.memory_space<vmem>>, vector<8x8x128xf32>
    %183 = arith.maximumf %181, %182 : vector<8x8x128xf32>
    %c2_172 = arith.constant 2 : index
    %c2_173 = arith.constant 2 : index
    %c0_174 = arith.constant 0 : index
    %184 = tpu.strided_load %arg14[%c2_172, %c2_173, %c0_174] {strides = array<i32: 2, 2, 1>} : memref<18x24x128xf32, #tpu.memory_space<vmem>>, vector<8x8x128xf32>
    %185 = arith.maximumf %183, %184 : vector<8x8x128xf32>
    %c0_175 = arith.constant 0 : index
    %c0_176 = arith.constant 0 : index
    %c0_177 = arith.constant 0 : index
    %c0_178 = arith.constant 0 : index
    %186 = vector.load %arg11[%c0_175, %c0_176, %c0_177, %c0_178] : memref<1x8x8x128xf32, #tpu.memory_space<vmem>>, vector<1x8x8x128xf32>
    %187 = vector.shape_cast %186 : vector<1x8x8x128xf32> to vector<8x8x128xf32>
    %188 = vector.shape_cast %185 : vector<8x8x128xf32> to vector<1x8x8x128xf32>
    tpu.vector_store %arg11[%c0_175, %c0_176, %c0_177, %c0_178], %188 {strides = array<i32>} : memref<1x8x8x128xf32, #tpu.memory_space<vmem>>, vector<1x8x8x128xf32>,
    return
  }
  func.func @transform_0(%arg0: i32) -> (i32, i32, i32, i32) {
    %c0_i32 = arith.constant 0 : i32
    %c0_i32_0 = arith.constant 0 : i32
    %c0_i32_1 = arith.constant 0 : i32
    %c0_i32_2 = arith.constant 0 : i32
    return %arg0, %c0_i32, %c0_i32_0, %c0_i32_1 : i32, i32, i32, i32
  }
  func.func @transform_1(%arg0: i32) -> (i32, i32) {
    %c0_i32 = arith.constant 0 : i32
    %c0_i32_0 = arith.constant 0 : i32
    %c0_i32_1 = arith.constant 0 : i32
    return %c0_i32, %c0_i32_0 : i32, i32
  }
  func.func @transform_2(%arg0: i32) -> (i32, i32) {
    %c0_i32 = arith.constant 0 : i32
    %c0_i32_0 = arith.constant 0 : i32
    %c0_i32_1 = arith.constant 0 : i32
    return %c0_i32, %c0_i32_0 : i32, i32
  }
  func.func @transform_3(%arg0: i32) -> (i32, i32) {
    %c0_i32 = arith.constant 0 : i32
    %c0_i32_0 = arith.constant 0 : i32
    %c0_i32_1 = arith.constant 0 : i32
    return %c0_i32, %c0_i32_0 : i32, i32
  }
  func.func @transform_4(%arg0: i32) -> (i32, i32, i32) {
    %c0_i32 = arith.constant 0 : i32
    %c0_i32_0 = arith.constant 0 : i32
    %c0_i32_1 = arith.constant 0 : i32
    %c0_i32_2 = arith.constant 0 : i32
    return %c0_i32, %c0_i32_0, %c0_i32_1 : i32, i32, i32
  }
  func.func @transform_5(%arg0: i32) -> (i32, i32) {
    %c0_i32 = arith.constant 0 : i32
    %c0_i32_0 = arith.constant 0 : i32
    %c0_i32_1 = arith.constant 0 : i32
    return %c0_i32, %c0_i32_0 : i32, i32
  }
  func.func @transform_6(%arg0: i32) -> (i32, i32) {
    %c0_i32 = arith.constant 0 : i32
    %c0_i32_0 = arith.constant 0 : i32
    %c0_i32_1 = arith.constant 0 : i32
    return %c0_i32, %c0_i32_0 : i32, i32
  }
  func.func @transform_7(%arg0: i32) -> (i32, i32, i32) {
    %c0_i32 = arith.constant 0 : i32
    %c0_i32_0 = arith.constant 0 : i32
    %c0_i32_1 = arith.constant 0 : i32
    %c0_i32_2 = arith.constant 0 : i32
    return %c0_i32, %c0_i32_0, %c0_i32_1 : i32, i32, i32
  }
  func.func @transform_8(%arg0: i32) -> (i32, i32) {
    %c0_i32 = arith.constant 0 : i32
    %c0_i32_0 = arith.constant 0 : i32
    %c0_i32_1 = arith.constant 0 : i32
    return %c0_i32, %c0_i32_0 : i32, i32
  }
  func.func @transform_9(%arg0: i32) -> (i32, i32) {
    %c0_i32 = arith.constant 0 : i32
    %c0_i32_0 = arith.constant 0 : i32
    %c0_i32_1 = arith.constant 0 : i32
    return %c0_i32, %c0_i32_0 : i32, i32
  }
  func.func @transform_10(%arg0: i32) -> (i32, i32, i32, i32) {
    %c0_i32 = arith.constant 0 : i32
    %c0_i32_0 = arith.constant 0 : i32
    %c0_i32_1 = arith.constant 0 : i32
    %c0_i32_2 = arith.constant 0 : i32
    return %arg0, %c0_i32, %c0_i32_0, %c0_i32_1 : i32, i32, i32, i32
  }
}

</mosaic_0001>

<bundles_post_ra>
// kernel: tpu_custom_call.1
= control target key start
LH: loop header
LB: loop body
LE: loop exit
PB: predicated region body
PF: predicated region fallthrough
CT: control target
= control target key end

     0   :  { %s15116_s0 = inlined_call_operand.hbm [shape: bf16[2,16,16,27], index: 0, kind: input, shape index: {}]   ;;  %s15117_s1 = inlined_call_operand.hbm [shape: bf16[27,64], index: 1, kind: input, shape index: {}]   ;;  %s15118_s2 = inlined_call_operand.vmem [shape: f32[1,64], index: 2, kind: input, shape index: {}]   ;;  %s15119_s3 = inlined_call_operand.vmem [shape: f32[1,64], index: 3, kind: input, shape index: {}]   ;;  %s15120_s4 = inlined_call_operand.hbm [shape: bf16[9,64,64], index: 4, kind: input, shape index: {}]   ;;  %s15121_s5 = inlined_call_operand.vmem [shape: f32[1,64], index: 5, kind: input, shape index: {}]   ;;  %s15122_s6 = inlined_call_operand.vmem [shape: f32[1,64], index: 6, kind: input, shape index: {}]   ;;  %s15123_s7 = inlined_call_operand.hbm [shape: bf16[9,64,128], index: 7, kind: input, shape index: {}]   ;;  %s15124_s8 = inlined_call_operand.vmem [shape: f32[1,128], index: 8, kind: input, shape index: {}]   ;;  %s15125_s9 = inlined_call_operand.vmem [shape: f32[1,128], index: 9, kind: input, shape index: {}]   ;;  %s15126_s10 = inlined_call_operand.hbm [shape: f32[2,8,8,128], index: 10, kind: output, shape index: {}]  }
   0x1   :  { %15183 = sst [smem:[#allocation74_spill]] %s15117_s1 }
   0x2   :  { %15184 = sst [smem:[#allocation75_spill]] %s15120_s4 }
   0x3   :  { %15185 = sst [smem:[#allocation76_spill]] %s15123_s7 }
   0x4   :  { %15 = vsyncpa [#allocation6], 0 }
   0x5   :  { %17 = vsyncpa [#allocation6 + $0x1], 0 }
   0x6   :  { %18 = vsyncpa [#allocation9], 0 }
   0x7   :  { %19 = vsyncpa [#allocation12], 0 }
   0x8   :  { %20 = vsyncpa [#allocation7], 0 }
   0x9   :  { %22 = vsyncpa [#allocation7 + $0x1], 0  ;;  %s11088_s13 = smov 0   ;;  %s11090_s14 = smov 0  }
   0xa   :  { %s11092_s15 = smov 0   ;;  %s11094_s16 = smov 0  }
   0xb LB: > { %s11109_s17 = sadd.s32 4294967295, %s11019_s16   ;;  %s8743_s18 = sadd.s32 4294967294, %s11019_s16   ;;  %s11019_s16 = sphi %s11094_s16, %s15532_s16   ;;  %s11015_s15 = sphi %s11092_s15, %s15531_s15   ;;  %s11011_s14 = sphi %s11090_s14, %s15530_s14   ;;  %s11007_s13 = sphi %s11088_s13, %s15529_s13  }
   0xc   : > { %p48_p0 = scmp.ne.s32.totalorder %s11011_s14, %s11007_s13  ;;  %p15127_p1 = scmp.eq.s32.totalorder %s11109_s17, 0 }
   0xd   : > { %p261_p2 = scmp.eq.s32.totalorder %s11109_s17, 1  ;;  %p267_p3 = scmp.eq.s32.totalorder %s8743_s18, 1 }
   0xe   : > { %p11118_p4 = por %p15127_p1, %p48_p0  ;;  %p8744_p5 = scmp.ge.s32.totalorder %s11019_s16, 1 }
   0xf   : > { %p11123_p6 = por %p267_p3, %p48_p0  ;;  %p274_p7 = scmp.lt.s32.totalorder %s11019_s16, 3 }
  0x10   : > { %s15186_s19 = scalar_select %p11118_p4, 1, 0 }
  0x11   : > { %s15187_s20 = scalar_select %p11123_p6, 1, 0 }
  0x12   : > { %p11128_p8 = pnand %p8744_p5, %p274_p7  ;;  %s11021_s22 = smov [#allocation8]  }
  0x13   : > { %s286_s23 = sshll.u32 %s11021_s22, 4  ;;  %s11022_s25 = smov [#allocation10]   ;;  %s287_s23 = int_to_ptr.vmem [resolvable:$true] %s286_s23 }
  0x14   : > { %s15188_s21 = scalar_select %p11128_p8, 1, 0 }
  0x15   : > { %p10591_p9 = pneg %p11128_p8  ;;  %s305_s26 = sshll.u32 %s11022_s25, 4  ;;  %s306_s26 = int_to_ptr.vmem [resolvable:$true] %s305_s26 }
  0x16   : > { %s11023_s27 = smov [#allocation11]   ;;  %s10852_s29 = scalar_lea.vmem %s287_s23, 256 }
  0x17   : > { %p11137_p11 = pnand %p10591_p9, %p15127_p1  ;;  %s324_s28 = sshll.u32 %s11023_s27, 4  ;;  %s325_s28 = int_to_ptr.vmem [resolvable:$true] %s324_s28 }
  0x18   : > { %p10853_p13 = scmp.ne.s32.totalorder %s287_s23, %s10852_s29  ;;  %p10860_p5 = scmp.lt.s32.totalorder %s287_s23, %s287_s23 }
  0x19   : > { %p10843_p12 = pneg %p11137_p11  ;;  %p10861_p7 = scmp.lt.s32.totalorder %s10852_s29, %s10852_s29 }
  0x1b   : > { %p10855_p0 = pnand %p10853_p13, %p10843_p12  ;;  %p10862_p9 = por %p10861_p7, %p10860_p5 }
  0x1d   : > { %p10856_p3 = pneg %p10855_p0 }
  0x1f   : > { %p10863_p10 = pnand %p10862_p9, %p10856_p3 }
  0x21   : > { %10866 = shalt.err (!%p10863_p10)
}
  0x22   : > { %s15128_s30 = smov 64   ;;  %s15129_s11 = smov 4  }
  0x23   : > { %s15190_s1 = sld [smem:[#allocation74_spill]]  ;;  %s10878_s22 = scalar_lea.vmem %s306_s26, 4608 }
  0x24   : > { %p10879_p13 = scmp.ne.s32.totalorder %s306_s26, %s10878_s22  ;;  %p10886_p3 = scmp.lt.s32.totalorder %s306_s26, %s306_s26 }
  0x25   : > { %p10887_p10 = scmp.lt.s32.totalorder %s10878_s22, %s10878_s22 }
  0x26   : > { %p10881_p0 = pnand %p10879_p13, %p10843_p12 }
  0x27   : > { %p10888_p7 = por %p10887_p10, %p10886_p3 }
  0x28   : > { %p10882_p5 = pneg %p10881_p0 }
  0x29   : > { %10594 = dma.hbm_to_vmem [thread:$0]  (!%p11137_p11), %s15190_s1, 256, %s287_s23, [#allocation9], %s15128_s30, %s15128_s30, %s15129_s11  }
  0x2a   : > { %p10889_p9 = pnand %p10888_p7, %p10882_p5 }
  0x2c   : > { %10892 = shalt.err (!%p10889_p9)
}
  0x2d   : > { %s15191_s4 = sld [smem:[#allocation75_spill]]  ;;  %s10904_s23 = scalar_lea.vmem %s325_s28, 4608 }
  0x2e   : > { %p10905_p1 = scmp.ne.s32.totalorder %s325_s28, %s10904_s23  ;;  %p10912_p3 = scmp.lt.s32.totalorder %s325_s28, %s325_s28 }
  0x2f   : > { %p10913_p5 = scmp.lt.s32.totalorder %s10904_s23, %s10904_s23 }
  0x30   : > { %p10907_p13 = pnand %p10905_p1, %p10843_p12 }
  0x31   : > { %p10914_p10 = por %p10913_p5, %p10912_p3 }
  0x32   : > { %p10908_p0 = pneg %p10907_p13 }
  0x33   : > { %10597 = dma.hbm_to_vmem [thread:$0]  (!%p11137_p11), %s15191_s4, 4608, %s306_s26, [#allocation9], %s15128_s30, %s15128_s30, %s15129_s11  }
  0x34   : > { %p10915_p7 = pnand %p10914_p10, %p10908_p0 }
  0x36   : > { %10918 = shalt.err (!%p10915_p7)
}
  0x37   : > { %s15192_s7 = sld [smem:[#allocation76_spill]]  ;;  %s11177_s26 = sadd.s32 1, %s11019_s16  }
  0x38   : > { %s32_s24 = ssub.s32 %s11019_s16, %s11177_s26  ;;  %s35_s18 = sadd.s32 1, %s11015_s15 }
  0x39   : > { %p33_p1 = scmp.eq.s32.totalorder %s32_s24, 0  ;;  %p42_p12 = scmp.ne.s32.totalorder %s11015_s15, %s11011_s14 }
  0x3a   : > { %p43_p9 = scmp.eq.s32.totalorder %s11019_s16, 0  ;;  %p10612_p13 = scmp.lt.s32.totalorder %s11019_s16, 2 }
  0x3b   : > { %s11187_s22 = scalar_select %p33_p1, %s11015_s15, %s35_s18  }
  0x3c   : > { %p44_p0 = por %p43_p9, %p42_p12  ;;  %p11191_p3 = por %p261_p2, %p42_p12 }
  0x3d   : > { %10600 = dma.hbm_to_vmem [thread:$0]  (!%p11137_p11), %s15192_s7, 4608, %s325_s28, [#allocation12], %s15128_s30, %s15128_s30, %s15129_s11  }
  0x3e   : > { %15193 = sst [smem:[#allocation18_spill]] %s11187_s22  ;;  %s344_s27 = sand.u32 1, %s11015_s15  }
  0x3f   : > { %s15194_s25 = scalar_select %p11191_p3, 1, 0 }
  0x40   : > { %s9371_s23 = sshll.u32 %s11019_s16, 11  ;;  %s8749_s28 = sshll.u32 %s344_s27, 7 }
  0x41   : > { %s11200_s30 = scalar_lea.hbm %s15116_s0, %s9371_s23  ;;  %s348_s24 = scalar_lea.vmem [#allocation5], %s8749_s28 }
  0x42   : > { %s355_s18 = sshll.u32 %s348_s24, 4  ;;  %p11202_p11 = pnand %p10612_p13, %p44_p0  ;;  %s11206_s18 = int_to_ptr.vmem [resolvable:$true] %s355_s18 }
  0x43   : > { %s11208_s1 = scalar_lea.sflag [#allocation6], %s344_s27  ;;  %s10919_s4 = scalar_lea.hbm %s11200_s30, 2048 }
  0x44   : > { %p10920_p2 = scmp.ne.s32.totalorder %s11200_s30, %s10919_s4  ;;  %p10921_p5 = pneg %p11202_p11 }
  0x45   : > { %s10924_s28 = scalar_lea.hbm %s15116_s0, 4096  ;;  %p10925_p1 = scmp.lt.s32.totalorder %s11200_s30, %s15116_s0 }
  0x46   : > { %p10922_p10 = pnand %p10921_p5, %p10920_p2  ;;  %p10926_p12 = scmp.lt.s32.totalorder %s10924_s28, %s10919_s4 }
  0x48   : > { %p10923_p7 = pneg %p10922_p10  ;;  %p10927_p9 = por %p10926_p12, %p10925_p1 }
  0x4a   : > { %p10928_p13 = pnand %p10927_p9, %p10923_p7 }
  0x4c   : > { %10931 = shalt.err (!%p10928_p13)
}
  0x4d   : > { %s10932_s27 = scalar_lea.vmem %s11206_s18, 2048  ;;  %s11026_s7 = smov [#allocation5]  }
  0x4e   : > { %p10933_p0 = scmp.ne.s32.totalorder %s11206_s18, %s10932_s27  ;;  %s10937_s22 = sshll.u32 %s11026_s7, 4  ;;  %s10938_s22 = int_to_ptr.vmem [resolvable:$false] %s10937_s22 }
  0x4f   : > { %s10939_s23 = scalar_lea.vmem %s10938_s22, 4096  ;;  %p10940_p10 = scmp.lt.s32.totalorder %s11206_s18, %s10938_s22 }
  0x50   : > { %p10935_p6 = pnand %p10933_p0, %p10921_p5  ;;  %p10941_p3 = scmp.lt.s32.totalorder %s10939_s23, %s10932_s27 }
  0x52   : > { %p10936_p2 = pneg %p10935_p6  ;;  %p10942_p4 = por %p10941_p3, %p10940_p10 }
  0x54   : > { %p10943_p8 = pnand %p10942_p4, %p10936_p2 }
  0x56   : > { %10946 = shalt.err (!%p10943_p8)
}
  0x57   : > { %s15196_s4 = smov 4   ;;  %s15197_s29 = smov 64  }
  0x58   : > { %10604 = dma.hbm_to_vmem [thread:$0]  (!%p11202_p11), %s11200_s30, 2048, %s11206_s18, %s11208_s1, %s15197_s29, %s15197_s29, %s15196_s4  }
  0x59   : > { %p15198_p6 = scmp.ne.s32.totalorder %s15188_s21, 0 }
  0x5b   : > { %367 = sbr.rel (%p15198_p6) target bundleno = 1462 (0x5b6), region = 60 }
  0x60   : > { %s11235_s7 = sand.u32 1, %s11011_s14   ;;  %p15199_p4 = scmp.ne.s32.totalorder %s15186_s19, 0 }
  0x61   : > { %s8753_s22 = sshll.u32 %s11235_s7, 7  ;;  %s370_s28 = scalar_lea.sflag [#allocation6], %s11235_s7 }
  0x62   : > { %s11239_s12 = scalar_lea.vmem [#allocation5], %s8753_s22 }
  0x63   : > { %10990 = dma.done.wait (%p15199_p4), %s370_s28, 2048  }
  0x64   : > { %10992 = vsyncadd (%p15199_p4), %s370_s28, 4294965248  ;;  %p15200_p8 = scmp.eq.s32.totalorder %s11109_s17, 0 }
  0x66   : > { %10994 = dma.done.wait (%p15200_p8), [#allocation9], 4864   ;;  %p15201_p3 = pmov %p15200_p8 }
  0x68   : > { %10996 = vsyncadd (%p15201_p3), [#allocation9], 4294962432  ;;  %p15202_p11 = pmov %p15201_p3 }
  0x69   : > { %p15203_p5 = pmov %p15201_p3 }
  0x6a   : > { %10998 = dma.done.wait (%p15202_p11), [#allocation12], 4608  }
  0x6b   : > { %11000 = vsyncadd (%p15203_p5), [#allocation12], 4294962688  ;;  %vm854_vm0 = vcmask 1044480   ;;  %v11027_v0 = vmov 0.0   ;;  %vm855_vm1 = vcmask 1045504   ;;  %v11028_v1 = vmov 65535  }
  0x6c   : > { %638 = vst [vmem:[#allocation4] sm:$0xff] %v11027_v0  ;;  %639 = vst [vmem:[#allocation4 + $0x8] sm:$0xff] %v11027_v0  ;;  %v856_v2 = vsel %vm854_vm0, 4294967295, %v11028_v1  ;;  %v10659_v4 = vld [vmem:[#allocation8 + $0x8] sm:$0x3f]   ;;  %v10660_v5 = vld [vmem:[#allocation8] sm:$0xff]  }
  0x6d   : > { %640 = vst [vmem:[#allocation4 + $0x10] sm:$0xff] %v11027_v0  ;;  %646 = vst [vmem:[#allocation4 + $0x18] sm:$0x1] %v11027_v0  ;;  %v857_v3 = vsel %vm855_vm1, %v856_v2, 0  ;;  %vm805_vm2 = vcmask 220160   ;;  %v10661_v7 = vld [vmem:[%s11239_s12] sm:$0xff]  }
  0x6e   : > { %647 = vst [vmem:[#allocation4 + $0x30] sm:$0x1] %v11027_v0  ;;  %648 = vst [vmem:[#allocation4 + $0x48] sm:$0x1] %v11027_v0  ;;  %v859_v6 = vand.u32 %v10659_v4, %v857_v3  ;;  %9819 = vmatprep.mubr.msk.bf16.mxu0 %vm805_vm2, %v10661_v7  ;;  %v10662_v8 = vld [vmem:[%s11239_s12 + $0x8] sm:$0xff]   ;;  %v10663_v9 = vld [vmem:[%s11239_s12 + $0x10] sm:$0xff]  }
  0x6f   : > { %649 = vst [vmem:[#allocation4 + $0x60] sm:$0x1] %v11027_v0  ;;  %650 = vst [vmem:[#allocation4 + $0x78] sm:$0x1] %v11027_v0  ;;  %v10667_v10 = vld [vmem:[%s11239_s12 + $0x40] sm:$0xff]   ;;  %v10668_v11 = vld [vmem:[%s11239_s12 + $0x48] sm:$0xff]  }
  0x70   : > { %651 = vst [vmem:[#allocation4 + $0x90] sm:$0x1] %v11027_v0  ;;  %652 = vst [vmem:[#allocation4 + $0xa8] sm:$0x1] %v11027_v0  ;;  %9815 = vmatprep.subr.bf16.mxu0 %v859_v6  ;;  %10571 = vmatprep.subr.bf16.mxu1 %v859_v6  ;;  %vm432_vm3 = vcmask 516096   ;;  %v10671_v12 = vld [vmem:[%s11239_s12 + $0x50] sm:$0xff]  }
  0x71   : > { %653 = vst [vmem:[#allocation4 + $0xc0] sm:$0x1] %v11027_v0  ;;  %654 = vst [vmem:[#allocation4 + $0xd8] sm:$0x1] %v11027_v0  ;;  %9816 = vmatpush3.bf16.msra.mxu0 %v859_v6  ;;  %10573 = vmatpush3.bf16.msra.mxu1 %v859_v6  ;;  %vm433_vm4 = vsmask.f32 256 }
  0x72   : > { %655 = vst [vmem:[#allocation4 + $0xf0] sm:$0x1] %v11027_v0  ;;  %656 = vst [vmem:[#allocation4 + $0x108] sm:$0x1] %v11027_v0  ;;  %9817 = vmatprep.subr.bf16.mxu0 %v10660_v5  ;;  %10572 = vmatprep.subr.bf16.mxu1 %v10660_v5  ;;  %v15204_v13 = vmov 0  ;;  %v10664_v14 = vld [vmem:[%s11239_s12 + $0x18] sm:$0xff]  }
  0x73   : > { %657 = vst [vmem:[#allocation4 + $0x120] sm:$0x1] %v11027_v0  ;;  %658 = vst [vmem:[#allocation4 + $0x138] sm:$0x1] %v11027_v0  ;;  %9835 = vmatprep.mubr.msk.bf16.mxu1 %vm805_vm2, %v10667_v10  ;;  %v10665_v15 = vld [vmem:[%s11239_s12 + $0x20] sm:$0xff]   ;;  %v10672_v16 = vld [vmem:[%s11239_s12 + $0x58] sm:$0xff]  }
  0x74   : > { %659 = vst [vmem:[#allocation4 + $0x150] sm:$0x1] %v11027_v0  ;;  %660 = vst [vmem:[#allocation4 + $0x168] sm:$0x1] %v11027_v0  ;;  %v10673_v17 = vld [vmem:[%s11239_s12 + $0x60] sm:$0xff]   ;;  %v10666_v20 = vld [vmem:[%s11239_s12 + $0x28] sm:$0xff]  }
  0x75   : > { %661 = vst [vmem:[#allocation4 + $0x180] sm:$0x1] %v11027_v0  ;;  %9818 = vmatpush3.bf16.msra.mxu0 %v10660_v5  ;;  %10574 = vmatpush3.bf16.msra.mxu1 %v10660_v5  ;;  %vm11266_vm5 = vmand %vm432_vm3, %vm433_vm4  ;;  %v438_v18 = vld [vmem:[#allocation2 + $0x18] sm:$0x1]  ;;  %v10669_v21 = vld [vmem:[%s11239_s12 + $0x30] sm:$0xff]   ;;  %vm423_vm6 = vcmask 519168  }
  0x76   : > { %v15205_v13 = vsel %vm11266_vm5, 4294967295, %v15204_v13  ;;  %v439_v19 = vsel %vm11266_vm5, 0, %v438_v18  ;;  %v10674_v22 = vld [vmem:[%s11239_s12 + $0x68] sm:$0xff]   ;;  %v10675_v23 = vld [vmem:[%s11239_s12 + $0x70] sm:$0xff]   ;;  %v10670_v24 = vld [vmem:[%s11239_s12 + $0x38] sm:$0xff]   ;;  %v15207_v26 = vmov 0 }
  0x77   : > { %15206 = vst [vmem:[#allocation19_spill] sm:$0xff] %v15205_v13  ;;  %440 = vst [vmem:[#allocation2 + $0x18] sm:$0x1] %v439_v19  ;;  %v10676_v25 = vld [vmem:[%s11239_s12 + $0x78] sm:$0xff]   ;;  %vm484_vm7 = vsmask.f32 7938 }
  0x78   : > { %9820 = vmatmul.mubr.msk.bf16.vlgmr.msra.gmra.mxu0 %vm805_vm2, %v10662_v8  ;;  %9836 = vmatmul.mubr.msk.bf16.vlgmr.msra.gmra.mxu1 %vm805_vm2, %v10668_v11  ;;  %vm11294_vm8 = vmand %vm423_vm6, %vm484_vm7  ;;  %v435_v27 = vld [vmem:[#allocation2 + $0xc] sm:$0x1]  ;;  %v489_v29 = vld [vmem:[#allocation2 + $0x20] sm:$0xf]  ;;  %v11029_v62 = vmov 0   ;;  %vm1839_vm9 = vcmask 523264  }
  0x79   : > { %9823 = vmatprep.mubr.msk.bf16.mxu0 %vm805_vm2, %v10663_v9  ;;  %9839 = vmatprep.mubr.msk.bf16.mxu1 %vm805_vm2, %v10671_v12  ;;  %v15208_v26 = vsel %vm11294_vm8, 4294967295, %v15207_v26  ;;  %v436_v28 = vsel %vm11266_vm5, 0, %v435_v27  ;;  %v490_v30 = vsel %vm11294_vm8, 0, %v489_v29  ;;  %v486_v31 = vld [vmem:[#allocation2 + $0x14] sm:$0xf]  ;;  %v10677_v34 = vld [vmem:[#allocation10 + $0x78] sm:$0xff]  }
  0x7a   : > { %15209 = vst [vmem:[#allocation20_spill] sm:$0xff] %v15208_v26  ;;  %437 = vst [vmem:[#allocation2 + $0xc] sm:$0x1] %v436_v28  ;;  %v487_v32 = vsel %vm11294_vm8, 0, %v486_v31  ;;  %v444_v33 = vld [vmem:[#allocation2 + $0x30] sm:$0x1]  ;;  %9851 = vmatprep.subr.bf16.mxu1 %v10677_v34 }
  0x7b   : > { %491 = vst [vmem:[#allocation2 + $0x20] sm:$0xf] %v490_v30  ;;  %488 = vst [vmem:[#allocation2 + $0x14] sm:$0xf] %v487_v32  ;;  %v445_v35 = vsel %vm11266_vm5, 0, %v444_v33  ;;  %9852 = vmatpush3.bf16.msra.mxu1 %v10677_v34  ;;  %v10680_v39 = vld [vmem:[#allocation10 + $0x18] sm:$0xff]  }
  0x7c   : > { %446 = vst [vmem:[#allocation2 + $0x30] sm:$0x1] %v445_v35  ;;  %v441_v36 = vld [vmem:[#allocation2 + $0x24] sm:$0x1]  ;;  %v495_v38 = vld [vmem:[#allocation2 + $0x38] sm:$0xf]  ;;  %9891 = vmatprep.subr.bf16.mxu0 %v10680_v39 }
  0x7d   : > { %v442_v37 = vsel %vm11266_vm5, 0, %v441_v36  ;;  %v10678_v40 = vld [vmem:[#allocation10 + $0x70] sm:$0xff]   ;;  %v496_v41 = vsel %vm11294_vm8, 0, %v495_v38  ;;  %9892 = vmatpush3.bf16.msra.mxu0 %v10680_v39  ;;  %v492_v42 = vld [vmem:[#allocation2 + $0x2c] sm:$0xf]  ;;  %v10679_v47 = vld [vmem:[#allocation10 + $0x68] sm:$0xff]  }
  0x7e   : > { %443 = vst [vmem:[#allocation2 + $0x24] sm:$0x1] %v442_v37  ;;  %497 = vst [vmem:[#allocation2 + $0x38] sm:$0xf] %v496_v41  ;;  %9853 = vmatprep.subr.bf16.mxu1 %v10678_v40  ;;  %v493_v43 = vsel %vm11294_vm8, 0, %v492_v42  ;;  %v10681_v44 = vld [vmem:[#allocation10 + $0x10] sm:$0xff]  }
  0x7f   : > { %9854 = vmatpush3.bf16.msra.mxu1 %v10678_v40  ;;  %494 = vst [vmem:[#allocation2 + $0x2c] sm:$0xf] %v493_v43  ;;  %v450_v45 = vld [vmem:[#allocation2 + $0x48] sm:$0x1]  ;;  %9893 = vmatprep.subr.bf16.mxu0 %v10681_v44  ;;  %v447_v48 = vld [vmem:[#allocation2 + $0x3c] sm:$0x1] }
  0x80   : > { %9824 = vmatmul.mubr.msk.bf16.gmra.mxu0 %vm805_vm2, %v10664_v14  ;;  %9840 = vmatmul.mubr.msk.bf16.gmra.mxu1 %vm805_vm2, %v10672_v16  ;;  %v451_v46 = vsel %vm11266_vm5, 0, %v450_v45  ;;  %v448_v49 = vsel %vm11266_vm5, 0, %v447_v48  ;;  %v501_v50 = vld [vmem:[#allocation2 + $0x50] sm:$0xf]  ;;  %v498_v52 = vld [vmem:[#allocation2 + $0x44] sm:$0xf] }
  0x81   : > { %9827 = vmatprep.mubr.msk.bf16.mxu0 %vm805_vm2, %v10665_v15  ;;  %9843 = vmatprep.mubr.msk.bf16.mxu1 %vm805_vm2, %v10673_v17  ;;  %452 = vst [vmem:[#allocation2 + $0x48] sm:$0x1] %v451_v46  ;;  %449 = vst [vmem:[#allocation2 + $0x3c] sm:$0x1] %v448_v49  ;;  %v502_v51 = vsel %vm11294_vm8, 0, %v501_v50  ;;  %v499_v53 = vsel %vm11294_vm8, 0, %v498_v52 }
  0x82   : > { %9894 = vmatpush3.bf16.msra.mxu0 %v10681_v44  ;;  %9855 = vmatprep.subr.bf16.mxu1 %v10679_v47  ;;  %503 = vst [vmem:[#allocation2 + $0x50] sm:$0xf] %v502_v51  ;;  %v10683_v54 = vld [vmem:[#allocation10 + $0x8] sm:$0xff]   ;;  %500 = vst [vmem:[#allocation2 + $0x44] sm:$0xf] %v499_v53  ;;  %v10682_v61 = vld [vmem:[#allocation10 + $0x60] sm:$0xff]  }
  0x83   : > { %9856 = vmatpush3.bf16.msra.mxu1 %v10679_v47  ;;  %v456_v55 = vld [vmem:[#allocation2 + $0x60] sm:$0x1]  ;;  %9895 = vmatprep.subr.bf16.mxu0 %v10683_v54  ;;  %v462_v56 = vld [vmem:[#allocation2 + $0x78] sm:$0x1]  ;;  %v459_v59 = vld [vmem:[#allocation2 + $0x6c] sm:$0x1] }
  0x84   : > { %v457_v57 = vsel %vm11266_vm5, 0, %v456_v55  ;;  %v463_v58 = vsel %vm11266_vm5, 0, %v462_v56  ;;  %v460_v60 = vsel %vm11266_vm5, 0, %v459_v59  ;;  %424 = vst.msk [vmem:[#allocation2] sm:$0xf] %vm423_vm6, %v11029_v62  ;;  %9857 = vmatprep.subr.bf16.mxu1 %v10682_v61  ;;  %v10684_v63 = vld [vmem:[#allocation10] sm:$0xff]  }
  0x85   : > { %458 = vst [vmem:[#allocation2 + $0x60] sm:$0x1] %v457_v57  ;;  %464 = vst [vmem:[#allocation2 + $0x78] sm:$0x1] %v463_v58  ;;  %v453_v0 = vld [vmem:[#allocation2 + $0x54] sm:$0x1] }
  0x86   : > { %9896 = vmatpush3.bf16.msra.mxu0 %v10683_v54  ;;  %461 = vst [vmem:[#allocation2 + $0x6c] sm:$0x1] %v460_v60  ;;  %425 = vst.msk [vmem:[#allocation2 + $0x4] sm:$0xf] %vm423_vm6, %v11029_v62  ;;  %v454_v1 = vsel %vm11266_vm5, 0, %v453_v0  ;;  %v11376_v40 = vld [vmem:[#allocation10 + $0x38] sm:$0xff]  }
  0x87   : > { %426 = vst.msk [vmem:[#allocation2 + $0x8] sm:$0xf] %vm423_vm6, %v11029_v62  ;;  %428 = vst.msk [vmem:[#allocation2 + $0xcc] sm:$0xf] %vm423_vm6, %v11029_v62  ;;  %9858 = vmatpush3.bf16.msra.mxu1 %v10682_v61  ;;  %9897 = vmatprep.subr.bf16.mxu0 %v10684_v63  ;;  %v507_v2 = vld [vmem:[#allocation2 + $0x68] sm:$0xf] }
  0x88   : > { %9828 = vmatmul.mubr.msk.bf16.gmra.mxu0 %vm805_vm2, %v10666_v20  ;;  %9844 = vmatmul.mubr.msk.bf16.gmra.mxu1 %vm805_vm2, %v10674_v22  ;;  %429 = vst.msk [vmem:[#allocation2 + $0xd0] sm:$0xf] %vm423_vm6, %v11029_v62  ;;  %430 = vst.msk [vmem:[#allocation2 + $0xd4] sm:$0xf] %vm423_vm6, %v11029_v62  ;;  %v513_v3 = vld [vmem:[#allocation2 + $0x80] sm:$0xf] }
  0x89   : > { %9831 = vmatprep.mubr.msk.bf16.mxu0 %vm805_vm2, %v10669_v21  ;;  %9847 = vmatprep.mubr.msk.bf16.mxu1 %vm805_vm2, %v10675_v23  ;;  %534 = vst.msk [vmem:[#allocation3] sm:$0xf] %vm423_vm6, %v11029_v62  ;;  %535 = vst.msk [vmem:[#allocation3 + $0x4] sm:$0xf] %vm423_vm6, %v11029_v62  ;;  %v508_v4 = vsel %vm11294_vm8, 0, %v507_v2  ;;  %v514_v5 = vsel %vm11294_vm8, 0, %v513_v3 }
  0x8a   : > { %536 = vst.msk [vmem:[#allocation3 + $0x8] sm:$0xf] %vm423_vm6, %v11029_v62  ;;  %538 = vst.msk [vmem:[#allocation3 + $0xcc] sm:$0xf] %vm423_vm6, %v11029_v62  ;;  %9898 = vmatpush3.bf16.msra.mxu0 %v10684_v63  ;;  %v510_v6 = vld [vmem:[#allocation2 + $0x74] sm:$0xf] }
  0x8b   : > { %539 = vst.msk [vmem:[#allocation3 + $0xd0] sm:$0xf] %vm423_vm6, %v11029_v62  ;;  %540 = vst.msk [vmem:[#allocation3 + $0xd4] sm:$0xf] %vm423_vm6, %v11029_v62  ;;  %v1664_v7 = vld [vmem:[#allocation2] sm:$0xf]  ;;  %9971 = vmatprep.subr.bf16.mxu0 %v11376_v40 }
  0x8c   : > { %455 = vst [vmem:[#allocation2 + $0x54] sm:$0x1] %v454_v1  ;;  %509 = vst [vmem:[#allocation2 + $0x68] sm:$0xf] %v508_v4  ;;  %v511_v8 = vsel %vm11294_vm8, 0, %v510_v6  ;;  %v11355_v20 = vld [vmem:[#allocation10 + $0xd8] sm:$0xff]  }
  0x8d   : > { %515 = vst [vmem:[#allocation2 + $0x80] sm:$0xf] %v514_v5  ;;  %v1665_v9 = vld [vmem:[#allocation2 + $0x4] sm:$0xf]  ;;  %512 = vst [vmem:[#allocation2 + $0x74] sm:$0xf] %v511_v8  ;;  %9931 = vmatprep.subr.bf16.mxu1 %v11355_v20 }
  0x8e   : > { %v8862_v10 = vcombine.low %v1664_v7, %v1665_v9  ;;  %v504_v11 = vld [vmem:[#allocation2 + $0x5c] sm:$0xf]  ;;  %v468_v14 = vld [vmem:[#allocation2 + $0x90] sm:$0x1]  ;;  %v465_v16 = vld [vmem:[#allocation2 + $0x84] sm:$0x1] }
  0x8f   : > { %v505_v12 = vsel %vm11294_vm8, 0, %v504_v11  ;;  %v469_v15 = vsel %vm11266_vm5, 0, %v468_v14  ;;  %v466_v17 = vsel %vm11266_vm5, 0, %v465_v16  ;;  %v519_v18 = vld [vmem:[#allocation2 + $0x98] sm:$0xf]  ;;  %vm3722_vm12 = vcmask 1042432  }
  0x90   : > { %9832 = vmatmul.mubr.msk.bf16.gmra.mxu0 %vm805_vm2, %v10670_v24  ;;  %9848 = vmatmul.mubr.msk.bf16.gmra.mxu1 %vm805_vm2, %v10676_v25  ;;  %506 = vst [vmem:[#allocation2 + $0x5c] sm:$0xf] %v505_v12  ;;  %470 = vst [vmem:[#allocation2 + $0x90] sm:$0x1] %v469_v15  ;;  %v520_v19 = vsel %vm11294_vm8, 0, %v519_v18  ;;  %vm3723_vm13 = vcmask 1046532  }
  0x91   : > { %9899 = vmatprep.mubr.msk.bf16.mxu0 %vm1839_vm9, %v8862_v10  ;;  %467 = vst [vmem:[#allocation2 + $0x84] sm:$0x1] %v466_v17  ;;  %521 = vst [vmem:[#allocation2 + $0x98] sm:$0xf] %v520_v19  ;;  %v516_v21 = vld [vmem:[#allocation2 + $0x8c] sm:$0xf] }
  0x92   : > { %v517_v22 = vsel %vm11294_vm8, 0, %v516_v21  ;;  %v474_v23 = vld [vmem:[#allocation2 + $0xa8] sm:$0x1]  ;;  %v471_v25 = vld [vmem:[#allocation2 + $0x9c] sm:$0x1]  ;;  %vm11783_vm14 = vmor %vm3722_vm12, %vm3723_vm13  ;;  %s8757_s21 = sshll.u32 %s11235_s7, 6 }
  0x93   : > { %518 = vst [vmem:[#allocation2 + $0x8c] sm:$0xf] %v517_v22  ;;  %v475_v24 = vsel %vm11266_vm5, 0, %v474_v23  ;;  %v472_v27 = vsel %vm11266_vm5, 0, %v471_v25  ;;  %v525_v28 = vld [vmem:[#allocation2 + $0xb0] sm:$0xf] }
  0x94   : > { %476 = vst [vmem:[#allocation2 + $0xa8] sm:$0x1] %v475_v24  ;;  %v522_v29 = vld [vmem:[#allocation2 + $0xa4] sm:$0xf]  ;;  %473 = vst [vmem:[#allocation2 + $0x9c] sm:$0x1] %v472_v27 }
  0x95   : > { %v526_v30 = vsel %vm11294_vm8, 0, %v525_v28  ;;  %v523_v31 = vsel %vm11294_vm8, 0, %v522_v29  ;;  %v480_v32 = vld [vmem:[#allocation2 + $0xc0] sm:$0x1]  ;;  %v477_v34 = vld [vmem:[#allocation2 + $0xb4] sm:$0x1] }
  0x96   : > { %527 = vst [vmem:[#allocation2 + $0xb0] sm:$0xf] %v526_v30  ;;  %524 = vst [vmem:[#allocation2 + $0xa4] sm:$0xf] %v523_v31  ;;  %v481_v33 = vsel %vm11266_vm5, 0, %v480_v32  ;;  %v478_v35 = vsel %vm11266_vm5, 0, %v477_v34 }
  0x97   : > { %482 = vst [vmem:[#allocation2 + $0xc0] sm:$0x1] %v481_v33  ;;  %v531_v36 = vld [vmem:[#allocation2 + $0xc8] sm:$0xf]  ;;  %479 = vst [vmem:[#allocation2 + $0xb4] sm:$0x1] %v478_v35 }
  0x98   : > { %v532_v37 = vsel %vm11294_vm8, 0, %v531_v36  ;;  %v528_v38 = vld [vmem:[#allocation2 + $0xbc] sm:$0xf]  ;;  %v11382_v41 = vld [vmem:[%s15118_s2] ss:$0 sm:$0xff]  ;;  %s14989_s30 = scalar_lea.vmem [#allocation13], %s8757_s21 }
  0x99   : > { %533 = vst [vmem:[#allocation2 + $0xc8] sm:$0xf] %v532_v37  ;;  %v529_v39 = vsel %vm11294_vm8, 0, %v528_v38  ;;  %v11387_v43 = vld [vmem:[%s15119_s3] ss:$0 sm:$0xff]  ;;  %s9436_s11 = sshll.u32 %s11109_s17, 10 }
  0x9a   : > { %530 = vst [vmem:[#allocation2 + $0xbc] sm:$0xf] %v529_v39  ;;  %vm1228_vm10 = vsmask.f32 4368  ;;  %v1557_v21 = vld [vmem:[#allocation2 + $0x18] sm:$0xf]  ;;  %s15070_s23 = scalar_lea.hbm %s15126_s10, %s9436_s11 }
  0x9b   : > { %v1550_v32 = vld [vmem:[#allocation2 + $0xc] sm:$0xf]  ;;  %vm11422_vm11 = vmor %vm433_vm4, %vm1228_vm10  ;;  %vm2485_vm15 = vsmask.f32 3328  ;;  %vm2486_vm0 = vsmask.f32 7440 }
  0x9c   : > { %vm11873_vm1 = vmor %vm2485_vm15, %vm2486_vm0  ;;  %s8595_s18 = sshll.u32 %s14989_s30, 4  ;;  %s8582_s4 = scalar_lea.sflag [#allocation7], %s11235_s7  ;;  %s15072_s18 = int_to_ptr.vmem [resolvable:$true] %s8595_s18 }
  0x9d   : > { %s10947_s29 = scalar_lea.vmem %s15072_s18, 1024  ;;  %p15525_p1 = scmp.ne.s32.totalorder %s15194_s25, 0 }
  0x9e   : > { %p10948_p7 = scmp.ne.s32.totalorder %s15072_s18, %s10947_s29  ;;  %s11030_s17 = smov [#allocation13]  }
  0x9f   : > { %s10951_s22 = sshll.u32 %s11030_s17, 4  ;;  %s10952_s22 = int_to_ptr.vmem [resolvable:$false] %s10951_s22 }
  0xa0   : > { %p10949_p12 = pnand %p10948_p7, %p15525_p1  ;;  %s10953_s28 = scalar_lea.vmem %s10952_s22, 2048 }
  0xa1   : > { %p10954_p13 = scmp.lt.s32.totalorder %s15072_s18, %s10952_s22  ;;  %p10955_p0 = scmp.lt.s32.totalorder %s10953_s28, %s10947_s29 }
  0xa2   : > { %p10950_p9 = pneg %p10949_p12 }
  0xa3   : > { %p10956_p2 = por %p10955_p0, %p10954_p13 }
  0xa5   : > { %p10957_p10 = pnand %p10956_p2, %p10950_p9 }
 0x138   : > { %v9821_v42 = vpop.f32.mrf.mxu0  ;;  %v9837_v45 = vpop.f32.mrf.mxu1 }
 0x139   : > { %v1031_v44 = vmul.f32 %v9821_v42, %v11382_v41  ;;  %v1047_v47 = vmul.f32 %v9837_v45, %v11382_v41  ;;  %v15210_v45 = vmov 0 }
 0x13a   : > { %v895_v46 = vpop.f32.mrf.mxu0  ;;  %v959_v50 = vpop.f32.mrf.mxu1  ;;  %v15211_v45 = vsel %vm11422_vm11, 4294967295, %v15210_v45 }
 0x13b   : > { %v1070_v48 = vadd.f32 %v11387_v43, %v1031_v44  ;;  %v1029_v49 = vmul.f32 %v11382_v41, %v895_v46  ;;  %v1086_v52 = vadd.f32 %v11387_v43, %v1047_v47  ;;  %v1045_v53 = vmul.f32 %v11382_v41, %v959_v50  ;;  %15212 = vst [vmem:[#allocation21_spill] sm:$0xff] %v15211_v45  ;;  %v1561_v46 = vld [vmem:[#allocation2 + $0x20] sm:$0x1] }
 0x13c   : > { %v9822_v51 = vpop.f32.mrf.mxu0  ;;  %v9838_v57 = vpop.f32.mrf.mxu1 }
 0x13d   : > { %v1102_v54 = vmax.f32 %v1070_v48, 0.0  ;;  %v1068_v55 = vadd.f32 %v11387_v43, %v1029_v49  ;;  %v1032_v56 = vmul.f32 %v9822_v51, %v11382_v41  ;;  %v1118_v59 = vmax.f32 %v1086_v52, 0.0 }
 0x13e   : > { %v898_v58 = vpop.f32.mrf.mxu0  ;;  %v11398_v60 = vadd.f32 %v11387_v43, %v1045_v53  ;;  %v1048_v61 = vmul.f32 %v9838_v57, %v11382_v41 }
 0x13f   : > { %v9374_v62 = vpack.c.bf16 %v1102_v54, %v1102_v54  ;;  %v1100_v63 = vmax.f32 %v1068_v55, 0.0  ;;  %v1071_v0 = vadd.f32 %v11387_v43, %v1032_v56  ;;  %v1030_v1 = vmul.f32 %v11382_v41, %v898_v58 }
 0x140   : > { %v9825_v2 = vpop.f32.mrf.mxu0  ;;  %v11403_v3 = vpack.c.bf16 %v1118_v59, %v1118_v59  ;;  %v1116_v4 = vmax.f32 %v11398_v60, 0.0  ;;  %v11407_v5 = vadd.f32 %v11387_v43, %v1048_v61 }
 0x141   : > { %v1248_v6 = vshrl.u32 %v9374_v62, 16  ;;  %v1251_v7 = vshll.u32 %v9374_v62, 16  ;;  %v9372_v8 = vpack.c.bf16 %v1100_v63, %v1100_v63  ;;  %v1103_v9 = vmax.f32 %v1071_v0, 0.0  ;;  %v962_v62 = vpop.f32.mrf.mxu1 }
 0x142   : > { %v1069_v10 = vadd.f32 %v11387_v43, %v1030_v1  ;;  %v1035_v11 = vmul.f32 %v9825_v2, %v11382_v41  ;;  %v911_v12 = vpop.f32.mrf.mxu0  ;;  %v1384_v14 = vshrl.u32 %v11403_v3, 16  ;;  %v1387_v15 = vshll.u32 %v11403_v3, 16  ;;  %v1554_v1 = vld [vmem:[#allocation2 + $0x14] sm:$0x1] }
 0x143   : > { %v1250_v16 = vrot.slane %v1248_v6, 7  ;;  %v1231_v17 = vshrl.u32 %v9372_v8, 16  ;;  %v1234_v18 = vshll.u32 %v9372_v8, 16  ;;  %v9375_v19 = vpack.c.bf16 %v1103_v9, %v1103_v9 }
 0x144   : > { %v1101_v22 = vmax.f32 %v1069_v10, 0.0  ;;  %v1074_v23 = vadd.f32 %v11387_v43, %v1035_v11  ;;  %v1033_v24 = vmul.f32 %v11382_v41, %v911_v12  ;;  %v9826_v25 = vpop.f32.mrf.mxu0  ;;  %v11415_v27 = vrot.slane %v1384_v14, 7  ;;  %v1571_v11 = vld [vmem:[#allocation2 + $0x30] sm:$0xf] }
 0x145   : > { %v1253_v28 = vor.u32 %v1251_v7, %v1250_v16  ;;  %v1254_v29 = vrot.slane %v1250_v16, 4  ;;  %v1233_v30 = vrot.slane %v1231_v17, 7  ;;  %v1256_v31 = vshrl.u32 %v9375_v19, 16 }
 0x146   : > { %v1259_v33 = vshll.u32 %v9375_v19, 16  ;;  %v9373_v34 = vpack.c.bf16 %v1101_v22, %v1101_v22  ;;  %v1106_v35 = vmax.f32 %v1074_v23, 0.0  ;;  %v1072_v36 = vadd.f32 %v11387_v43, %v1033_v24  ;;  %v914_v37 = vpop.f32.mrf.mxu0 }
 0x147   : > { %v1558_v38 = vsel %vm11294_vm8, %v1253_v28, %v1557_v21  ;;  %v1236_v39 = vor.u32 %v1234_v18, %v1233_v30  ;;  %v1237_v42 = vrot.slane %v1233_v30, 4  ;;  %v1258_v44 = vrot.slane %v1256_v31, 7  ;;  %v1564_v31 = vld [vmem:[#allocation2 + $0x24] sm:$0xf] }
 0x148   : > { %1559 = vst [vmem:[#allocation2 + $0x18] sm:$0xf] %v1558_v38  ;;  %v1239_v47 = vshrl.u32 %v9373_v34, 16  ;;  %v1242_v48 = vshll.u32 %v9373_v34, 16  ;;  %v9378_v49 = vpack.c.bf16 %v1106_v35, %v1106_v35  ;;  %v1104_v50 = vmax.f32 %v1072_v36, 0.0  ;;  %v9829_v51 = vpop.f32.mrf.mxu0 }
 0x149   : > { %v1551_v52 = vsel %vm11294_vm8, %v1236_v39, %v1550_v32  ;;  %v1261_v53 = vor.u32 %v1259_v33, %v1258_v44  ;;  %v1263_v54 = vrot.slane %v1258_v44, 4  ;;  %v1036_v55 = vmul.f32 %v9826_v25, %v11382_v41  ;;  %v1613_v35 = vld [vmem:[#allocation2 + $0x78] sm:$0xf] }
 0x14a   : > { %1552 = vst [vmem:[#allocation2 + $0xc] sm:$0xf] %v1551_v52  ;;  %v1241_v56 = vrot.slane %v1239_v47, 7  ;;  %v1282_v57 = vshrl.u32 %v9378_v49, 16  ;;  %v1285_v58 = vshll.u32 %v9378_v49, 16  ;;  %v9376_v59 = vpack.c.bf16 %v1104_v50, %v1104_v50  ;;  %v927_v61 = vpop.f32.mrf.mxu0 }
 0x14b   : > { %v1262_v63 = vsel %vm11422_vm11, %v1254_v29, %v1261_v53  ;;  %v1562_v0 = vsel %vm11266_vm5, %v1263_v54, %v1561_v46  ;;  %v1075_v2 = vadd.f32 %v11387_v43, %v1036_v55  ;;  %v1034_v6 = vmul.f32 %v11382_v41, %v914_v37 }
 0x14c   : > { %1560 = vst.msk [vmem:[#allocation2 + $0x1c] sm:$0xf] %vm423_vm6, %v1262_v63  ;;  %1563 = vst [vmem:[#allocation2 + $0x20] sm:$0x1] %v1562_v0  ;;  %v1244_v7 = vor.u32 %v1242_v48, %v1241_v56  ;;  %v1246_v8 = vrot.slane %v1241_v56, 4  ;;  %v1284_v9 = vrot.slane %v1282_v57, 7  ;;  %v1039_v16 = vmul.f32 %v9829_v51, %v11382_v41  ;;  %v9830_v17 = vpop.f32.mrf.mxu0 }
 0x14d   : > { %v1265_v10 = vshrl.u32 %v9376_v59, 16  ;;  %v1107_v12 = vmax.f32 %v1075_v2, 0.0  ;;  %v1073_v14 = vadd.f32 %v11387_v43, %v1034_v6  ;;  %v11439_v18 = vmul.f32 %v11382_v41, %v962_v62 }
 0x14e   : > { %v1245_v19 = vsel %vm11422_vm11, %v1237_v42, %v1244_v7  ;;  %v1555_v21 = vsel %vm11266_vm5, %v1246_v8, %v1554_v1  ;;  %v1287_v22 = vor.u32 %v1285_v58, %v1284_v9  ;;  %v1268_v23 = vshll.u32 %v9376_v59, 16  ;;  %v930_v42 = vpop.f32.mrf.mxu0  ;;  %v1568_v7 = vld [vmem:[#allocation2 + $0x2c] sm:$0x1] }
 0x14f   : > { %1553 = vst.msk [vmem:[#allocation2 + $0x10] sm:$0xf] %vm423_vm6, %v1245_v19  ;;  %1556 = vst [vmem:[#allocation2 + $0x14] sm:$0x1] %v1555_v21  ;;  %v1267_v24 = vrot.slane %v1265_v10, 7  ;;  %v9379_v25 = vpack.c.bf16 %v1107_v12, %v1107_v12  ;;  %v1105_v28 = vmax.f32 %v1073_v14, 0.0  ;;  %v1078_v29 = vadd.f32 %v11387_v43, %v1039_v16 }
 0x150   : > { %v1572_v30 = vsel %vm11294_vm8, %v1287_v22, %v1571_v11  ;;  %v1037_v32 = vmul.f32 %v11382_v41, %v927_v61  ;;  %v1040_v33 = vmul.f32 %v9830_v17, %v11382_v41  ;;  %v1389_v34 = vor.u32 %v1387_v15, %v11415_v27  ;;  %v1575_v15 = vld [vmem:[#allocation2 + $0x38] sm:$0x1]  ;;  %v9833_v61 = vpop.f32.mrf.mxu0  ;;  %v1585_v16 = vld [vmem:[#allocation2 + $0x48] sm:$0xf] }
 0x151   : > { %v1288_v36 = vrot.slane %v1284_v9, 4  ;;  %1573 = vst [vmem:[#allocation2 + $0x30] sm:$0xf] %v1572_v30  ;;  %v1270_v37 = vor.u32 %v1268_v23, %v1267_v24  ;;  %v1271_v38 = vrot.slane %v1267_v24, 4  ;;  %v1290_v39 = vshrl.u32 %v9379_v25, 16 }
 0x152   : > { %v9377_v44 = vpack.c.bf16 %v1105_v28, %v1105_v28  ;;  %v1110_v46 = vmax.f32 %v1078_v29, 0.0  ;;  %v1076_v47 = vadd.f32 %v11387_v43, %v1037_v32  ;;  %v1079_v48 = vadd.f32 %v11387_v43, %v1040_v33  ;;  %v943_v23 = vpop.f32.mrf.mxu0 }
 0x153   : > { %v1565_v49 = vsel %vm11294_vm8, %v1270_v37, %v1564_v31  ;;  %v1292_v50 = vrot.slane %v1290_v39, 7  ;;  %v1293_v51 = vshll.u32 %v9379_v25, 16  ;;  %v1614_v3 = vsel %vm11294_vm8, %v1389_v34, %v1613_v35  ;;  %v1578_v35 = vld [vmem:[#allocation2 + $0x3c] sm:$0xf] }
 0x154   : > { %1566 = vst [vmem:[#allocation2 + $0x24] sm:$0xf] %v1565_v49  ;;  %v1273_v52 = vshrl.u32 %v9377_v44, 16  ;;  %v1276_v53 = vshll.u32 %v9377_v44, 16  ;;  %v9382_v54 = vpack.c.bf16 %v1110_v46, %v1110_v46  ;;  %v1108_v55 = vmax.f32 %v1076_v47, 0.0 }
 0x155   : > { %1615 = vst [vmem:[#allocation2 + $0x78] sm:$0xf] %v1614_v3  ;;  %v1295_v56 = vor.u32 %v1293_v51, %v1292_v50  ;;  %v1297_v57 = vrot.slane %v1292_v50, 4  ;;  %v1111_v58 = vmax.f32 %v1079_v48, 0.0  ;;  %v1038_v59 = vmul.f32 %v11382_v41, %v930_v42  ;;  %v9834_v50 = vpop.f32.mrf.mxu0  ;;  %v9841_v51 = vpop.f32.mrf.mxu1 }
 0x156   : > { %v1275_v62 = vrot.slane %v1273_v52, 7  ;;  %v1316_v63 = vshrl.u32 %v9382_v54, 16  ;;  %v1319_v0 = vshll.u32 %v9382_v54, 16  ;;  %v9380_v1 = vpack.c.bf16 %v1108_v55, %v1108_v55 }
 0x157   : > { %v1296_v2 = vsel %vm11422_vm11, %v1288_v36, %v1295_v56  ;;  %v1576_v6 = vsel %vm11266_vm5, %v1297_v57, %v1575_v15  ;;  %v9383_v8 = vpack.c.bf16 %v1111_v58, %v1111_v58  ;;  %v1077_v9 = vadd.f32 %v11387_v43, %v1038_v59  ;;  %v1589_v36 = vld [vmem:[#allocation2 + $0x50] sm:$0x1]  ;;  %v1582_v58 = vld [vmem:[#allocation2 + $0x44] sm:$0x1]  ;;  %v1606_v59 = vld [vmem:[#allocation2 + $0x6c] sm:$0xf] }
 0x158   : > { %1574 = vst.msk [vmem:[#allocation2 + $0x34] sm:$0xf] %vm423_vm6, %v1296_v2  ;;  %1577 = vst [vmem:[#allocation2 + $0x38] sm:$0x1] %v1576_v6  ;;  %v1278_v10 = vor.u32 %v1276_v53, %v1275_v62  ;;  %v1280_v11 = vrot.slane %v1275_v62, 4  ;;  %v1318_v12 = vrot.slane %v1316_v63, 7  ;;  %v9388_v33 = vpack.c.bf16 %v1116_v4, %v1116_v4 }
 0x159   : > { %v1299_v14 = vshrl.u32 %v9380_v1, 16  ;;  %v1302_v17 = vshll.u32 %v9380_v1, 16  ;;  %v1324_v19 = vshrl.u32 %v9383_v8, 16  ;;  %v1390_v21 = vrot.slane %v11415_v27, 4 }
 0x15a   : > { %v1109_v22 = vmax.f32 %v1077_v9, 0.0  ;;  %v1279_v24 = vsel %vm11422_vm11, %v1271_v38, %v1278_v10  ;;  %v1569_v25 = vsel %vm11266_vm5, %v1280_v11, %v1568_v7  ;;  %v1321_v28 = vor.u32 %v1319_v0, %v1318_v12  ;;  %v975_v7 = vpop.f32.mrf.mxu1 }
 0x15b   : > { %v1327_v29 = vshll.u32 %v9383_v8, 16  ;;  %1567 = vst.msk [vmem:[#allocation2 + $0x28] sm:$0xf] %vm423_vm6, %v1279_v24  ;;  %1570 = vst [vmem:[#allocation2 + $0x2c] sm:$0x1] %v1569_v25  ;;  %v1301_v30 = vrot.slane %v1299_v14, 7  ;;  %v1043_v37 = vmul.f32 %v9833_v61, %v11382_v41  ;;  %v1041_v39 = vmul.f32 %v11382_v41, %v943_v23 }
 0x15c   : > { %v1326_v31 = vrot.slane %v1324_v19, 7  ;;  %v9381_v32 = vpack.c.bf16 %v1109_v22, %v1109_v22  ;;  %v1586_v34 = vsel %vm11294_vm8, %v1321_v28, %v1585_v16  ;;  %v1119_v38 = vmax.f32 %v11407_v5, 0.0  ;;  %v1617_v25 = vld [vmem:[#allocation2 + $0x80] sm:$0x1] }
 0x15d   : > { %v1322_v42 = vrot.slane %v1318_v12, 4  ;;  %1587 = vst [vmem:[#allocation2 + $0x48] sm:$0xf] %v1586_v34  ;;  %v1304_v44 = vor.u32 %v1302_v17, %v1301_v30  ;;  %v1367_v49 = vshrl.u32 %v9388_v33, 16  ;;  %v1370_v4 = vshll.u32 %v9388_v33, 16  ;;  %v946_v12 = vpop.f32.mrf.mxu0 }
 0x15e   : > { %v1329_v46 = vor.u32 %v1327_v29, %v1326_v31  ;;  %v1331_v47 = vrot.slane %v1326_v31, 4  ;;  %v1307_v48 = vshrl.u32 %v9381_v32, 16  ;;  %v1310_v60 = vshll.u32 %v9381_v32, 16  ;;  %v9842_v32 = vpop.f32.mrf.mxu1 }
 0x15f   : > { %v1579_v3 = vsel %vm11294_vm8, %v1304_v44, %v1578_v35  ;;  %v1082_v52 = vadd.f32 %v11387_v43, %v1043_v37  ;;  %v11489_v54 = vrot.slane %v1367_v49, 7  ;;  %v9391_v55 = vpack.c.bf16 %v1119_v38, %v1119_v38  ;;  %v1599_v38 = vld [vmem:[#allocation2 + $0x60] sm:$0xf] }
 0x160   : > { %v1330_v15 = vsel %vm11422_vm11, %v1322_v42, %v1329_v46  ;;  %v1590_v5 = vsel %vm11266_vm5, %v1331_v47, %v1589_v36  ;;  %1580 = vst [vmem:[#allocation2 + $0x3c] sm:$0xf] %v1579_v3  ;;  %v1309_v53 = vrot.slane %v1307_v48, 7  ;;  %v1080_v56 = vadd.f32 %v11387_v43, %v1041_v39  ;;  %v11520_v3 = vpop.f32.mrf.mxu1 }
 0x161   : > { %1588 = vst.msk [vmem:[#allocation2 + $0x4c] sm:$0xf] %vm423_vm6, %v1330_v15  ;;  %1591 = vst [vmem:[#allocation2 + $0x50] sm:$0x1] %v1590_v5  ;;  %v1305_v57 = vrot.slane %v1301_v30, 4  ;;  %v1114_v61 = vmax.f32 %v1082_v52, 0.0  ;;  %v1085_v62 = vadd.f32 %v11387_v43, %v11439_v18  ;;  %v1044_v63 = vmul.f32 %v9834_v50, %v11382_v41 }
 0x162   : > { %v1312_v0 = vor.u32 %v1310_v60, %v1309_v53  ;;  %v1314_v1 = vrot.slane %v1309_v53, 4  ;;  %v1372_v2 = vor.u32 %v1370_v4, %v11489_v54  ;;  %v1051_v6 = vmul.f32 %v9841_v51, %v11382_v41  ;;  %v1592_v15 = vld [vmem:[#allocation2 + $0x54] sm:$0xf] }
 0x163   : > { %v9386_v8 = vpack.c.bf16 %v1114_v61, %v1114_v61  ;;  %v1392_v9 = vshrl.u32 %v9391_v55, 16  ;;  %v1395_v10 = vshll.u32 %v9391_v55, 16  ;;  %v1112_v11 = vmax.f32 %v1080_v56, 0.0  ;;  %v1610_v5 = vld [vmem:[#allocation2 + $0x74] sm:$0x1] }
 0x164   : > { %v1313_v14 = vsel %vm11422_vm11, %v1305_v57, %v1312_v0  ;;  %v1583_v18 = vsel %vm11266_vm5, %v1314_v1, %v1582_v58  ;;  %v1607_v16 = vsel %vm11294_vm8, %v1372_v2, %v1606_v59  ;;  %v1117_v17 = vmax.f32 %v1085_v62, 0.0  ;;  %v11528_v62 = vld [vmem:[#allocation2 + $0x10] sm:$0xf] }
 0x165   : > { %1581 = vst.msk [vmem:[#allocation2 + $0x40] sm:$0xf] %vm423_vm6, %v1313_v14  ;;  %1584 = vst [vmem:[#allocation2 + $0x44] sm:$0x1] %v1583_v18  ;;  %v1350_v19 = vshrl.u32 %v9386_v8, 16  ;;  %v1353_v22 = vshll.u32 %v9386_v8, 16  ;;  %v9384_v24 = vpack.c.bf16 %v1112_v11, %v1112_v11  ;;  %v1083_v29 = vadd.f32 %v11387_v43, %v1044_v63 }
 0x166   : > { %1608 = vst [vmem:[#allocation2 + $0x6c] sm:$0xf] %v1607_v16  ;;  %v1394_v23 = vrot.slane %v1392_v9, 7  ;;  %v9389_v28 = vpack.c.bf16 %v1117_v17, %v1117_v17  ;;  %v1090_v30 = vadd.f32 %v11387_v43, %v1051_v6  ;;  %v1042_v31 = vmul.f32 %v11382_v41, %v946_v12  ;;  %v11537_v6 = vpop.f32.mrf.mxu1  ;;  %v11540_v11 = vld [vmem:[#allocation2 + $0xc] sm:$0xf] }
 0x167   : > { %v11507_v33 = vrot.slane %v1350_v19, 7  ;;  %v1333_v36 = vshrl.u32 %v9384_v24, 16  ;;  %v1373_v37 = vrot.slane %v11489_v54, 4  ;;  %v1115_v44 = vmax.f32 %v1083_v29, 0.0  ;;  %v1603_v14 = vld [vmem:[#allocation2 + $0x68] sm:$0x1] }
 0x168   : > { %v1397_v34 = vor.u32 %v1395_v10, %v1394_v23  ;;  %v1399_v35 = vrot.slane %v1394_v23, 4  ;;  %v1375_v39 = vshrl.u32 %v9389_v28, 16  ;;  %v1378_v42 = vshll.u32 %v9389_v28, 16  ;;  %v10706_v19 = vld [vmem:[#allocation10 + $0x30] sm:$0xff]   ;;  %v1627_v28 = vld [vmem:[#allocation2 + $0x90] sm:$0xf] }
 0x169   : > { %v1355_v46 = vor.u32 %v1353_v22, %v11507_v33  ;;  %v1336_v60 = vshll.u32 %v9384_v24, 16  ;;  %v11518_v49 = vrot.slane %v1333_v36, 7  ;;  %v9387_v50 = vpack.c.bf16 %v1115_v44, %v1115_v44 }
 0x16a   : > { %v1398_v47 = vsel %vm11422_vm11, %v1390_v21, %v1397_v34  ;;  %v1618_v48 = vsel %vm11266_vm5, %v1399_v35, %v1617_v25  ;;  %v1377_v4 = vrot.slane %v1375_v39, 7  ;;  %v1122_v51 = vmax.f32 %v1090_v30, 0.0 }
 0x16b   : > { %1616 = vst.msk [vmem:[#allocation2 + $0x7c] sm:$0xf] %vm423_vm6, %v1398_v47  ;;  %1619 = vst [vmem:[#allocation2 + $0x80] sm:$0x1] %v1618_v48  ;;  %v1600_v27 = vsel %vm11294_vm8, %v1355_v46, %v1599_v38  ;;  %v1081_v21 = vadd.f32 %v11387_v43, %v1042_v31  ;;  %v1049_v52 = vmul.f32 %v11382_v41, %v975_v7  ;;  %v1358_v57 = vshrl.u32 %v9387_v50, 16  ;;  %v991_v31 = vpop.f32.mrf.mxu1 }
 0x16c   : > { %1601 = vst [vmem:[#allocation2 + $0x60] sm:$0xf] %v1600_v27  ;;  %v1338_v53 = vor.u32 %v1336_v60, %v11518_v49  ;;  %v1380_v54 = vor.u32 %v1378_v42, %v1377_v4  ;;  %v1382_v55 = vrot.slane %v1377_v4, 4  ;;  %v1052_v56 = vmul.f32 %v9842_v32, %v11382_v41  ;;  %v10707_v42 = vld [vmem:[#allocation10 + $0x28] sm:$0xff]   ;;  %v1620_v27 = vld [vmem:[#allocation2 + $0x84] sm:$0xf] }
 0x16d   : > { %v1361_v58 = vshll.u32 %v9387_v50, 16  ;;  %v9394_v59 = vpack.c.bf16 %v1122_v51, %v1122_v51  ;;  %v1113_v61 = vmax.f32 %v1081_v21, 0.0  ;;  %v1088_v2 = vadd.f32 %v11387_v43, %v1049_v52  ;;  %v1596_v47 = vld [vmem:[#allocation2 + $0x5c] sm:$0x1]  ;;  %v9846_v51 = vpop.f32.mrf.mxu1  ;;  %v11569_v52 = vld [vmem:[#allocation2 + $0x18] sm:$0xf] }
 0x16e   : > { %v1593_v63 = vsel %vm11294_vm8, %v1338_v53, %v1592_v15  ;;  %v1381_v0 = vsel %vm11422_vm11, %v1373_v37, %v1380_v54  ;;  %v1611_v1 = vsel %vm11266_vm5, %v1382_v55, %v1610_v5  ;;  %v1360_v7 = vrot.slane %v1358_v57, 7  ;;  %v11562_v50 = vld [vmem:[#allocation2 + $0x1c] sm:$0xf] }
 0x16f   : > { %1594 = vst [vmem:[#allocation2 + $0x54] sm:$0xf] %v1593_v63  ;;  %1609 = vst.msk [vmem:[#allocation2 + $0x70] sm:$0xf] %vm423_vm6, %v1381_v0  ;;  %v1418_v8 = vshrl.u32 %v9394_v59, 16  ;;  %v1421_v9 = vshll.u32 %v9394_v59, 16  ;;  %v9385_v10 = vpack.c.bf16 %v1113_v61, %v1113_v61  ;;  %v1091_v16 = vadd.f32 %v11387_v43, %v1052_v56  ;;  %v994_v63 = vpop.f32.mrf.mxu1 }
 0x170   : > { %1612 = vst [vmem:[#allocation2 + $0x74] sm:$0x1] %v1611_v1  ;;  %v1356_v12 = vrot.slane %v11507_v33, 4  ;;  %v1120_v18 = vmax.f32 %v1088_v2, 0.0  ;;  %v8826_v17 = vcombine.low %v11540_v11, %v11528_v62  ;;  %v1363_v22 = vor.u32 %v1361_v58, %v1360_v7  ;;  %v10692_v56 = vld [vmem:[#allocation10 + $0xd0] sm:$0xff]   ;;  %v10709_v0 = vld [vmem:[#allocation10 + $0x20] sm:$0xff]  }
 0x171   : > { %v1365_v23 = vrot.slane %v1360_v7, 4  ;;  %v11546_v24 = vrot.slane %v1418_v8, 7  ;;  %v1341_v25 = vshrl.u32 %v9385_v10, 16  ;;  %v1123_v30 = vmax.f32 %v1091_v16, 0.0  ;;  %v1631_v58 = vld [vmem:[#allocation2 + $0x98] sm:$0x1] }
 0x172   : > { %v9392_v29 = vpack.c.bf16 %v1120_v18, %v1120_v18  ;;  %9859 = vmatprep.mubr.msk.bf16.mxu1 %vm1839_vm9, %v8826_v17  ;;  %9900 = vmatmul.mubr.msk.bf16.vlgmr.msra.gmra.mxu0 %vm1839_vm9, %v8826_v17  ;;  %v1364_v32 = vsel %vm11422_vm11, %v1356_v12, %v1363_v22  ;;  %v1344_v35 = vshll.u32 %v9385_v10, 16  ;;  %v1339_v44 = vrot.slane %v11518_v49, 4  ;;  %v11581_v61 = vld [vmem:[#allocation2 + $0x28] sm:$0xf]  ;;  %v11593_v10 = vld [vmem:[#allocation2 + $0x24] sm:$0xf] }
 0x173   : > { %v1604_v33 = vsel %vm11266_vm5, %v1365_v23, %v1603_v14  ;;  %v1423_v34 = vor.u32 %v1421_v9, %v11546_v24  ;;  %9972 = vmatpush3.bf16.msra.mxu0 %v11376_v40  ;;  %1602 = vst.msk [vmem:[#allocation2 + $0x64] sm:$0xf] %vm423_vm6, %v1364_v32  ;;  %v1343_v36 = vrot.slane %v1341_v25, 7  ;;  %v9395_v39 = vpack.c.bf16 %v1123_v30, %v1123_v30  ;;  %v11595_v12 = vld [vmem:[#allocation2 + $0x34] sm:$0xf]  ;;  %v11619_v32 = vld [vmem:[#allocation10 + $0xf8] sm:$0xff]  }
 0x174   : > { %1605 = vst [vmem:[#allocation2 + $0x68] sm:$0x1] %v1604_v33  ;;  %v1401_v37 = vshrl.u32 %v9392_v29, 16  ;;  %v1404_v38 = vshll.u32 %v9392_v29, 16  ;;  %9973 = vmatprep.subr.bf16.mxu0 %v10706_v19  ;;  %v1424_v53 = vrot.slane %v11546_v24, 4  ;;  %v11575_v55 = vcombine.low %v11569_v52, %v11562_v50  ;;  %v9849_v24 = vpop.f32.mrf.mxu1 }
 0x175   : > { %v1628_v46 = vsel %vm11294_vm8, %v1423_v34, %v1627_v28  ;;  %v1346_v48 = vor.u32 %v1344_v35, %v1343_v36  ;;  %v1348_v60 = vrot.slane %v1343_v36, 4  ;;  %v1426_v40 = vshrl.u32 %v9395_v39, 16  ;;  %v11609_v23 = vld [vmem:[#allocation2 + $0x30] sm:$0xf] }
 0x176   : > { %1629 = vst [vmem:[#allocation2 + $0x90] sm:$0xf] %v1628_v46  ;;  %v11560_v4 = vrot.slane %v1401_v37, 7  ;;  %v1429_v15 = vshll.u32 %v9395_v39, 16  ;;  %v1050_v59 = vmul.f32 %v11382_v41, %v11520_v3  ;;  %9860 = vmatmul.mubr.msk.bf16.vlgmr.msra.gmra.mxu1 %vm1839_vm9, %v11575_v55  ;;  %9903 = vmatprep.mubr.msk.bf16.mxu0 %vm1839_vm9, %v11575_v55  ;;  %v1055_v3 = vmul.f32 %v11537_v6, %v11382_v41  ;;  %v10697_v6 = vld [vmem:[#allocation10 + $0xc8] sm:$0xff]   ;;  %v10702_v34 = vld [vmem:[#allocation10 + $0xc0] sm:$0xff]   ;;  %v1007_v39 = vpop.f32.mrf.mxu1 }
 0x177   : > { %9974 = vmatpush3.bf16.msra.mxu0 %v10706_v19  ;;  %v1347_v5 = vsel %vm11422_vm11, %v1339_v44, %v1346_v48  ;;  %v1597_v49 = vsel %vm11266_vm5, %v1348_v60, %v1596_v47  ;;  %v1428_v54 = vrot.slane %v1426_v40, 7  ;;  %9932 = vmatpush3.bf16.msra.mxu1 %v11355_v20  ;;  %v1053_v8 = vmul.f32 %v11382_v41, %v991_v31 }
 0x178   : > { %v1406_v21 = vor.u32 %v1404_v38, %v11560_v4  ;;  %9975 = vmatprep.subr.bf16.mxu0 %v10707_v42  ;;  %1595 = vst.msk [vmem:[#allocation2 + $0x58] sm:$0xf] %vm423_vm6, %v1347_v5  ;;  %1598 = vst [vmem:[#allocation2 + $0x5c] sm:$0x1] %v1597_v49  ;;  %v1089_v7 = vadd.f32 %v11387_v43, %v1050_v59  ;;  %v1056_v9 = vmul.f32 %v9846_v51, %v11382_v41  ;;  %v1624_v51 = vld [vmem:[#allocation2 + $0x8c] sm:$0x1] }
 0x179   : > { %v1431_v1 = vor.u32 %v1429_v15, %v1428_v54  ;;  %v1433_v2 = vrot.slane %v1428_v54, 4  ;;  %v11603_v20 = vcombine.low %v11593_v10, %v11581_v61  ;;  %9933 = vmatprep.subr.bf16.mxu1 %v10692_v56  ;;  %v1094_v17 = vadd.f32 %v11387_v43, %v1055_v3 }
 0x17a   : > { %v1621_v57 = vsel %vm11294_vm8, %v1406_v21, %v1620_v27  ;;  %v1121_v16 = vmax.f32 %v1089_v7, 0.0  ;;  %v1092_v19 = vadd.f32 %v11387_v43, %v1053_v8  ;;  %v1095_v22 = vadd.f32 %v11387_v43, %v1056_v9  ;;  %v11631_v21 = vld [vmem:[#allocation10 + $0x98] sm:$0xff]   ;;  %v1634_v9 = vld [vmem:[#allocation2 + $0x9c] sm:$0xf] }
 0x17b   : > { %1622 = vst [vmem:[#allocation2 + $0x84] sm:$0xf] %v1621_v57  ;;  %v1432_v14 = vsel %vm11422_vm11, %v1424_v53, %v1431_v1  ;;  %v1632_v18 = vsel %vm11266_vm5, %v1433_v2, %v1631_v58  ;;  %9976 = vmatpush3.bf16.msra.mxu0 %v10707_v42  ;;  %9863 = vmatprep.mubr.msk.bf16.mxu1 %vm1839_vm9, %v11603_v20  ;;  %v1126_v29 = vmax.f32 %v1094_v17, 0.0  ;;  %v1407_v33 = vrot.slane %v11560_v4, 4  ;;  %v1641_v58 = vld [vmem:[#allocation2 + $0xa8] sm:$0xf] }
 0x17c   : > { %1630 = vst.msk [vmem:[#allocation2 + $0x94] sm:$0xf] %vm423_vm6, %v1432_v14  ;;  %1633 = vst [vmem:[#allocation2 + $0x98] sm:$0x1] %v1632_v18  ;;  %9977 = vmatprep.subr.bf16.mxu0 %v10709_v0  ;;  %9904 = vmatmul.mubr.msk.bf16.gmra.mxu0 %vm1839_vm9, %v11603_v20  ;;  %v11617_v25 = vcombine.low %v11609_v23, %v11595_v12  ;;  %v9393_v28 = vpack.c.bf16 %v1121_v16, %v1121_v16  ;;  %v1124_v30 = vmax.f32 %v1092_v19, 0.0 }
 0x17d   : > { %v1127_v31 = vmax.f32 %v1095_v22, 0.0  ;;  %9934 = vmatpush3.bf16.msra.mxu1 %v10692_v56  ;;  %v9398_v37 = vpack.c.bf16 %v1126_v29, %v1126_v29  ;;  %v1054_v44 = vmul.f32 %v11382_v41, %v994_v63  ;;  %v1059_v46 = vmul.f32 %v9849_v24, %v11382_v41  ;;  %v1645_v14 = vld [vmem:[#allocation2 + $0xb0] sm:$0x1]  ;;  %v11646_v29 = vld [vmem:[#allocation2 + $0x40] sm:$0xf] }
 0x17e   : > { %9907 = vmatprep.mubr.msk.bf16.mxu0 %vm1839_vm9, %v11617_v25  ;;  %9935 = vmatprep.subr.bf16.mxu1 %v10697_v6  ;;  %v1409_v35 = vshrl.u32 %v9393_v28, 16  ;;  %v1412_v36 = vshll.u32 %v9393_v28, 16  ;;  %v9396_v38 = vpack.c.bf16 %v1124_v30, %v1124_v30  ;;  %v1057_v47 = vmul.f32 %v11382_v41, %v1007_v39  ;;  %v9850_v28 = vpop.f32.mrf.mxu1  ;;  %v11656_v39 = vld [vmem:[#allocation2 + $0x3c] sm:$0xf] }
 0x17f   : > { %9978 = vmatpush3.bf16.msra.mxu0 %v10709_v0  ;;  %v9399_v42 = vpack.c.bf16 %v1127_v31, %v1127_v31  ;;  %9864 = vmatmul.mubr.msk.bf16.gmra.mxu1 %vm1839_vm9, %v11617_v25  ;;  %v1452_v60 = vshrl.u32 %v9398_v37, 16  ;;  %v1455_v4 = vshll.u32 %v9398_v37, 16  ;;  %v1093_v49 = vadd.f32 %v11387_v43, %v1054_v44 }
 0x180   : > { %v1411_v48 = vrot.slane %v1409_v35, 7  ;;  %v1435_v40 = vshrl.u32 %v9396_v38, 16  ;;  %10051 = vmatprep.subr.bf16.mxu0 %v11619_v32  ;;  %v1438_v27 = vshll.u32 %v9396_v38, 16  ;;  %v1098_v0 = vadd.f32 %v11387_v43, %v1059_v46 }
 0x181   : > { %9936 = vmatpush3.bf16.msra.mxu1 %v10697_v6  ;;  %v1460_v15 = vshrl.u32 %v9399_v42, 16  ;;  %v1463_v5 = vshll.u32 %v9399_v42, 16  ;;  %v1454_v56 = vrot.slane %v1452_v60, 7  ;;  %v1125_v63 = vmax.f32 %v1093_v49, 0.0  ;;  %v11658_v42 = vld [vmem:[#allocation2 + $0x4c] sm:$0xf] }
 0x182   : > { %9937 = vmatprep.subr.bf16.mxu1 %v10702_v34  ;;  %v1414_v53 = vor.u32 %v1412_v36, %v1411_v48  ;;  %v1416_v54 = vrot.slane %v1411_v48, 4  ;;  %v11633_v57 = vrot.slane %v1435_v40, 7  ;;  %v1096_v1 = vadd.f32 %v11387_v43, %v1057_v47 }
 0x183   : > { %v1462_v59 = vrot.slane %v1460_v15, 7  ;;  %v1457_v3 = vor.u32 %v1455_v4, %v1454_v56  ;;  %v1458_v8 = vrot.slane %v1454_v56, 4  ;;  %v9397_v19 = vpack.c.bf16 %v1125_v63, %v1125_v63  ;;  %v1010_v63 = vpop.f32.mrf.mxu1 }
 0x184   : > { %v1415_v2 = vsel %vm11422_vm11, %v1407_v33, %v1414_v53  ;;  %v1625_v7 = vsel %vm11266_vm5, %v1416_v54, %v1624_v51  ;;  %v1440_v18 = vor.u32 %v1438_v27, %v11633_v57  ;;  %v1130_v22 = vmax.f32 %v1098_v0, 0.0  ;;  %v11666_v51 = vld [vmem:[#allocation2 + $0x48] sm:$0xf]  ;;  %v1638_v27 = vld [vmem:[#allocation2 + $0xa4] sm:$0x1] }
 0x185   : > { %9938 = vmatpush3.bf16.msra.mxu1 %v10702_v34  ;;  %1623 = vst.msk [vmem:[#allocation2 + $0x88] sm:$0xf] %vm423_vm6, %v1415_v2  ;;  %1626 = vst [vmem:[#allocation2 + $0x8c] sm:$0x1] %v1625_v7  ;;  %v1465_v6 = vor.u32 %v1463_v5, %v1462_v59  ;;  %v1467_v16 = vrot.slane %v1462_v59, 4  ;;  %v1642_v17 = vsel %vm11294_vm8, %v1457_v3, %v1641_v58  ;;  %v1128_v24 = vmax.f32 %v1096_v1, 0.0 }
 0x186   : > { %10011 = vmatprep.subr.bf16.mxu1 %v11631_v21  ;;  %1643 = vst [vmem:[#allocation2 + $0xa8] sm:$0xf] %v1642_v17  ;;  %v1635_v30 = vsel %vm11294_vm8, %v1440_v18, %v1634_v9  ;;  %v1060_v34 = vmul.f32 %v9850_v28, %v11382_v41  ;;  %v1443_v35 = vshrl.u32 %v9397_v19, 16  ;;  %v1446_v36 = vshll.u32 %v9397_v19, 16  ;;  %v1655_v58 = vld [vmem:[#allocation2 + $0xc0] sm:$0xf] }
 0x187   : > { %v1466_v31 = vsel %vm11422_vm11, %v1458_v8, %v1465_v6  ;;  %v1646_v33 = vsel %vm11266_vm5, %v1467_v16, %v1645_v14  ;;  %1636 = vst [vmem:[#allocation2 + $0x9c] sm:$0xf] %v1635_v30  ;;  %v9402_v37 = vpack.c.bf16 %v1130_v22, %v1130_v22  ;;  %v9400_v38 = vpack.c.bf16 %v1128_v24, %v1128_v24  ;;  %v1648_v7 = vld [vmem:[#allocation2 + $0xb4] sm:$0xf]  ;;  %v11686_v3 = vld [vmem:[#allocation2 + $0x58] sm:$0xf] }
 0x188   : > { %1644 = vst.msk [vmem:[#allocation2 + $0xac] sm:$0xf] %vm423_vm6, %v1466_v31  ;;  %1647 = vst [vmem:[#allocation2 + $0xb0] sm:$0x1] %v1646_v33  ;;  %v1441_v44 = vrot.slane %v11633_v57, 4  ;;  %v1099_v46 = vadd.f32 %v11387_v43, %v1060_v34  ;;  %v11664_v47 = vcombine.low %v11656_v39, %v11646_v29  ;;  %v1445_v48 = vrot.slane %v1443_v35, 7 }
 0x189   : > { %v1486_v60 = vshrl.u32 %v9402_v37, 16  ;;  %v1489_v4 = vshll.u32 %v9402_v37, 16  ;;  %v1469_v40 = vshrl.u32 %v9400_v38, 16  ;;  %v1472_v15 = vshll.u32 %v9400_v38, 16  ;;  %v11690_v18 = vld [vmem:[#allocation2 + $0x64] sm:$0xf] }
 0x18a   : > { %v1131_v5 = vmax.f32 %v1099_v46, 0.0  ;;  %9867 = vmatprep.mubr.msk.bf16.mxu1 %vm1839_vm9, %v11664_v47  ;;  %9908 = vmatmul.mubr.msk.bf16.gmra.mxu0 %vm1839_vm9, %v11664_v47  ;;  %v11674_v49 = vcombine.low %v11666_v51, %v11658_v42  ;;  %v1448_v53 = vor.u32 %v1446_v36, %v1445_v48  ;;  %v1450_v54 = vrot.slane %v1445_v48, 4  ;;  %v11695_v17 = vld [vmem:[#allocation2 + $0x54] sm:$0xf]  ;;  %v11703_v30 = vld [vmem:[#allocation2 + $0x60] sm:$0xf] }
 0x18b   : > { %v1488_v56 = vrot.slane %v1486_v60, 7  ;;  %v11676_v57 = vrot.slane %v1469_v40, 7  ;;  %v1058_v16 = vmul.f32 %v11382_v41, %v1010_v63  ;;  %v11701_v28 = vcombine.low %v11695_v17, %v11686_v3  ;;  %v10785_v31 = vld [vmem:[#allocation2] sm:$0xf]  ;;  %v1659_v35 = vld [vmem:[#allocation2 + $0xc8] sm:$0x1] }
 0x18c   : > { %v9403_v59 = vpack.c.bf16 %v1131_v5, %v1131_v5  ;;  %9868 = vmatmul.mubr.msk.bf16.gmra.mxu1 %vm1839_vm9, %v11674_v49  ;;  %9911 = vmatprep.mubr.msk.bf16.mxu0 %vm1839_vm9, %v11674_v49  ;;  %v1449_v0 = vsel %vm11422_vm11, %v1441_v44, %v1448_v53  ;;  %v1639_v1 = vsel %vm11266_vm5, %v1450_v54, %v1638_v27  ;;  %v2489_v33 = vshrl.u32 %v10785_v31, 16  ;;  %v11716_v48 = vld [vmem:[#allocation2 + $0x6c] sm:$0xf]  ;;  %v11722_v40 = vld [vmem:[#allocation2 + $0x70] sm:$0xf] }
 0x18d   : > { %v1491_v2 = vor.u32 %v1489_v4, %v1488_v56  ;;  %1637 = vst.msk [vmem:[#allocation2 + $0xa0] sm:$0xf] %vm423_vm6, %v1449_v0  ;;  %1640 = vst [vmem:[#allocation2 + $0xa4] sm:$0x1] %v1639_v1  ;;  %v1474_v8 = vor.u32 %v1472_v15, %v11676_v57  ;;  %v1492_v19 = vrot.slane %v1488_v56, 4  ;;  %v2492_v34 = vshll.u32 %v10785_v31, 16  ;;  %9871 = vmatprep.mubr.msk.bf16.mxu1 %vm1839_vm9, %v11701_v28 }
 0x18e   : > { %v1494_v9 = vshrl.u32 %v9403_v59, 16  ;;  %v1497_v14 = vshll.u32 %v9403_v59, 16  ;;  %v1097_v41 = vadd.f32 %v11387_v43, %v1058_v16  ;;  %v11708_v36 = vcombine.low %v11703_v30, %v11690_v18  ;;  %v1666_v1 = vld [vmem:[#allocation2 + $0x8] sm:$0xf]  ;;  %v1652_v16 = vld [vmem:[#allocation2 + $0xbc] sm:$0x1] }
 0x18f   : > { %v1656_v6 = vsel %vm11294_vm8, %v1491_v2, %v1655_v58  ;;  %v1649_v22 = vsel %vm11294_vm8, %v1474_v8, %v1648_v7  ;;  %v2513_v37 = vshrl.u32 %v11540_v11, 16  ;;  %v2516_v38 = vshll.u32 %v11540_v11, 16  ;;  %v11739_v2 = vld [vmem:[#allocation2 + $0x78] sm:$0xf]  ;;  %v11741_v7 = vld [vmem:[#allocation2 + $0x7c] sm:$0xf] }
 0x190   : > { %1657 = vst [vmem:[#allocation2 + $0xc0] sm:$0xf] %v1656_v6  ;;  %v1496_v24 = vrot.slane %v1494_v9, 7  ;;  %1650 = vst [vmem:[#allocation2 + $0xb4] sm:$0xf] %v1649_v22  ;;  %v2522_v43 = vshll.u32 %v11528_v62, 16  ;;  %v11732_v15 = vcombine.low %v11716_v48, %v11722_v40 }
 0x191   : > { %v2526_v60 = vshrl.u32 %v11528_v62, 16  ;;  %v1129_v4 = vmax.f32 %v1097_v41, 0.0  ;;  %v2515_v5 = vrot.slane %v2513_v37, 4  ;;  %v2518_v53 = vrot.slane %v2516_v38, 5  ;;  %v10786_v8 = vld [vmem:[#allocation2 + $0x4] sm:$0xf] }
 0x192   : > { %v1499_v44 = vor.u32 %v1497_v14, %v1496_v24  ;;  %v1501_v46 = vrot.slane %v1496_v24, 4  ;;  %9912 = vmatmul.mubr.msk.bf16.gmra.mxu0 %vm1839_vm9, %v11701_v28  ;;  %15213 = vst [vmem:[#allocation22_spill] sm:$0xff] %v11732_v15  ;;  %v2491_v54 = vrot.slane %v2489_v33, 4  ;;  %v2494_v56 = vrot.slane %v2492_v34, 5  ;;  %v11750_v24 = vld [vmem:[#allocation2 + $0x84] sm:$0xf] }
 0x193   : > { %9915 = vmatprep.mubr.msk.bf16.mxu0 %vm1839_vm9, %v11708_v36  ;;  %v9401_v62 = vpack.c.bf16 %v1129_v4, %v1129_v4  ;;  %v11737_v58 = vrot.slane %v2522_v43, 5  ;;  %v2528_v59 = vrot.slane %v2526_v60, 4  ;;  %v2502_v9 = vshrl.u32 %v10786_v8, 16  ;;  %v11752_v31 = vld [vmem:[#allocation2 + $0x88] sm:$0xf] }
 0x194   : > { %v1500_v11 = vsel %vm11422_vm11, %v1492_v19, %v1499_v44  ;;  %v1660_v27 = vsel %vm11266_vm5, %v1501_v46, %v1659_v35  ;;  %9872 = vmatmul.mubr.msk.bf16.gmra.mxu1 %vm1839_vm9, %v11708_v36  ;;  %v1475_v14 = vrot.slane %v11676_v57, 4  ;;  %v11746_v19 = vcombine.low %v11739_v2, %v11741_v7 }
 0x195   : > { %1658 = vst.msk [vmem:[#allocation2 + $0xc4] sm:$0xf] %vm423_vm6, %v1500_v11  ;;  %1661 = vst [vmem:[#allocation2 + $0xc8] sm:$0x1] %v1660_v27  ;;  %9875 = vmatprep.mubr.msk.bf16.mxu1 %vm1839_vm9, %v11732_v15  ;;  %v1477_v63 = vshrl.u32 %v9401_v62, 16  ;;  %v1480_v0 = vshll.u32 %v9401_v62, 16  ;;  %v2519_v22 = vor.u32 %v2518_v53, %v2515_v5  ;;  %v2495_v33 = vor.u32 %v2494_v56, %v2491_v54 }
 0x196   : > { %15214 = vst [vmem:[#allocation23_spill] sm:$0xff] %v11746_v19  ;;  %v2498_v34 = vshll.u32 %v10786_v8, 16  ;;  %v2508_v35 = vshll.u32 %v1666_v1, 16  ;;  %v2529_v41 = vor.u32 %v2528_v59, %v11737_v58  ;;  %v11759_v38 = vcombine.low %v11750_v24, %v11752_v31  ;;  %v11842_v59 = vld [vmem:[#allocation2 + $0xac] sm:$0xf] }
 0x197   : > { %v1479_v6 = vrot.slane %v1477_v63, 7  ;;  %v3741_v43 = vrot.slane %v11562_v50, 5  ;;  %v2504_v4 = vrot.slane %v2502_v9, 4  ;;  %v11775_v27 = vrot.slane %v2519_v22, 4  ;;  %v11789_v63 = vld [vmem:[#allocation2 + $0x90] sm:$0xf] }
 0x198   : > { %15215 = vst [vmem:[#allocation24_spill] sm:$0xff] %v11759_v38  ;;  %v11771_v60 = vrot.slane %v2498_v34, 5  ;;  %v11773_v11 = vrot.slane %v2508_v35, 5  ;;  %v11777_v62 = vrot.slane %v2529_v41, 4  ;;  %v8984_v5 = vrot.slane %v11569_v52, 9 }
 0x199   : > { %v1482_v57 = vor.u32 %v1480_v0, %v1479_v6  ;;  %v1484_v37 = vrot.slane %v1479_v6, 4  ;;  %v11780_v53 = vrot.slane %v2495_v33, 4  ;;  %v15216_v54 = vmov 0  ;;  %v11791_v0 = vld [vmem:[#allocation2 + $0x94] sm:$0xf] }
 0x19a   : > { %9916 = vmatmul.mubr.msk.bf16.gmra.mxu0 %vm1839_vm9, %v11732_v15  ;;  %v15217_v54 = vsel %vm11783_vm14, 4294967295, %v15216_v54  ;;  %v11804_v22 = vld [vmem:[#allocation2 + $0x9c] sm:$0xf]  ;;  %v11806_v33 = vld [vmem:[#allocation2 + $0xa0] sm:$0xf]  ;;  %v3742_v34 = vsel %vm11783_vm14, %v8984_v5, %v3741_v43  ;;  %v2546_v5 = vshll.u32 %v11562_v50, 16 }
 0x19b   : > { %9919 = vmatprep.mubr.msk.bf16.mxu0 %vm1839_vm9, %v11746_v19  ;;  %v1483_v44 = vsel %vm11422_vm11, %v1475_v14, %v1482_v57  ;;  %v1653_v46 = vsel %vm11266_vm5, %v1484_v37, %v1652_v16  ;;  %15218 = vst [vmem:[#allocation25_spill] sm:$0xff] %v15217_v54  ;;  %v11798_v14 = vcombine.low %v11789_v63, %v11791_v0  ;;  %v2550_v16 = vshrl.u32 %v11562_v50, 16  ;;  %v11838_v35 = vld [vmem:[#allocation2 + $0xa8] sm:$0xf] }
 0x19c   : > { %9876 = vmatmul.mubr.msk.bf16.gmra.mxu1 %vm1839_vm9, %v11746_v19  ;;  %1651 = vst.msk [vmem:[#allocation2 + $0xb8] sm:$0xf] %vm423_vm6, %v1483_v44  ;;  %1654 = vst [vmem:[#allocation2 + $0xbc] sm:$0x1] %v1653_v46  ;;  %v11817_v37 = vcombine.low %v11804_v22, %v11806_v33  ;;  %v11819_v44 = vld [vmem:[#allocation2 + $0x20] sm:$0xf]  ;;  %v2505_v46 = vor.u32 %v2504_v4, %v11771_v60  ;;  %v11852_v57 = vcombine.low %v11838_v35, %v11842_v59 }
 0x19d   : > { %9879 = vmatprep.mubr.msk.bf16.mxu1 %vm1839_vm9, %v11759_v38  ;;  %15219 = vst [vmem:[#allocation26_spill] sm:$0xff] %v11798_v14  ;;  %v3743_v41 = vrot.slane %v3741_v43, 4  ;;  %v3744_v50 = vrot.slane %v11819_v44, 5  ;;  %v2537_v6 = vshrl.u32 %v11569_v52, 16  ;;  %v2540_v9 = vshll.u32 %v11569_v52, 16 }
 0x19e   : > { %15220 = vst [vmem:[#allocation27_spill] sm:$0xff] %v11817_v37  ;;  %v2506_v56 = vrot.slane %v2505_v46, 4  ;;  %v11844_v8 = vrot.slane %v2546_v5, 5  ;;  %v2552_v4 = vrot.slane %v2550_v16, 4  ;;  %15221 = vst [vmem:[#allocation28_spill] sm:$0xff] %v11852_v57  ;;  %v2501_v5 = vsel %vm11873_vm1, %v11780_v53, %v11771_v60 }
 0x19f   : > { %v3745_v1 = vsel %vm11783_vm14, %v3743_v41, %v3744_v50  ;;  %v11860_v16 = vld [vmem:[#allocation2 + $0xb4] sm:$0xf]  ;;  %v2539_v46 = vrot.slane %v2537_v6, 4  ;;  %v2542_v52 = vrot.slane %v2540_v9, 5  ;;  %v2570_v43 = vshll.u32 %v11581_v61, 16 }
 0x1a0   : > { %v11854_v26 = vcombine.low %v3742_v34, %v3745_v1  ;;  %v15223_v34 = vmov 0  ;;  %v11877_v50 = vld [vmem:[#allocation2 + $0x14] sm:$0xf]  ;;  %v2511_v45 = vsel %vm11873_vm1, %v2506_v56, %v11773_v11  ;;  %v2553_v13 = vor.u32 %v2552_v4, %v11844_v8  ;;  %v11901_v4 = vld [vmem:[#allocation2 + $0xc0] sm:$0xf] }
 0x1a1   : > { %v15224_v34 = vsel %vm11873_vm1, 4294967295, %v15223_v34  ;;  %15226 = vst [vmem:[#allocation31_spill] sm:$0xff] %v11877_v50  ;;  %v2532_v53 = vshll.u32 %v11877_v50, 16  ;;  %v2594_v11 = vshll.u32 %v11595_v12, 16  ;;  %v11903_v9 = vld [vmem:[#allocation2 + $0xc4] sm:$0xf]  ;;  %v8904_v6 = vcombine.low %v2501_v5, %v2511_v45 }
 0x1a2   : > { %9920 = vmatmul.mubr.msk.bf16.gmra.mxu0 %vm1839_vm9, %v11759_v38  ;;  %15222 = vst [vmem:[#allocation29_spill] sm:$0xff] %v11854_v26  ;;  %15225 = vst [vmem:[#allocation30_spill] sm:$0xff] %v15224_v34  ;;  %v2543_v26 = vor.u32 %v2542_v52, %v2539_v46  ;;  %v2556_v54 = vshll.u32 %v11819_v44, 16  ;;  %v15228_v60 = vshrl.u32 %v11593_v10, 16  ;;  %v11914_v56 = vrot.slane %v2570_v43, 5 }
 0x1a3   : > { %9923 = vmatprep.mubr.msk.bf16.mxu0 %vm1839_vm9, %v11798_v14  ;;  %v11862_v41 = vld [vmem:[#allocation2 + $0xb8] sm:$0xf]  ;;  %v15230_v19 = vshrl.u32 %v11581_v61, 16  ;;  %v15231_v45 = vshrl.u32 %v11609_v23, 16  ;;  %v15232_v44 = vshll.u32 %v11609_v23, 16  ;;  %v11924_v5 = vrot.slane %v2594_v11, 5 }
 0x1a4   : > { %9880 = vmatmul.mubr.msk.bf16.gmra.mxu1 %vm1839_vm9, %v11798_v14  ;;  %v11869_v1 = vcombine.low %v11860_v16, %v11862_v41  ;;  %v2563_v50 = vrot.slane %v15228_v60, 4  ;;  %v15229_v14 = vshll.u32 %v11593_v10, 16  ;;  %v15233_v10 = vshrl.u32 %v11595_v12, 16  ;;  %v11937_v11 = vld [vmem:[#allocation2 + $0x2c] sm:$0xf] }
 0x1a5   : > { %9883 = vmatprep.mubr.msk.bf16.mxu1 %vm1839_vm9, %v11817_v37  ;;  %v2576_v15 = vrot.slane %v15230_v19, 4  ;;  %v2587_v52 = vrot.slane %v15231_v45, 4  ;;  %v2590_v46 = vrot.slane %v15232_v44, 5  ;;  %v2618_v43 = vshll.u32 %v11646_v29, 16  ;;  %15234 = vst [vmem:[#allocation33_spill] sm:$0xff] %v11937_v11 }
 0x1a6   : > { %v2566_v38 = vrot.slane %v15229_v14, 5  ;;  %v2600_v14 = vrot.slane %v15233_v10, 4  ;;  %v2544_v60 = vrot.slane %v2543_v26, 4  ;;  %v2558_v45 = vrot.slane %v2556_v54, 5 }
 0x1a7   : > { %v15235_v44 = vshrl.u32 %v11656_v39, 16  ;;  %v15236_v61 = vshll.u32 %v11656_v39, 16  ;;  %v2525_v26 = vsel %vm11873_vm1, %v11775_v27, %v11737_v58  ;;  %v2577_v54 = vor.u32 %v2576_v15, %v11914_v56 }
 0x1a8   : > { %v2567_v12 = vor.u32 %v2566_v38, %v2563_v50  ;;  %v11952_v38 = vld [vmem:[#allocation2 + $0x38] sm:$0xf]  ;;  %v2591_v50 = vor.u32 %v2590_v46, %v2587_v52  ;;  %v11955_v39 = vrot.slane %v2618_v43, 5  ;;  %v2549_v15 = vsel %vm11873_vm1, %v2544_v60, %v11844_v8 }
 0x1a9   : > { %v2611_v10 = vrot.slane %v15235_v44, 4  ;;  %v2614_v19 = vrot.slane %v15236_v61, 5  ;;  %v2642_v61 = vshll.u32 %v11658_v42, 16  ;;  %v2580_v27 = vshll.u32 %v11937_v11, 16 }
 0x1aa   : > { %9924 = vmatmul.mubr.msk.bf16.gmra.mxu0 %vm1839_vm9, %v11817_v37  ;;  %v11908_v37 = vcombine.low %v11901_v4, %v11903_v9  ;;  %v2568_v52 = vrot.slane %v2567_v12, 4  ;;  %v2604_v46 = vshll.u32 %v11952_v38, 16  ;;  %v2578_v43 = vrot.slane %v2577_v54, 4  ;;  %v10711_v12 = vld [vmem:[#allocation10 + $0x90] sm:$0xff]  }
 0x1ab   : > { %9927 = vmatprep.mubr.msk.bf16.mxu0 %vm1839_vm9, %v11852_v57  ;;  %v15242_v44 = vshll.u32 %v11666_v51, 16 }
 0x1ac   : > { %9884 = vmatmul.mubr.msk.bf16.gmra.mxu1 %vm1839_vm9, %v11852_v57  ;;  %15227 = vst [vmem:[#allocation32_spill] sm:$0xff] %v11908_v37  ;;  %v2554_v57 = vrot.slane %v2553_v13, 4  ;;  %v2534_v13 = vrot.slane %v2532_v53, 5 }
 0x1ad   : > { %9887 = vmatprep.mubr.msk.bf16.mxu1 %vm1839_vm9, %v11869_v1 }
 0x1ae   : > { %v2535_v53 = vsel %vm11873_vm1, %v11777_v62, %v2534_v13  ;;  %v2559_v62 = vsel %vm11873_vm1, %v2554_v57, %v2558_v45  ;;  %v15237_v13 = vshrl.u32 %v11646_v29, 16  ;;  %v10715_v29 = vld [vmem:[#allocation10 + $0xf0] sm:$0xff]   ;;  %v2592_v45 = vrot.slane %v2591_v50, 4  ;;  %v10716_v50 = vld [vmem:[#allocation10 + $0xe8] sm:$0xff]  }
 0x1af   : > { %v11961_v58 = vcombine.low %v2525_v26, %v2535_v53  ;;  %v11967_v57 = vcombine.low %v2549_v15, %v2559_v62  ;;  %v15241_v53 = vshrl.u32 %v11666_v51, 16  ;;  %v11979_v62 = vld [vmem:[#allocation2 + $0x50] sm:$0xf]  ;;  %v2666_v15 = vshll.u32 %v11686_v3, 16 }
 0x1b1   : > { %15238 = vst [vmem:[#allocation34_spill] sm:$0xff] %v11961_v58  ;;  %15239 = vst [vmem:[#allocation35_spill] sm:$0xff] %v11967_v57  ;;  %v2635_v26 = vrot.slane %v15241_v53, 4  ;;  %v12012_v11 = vrot.slane %v2666_v15, 5 }
 0x1b2   : > { %9928 = vmatmul.mubr.msk.bf16.gmra.mxu0 %vm1839_vm9, %v11869_v1 }
 0x1b3   : > { %9979 = vmatprep.mubr.msk.bf16.mxu0 %vm1839_vm9, %v8904_v6  ;;  %v2601_v6 = vor.u32 %v2600_v14, %v11924_v5  ;;  %v2615_v14 = vor.u32 %v2614_v19, %v2611_v10  ;;  %v11981_v19 = vrot.slane %v2642_v61, 5  ;;  %v15243_v10 = vshrl.u32 %v11658_v42, 16 }
 0x1b4   : > { %9888 = vmatmul.mubr.msk.bf16.gmra.mxu1 %vm1839_vm9, %v11908_v37  ;;  %v2638_v37 = vrot.slane %v15242_v44, 5  ;;  %v2582_v44 = vrot.slane %v2580_v27, 5  ;;  %v2606_v61 = vrot.slane %v2604_v46, 5  ;;  %v2652_v46 = vshll.u32 %v11979_v62, 16 }
 0x1b5   : > { %9939 = vmatprep.mubr.msk.bf16.mxu1 %vm1839_vm9, %v11575_v55  ;;  %v2624_v55 = vrot.slane %v15237_v13, 4  ;;  %v11970_v13 = vld [vmem:[#allocation2 + $0x44] sm:$0xf]  ;;  %v2602_v8 = vrot.slane %v2601_v6, 4  ;;  %v2648_v54 = vrot.slane %v15243_v10, 4  ;;  %v2690_v6 = vshll.u32 %v11690_v18, 16 }
 0x1b6   : > { %15240 = vst [vmem:[#allocation36_spill] sm:$0xff] %v11970_v13  ;;  %v11994_v53 = vrot.slane %v2615_v14, 4  ;;  %v2628_v10 = vshll.u32 %v11970_v13, 16  ;;  %v2583_v27 = vsel %vm11873_vm1, %v2578_v43, %v2582_v44  ;;  %v2597_v14 = vsel %vm11873_vm1, %v2592_v45, %v11924_v5  ;;  %v10712_v13 = vld [vmem:[#allocation10 + $0x88] sm:$0xff]  }
 0x1b7   : > { %v2625_v60 = vor.u32 %v2624_v55, %v11955_v39  ;;  %v15245_v43 = vshrl.u32 %v11690_v18, 16  ;;  %v2654_v15 = vrot.slane %v2652_v46, 5  ;;  %v12043_v46 = vld [vmem:[#allocation2 + $0x68] sm:$0xf] }
 0x1b8   : > { %v2621_v45 = vsel %vm11873_vm1, %v11994_v53, %v11955_v39  ;;  %v12035_v53 = vld [vmem:[#allocation2 + $0x5c] sm:$0xf] }
 0x1b9   : > { %v2626_v55 = vrot.slane %v2625_v60, 4  ;;  %v2714_v60 = vshll.u32 %v11722_v40, 16  ;;  %15249 = vst [vmem:[#allocation39_spill] sm:$0xff] %v12035_v53 }
 0x1ba   : > { %9980 = vmatmul.mubr.msk.bf16.vlgmr.msra.gmra.mxu0 %vm1839_vm9, %v11961_v58 }
 0x1bb   : > { %9983 = vmatprep.mubr.msk.bf16.mxu0 %vm1839_vm9, %v11967_v57  ;;  %10052 = vmatpush3.bf16.msra.mxu0 %v11619_v32  ;;  %v2573_v32 = vsel %vm11873_vm1, %v2568_v52, %v11914_v56  ;;  %v15244_v56 = vshrl.u32 %v11686_v3, 16 }
 0x1bc   : > { %9940 = vmatmul.mubr.msk.bf16.vlgmr.msra.gmra.mxu1 %vm1839_vm9, %v11603_v20  ;;  %10053 = vmatprep.subr.bf16.mxu0 %v10715_v29  ;;  %v2639_v20 = vor.u32 %v2638_v37, %v2635_v26  ;;  %v12016_v37 = vrot.slane %v2690_v6, 5  ;;  %v2696_v26 = vrot.slane %v15245_v43, 4  ;;  %v12020_v5 = vcombine.low %v2573_v32, %v2583_v27 }
 0x1bd   : > { %10012 = vmatpush3.bf16.msra.mxu1 %v11631_v21  ;;  %9943 = vmatprep.mubr.msk.bf16.mxu1 %vm1839_vm9, %v11617_v25  ;;  %v2607_v21 = vsel %vm11873_vm1, %v2602_v8, %v2606_v61  ;;  %v2649_v25 = vor.u32 %v2648_v54, %v11981_v19  ;;  %v2672_v52 = vrot.slane %v15244_v56, 4  ;;  %v2630_v8 = vrot.slane %v2628_v10, 5  ;;  %v10718_v54 = vld [vmem:[#allocation10 + $0xe0] sm:$0xff]  }
 0x1be   : > { %10013 = vmatprep.subr.bf16.mxu1 %v10711_v12  ;;  %15246 = vst [vmem:[#allocation37_spill] sm:$0xff] %v12020_v5  ;;  %v12027_v3 = vcombine.low %v2597_v14, %v2607_v21  ;;  %v2640_v44 = vrot.slane %v2639_v20, 4  ;;  %v15248_v6 = vshrl.u32 %v11695_v17, 16  ;;  %v15250_v10 = vshll.u32 %v11695_v17, 16  ;;  %v10713_v20 = vld [vmem:[#allocation10 + $0x80] sm:$0xff]  }
 0x1bf   : > { %10054 = vmatpush3.bf16.msra.mxu0 %v10715_v29  ;;  %v2631_v61 = vsel %vm11873_vm1, %v2626_v55, %v2630_v8  ;;  %v2650_v39 = vrot.slane %v2649_v25, 4  ;;  %v2738_v27 = vshll.u32 %v11741_v7, 16  ;;  %v15251_v14 = vshrl.u32 %v11703_v30, 16 }
 0x1c0   : > { %10055 = vmatprep.subr.bf16.mxu0 %v10716_v50  ;;  %15247 = vst [vmem:[#allocation38_spill] sm:$0xff] %v12027_v3  ;;  %v2659_v29 = vrot.slane %v15248_v6, 4  ;;  %v2662_v32 = vrot.slane %v15250_v10, 5  ;;  %v15252_v21 = vshll.u32 %v11703_v30, 16  ;;  %v2697_v17 = vor.u32 %v2696_v26, %v12016_v37  ;;  %v12068_v26 = vld [vmem:[#allocation2 + $0x74] sm:$0xf] }
 0x1c1   : > { %10014 = vmatpush3.bf16.msra.mxu1 %v10711_v12  ;;  %v2673_v12 = vor.u32 %v2672_v52, %v12012_v11  ;;  %v2683_v55 = vrot.slane %v15251_v14, 4  ;;  %v15253_v56 = vshrl.u32 %v11716_v48, 16  ;;  %v15254_v8 = vshll.u32 %v11716_v48, 16  ;;  %15256 = vst [vmem:[#allocation40_spill] sm:$0xff] %v12068_v26 }
 0x1c2   : > { %9984 = vmatmul.mubr.msk.bf16.gmra.mxu0 %vm1839_vm9, %v12020_v5  ;;  %10015 = vmatprep.subr.bf16.mxu1 %v10712_v13  ;;  %v2686_v25 = vrot.slane %v15252_v21, 5  ;;  %v12056_v6 = vrot.slane %v2714_v60, 5  ;;  %v15255_v10 = vshrl.u32 %v11722_v40, 16  ;;  %v15257_v48 = vshrl.u32 %v11739_v2, 16 }
 0x1c3   : > { %9987 = vmatprep.mubr.msk.bf16.mxu0 %vm1839_vm9, %v12027_v3  ;;  %10056 = vmatpush3.bf16.msra.mxu0 %v10716_v50  ;;  %v2707_v43 = vrot.slane %v15253_v56, 4  ;;  %v2710_v52 = vrot.slane %v15254_v8, 5  ;;  %v12060_v3 = vld [vmem:[#allocation10 + $0xb8] sm:$0xff]   ;;  %v2676_v50 = vshll.u32 %v12035_v53, 16  ;;  %v15258_v40 = vshll.u32 %v11739_v2, 16 }
 0x1c4   : > { %9944 = vmatmul.mubr.msk.bf16.gmra.mxu1 %vm1839_vm9, %v11664_v47  ;;  %v2720_v14 = vrot.slane %v15255_v10, 4  ;;  %10057 = vmatprep.subr.bf16.mxu0 %v10718_v54  ;;  %v2645_v47 = vsel %vm11873_vm1, %v2640_v44, %v11981_v19  ;;  %v2731_v60 = vrot.slane %v15257_v48, 4  ;;  %v2655_v56 = vsel %vm11873_vm1, %v2650_v39, %v2654_v15  ;;  %v12081_v10 = vld [vmem:[#allocation10 + $0x58] sm:$0xff]  }
 0x1c5   : > { %9947 = vmatprep.mubr.msk.bf16.mxu1 %vm1839_vm9, %v11674_v49  ;;  %v2734_v21 = vrot.slane %v15258_v40, 5  ;;  %10016 = vmatpush3.bf16.msra.mxu1 %v10712_v13  ;;  %v2700_v49 = vshll.u32 %v12043_v46, 16  ;;  %v12077_v8 = vrot.slane %v2738_v27, 5  ;;  %v15259_v19 = vshrl.u32 %v11741_v7, 16  ;;  %v12085_v40 = vld [vmem:[#allocation2 + $0x80] sm:$0xf] }
 0x1c6   : > { %10017 = vmatprep.subr.bf16.mxu1 %v10713_v20  ;;  %v12083_v53 = vcombine.low %v2621_v45, %v2631_v61  ;;  %v2663_v48 = vor.u32 %v2662_v32, %v2659_v29  ;;  %v2674_v5 = vrot.slane %v2673_v12, 4  ;;  %v2687_v58 = vor.u32 %v2686_v25, %v2683_v55 }
 0x1c7   : > { %v2744_v44 = vrot.slane %v15259_v19, 4  ;;  %10058 = vmatpush3.bf16.msra.mxu0 %v10718_v54  ;;  %v2698_v13 = vrot.slane %v2697_v17, 4  ;;  %v2711_v15 = vor.u32 %v2710_v52, %v2707_v43  ;;  %v2721_v39 = vor.u32 %v2720_v14, %v12056_v6 }
 0x1c8   : > { %v2724_v27 = vshll.u32 %v12068_v26, 16  ;;  %10131 = vmatprep.subr.bf16.mxu0 %v12060_v3  ;;  %v2838_v19 = vshrl.u32 %v11842_v59, 16  ;;  %v12091_v57 = vcombine.low %v2645_v47, %v2655_v56  ;;  %v2678_v45 = vrot.slane %v2676_v50, 5 }
 0x1c9   : > { %v2735_v61 = vor.u32 %v2734_v21, %v2731_v60  ;;  %10018 = vmatpush3.bf16.msra.mxu1 %v10713_v20  ;;  %v2702_v29 = vrot.slane %v2700_v49, 5  ;;  %v2745_v54 = vor.u32 %v2744_v44, %v12077_v8  ;;  %v2748_v32 = vshll.u32 %v12085_v40, 16  ;;  %v12115_v44 = vld [vmem:[#allocation2 + $0x8c] sm:$0xf] }
 0x1ca   : > { %9988 = vmatmul.mubr.msk.bf16.gmra.mxu0 %vm1839_vm9, %v12083_v53  ;;  %v2762_v12 = vshll.u32 %v11752_v31, 16  ;;  %10091 = vmatprep.subr.bf16.mxu1 %v12081_v10  ;;  %v2664_v25 = vrot.slane %v2663_v48, 4  ;;  %v2679_v20 = vsel %vm11873_vm1, %v2674_v5, %v2678_v45  ;;  %v2688_v17 = vrot.slane %v2687_v58, 4  ;;  %15262 = vst [vmem:[#allocation41_spill] sm:$0xff] %v12115_v44 }
 0x1cb   : > { %9991 = vmatprep.mubr.msk.bf16.mxu0 %vm1839_vm9, %v12091_v57  ;;  %v2703_v43 = vsel %vm11873_vm1, %v2698_v13, %v2702_v29  ;;  %v2712_v52 = vrot.slane %v2711_v15, 4  ;;  %v2722_v14 = vrot.slane %v2721_v39, 4  ;;  %v2726_v47 = vrot.slane %v2724_v27, 5  ;;  %v12127_v39 = vld [vmem:[#allocation2 + $0x98] sm:$0xf] }
 0x1cc   : > { %9948 = vmatmul.mubr.msk.bf16.gmra.mxu1 %vm1839_vm9, %v11701_v28  ;;  %v2736_v50 = vrot.slane %v2735_v61, 4  ;;  %v15260_v60 = vshrl.u32 %v11750_v24, 16  ;;  %v15261_v56 = vshll.u32 %v11750_v24, 16  ;;  %v2786_v58 = vshll.u32 %v11791_v0, 16 }
 0x1cd   : > { %9951 = vmatprep.mubr.msk.bf16.mxu1 %vm1839_vm9, %v11708_v36  ;;  %v2746_v49 = vrot.slane %v2745_v54, 4  ;;  %v2750_v28 = vrot.slane %v2748_v32, 5  ;;  %v12117_v48 = vrot.slane %v2762_v12, 5  ;;  %v15263_v13 = vshrl.u32 %v11752_v31, 16 }
 0x1ce   : > { %v2755_v21 = vrot.slane %v15260_v60, 4  ;;  %v2758_v5 = vrot.slane %v15261_v56, 5  ;;  %v2669_v36 = vsel %vm11873_vm1, %v2664_v25, %v12012_v11  ;;  %v2693_v24 = vsel %vm11873_vm1, %v2688_v17, %v12016_v37 }
 0x1cf   : > { %v2768_v15 = vrot.slane %v15263_v13, 4  ;;  %v15264_v27 = vshrl.u32 %v11789_v63, 16  ;;  %v15265_v61 = vshll.u32 %v11789_v63, 16  ;;  %v12133_v54 = vcombine.low %v2669_v36, %v2679_v20 }
 0x1d0   : > { %v12135_v31 = vcombine.low %v2693_v24, %v2703_v43  ;;  %v2717_v11 = vsel %vm11873_vm1, %v2712_v52, %v12056_v6  ;;  %v2727_v32 = vsel %vm11873_vm1, %v2722_v14, %v2726_v47  ;;  %v2759_v37 = vor.u32 %v2758_v5, %v2755_v21 }
 0x1d1   : > { %v2779_v45 = vrot.slane %v15264_v27, 4  ;;  %v2782_v29 = vrot.slane %v15265_v61, 5  ;;  %v2772_v12 = vshll.u32 %v12115_v44, 16  ;;  %v12143_v25 = vrot.slane %v2786_v58, 5  ;;  %v15276_v44 = vld [vmem:[#allocation26_spill] sm:$0xff] }
 0x1d2   : > { %v15266_v17 = vshrl.u32 %v11791_v0, 16  ;;  %9992 = vmatmul.mubr.msk.bf16.gmra.mxu0 %vm1839_vm9, %v12133_v54  ;;  %v2741_v20 = vsel %vm11873_vm1, %v2736_v50, %v12077_v8  ;;  %v2751_v6 = vsel %vm11873_vm1, %v2746_v49, %v2750_v28  ;;  %v2769_v43 = vor.u32 %v2768_v15, %v12117_v48  ;;  %v15267_v50 = vld [vmem:[#allocation22_spill] sm:$0xff]  ;;  %v15268_v28 = vld [vmem:[#allocation23_spill] sm:$0xff] }
 0x1d3   : > { %v2796_v52 = vshll.u32 %v12127_v39, 16  ;;  %v3195_v47 = vshrl.u32 %v11901_v4, 16  ;;  %v3198_v21 = vshll.u32 %v11901_v4, 16  ;;  %9995 = vmatprep.mubr.msk.bf16.mxu0 %vm1839_vm9, %v12135_v31  ;;  %v2783_v56 = vor.u32 %v2782_v29, %v2779_v45 }
 0x1d4   : > { %v2792_v60 = vrot.slane %v15266_v17, 4  ;;  %v3208_v8 = vshrl.u32 %v11903_v9, 16  ;;  %9952 = vmatmul.mubr.msk.bf16.gmra.mxu1 %vm1839_vm9, %v15267_v50  ;;  %v12165_v58 = vcombine.low %v2717_v11, %v2727_v32  ;;  %v2810_v49 = vshll.u32 %v11806_v33, 16  ;;  %v12176_v11 = vld [vmem:[#allocation2 + $0xc8] sm:$0xf] }
 0x1d5   : > { %9955 = vmatprep.mubr.msk.bf16.mxu1 %vm1839_vm9, %v15268_v28  ;;  %v12170_v13 = vcombine.low %v2741_v20, %v2751_v6  ;;  %v2760_v15 = vrot.slane %v2759_v37, 4  ;;  %v2774_v36 = vrot.slane %v2772_v12, 5  ;;  %v2770_v27 = vrot.slane %v2769_v43, 4 }
 0x1d6   : > { %v2793_v24 = vor.u32 %v2792_v60, %v12143_v25  ;;  %v2798_v45 = vrot.slane %v2796_v52, 5  ;;  %v15269_v61 = vshrl.u32 %v11804_v22, 16  ;;  %v2834_v17 = vshll.u32 %v11842_v59, 16  ;;  %v12184_v60 = vld [vmem:[#allocation2 + $0xa4] sm:$0xf] }
 0x1d7   : > { %v2784_v32 = vrot.slane %v2783_v56, 4  ;;  %v15270_v50 = vshll.u32 %v11804_v22, 16  ;;  %v15271_v20 = vshrl.u32 %v11806_v33, 16  ;;  %v15272_v37 = vshrl.u32 %v11838_v35, 16  ;;  %15273 = vst [vmem:[#allocation22_spill] sm:$0xff] %v12184_v60 }
 0x1d8   : > { %v2803_v29 = vrot.slane %v15269_v61, 4  ;;  %v12186_v43 = vrot.slane %v2810_v49, 5  ;;  %v3197_v52 = vrot.slane %v3195_v47, 4  ;;  %v3200_v28 = vrot.slane %v3198_v21, 5  ;;  %v12194_v33 = vld [vmem:[#allocation2 + $0xb0] sm:$0xf] }
 0x1d9   : > { %v2806_v5 = vrot.slane %v15270_v50, 5  ;;  %v2816_v6 = vrot.slane %v15271_v20, 4  ;;  %v2827_v12 = vrot.slane %v15272_v37, 4  ;;  %v3204_v61 = vshll.u32 %v11903_v9, 16 }
 0x1da   : > { %v2794_v14 = vrot.slane %v2793_v24, 4  ;;  %v15274_v56 = vshll.u32 %v11838_v35, 16  ;;  %v3210_v22 = vrot.slane %v3208_v8, 4  ;;  %v3214_v50 = vshll.u32 %v12176_v11, 16  ;;  %9996 = vmatmul.mubr.msk.bf16.gmra.mxu0 %vm1839_vm9, %v12165_v58 }
 0x1db   : > { %v12196_v20 = vrot.slane %v2834_v17, 5  ;;  %v2840_v47 = vrot.slane %v2838_v19, 4  ;;  %v3201_v21 = vor.u32 %v3200_v28, %v3197_v52  ;;  %v3206_v49 = vrot.slane %v3204_v61, 5  ;;  %9999 = vmatprep.mubr.msk.bf16.mxu0 %vm1839_vm9, %v12170_v13  ;;  %v15275_v17 = vld [vmem:[#allocation24_spill] sm:$0xff] }
 0x1dc   : > { %v2830_v55 = vrot.slane %v15274_v56, 5  ;;  %v2765_v8 = vsel %vm11873_vm1, %v2760_v15, %v12117_v48  ;;  %v2775_v24 = vsel %vm11873_vm1, %v2770_v27, %v2774_v36  ;;  %v2807_v37 = vor.u32 %v2806_v5, %v2803_v29  ;;  %9956 = vmatmul.mubr.msk.bf16.gmra.mxu1 %vm1839_vm9, %v15275_v17 }
 0x1dd   : > { %v2820_v56 = vshll.u32 %v12184_v60, 16  ;;  %v2817_v19 = vor.u32 %v2816_v6, %v12186_v43  ;;  %v3202_v52 = vrot.slane %v3201_v21, 4  ;;  %v3211_v28 = vor.u32 %v3210_v22, %v3206_v49  ;;  %9959 = vmatprep.mubr.msk.bf16.mxu1 %vm1839_vm9, %v15276_v44 }
 0x1de   : > { %v3216_v61 = vrot.slane %v3214_v50, 5  ;;  %v2789_v48 = vsel %vm11873_vm1, %v2784_v32, %v12143_v25  ;;  %v2799_v5 = vsel %vm11873_vm1, %v2794_v14, %v2798_v45  ;;  %v2844_v15 = vshll.u32 %v12194_v33, 16  ;;  %v10787_v50 = vld [vmem:[#allocation2 + $0x34] sm:$0xf] }
 0x1df   : > { %v2858_v36 = vshll.u32 %v11862_v41, 16  ;;  %v2831_v27 = vor.u32 %v2830_v55, %v2827_v12  ;;  %v2841_v29 = vor.u32 %v2840_v47, %v12196_v20  ;;  %v3207_v6 = vsel %vm11873_vm1, %v3202_v52, %v3206_v49  ;;  %v12233_v47 = vld [vmem:[#allocation2 + $0xbc] sm:$0xf] }
 0x1e0   : > { %v3212_v22 = vrot.slane %v3211_v28, 4  ;;  %v3755_v44 = vrot.slane %v10787_v50, 5  ;;  %v12223_v21 = vcombine.low %v2765_v8, %v2775_v24  ;;  %v2808_v17 = vrot.slane %v2807_v37, 4 }
 0x1e1   : > { %v2822_v25 = vrot.slane %v2820_v56, 5  ;;  %v2818_v32 = vrot.slane %v2817_v19, 4  ;;  %v15277_v14 = vshrl.u32 %v11860_v16, 16  ;;  %v15278_v60 = vshll.u32 %v11860_v16, 16 }
 0x1e2   : > { %v3217_v55 = vsel %vm11873_vm1, %v3212_v22, %v3216_v61  ;;  %v12231_v12 = vcombine.low %v2789_v48, %v2799_v5  ;;  %v12235_v49 = vrot.slane %v2858_v36, 5  ;;  %v15279_v8 = vshrl.u32 %v11862_v41, 16  ;;  %10000 = vmatmul.mubr.msk.bf16.gmra.mxu0 %vm1839_vm9, %v12223_v21 }
 0x1e3   : > { %v2851_v45 = vrot.slane %v15277_v14, 4  ;;  %v2854_v26 = vrot.slane %v15278_v60, 5  ;;  %v12239_v37 = vcombine.low %v3207_v6, %v3217_v55  ;;  %v3769_v56 = vrot.slane %v11658_v42, 5  ;;  %v15280_v42 = vld [vmem:[#allocation27_spill] sm:$0xff] }
 0x1e4   : > { %v2864_v24 = vrot.slane %v15279_v8, 4  ;;  %v2832_v16 = vrot.slane %v2831_v27, 4  ;;  %v2842_v60 = vrot.slane %v2841_v29, 4  ;;  %v2846_v19 = vrot.slane %v2844_v15, 5  ;;  %10003 = vmatprep.mubr.msk.bf16.mxu0 %vm1839_vm9, %v12231_v12  ;;  %9960 = vmatmul.mubr.msk.bf16.gmra.mxu1 %vm1839_vm9, %v15280_v42  ;;  %v15283_v29 = vld [vmem:[#allocation28_spill] sm:$0xff] }
 0x1e5   : > { %v8988_v52 = vrot.slane %v11666_v51, 9  ;;  %v8990_v28 = vrot.slane %v11703_v30, 9  ;;  %v3783_v61 = vrot.slane %v11690_v18, 5  ;;  %v2813_v41 = vsel %vm11873_vm1, %v2808_v17, %v12186_v43  ;;  %9963 = vmatprep.mubr.msk.bf16.mxu1 %vm1839_vm9, %v15283_v29 }
 0x1e6   : > { %v2823_v48 = vsel %vm11873_vm1, %v2818_v32, %v2822_v25  ;;  %v2855_v5 = vor.u32 %v2854_v26, %v2851_v45  ;;  %v2868_v51 = vshll.u32 %v12233_v47, 16  ;;  %v15281_v30 = vrot.slane %v11609_v23, 9 }
 0x1e7   : > { %v8992_v36 = vrot.slane %v11739_v2, 9  ;;  %v3758_v27 = vrot.slane %v11952_v38, 5  ;;  %v2865_v43 = vor.u32 %v2864_v24, %v12235_v49  ;;  %v3757_v6 = vrot.slane %v3755_v44, 4 }
 0x1e8   : > { %v3756_v18 = vsel %vm11783_vm14, %v15281_v30, %v3755_v44  ;;  %v3797_v22 = vrot.slane %v11741_v7, 5  ;;  %v2837_v26 = vsel %vm11873_vm1, %v2832_v16, %v12196_v20  ;;  %v2847_v23 = vsel %vm11873_vm1, %v2842_v60, %v2846_v19 }
 0x1e9   : > { %v3770_v2 = vsel %vm11783_vm14, %v8988_v52, %v3769_v56  ;;  %v3772_v38 = vrot.slane %v11979_v62, 5  ;;  %v3786_v50 = vrot.slane %v12043_v46, 5  ;;  %v12276_v17 = vcombine.low %v2813_v41, %v2823_v48  ;;  %v15284_v52 = vld [vmem:[#allocation32_spill] sm:$0xff] }
 0x1ea   : > { %v3759_v44 = vsel %vm11783_vm14, %v3757_v6, %v3758_v27  ;;  %v2856_v7 = vrot.slane %v2855_v5, 4  ;;  %v2870_v25 = vrot.slane %v2868_v51, 5  ;;  %v3771_v20 = vrot.slane %v3769_v56, 4 }
 0x1eb   : > { %v12280_v32 = vcombine.low %v3756_v18, %v3759_v44  ;;  %v12282_v14 = vcombine.low %v2837_v26, %v2847_v23  ;;  %v2866_v45 = vrot.slane %v2865_v43, 4  ;;  %v3784_v55 = vsel %vm11783_vm14, %v8990_v28, %v3783_v61  ;;  %10004 = vmatmul.mubr.msk.bf16.gmra.mxu0 %vm1839_vm9, %v12276_v17  ;;  %v15285_v43 = vld [vmem:[#allocation35_spill] sm:$0xff]  ;;  %v15286_v23 = vld [vmem:[#allocation34_spill] sm:$0xff]  ;;  %v15287_v44 = vld [vmem:[#allocation37_spill] sm:$0xff] }
 0x1ec   : > { %v3785_v8 = vrot.slane %v3783_v61, 4  ;;  %v8994_v62 = vrot.slane %v11789_v63, 9  ;;  %v3773_v46 = vsel %vm11783_vm14, %v3771_v20, %v3772_v38  ;;  %v3811_v24 = vrot.slane %v11791_v0, 5  ;;  %9964 = vmatmul.mubr.msk.bf16.gmra.mxu1 %vm1839_vm9, %v11869_v1  ;;  %v12314_v61 = vld [vmem:[#allocation2 + $0xcc] sm:$0xf]  ;;  %v10725_v20 = vld [vmem:[#allocation10 + $0xa8] sm:$0xff]  }
 0x1ed   : > { %v3800_v16 = vrot.slane %v12085_v40, 5  ;;  %10007 = vmatprep.mubr.msk.bf16.mxu0 %vm1839_vm9, %v12282_v14  ;;  %v12295_v56 = vcombine.low %v3770_v2, %v3773_v46  ;;  %v8996_v63 = vrot.slane %v11838_v35, 9  ;;  %v3798_v0 = vsel %vm11783_vm14, %v8992_v36, %v3797_v22  ;;  %9967 = vmatprep.mubr.msk.bf16.mxu1 %vm1839_vm9, %v15284_v52  ;;  %v12316_v1 = vld [vmem:[#allocation2 + $0xd0] sm:$0xf] }
 0x1ee   : > { %v3787_v60 = vsel %vm11783_vm14, %v3785_v8, %v3786_v50  ;;  %v3814_v40 = vrot.slane %v12127_v39, 5  ;;  %v2861_v28 = vsel %vm11873_vm1, %v2856_v7, %v12235_v49  ;;  %v2871_v35 = vsel %vm11873_vm1, %v2866_v45, %v2870_v25  ;;  %v10724_v50 = vld [vmem:[#allocation10 + $0xb0] sm:$0xff]   ;;  %v15288_v25 = vld [vmem:[#allocation38_spill] sm:$0xff]  ;;  %v10721_v45 = vld [vmem:[#allocation10 + $0x48] sm:$0xff]  }
 0x1ef   : > { %v12302_v19 = vcombine.low %v3784_v55, %v3787_v60  ;;  %v3799_v41 = vrot.slane %v3797_v22, 4  ;;  %v3825_v42 = vrot.slane %v11842_v59, 5  ;;  %v3812_v39 = vsel %vm11783_vm14, %v8994_v62, %v3811_v24  ;;  %v10720_v7 = vld [vmem:[#allocation10 + $0x50] sm:$0xff]   ;;  %v10726_v55 = vld [vmem:[#allocation10 + $0xa0] sm:$0xff]  }
 0x1f0   : > { %v9034_v48 = vrot.slane %v11901_v4, 9  ;;  %v4162_v5 = vrot.slane %v11903_v9, 5  ;;  %v3813_v51 = vrot.slane %v3811_v24, 4  ;;  %v3828_v30 = vrot.slane %v12194_v33, 5  ;;  %v12405_v24 = vld [vmem:[#allocation2 + $0xd4] sm:$0xf] }
 0x1f1   : > { %v3801_v49 = vsel %vm11783_vm14, %v3799_v41, %v3800_v16  ;;  %v12326_v18 = vcombine.low %v2861_v28, %v2871_v35  ;;  %v8883_v36 = vcombine.low %v12314_v61, %v12316_v1  ;;  %v3826_v4 = vsel %vm11783_vm14, %v8996_v63, %v3825_v42 }
 0x1f2   : > { %v12330_v27 = vcombine.low %v3798_v0, %v3801_v49  ;;  %v3815_v59 = vsel %vm11783_vm14, %v3813_v51, %v3814_v40  ;;  %v4165_v9 = vrot.slane %v12176_v11, 5  ;;  %v3827_v33 = vrot.slane %v3825_v42, 4  ;;  %v10789_v0 = vld [vmem:[#allocation2 + $0x4] sm:$0xf]  ;;  %v10790_v42 = vld [vmem:[#allocation2] sm:$0xf] }
 0x1f3   : > { %10008 = vmatmul.mubr.msk.bf16.gmra.mxu0 %vm1839_vm9, %v12326_v18  ;;  %v12339_v29 = vcombine.low %v3812_v39, %v3815_v59  ;;  %v4163_v22 = vsel %vm11783_vm14, %v9034_v48, %v4162_v5  ;;  %v4164_v26 = vrot.slane %v4162_v5, 4  ;;  %v3460_v8 = vshll.u32 %v12316_v1, 16  ;;  %v10791_v5 = vld [vmem:[#allocation2 + $0x8] sm:$0xf]  ;;  %v15289_v51 = vld [vmem:[#allocation31_spill] sm:$0xff] }
 0x1f4   : > { %10059 = vmatprep.mubr.msk.bf16.mxu0 %vm1839_vm9, %v15285_v43  ;;  %9968 = vmatmul.mubr.msk.bf16.gmra.mxu1 %vm1839_vm9, %v8883_v36  ;;  %v3829_v6 = vsel %vm11783_vm14, %v3827_v33, %v3828_v30  ;;  %v3470_v63 = vshll.u32 %v12405_v24, 16  ;;  %v3727_v40 = vrot.slane %v10789_v0, 5  ;;  %v8982_v39 = vrot.slane %v10790_v42, 9  ;;  %v10792_v36 = vld [vmem:[#allocation2 + $0xc] sm:$0xf] }
 0x1f5   : > { %10019 = vmatprep.mubr.msk.bf16.mxu1 %vm1839_vm9, %v15286_v23  ;;  %v12350_v2 = vcombine.low %v3826_v4, %v3829_v6  ;;  %v4166_v11 = vsel %vm11783_vm14, %v4164_v26, %v4165_v9  ;;  %v3462_v62 = vrot.slane %v3460_v8, 5  ;;  %v3730_v49 = vrot.slane %v10791_v5, 5 }
 0x1f6   : > { %v12354_v38 = vcombine.low %v4163_v22, %v4166_v11  ;;  %v3472_v35 = vrot.slane %v3470_v63, 5  ;;  %v3729_v48 = vrot.slane %v3727_v40, 4  ;;  %v3737_v30 = vrot.slane %v15289_v51, 5  ;;  %v10793_v22 = vld [vmem:[#allocation2 + $0x28] sm:$0xf] }
 0x1f7   : > { %v8983_v59 = vrot.slane %v10792_v36, 9  ;;  %v3748_v26 = vrot.slane %v10793_v22, 5  ;;  %v4402_v11 = vrot.slane %v12316_v1, 5 }
 0x1f8   : > { %v3731_v6 = vsel %vm11783_vm14, %v3729_v48, %v3730_v49  ;;  %v10796_v49 = vld [vmem:[#allocation2 + $0x3c] sm:$0xf] }
 0x1fb   : > { %10060 = vmatmul.mubr.msk.bf16.vlgmr.msra.gmra.mxu0 %vm1839_vm9, %v15287_v44 }
 0x1fc   : > { %10063 = vmatprep.mubr.msk.bf16.mxu0 %vm1839_vm9, %v15288_v25  ;;  %10132 = vmatpush3.bf16.msra.mxu0 %v12060_v3  ;;  %v10722_v3 = vld [vmem:[#allocation10 + $0x40] sm:$0xff]  }
 0x1fd   : > { %10020 = vmatmul.mubr.msk.bf16.vlgmr.msra.gmra.mxu1 %vm1839_vm9, %v15285_v43  ;;  %10133 = vmatprep.subr.bf16.mxu0 %v10724_v50  ;;  %v3728_v43 = vsel %vm11783_vm14, %v8982_v39, %v3727_v40 }
 0x1fe   : > { %10092 = vmatpush3.bf16.msra.mxu1 %v12081_v10  ;;  %10023 = vmatprep.mubr.msk.bf16.mxu1 %vm1839_vm9, %v15287_v44  ;;  %v12374_v10 = vld [vmem:[#allocation10 + $0x118] sm:$0xff]   ;;  %v8998_v44 = vcombine.low %v3728_v43, %v3731_v6 }
 0x1ff   : > { %10093 = vmatprep.subr.bf16.mxu1 %v10720_v7 }
 0x200   : > { %10134 = vmatpush3.bf16.msra.mxu0 %v10724_v50 }
 0x201   : > { %10135 = vmatprep.subr.bf16.mxu0 %v10725_v20 }
 0x202   : > { %10094 = vmatpush3.bf16.msra.mxu1 %v10720_v7  ;;  %v3750_v7 = vrot.slane %v3748_v26, 4 }
 0x203   : > { %10064 = vmatmul.mubr.msk.bf16.gmra.mxu0 %vm1839_vm9, %v12083_v53  ;;  %10095 = vmatprep.subr.bf16.mxu1 %v10721_v45 }
 0x204   : > { %10067 = vmatprep.mubr.msk.bf16.mxu0 %vm1839_vm9, %v12091_v57  ;;  %10136 = vmatpush3.bf16.msra.mxu0 %v10725_v20  ;;  %v4405_v20 = vrot.slane %v12405_v24, 5 }
 0x205   : > { %10024 = vmatmul.mubr.msk.bf16.gmra.mxu1 %vm1839_vm9, %v15288_v25  ;;  %10137 = vmatprep.subr.bf16.mxu0 %v10726_v55 }
 0x206   : > { %10027 = vmatprep.mubr.msk.bf16.mxu1 %vm1839_vm9, %v12083_v53  ;;  %10096 = vmatpush3.bf16.msra.mxu1 %v10721_v45  ;;  %v3454_v53 = vshll.u32 %v12314_v61, 16  ;;  %v15290_v45 = vld [vmem:[#allocation33_spill] sm:$0xff] }
 0x207   : > { %10097 = vmatprep.subr.bf16.mxu1 %v10722_v3 }
 0x208   : > { %10138 = vmatpush3.bf16.msra.mxu0 %v10726_v55  ;;  %v3751_v55 = vrot.slane %v15290_v45, 5  ;;  %v10799_v45 = vld [vmem:[#allocation2 + $0x70] sm:$0xf] }
 0x20a   : > { %10098 = vmatpush3.bf16.msra.mxu1 %v10722_v3 }
 0x20b   : > { %10068 = vmatmul.mubr.msk.bf16.gmra.mxu0 %vm1839_vm9, %v12133_v54  ;;  %10171 = vmatprep.subr.bf16.mxu1 %v12374_v10 }
 0x20c   : > { %10071 = vmatprep.mubr.msk.bf16.mxu0 %vm1839_vm9, %v12135_v31 }
 0x20d   : > { %10028 = vmatmul.mubr.msk.bf16.gmra.mxu1 %vm1839_vm9, %v12091_v57  ;;  %v3451_v57 = vshrl.u32 %v12314_v61, 16 }
 0x20e   : > { %10031 = vmatprep.mubr.msk.bf16.mxu1 %vm1839_vm9, %v12133_v54  ;;  %v3464_v54 = vshrl.u32 %v12316_v1, 16  ;;  %v4404_v1 = vrot.slane %v4402_v11, 4 }
 0x210   : > { %v3466_v46 = vrot.slane %v3464_v54, 4  ;;  %v3752_v54 = vsel %vm11783_vm14, %v3750_v7, %v3751_v55  ;;  %v10798_v7 = vld [vmem:[#allocation2 + $0x54] sm:$0xf]  ;;  %v3790_v55 = vrot.slane %v10799_v45, 5 }
 0x212   : > { %v3467_v60 = vor.u32 %v3466_v46, %v3462_v62 }
 0x213   : > { %10072 = vmatmul.mubr.msk.bf16.gmra.mxu0 %vm1839_vm9, %v12165_v58 }
 0x214   : > { %10075 = vmatprep.mubr.msk.bf16.mxu0 %vm1839_vm9, %v12170_v13  ;;  %v3468_v28 = vrot.slane %v3467_v60, 4 }
 0x215   : > { %10032 = vmatmul.mubr.msk.bf16.gmra.mxu1 %vm1839_vm9, %v12135_v31  ;;  %v3453_v31 = vrot.slane %v3451_v57, 4  ;;  %v10794_v57 = vld [vmem:[#allocation2 + $0x24] sm:$0xf] }
 0x216   : > { %10035 = vmatprep.mubr.msk.bf16.mxu1 %vm1839_vm9, %v12165_v58  ;;  %v3456_v58 = vrot.slane %v3454_v53, 5  ;;  %v8985_v53 = vrot.slane %v10794_v57, 9 }
 0x218   : > { %v3457_v16 = vor.u32 %v3456_v58, %v3453_v31  ;;  %v10795_v31 = vld [vmem:[#allocation2 + $0x40] sm:$0xf]  ;;  %v3749_v46 = vsel %vm11783_vm14, %v8985_v53, %v3748_v26  ;;  %v10800_v53 = vld [vmem:[#allocation2 + $0x6c] sm:$0xf] }
 0x219   : > { %v3762_v58 = vrot.slane %v10795_v31, 5  ;;  %v12462_v60 = vcombine.low %v3749_v46, %v3752_v54  ;;  %v8991_v54 = vrot.slane %v10800_v53, 9  ;;  %v15294_v31 = vld [vmem:[#allocation40_spill] sm:$0xff] }
 0x21a   : > { %v3458_v52 = vrot.slane %v3457_v16, 4 }
 0x21b   : > { %10076 = vmatmul.mubr.msk.bf16.gmra.mxu0 %vm1839_vm9, %v12223_v21  ;;  %v3764_v40 = vrot.slane %v3762_v58, 4 }
 0x21c   : > { %10079 = vmatprep.mubr.msk.bf16.mxu0 %vm1839_vm9, %v12231_v12 }
 0x21d   : > { %10036 = vmatmul.mubr.msk.bf16.gmra.mxu1 %vm1839_vm9, %v12170_v13  ;;  %v10788_v13 = vld [vmem:[#allocation2 + $0x10] sm:$0xf] }
 0x21e   : > { %10039 = vmatprep.mubr.msk.bf16.mxu1 %vm1839_vm9, %v12223_v21  ;;  %v3734_v21 = vrot.slane %v10788_v13, 5  ;;  %v15291_v13 = vld [vmem:[#allocation29_spill] sm:$0xff] }
 0x220   : > { %v3736_v41 = vrot.slane %v3734_v21, 4 }
 0x222   : > { %v3738_v4 = vsel %vm11783_vm14, %v3736_v41, %v3737_v30  ;;  %v15292_v41 = vld [vmem:[#allocation36_spill] sm:$0xff] }
 0x223   : > { %10080 = vmatmul.mubr.msk.bf16.gmra.mxu0 %vm1839_vm9, %v12276_v17  ;;  %v3765_v42 = vrot.slane %v15292_v41, 5  ;;  %v10797_v30 = vld [vmem:[#allocation2 + $0x58] sm:$0xf]  ;;  %v10801_v41 = vld [vmem:[#allocation2 + $0x88] sm:$0xf] }
 0x224   : > { %10083 = vmatprep.mubr.msk.bf16.mxu0 %vm1839_vm9, %v12282_v14  ;;  %v3776_v36 = vrot.slane %v10797_v30, 5 }
 0x225   : > { %10040 = vmatmul.mubr.msk.bf16.gmra.mxu1 %vm1839_vm9, %v12231_v12  ;;  %v3463_v12 = vsel %vm11873_vm1, %v3458_v52, %v3462_v62  ;;  %v10728_v52 = vld [vmem:[#allocation10 + $0x110] sm:$0xff]  }
 0x226   : > { %10043 = vmatprep.mubr.msk.bf16.mxu1 %vm1839_vm9, %v12276_v17  ;;  %v3473_v17 = vsel %vm11873_vm1, %v3468_v28, %v3472_v35  ;;  %v3778_v26 = vrot.slane %v3776_v36, 4 }
 0x227   : > { %v8961_v33 = vcombine.low %v3463_v12, %v3473_v17  ;;  %v8987_v12 = vrot.slane %v10796_v49, 9  ;;  %v3766_v17 = vsel %vm11783_vm14, %v3764_v40, %v3765_v42  ;;  %v3804_v42 = vrot.slane %v10801_v41, 5 }
 0x22b   : > { %10084 = vmatmul.mubr.msk.bf16.gmra.mxu0 %vm1839_vm9, %v12326_v18 }
 0x22c   : > { %10087 = vmatprep.mubr.msk.bf16.mxu0 %vm1839_vm9, %v12239_v37 }
 0x22d   : > { %10044 = vmatmul.mubr.msk.bf16.gmra.mxu1 %vm1839_vm9, %v12282_v14  ;;  %v3735_v14 = vsel %vm11783_vm14, %v8983_v59, %v3734_v21  ;;  %v10729_v59 = vld [vmem:[#allocation10 + $0x108] sm:$0xff]  }
 0x22e   : > { %10047 = vmatprep.mubr.msk.bf16.mxu1 %vm1839_vm9, %v12326_v18  ;;  %v9056_v18 = vrot.slane %v12314_v61, 9  ;;  %v8999_v50 = vcombine.low %v3735_v14, %v3738_v4 }
 0x230   : > { %v12448_v61 = vsel %vm11783_vm14, %v9056_v18, %v4402_v11  ;;  %v15293_v11 = vld [vmem:[#allocation39_spill] sm:$0xff] }
 0x232   : > { %v9901_v9 = vpop.f32.mrf.mxu0 }
 0x233   : > { %10088 = vmatmul.mubr.msk.bf16.gmra.mxu0 %vm1839_vm9, %v8961_v33 }
 0x234   : > { %v2115_v23 = vpop.f32.mrf.mxu0  ;;  %10139 = vmatprep.mubr.msk.bf16.mxu0 %vm1839_vm9, %v8999_v50 }
 0x235   : > { %10048 = vmatmul.mubr.msk.bf16.gmra.mxu1 %vm1839_vm9, %v12239_v37  ;;  %v12456_v37 = vsel %vm11783_vm14, %v4404_v1, %v4405_v20 }
 0x236   : > { %v9902_v25 = vpop.f32.mrf.mxu0  ;;  %10099 = vmatprep.mubr.msk.bf16.mxu1 %vm1839_vm9, %v8998_v44  ;;  %v9861_v3 = vpop.f32.mrf.mxu1 }
 0x237   : > { %v12452_v62 = vadd.f32 %v9901_v9, %v9861_v3 }
 0x238   : > { %v2118_v8 = vpop.f32.mrf.mxu0  ;;  %v1922_v24 = vpop.f32.mrf.mxu1 }
 0x239   : > { %v12464_v63 = vadd.f32 %v2115_v23, %v1922_v24  ;;  %v10730_v23 = vld [vmem:[#allocation10 + $0x100] sm:$0xff]  }
 0x23a   : > { %v9862_v21 = vpop.f32.mrf.mxu1 }
 0x23b   : > { %10140 = vmatmul.mubr.msk.bf16.vlgmr.msra.gmra.mxu0 %vm1839_vm9, %v15291_v13  ;;  %v12470_v28 = vadd.f32 %v9902_v25, %v9862_v21  ;;  %v8989_v25 = vrot.slane %v10798_v7, 9 }
 0x23c   : > { %v9905_v0 = vpop.f32.mrf.mxu0  ;;  %10143 = vmatprep.mubr.msk.bf16.mxu0 %vm1839_vm9, %v12462_v60  ;;  %v1925_v35 = vpop.f32.mrf.mxu1 }
 0x23d   : > { %10100 = vmatmul.mubr.msk.bf16.vlgmr.msra.gmra.mxu1 %vm1839_vm9, %v8999_v50  ;;  %v12477_v48 = vadd.f32 %v2118_v8, %v1925_v35  ;;  %v3779_v50 = vrot.slane %v15293_v11, 5  ;;  %v3777_v1 = vsel %vm11783_vm14, %v8989_v25, %v3776_v36  ;;  %v3792_v8 = vrot.slane %v3790_v55, 4  ;;  %v10802_v36 = vld [vmem:[#allocation2 + $0x84] sm:$0xf] }
 0x23e   : > { %v2131_v39 = vpop.f32.mrf.mxu0  ;;  %10172 = vmatpush3.bf16.msra.mxu1 %v12374_v10  ;;  %10103 = vmatprep.mubr.msk.bf16.mxu1 %vm1839_vm9, %v15291_v13  ;;  %v3763_v10 = vsel %vm11783_vm14, %v8987_v12, %v3762_v58  ;;  %v3793_v58 = vrot.slane %v15294_v31, 5 }
 0x23f   : > { %v9865_v5 = vpop.f32.mrf.mxu1  ;;  %10173 = vmatprep.subr.bf16.mxu1 %v10728_v52  ;;  %v12485_v33 = vcombine.low %v3763_v10, %v3766_v17  ;;  %v3780_v20 = vsel %vm11783_vm14, %v3778_v26, %v3779_v50  ;;  %v3806_v10 = vrot.slane %v3804_v42, 4 }
 0x240   : > { %v9906_v51 = vpop.f32.mrf.mxu0  ;;  %v12481_v4 = vadd.f32 %v9905_v0, %v9865_v5  ;;  %v12506_v3 = vcombine.low %v3777_v1, %v3780_v20  ;;  %v3794_v35 = vsel %vm11783_vm14, %v3792_v8, %v3793_v58  ;;  %v10803_v20 = vld [vmem:[#allocation2 + $0xa0] sm:$0xf]  ;;  %v10804_v58 = vld [vmem:[#allocation2 + $0x9c] sm:$0xf] }
 0x241   : > { %v1938_v9 = vpop.f32.mrf.mxu1  ;;  %v3818_v45 = vrot.slane %v10803_v20, 5 }
 0x242   : > { %v12487_v43 = vadd.f32 %v2131_v39, %v1938_v9  ;;  %10174 = vmatpush3.bf16.msra.mxu1 %v10728_v52  ;;  %v2134_v22 = vpop.f32.mrf.mxu0  ;;  %v3791_v52 = vsel %vm11783_vm14, %v8991_v54, %v3790_v55  ;;  %v15295_v9 = vld [vmem:[#allocation41_spill] sm:$0xff] }
 0x243   : > { %10144 = vmatmul.mubr.msk.bf16.gmra.mxu0 %vm1839_vm9, %v12280_v32  ;;  %v9866_v6 = vpop.f32.mrf.mxu1  ;;  %10175 = vmatprep.subr.bf16.mxu1 %v10729_v59  ;;  %v12527_v17 = vcombine.low %v3791_v52, %v3794_v35 }
 0x244   : > { %10147 = vmatprep.mubr.msk.bf16.mxu0 %vm1839_vm9, %v12485_v33  ;;  %v12493_v14 = vadd.f32 %v9906_v51, %v9866_v6  ;;  %v3807_v6 = vrot.slane %v15295_v9, 5 }
 0x245   : > { %10104 = vmatmul.mubr.msk.bf16.gmra.mxu1 %vm1839_vm9, %v12462_v60  ;;  %v1941_v18 = vpop.f32.mrf.mxu1 }
 0x246   : > { %10107 = vmatprep.mubr.msk.bf16.mxu1 %vm1839_vm9, %v12280_v32  ;;  %v12500_v44 = vadd.f32 %v2134_v22, %v1941_v18  ;;  %10176 = vmatpush3.bf16.msra.mxu1 %v10729_v59  ;;  %v8993_v59 = vrot.slane %v10802_v36, 9  ;;  %v3808_v25 = vsel %vm11783_vm14, %v3806_v10, %v3807_v6  ;;  %v10805_v36 = vld [vmem:[#allocation2 + $0xb8] sm:$0xf] }
 0x247   : > { %10177 = vmatprep.subr.bf16.mxu1 %v10730_v23 }
 0x248   : > { %v3805_v7 = vsel %vm11783_vm14, %v8993_v59, %v3804_v42  ;;  %v3832_v59 = vrot.slane %v10805_v36, 5 }
 0x249   : > { %v12550_v54 = vcombine.low %v3805_v7, %v3808_v25  ;;  %v10806_v7 = vld [vmem:[#allocation2 + $0xb4] sm:$0xf] }
 0x24a   : > { %10178 = vmatpush3.bf16.msra.mxu1 %v10730_v23  ;;  %v9909_v57 = vpop.f32.mrf.mxu0  ;;  %v8997_v25 = vrot.slane %v10806_v7, 9  ;;  %v3834_v20 = vrot.slane %v3832_v59, 4 }
 0x24b   : > { %10148 = vmatmul.mubr.msk.bf16.gmra.mxu0 %vm1839_vm9, %v12295_v56 }
 0x24c   : > { %10151 = vmatprep.mubr.msk.bf16.mxu0 %vm1839_vm9, %v12506_v3  ;;  %v9869_v46 = vpop.f32.mrf.mxu1  ;;  %v2147_v24 = vpop.f32.mrf.mxu0 }
 0x24d   : > { %10108 = vmatmul.mubr.msk.bf16.gmra.mxu1 %vm1839_vm9, %v12485_v33  ;;  %v12515_v21 = vadd.f32 %v9909_v57, %v9869_v46  ;;  %v8995_v46 = vrot.slane %v10804_v58, 9 }
 0x24e   : > { %10111 = vmatprep.mubr.msk.bf16.mxu1 %vm1839_vm9, %v12295_v56  ;;  %v1954_v0 = vpop.f32.mrf.mxu1  ;;  %v9910_v40 = vpop.f32.mrf.mxu0 }
 0x24f   : > { %v12523_v39 = vadd.f32 %v2147_v24, %v1954_v0  ;;  %v3820_v24 = vrot.slane %v3818_v45, 4  ;;  %v15296_v0 = vld [vmem:[#allocation22_spill] sm:$0xff] }
 0x250   : > { %v9870_v5 = vpop.f32.mrf.mxu1  ;;  %v2150_v49 = vpop.f32.mrf.mxu0 }
 0x251   : > { %v12525_v12 = vadd.f32 %v9910_v40, %v9870_v5  ;;  %v3821_v40 = vrot.slane %v15296_v0, 5 }
 0x252   : > { %v1957_v51 = vpop.f32.mrf.mxu1  ;;  %v9913_v30 = vpop.f32.mrf.mxu0 }
 0x253   : > { %10152 = vmatmul.mubr.msk.bf16.gmra.mxu0 %vm1839_vm9, %v12302_v19  ;;  %v12532_v22 = vadd.f32 %v2150_v49, %v1957_v51  ;;  %v3819_v51 = vsel %vm11783_vm14, %v8995_v46, %v3818_v45  ;;  %v3835_v45 = vrot.slane %v12233_v47, 5  ;;  %v3833_v46 = vsel %vm11783_vm14, %v8997_v25, %v3832_v59 }
 0x254   : > { %10155 = vmatprep.mubr.msk.bf16.mxu0 %vm1839_vm9, %v12527_v17  ;;  %v9873_v26 = vpop.f32.mrf.mxu1  ;;  %v2163_v23 = vpop.f32.mrf.mxu0 }
 0x255   : > { %10112 = vmatmul.mubr.msk.bf16.gmra.mxu1 %vm1839_vm9, %v12506_v3  ;;  %v12538_v18 = vadd.f32 %v9913_v30, %v9873_v26  ;;  %v3822_v30 = vsel %vm11783_vm14, %v3820_v24, %v3821_v40  ;;  %v3836_v47 = vsel %vm11783_vm14, %v3834_v20, %v3835_v45 }
 0x256   : > { %10115 = vmatprep.mubr.msk.bf16.mxu1 %vm1839_vm9, %v12302_v19  ;;  %v1970_v11 = vpop.f32.mrf.mxu1  ;;  %v9914_v50 = vpop.f32.mrf.mxu0 }
 0x257   : > { %v12546_v55 = vadd.f32 %v2163_v23, %v1970_v11  ;;  %v12575_v23 = vcombine.low %v3819_v51, %v3822_v30 }
 0x258   : > { %v9874_v1 = vpop.f32.mrf.mxu1  ;;  %v2166_v57 = vpop.f32.mrf.mxu0 }
 0x259   : > { %v12548_v53 = vadd.f32 %v9914_v50, %v9874_v1 }
 0x25a   : > { %v1973_v8 = vpop.f32.mrf.mxu1  ;;  %v9917_v31 = vpop.f32.mrf.mxu0 }
 0x25b   : > { %10156 = vmatmul.mubr.msk.bf16.gmra.mxu0 %vm1839_vm9, %v12330_v27  ;;  %v12555_v52 = vadd.f32 %v2166_v57, %v1973_v8 }
 0x25c   : > { %10159 = vmatprep.mubr.msk.bf16.mxu0 %vm1839_vm9, %v12550_v54  ;;  %v9877_v35 = vpop.f32.mrf.mxu1  ;;  %v2179_v41 = vpop.f32.mrf.mxu0 }
 0x25d   : > { %10116 = vmatmul.mubr.msk.bf16.gmra.mxu1 %vm1839_vm9, %v12527_v17  ;;  %v12561_v42 = vadd.f32 %v9917_v31, %v9877_v35 }
 0x25e   : > { %10119 = vmatprep.mubr.msk.bf16.mxu1 %vm1839_vm9, %v12330_v27  ;;  %v1986_v5 = vpop.f32.mrf.mxu1  ;;  %v9918_v49 = vpop.f32.mrf.mxu0 }
 0x25f   : > { %v12569_v10 = vadd.f32 %v2179_v41, %v1986_v5  ;;  %v12600_v41 = vcombine.low %v3833_v46, %v3836_v47 }
 0x260   : > { %v9878_v9 = vpop.f32.mrf.mxu1  ;;  %v12571_v6 = vpop.f32.mrf.mxu0 }
 0x261   : > { %v12573_v26 = vadd.f32 %v9918_v49, %v9878_v9 }
 0x262   : > { %v12577_v11 = vpop.f32.mrf.mxu1  ;;  %v9921_v50 = vpop.f32.mrf.mxu0 }
 0x263   : > { %10160 = vmatmul.mubr.msk.bf16.gmra.mxu0 %vm1839_vm9, %v12339_v29 }
 0x264   : > { %10163 = vmatprep.mubr.msk.bf16.mxu0 %vm1839_vm9, %v12575_v23  ;;  %v9881_v1 = vpop.f32.mrf.mxu1  ;;  %v2195_v57 = vpop.f32.mrf.mxu0 }
 0x265   : > { %10120 = vmatmul.mubr.msk.bf16.gmra.mxu1 %vm1839_vm9, %v12550_v54  ;;  %v12586_v8 = vadd.f32 %v9921_v50, %v9881_v1 }
 0x266   : > { %10123 = vmatprep.mubr.msk.bf16.mxu1 %vm1839_vm9, %v12339_v29  ;;  %v2002_v31 = vpop.f32.mrf.mxu1  ;;  %v9922_v58 = vpop.f32.mrf.mxu0 }
 0x267   : > { %v12594_v24 = vadd.f32 %v2195_v57, %v2002_v31 }
 0x268   : > { %v9882_v0 = vpop.f32.mrf.mxu1  ;;  %v12596_v40 = vpop.f32.mrf.mxu0 }
 0x269   : > { %v12598_v35 = vadd.f32 %v9922_v58, %v9882_v0 }
 0x26a   : > { %v12602_v5 = vpop.f32.mrf.mxu1  ;;  %v9925_v49 = vpop.f32.mrf.mxu0 }
 0x26b   : > { %10164 = vmatmul.mubr.msk.bf16.gmra.mxu0 %vm1839_vm9, %v12350_v2 }
 0x26c   : > { %10167 = vmatprep.mubr.msk.bf16.mxu0 %vm1839_vm9, %v12600_v41  ;;  %v9885_v51 = vpop.f32.mrf.mxu1  ;;  %v2211_v30 = vpop.f32.mrf.mxu0 }
 0x26d   : > { %10124 = vmatmul.mubr.msk.bf16.gmra.mxu1 %vm1839_vm9, %v12575_v23  ;;  %v12610_v36 = vadd.f32 %v9925_v49, %v9885_v51 }
 0x26e   : > { %10127 = vmatprep.mubr.msk.bf16.mxu1 %vm1839_vm9, %v12350_v2  ;;  %v2018_v59 = vpop.f32.mrf.mxu1  ;;  %v9926_v9 = vpop.f32.mrf.mxu0 }
 0x26f   : > { %v12614_v50 = vadd.f32 %v2211_v30, %v2018_v59 }
 0x270   : > { %v9886_v7 = vpop.f32.mrf.mxu1  ;;  %v12616_v25 = vpop.f32.mrf.mxu0 }
 0x271   : > { %v12618_v20 = vadd.f32 %v9926_v9, %v9886_v7 }
 0x272   : > { %v12620_v45 = vpop.f32.mrf.mxu1  ;;  %v9929_v1 = vpop.f32.mrf.mxu0 }
 0x273   : > { %10168 = vmatmul.mubr.msk.bf16.gmra.mxu0 %vm1839_vm9, %v12354_v38 }
 0x274   : > { %v9889_v57 = vpop.f32.mrf.mxu1  ;;  %v2227_v31 = vpop.f32.mrf.mxu0 }
 0x275   : > { %10128 = vmatmul.mubr.msk.bf16.gmra.mxu1 %vm1839_vm9, %v12600_v41  ;;  %v12626_v58 = vadd.f32 %v9929_v1, %v9889_v57 }
 0x276   : > { %10179 = vmatprep.mubr.msk.bf16.mxu1 %vm1839_vm9, %v15291_v13  ;;  %v2034_v46 = vpop.f32.mrf.mxu1  ;;  %v9930_v47 = vpop.f32.mrf.mxu0 }
 0x277   : > { %v12630_v0 = vadd.f32 %v2227_v31, %v2034_v46 }
 0x278   : > { %v9890_v49 = vpop.f32.mrf.mxu1  ;;  %v12632_v51 = vpop.f32.mrf.mxu0 }
 0x279   : > { %15297 = vst [vmem:[#allocation23_spill] sm:$0xff] %v12632_v51  ;;  %v12634_v30 = vadd.f32 %v9930_v47, %v9890_v49 }
 0x27a   : > { %v12636_v59 = vpop.f32.mrf.mxu1  ;;  %v9981_v9 = vpop.f32.mrf.mxu0 }
 0x27c   : > { %v9941_v7 = vpop.f32.mrf.mxu1  ;;  %v3026_v1 = vpop.f32.mrf.mxu0 }
 0x27d   : > { %10180 = vmatmul.mubr.msk.bf16.vlgmr.msra.gmra.mxu1 %vm1839_vm9, %v12462_v60  ;;  %v2446_v57 = vadd.f32 %v9941_v7, %v12452_v62 }
 0x27e   : > { %10183 = vmatprep.mubr.msk.bf16.mxu1 %vm1839_vm9, %v12280_v32  ;;  %v2317_v13 = vpop.f32.mrf.mxu1  ;;  %v9982_v31 = vpop.f32.mrf.mxu0 }
 0x27f   : > { %v2444_v46 = vadd.f32 %v2317_v13, %v12464_v63  ;;  %v12644_v16 = vadd.f32 %v9981_v9, %v2446_v57 }
 0x280   : > { %v9942_v47 = vpop.f32.mrf.mxu1  ;;  %v12646_v49 = vpop.f32.mrf.mxu0 }
 0x281   : > { %v2447_v15 = vadd.f32 %v9942_v47, %v12470_v28  ;;  %v12649_v34 = vadd.f32 %v3026_v1, %v2444_v46 }
 0x282   : > { %v2320_v60 = vpop.f32.mrf.mxu1  ;;  %v9985_v51 = vpop.f32.mrf.mxu0 }
 0x283   : > { %v12652_v62 = vadd.f32 %v2320_v60, %v12477_v48  ;;  %v12654_v7 = vadd.f32 %v9982_v31, %v2447_v15 }
 0x284   : > { %v9945_v32 = vpop.f32.mrf.mxu1  ;;  %v3042_v63 = vpop.f32.mrf.mxu0 }
 0x285   : > { %10184 = vmatmul.mubr.msk.bf16.gmra.mxu1 %vm1839_vm9, %v12485_v33  ;;  %v2450_v9 = vadd.f32 %v9945_v32, %v12481_v4 }
 0x286   : > { %10187 = vmatprep.mubr.msk.bf16.mxu1 %vm1839_vm9, %v12295_v56  ;;  %v2333_v28 = vpop.f32.mrf.mxu1  ;;  %v9986_v1 = vpop.f32.mrf.mxu0 }
 0x287   : > { %v2448_v57 = vadd.f32 %v2333_v28, %v12487_v43  ;;  %v12662_v13 = vadd.f32 %v9985_v51, %v2450_v9 }
 0x288   : > { %v9946_v48 = vpop.f32.mrf.mxu1  ;;  %v12664_v46 = vpop.f32.mrf.mxu0 }
 0x289   : > { %v2451_v15 = vadd.f32 %v9946_v48, %v12493_v14  ;;  %v12667_v31 = vadd.f32 %v3042_v63, %v2448_v57 }
 0x28a   : > { %v2336_v33 = vpop.f32.mrf.mxu1  ;;  %v9989_v47 = vpop.f32.mrf.mxu0 }
 0x28b   : > { %v12670_v4 = vadd.f32 %v2336_v33, %v12500_v44  ;;  %v12672_v60 = vadd.f32 %v9986_v1, %v2451_v15 }
 0x28c   : > { %v9949_v56 = vpop.f32.mrf.mxu1  ;;  %v3058_v43 = vpop.f32.mrf.mxu0 }
 0x28d   : > { %10188 = vmatmul.mubr.msk.bf16.gmra.mxu1 %vm1839_vm9, %v12506_v3  ;;  %v2454_v51 = vadd.f32 %v9949_v56, %v12515_v21 }
 0x28e   : > { %10191 = vmatprep.mubr.msk.bf16.mxu1 %vm1839_vm9, %v12302_v19  ;;  %v2349_v14 = vpop.f32.mrf.mxu1  ;;  %v9990_v32 = vpop.f32.mrf.mxu0 }
 0x28f   : > { %v2452_v63 = vadd.f32 %v2349_v14, %v12523_v39  ;;  %v12680_v9 = vadd.f32 %v9989_v47, %v2454_v51 }
 0x290   : > { %v9950_v44 = vpop.f32.mrf.mxu1  ;;  %v12682_v28 = vpop.f32.mrf.mxu0 }
 0x291   : > { %v2455_v1 = vadd.f32 %v9950_v44, %v12525_v12  ;;  %v12685_v57 = vadd.f32 %v3058_v43, %v2452_v63 }
 0x292   : > { %v2352_v3 = vpop.f32.mrf.mxu1  ;;  %v9993_v48 = vpop.f32.mrf.mxu0 }
 0x293   : > { %v12688_v21 = vadd.f32 %v2352_v3, %v12532_v22  ;;  %v12690_v15 = vadd.f32 %v9990_v32, %v2455_v1 }
 0x294   : > { %v9953_v19 = vpop.f32.mrf.mxu1  ;;  %v3074_v39 = vpop.f32.mrf.mxu0 }
 0x295   : > { %10192 = vmatmul.mubr.msk.bf16.gmra.mxu1 %vm1839_vm9, %v12527_v17  ;;  %v2458_v33 = vadd.f32 %v9953_v19, %v12538_v18 }
 0x296   : > { %10195 = vmatprep.mubr.msk.bf16.mxu1 %vm1839_vm9, %v12330_v27  ;;  %v2365_v12 = vpop.f32.mrf.mxu1  ;;  %v9994_v47 = vpop.f32.mrf.mxu0 }
 0x297   : > { %v2456_v56 = vadd.f32 %v2365_v12, %v12546_v55  ;;  %v12698_v43 = vadd.f32 %v9993_v48, %v2458_v33 }
 0x298   : > { %v9954_v22 = vpop.f32.mrf.mxu1  ;;  %v12700_v51 = vpop.f32.mrf.mxu0 }
 0x299   : > { %v2459_v14 = vadd.f32 %v9954_v22, %v12548_v53  ;;  %v12703_v32 = vadd.f32 %v3074_v39, %v2456_v56 }
 0x29a   : > { %v2368_v17 = vpop.f32.mrf.mxu1  ;;  %v9997_v63 = vpop.f32.mrf.mxu0 }
 0x29b   : > { %v12706_v18 = vadd.f32 %v2368_v17, %v12555_v52  ;;  %v12708_v44 = vadd.f32 %v9994_v47, %v2459_v14  ;;  %v10731_v52 = vld [vmem:[#allocation11 + $0x78] sm:$0xff]  }
 0x29c   : > { %v9957_v27 = vpop.f32.mrf.mxu1  ;;  %v3090_v55 = vpop.f32.mrf.mxu0  ;;  %10211 = vmatprep.subr.bf16.mxu0 %v10731_v52 }
 0x29d   : > { %10196 = vmatmul.mubr.msk.bf16.gmra.mxu1 %vm1839_vm9, %v12550_v54  ;;  %v2462_v1 = vadd.f32 %v9957_v27, %v12561_v42  ;;  %10212 = vmatpush3.bf16.msra.mxu0 %v10731_v52 }
 0x29e   : > { %10199 = vmatprep.mubr.msk.bf16.mxu1 %vm1839_vm9, %v12339_v29  ;;  %v2381_v53 = vpop.f32.mrf.mxu1  ;;  %v9998_v3 = vpop.f32.mrf.mxu0 }
 0x29f   : > { %v2460_v48 = vadd.f32 %v2381_v53, %v12569_v10  ;;  %v12716_v19 = vadd.f32 %v9997_v63, %v2462_v1 }
 0x2a0   : > { %v9958_v39 = vpop.f32.mrf.mxu1  ;;  %v12718_v33 = vpop.f32.mrf.mxu0 }
 0x2a1   : > { %15298 = vst [vmem:[#allocation24_spill] sm:$0xff] %v12718_v33  ;;  %v2463_v12 = vadd.f32 %v9958_v39, %v12573_v26  ;;  %v12721_v47 = vadd.f32 %v3090_v55, %v2460_v48  ;;  %v542_v33 = vld [vmem:[#allocation3 + $0xc] sm:$0x1] }
 0x2a2   : > { %v12723_v54 = vpop.f32.mrf.mxu1  ;;  %v10001_v42 = vpop.f32.mrf.mxu0 }
 0x2a3   : > { %v12725_v29 = vadd.f32 %v9998_v3, %v2463_v12 }
 0x2a4   : > { %v9961_v56 = vpop.f32.mrf.mxu1  ;;  %v3106_v10 = vpop.f32.mrf.mxu0 }
 0x2a5   : > { %10200 = vmatmul.mubr.msk.bf16.gmra.mxu1 %vm1839_vm9, %v12575_v23  ;;  %v2466_v22 = vadd.f32 %v9961_v56, %v12586_v8 }
 0x2a6   : > { %10203 = vmatprep.mubr.msk.bf16.mxu1 %vm1839_vm9, %v12350_v2  ;;  %v2397_v26 = vpop.f32.mrf.mxu1  ;;  %v10002_v14 = vpop.f32.mrf.mxu0 }
 0x2a7   : > { %v2464_v17 = vadd.f32 %v2397_v26, %v12594_v24  ;;  %v12733_v63 = vadd.f32 %v10001_v42, %v2466_v22  ;;  %v10732_v42 = vld [vmem:[#allocation11 + $0x70] sm:$0xff]  }
 0x2a8   : > { %v9962_v27 = vpop.f32.mrf.mxu1  ;;  %v12735_v55 = vpop.f32.mrf.mxu0  ;;  %10213 = vmatprep.subr.bf16.mxu0 %v10732_v42 }
 0x2a9   : > { %15299 = vst [vmem:[#allocation26_spill] sm:$0xff] %v12735_v55  ;;  %v2467_v1 = vadd.f32 %v9962_v27, %v12598_v35  ;;  %v12738_v53 = vadd.f32 %v3106_v10, %v2464_v17  ;;  %10214 = vmatpush3.bf16.msra.mxu0 %v10732_v42 }
 0x2aa   : > { %v12740_v23 = vpop.f32.mrf.mxu1 }
 0x2ab   : > { %v10005_v3 = vpop.f32.mrf.mxu0  ;;  %v12742_v8 = vadd.f32 %v10002_v14, %v2467_v1 }
 0x2ac   : > { %v9965_v48 = vpop.f32.mrf.mxu1 }
 0x2ad   : > { %10204 = vmatmul.mubr.msk.bf16.gmra.mxu1 %vm1839_vm9, %v12600_v41  ;;  %v3122_v2 = vpop.f32.mrf.mxu0  ;;  %v2470_v24 = vadd.f32 %v9965_v48, %v12610_v36 }
 0x2ae   : > { %10207 = vmatprep.mubr.msk.bf16.mxu1 %vm1839_vm9, %v12354_v38  ;;  %v2413_v52 = vpop.f32.mrf.mxu1 }
 0x2af   : > { %v10006_v39 = vpop.f32.mrf.mxu0  ;;  %v2468_v35 = vadd.f32 %v2413_v52, %v12614_v50  ;;  %v12750_v12 = vadd.f32 %v10005_v3, %v2470_v24  ;;  %v15302_v50 = vcombine.low %v12448_v61, %v12456_v37 }
 0x2b0   : > { %v9966_v56 = vpop.f32.mrf.mxu1 }
 0x2b1   : > { %v12752_v10 = vpop.f32.mrf.mxu0  ;;  %v2471_v22 = vadd.f32 %v9966_v56, %v12618_v20  ;;  %v12755_v26 = vadd.f32 %v3122_v2, %v2468_v35 }
 0x2b2   : > { %15300 = vst [vmem:[#allocation27_spill] sm:$0xff] %v12752_v10  ;;  %v12757_v41 = vpop.f32.mrf.mxu1 }
 0x2b3   : > { %15301 = vst [vmem:[#allocation28_spill] sm:$0xff] %v12757_v41  ;;  %v10009_v36 = vpop.f32.mrf.mxu0  ;;  %v12759_v38 = vadd.f32 %v10006_v39, %v2471_v22 }
 0x2b4   : > { %v9969_v14 = vpop.f32.mrf.mxu1 }
 0x2b5   : > { %10208 = vmatmul.mubr.msk.bf16.gmra.mxu1 %vm1839_vm9, %v15302_v50  ;;  %v3138_v17 = vpop.f32.mrf.mxu0  ;;  %v2474_v27 = vadd.f32 %v9969_v14, %v12626_v58  ;;  %v545_v58 = vld [vmem:[#allocation3 + $0x18] sm:$0x1] }
 0x2b6   : > { %v2429_v1 = vpop.f32.mrf.mxu1  ;;  %v546_v22 = vsel %vm11266_vm5, 0, %v545_v58 }
 0x2b7   : > { %v10010_v20 = vpop.f32.mrf.mxu0  ;;  %v2472_v3 = vadd.f32 %v2429_v1, %v12630_v0  ;;  %v12767_v48 = vadd.f32 %v10009_v36, %v2474_v27  ;;  %547 = vst [vmem:[#allocation3 + $0x18] sm:$0x1] %v546_v22 }
 0x2b8   : > { %v9970_v2 = vpop.f32.mrf.mxu1 }
 0x2b9   : > { %v12769_v24 = vpop.f32.mrf.mxu0  ;;  %v2475_v52 = vadd.f32 %v9970_v2, %v12634_v30  ;;  %v12772_v39 = vadd.f32 %v3138_v17, %v2472_v3 }
 0x2ba   : > { %15303 = vst [vmem:[#allocation32_spill] sm:$0xff] %v12769_v24  ;;  %v12774_v35 = vpop.f32.mrf.mxu1 }
 0x2bb   : > { %15304 = vst [vmem:[#allocation35_spill] sm:$0xff] %v12774_v35  ;;  %v12776_v61 = vpop.f32.mrf.mxu0  ;;  %v12778_v37 = vadd.f32 %v10010_v20, %v2475_v52 }
 0x2bd   : > { %v10021_v42 = vpop.f32.mrf.mxu1  ;;  %v12780_v56 = vpop.f32.mrf.mxu0 }
 0x2be   : > { %v12785_v36 = vadd.f32 %v10021_v42, %v12644_v16 }
 0x2bf   : > { %v3282_v30 = vpop.f32.mrf.mxu1  ;;  %v12787_v14 = vpop.f32.mrf.mxu0 }
 0x2c0   : > { %v12790_v50 = vadd.f32 %v3282_v30, %v12649_v34 }
 0x2c1   : > { %v10022_v17 = vpop.f32.mrf.mxu1  ;;  %v12792_v27 = vpop.f32.mrf.mxu0 }
 0x2c2   : > { %15306 = vst [vmem:[#allocation34_spill] sm:$0xff] %v12792_v27  ;;  %v12795_v1 = vadd.f32 %v10022_v17, %v12654_v7  ;;  %v602_v27 = vld [vmem:[#allocation3 + $0x44] sm:$0xf] }
 0x2c3   : > { %v12797_v20 = vpop.f32.mrf.mxu1  ;;  %v12799_v3 = vpop.f32.mrf.mxu0 }
 0x2c4   : > { %15307 = vst [vmem:[#allocation37_spill] sm:$0xff] %v12799_v3 }
 0x2c5   : > { %v10025_v2 = vpop.f32.mrf.mxu1  ;;  %v12801_v16 = vpop.f32.mrf.mxu0 }
 0x2c6   : > { %15308 = vst [vmem:[#allocation38_spill] sm:$0xff] %v12801_v16  ;;  %v12804_v52 = vadd.f32 %v10025_v2, %v12662_v13 }
 0x2c7   : > { %v3298_v58 = vpop.f32.mrf.mxu1  ;;  %v10066_v42 = vpop.f32.mrf.mxu0 }
 0x2c8   : > { %15309 = vst [vmem:[#allocation31_spill] sm:$0xff] %v12804_v52  ;;  %v12807_v34 = vadd.f32 %v3298_v58, %v12667_v31  ;;  %v599_v52 = vld [vmem:[#allocation3 + $0x38] sm:$0xf] }
 0x2c9   : > { %v10026_v22 = vpop.f32.mrf.mxu1  ;;  %v12809_v30 = vpop.f32.mrf.mxu0 }
 0x2ca   : > { %15310 = vst [vmem:[#allocation33_spill] sm:$0xff] %v12807_v34  ;;  %15311 = vst [vmem:[#allocation29_spill] sm:$0xff] %v12809_v30  ;;  %v3416_v7 = vadd.f32 %v10026_v22, %v12672_v60  ;;  %v543_v30 = vsel %vm11266_vm5, 0, %v542_v33 }
 0x2cb   : > { %v12812_v17 = vpop.f32.mrf.mxu1  ;;  %v10069_v24 = vpop.f32.mrf.mxu0  ;;  %544 = vst [vmem:[#allocation3 + $0xc] sm:$0x1] %v543_v30 }
 0x2cc   : > { %v12814_v10 = vadd.f32 %v10066_v42, %v3416_v7  ;;  %v10733_v42 = vld [vmem:[#allocation11 + $0x68] sm:$0xff]  }
 0x2cd   : > { %v10029_v35 = vpop.f32.mrf.mxu1  ;;  %v3570_v41 = vpop.f32.mrf.mxu0  ;;  %v593_v7 = vld [vmem:[#allocation3 + $0x20] sm:$0xf]  ;;  %10215 = vmatprep.subr.bf16.mxu0 %v10733_v42 }
 0x2ce   : > { %v3419_v13 = vadd.f32 %v10029_v35, %v12680_v9  ;;  %v594_v35 = vsel %vm11294_vm8, 0, %v593_v7  ;;  %10216 = vmatpush3.bf16.msra.mxu0 %v10733_v42 }
 0x2cf   : > { %v3314_v2 = vpop.f32.mrf.mxu1  ;;  %v10070_v55 = vpop.f32.mrf.mxu0  ;;  %595 = vst [vmem:[#allocation3 + $0x20] sm:$0xf] %v594_v35 }
 0x2d0   : > { %v3417_v31 = vadd.f32 %v3314_v2, %v12685_v57  ;;  %v12818_v58 = vadd.f32 %v10069_v24, %v3419_v13  ;;  %v590_v24 = vld [vmem:[#allocation3 + $0x14] sm:$0xf] }
 0x2d1   : > { %v10030_v60 = vpop.f32.mrf.mxu1  ;;  %v12822_v22 = vpop.f32.mrf.mxu0  ;;  %v591_v30 = vsel %vm11294_vm8, 0, %v590_v24 }
 0x2d2   : > { %15312 = vst [vmem:[#allocation36_spill] sm:$0xff] %v12822_v22  ;;  %v3420_v16 = vadd.f32 %v10030_v60, %v12690_v15  ;;  %v12825_v34 = vadd.f32 %v3570_v41, %v3417_v31  ;;  %592 = vst [vmem:[#allocation3 + $0x14] sm:$0xf] %v591_v30  ;;  %v551_v41 = vld [vmem:[#allocation3 + $0x30] sm:$0x1] }
 0x2d3   : > { %v12829_v3 = vpop.f32.mrf.mxu1  ;;  %v10073_v57 = vpop.f32.mrf.mxu0  ;;  %v552_v7 = vsel %vm11266_vm5, 0, %v551_v41 }
 0x2d4   : > { %15314 = vst [vmem:[#allocation39_spill] sm:$0xff] %v12829_v3  ;;  %v12831_v33 = vadd.f32 %v10070_v55, %v3420_v16  ;;  %553 = vst [vmem:[#allocation3 + $0x30] sm:$0x1] %v552_v7  ;;  %v548_v55 = vld [vmem:[#allocation3 + $0x24] sm:$0x1] }
 0x2d5   : > { %v10033_v13 = vpop.f32.mrf.mxu1  ;;  %v3586_v2 = vpop.f32.mrf.mxu0  ;;  %v549_v24 = vsel %vm11266_vm5, 0, %v548_v55  ;;  %v563_v3 = vld [vmem:[#allocation3 + $0x60] sm:$0x1] }
 0x2d6   : > { %v3423_v15 = vadd.f32 %v10033_v13, %v12698_v43  ;;  %550 = vst [vmem:[#allocation3 + $0x24] sm:$0x1] %v549_v24 }
 0x2d7   : > { %v3330_v31 = vpop.f32.mrf.mxu1  ;;  %v10074_v60 = vpop.f32.mrf.mxu0 }
 0x2d8   : > { %v3421_v35 = vadd.f32 %v3330_v31, %v12703_v32  ;;  %v12839_v22 = vadd.f32 %v10073_v57, %v3423_v15  ;;  %v600_v57 = vsel %vm11294_vm8, 0, %v599_v52 }
 0x2d9   : > { %v10034_v16 = vpop.f32.mrf.mxu1  ;;  %v12841_v42 = vpop.f32.mrf.mxu0  ;;  %601 = vst [vmem:[#allocation3 + $0x38] sm:$0xf] %v600_v57 }
 0x2da   : > { %15315 = vst [vmem:[#allocation40_spill] sm:$0xff] %v12841_v42  ;;  %v3424_v43 = vadd.f32 %v10034_v16, %v12708_v44  ;;  %v12846_v30 = vadd.f32 %v3586_v2, %v3421_v35  ;;  %v596_v44 = vld [vmem:[#allocation3 + $0x2c] sm:$0xf] }
 0x2db   : > { %v12848_v13 = vpop.f32.mrf.mxu1  ;;  %v10077_v41 = vpop.f32.mrf.mxu0  ;;  %v597_v16 = vsel %vm11294_vm8, 0, %v596_v44  ;;  %v554_v44 = vld [vmem:[#allocation3 + $0x3c] sm:$0x1] }
 0x2dc   : > { %15316 = vst [vmem:[#allocation41_spill] sm:$0xff] %v12848_v13  ;;  %v12850_v32 = vadd.f32 %v10074_v60, %v3424_v43  ;;  %598 = vst [vmem:[#allocation3 + $0x2c] sm:$0xf] %v597_v16  ;;  %v557_v13 = vld [vmem:[#allocation3 + $0x48] sm:$0x1] }
 0x2dd   : > { %v10037_v15 = vpop.f32.mrf.mxu1  ;;  %v3602_v31 = vpop.f32.mrf.mxu0 }
 0x2de   : > { %v3427_v7 = vadd.f32 %v10037_v15, %v12716_v19 }
 0x2df   : > { %v3346_v55 = vpop.f32.mrf.mxu1  ;;  %v10078_v42 = vpop.f32.mrf.mxu0 }
 0x2e0   : > { %v3425_v2 = vadd.f32 %v3346_v55, %v12721_v47  ;;  %v12856_v35 = vadd.f32 %v10077_v41, %v3427_v7  ;;  %v558_v7 = vsel %vm11266_vm5, 0, %v557_v13  ;;  %v605_v13 = vld [vmem:[#allocation3 + $0x50] sm:$0xf] }
 0x2e1   : > { %v10038_v60 = vpop.f32.mrf.mxu1  ;;  %v12860_v24 = vpop.f32.mrf.mxu0  ;;  %559 = vst [vmem:[#allocation3 + $0x48] sm:$0x1] %v558_v7  ;;  %v606_v7 = vsel %vm11294_vm8, 0, %v605_v13 }
 0x2e2   : > { %15317 = vst [vmem:[#allocation22_spill] sm:$0xff] %v12860_v24  ;;  %v3428_v52 = vadd.f32 %v10038_v60, %v12725_v29  ;;  %v12863_v43 = vadd.f32 %v3602_v31, %v3425_v2  ;;  %v555_v29 = vsel %vm11266_vm5, 0, %v554_v44  ;;  %v10736_v44 = vld [vmem:[#allocation11 + $0x10] sm:$0xff]   ;;  %607 = vst [vmem:[#allocation3 + $0x50] sm:$0xf] %v606_v7 }
 0x2e3   : > { %v12865_v57 = vpop.f32.mrf.mxu1  ;;  %v10081_v19 = vpop.f32.mrf.mxu0  ;;  %556 = vst [vmem:[#allocation3 + $0x3c] sm:$0x1] %v555_v29 }
 0x2e4   : > { %15318 = vst [vmem:[#allocation19_spill] sm:$0xff] %v12865_v57  ;;  %v12867_v15 = vadd.f32 %v10078_v42, %v3428_v52  ;;  %v10734_v52 = vld [vmem:[#allocation11 + $0x60] sm:$0xff]   ;;  %v10735_v57 = vld [vmem:[#allocation11 + $0x18] sm:$0xff]  }
 0x2e5   : > { %v10041_v47 = vpop.f32.mrf.mxu1  ;;  %v3618_v41 = vpop.f32.mrf.mxu0  ;;  %10217 = vmatprep.subr.bf16.mxu0 %v10734_v52  ;;  %10251 = vmatprep.subr.bf16.mxu1 %v10735_v57 }
 0x2e6   : > { %v3431_v55 = vadd.f32 %v10041_v47, %v12733_v63  ;;  %10218 = vmatpush3.bf16.msra.mxu0 %v10734_v52  ;;  %10252 = vmatpush3.bf16.msra.mxu1 %v10735_v57 }
 0x2e7   : > { %v3362_v16 = vpop.f32.mrf.mxu1  ;;  %v10082_v24 = vpop.f32.mrf.mxu0  ;;  %10253 = vmatprep.subr.bf16.mxu1 %v10736_v44 }
 0x2e8   : > { %v3429_v31 = vadd.f32 %v3362_v16, %v12738_v53  ;;  %v12875_v2 = vadd.f32 %v10081_v19, %v3431_v55  ;;  %v603_v55 = vsel %vm11294_vm8, 0, %v602_v27  ;;  %v560_v27 = vld [vmem:[#allocation3 + $0x54] sm:$0x1] }
 0x2e9   : > { %v10042_v42 = vpop.f32.mrf.mxu1  ;;  %v12877_v60 = vpop.f32.mrf.mxu0  ;;  %604 = vst [vmem:[#allocation3 + $0x44] sm:$0xf] %v603_v55  ;;  %v561_v57 = vsel %vm11266_vm5, 0, %v560_v27 }
 0x2ea   : > { %15319 = vst [vmem:[#allocation20_spill] sm:$0xff] %v12877_v60  ;;  %v3432_v63 = vadd.f32 %v10042_v42, %v12742_v8  ;;  %v12880_v47 = vadd.f32 %v3618_v41, %v3429_v31  ;;  %v564_v8 = vsel %vm11266_vm5, 0, %v563_v3  ;;  %10254 = vmatpush3.bf16.msra.mxu1 %v10736_v44  ;;  %562 = vst [vmem:[#allocation3 + $0x54] sm:$0x1] %v561_v57  ;;  %v611_v44 = vld [vmem:[#allocation3 + $0x68] sm:$0xf] }
 0x2eb   : > { %v12884_v53 = vpop.f32.mrf.mxu1  ;;  %v10085_v19 = vpop.f32.mrf.mxu0  ;;  %565 = vst [vmem:[#allocation3 + $0x60] sm:$0x1] %v564_v8 }
 0x2ec   : > { %15320 = vst [vmem:[#allocation42_spill] sm:$0xff] %v12884_v53  ;;  %v12890_v41 = vadd.f32 %v10082_v24, %v3432_v63 }
 0x2ed   : > { %v10045_v16 = vpop.f32.mrf.mxu1  ;;  %v3634_v29 = vpop.f32.mrf.mxu0 }
 0x2ee   : > { %v3435_v31 = vadd.f32 %v10045_v16, %v12750_v12 }
 0x2ef   : > { %v3378_v42 = vpop.f32.mrf.mxu1  ;;  %v10086_v13 = vpop.f32.mrf.mxu0 }
 0x2f0   : > { %v3433_v7 = vadd.f32 %v3378_v42, %v12755_v26  ;;  %v12894_v60 = vadd.f32 %v10085_v19, %v3435_v31  ;;  %v10737_v19 = vld [vmem:[#allocation11 + $0x8] sm:$0xff]   ;;  %v612_v31 = vsel %vm11294_vm8, 0, %v611_v44  ;;  %v10738_v44 = vld [vmem:[#allocation11] sm:$0xff]  }
 0x2f1   : > { %v10046_v3 = vpop.f32.mrf.mxu1  ;;  %v12896_v24 = vpop.f32.mrf.mxu0  ;;  %10255 = vmatprep.subr.bf16.mxu1 %v10737_v19  ;;  %613 = vst [vmem:[#allocation3 + $0x68] sm:$0xf] %v612_v31  ;;  %v569_v31 = vld [vmem:[#allocation3 + $0x78] sm:$0x1] }
 0x2f2   : > { %15321 = vst [vmem:[#allocation43_spill] sm:$0xff] %v12896_v24  ;;  %v3436_v52 = vadd.f32 %v10046_v3, %v12759_v38  ;;  %v12901_v63 = vadd.f32 %v3634_v29, %v3433_v7  ;;  %v608_v38 = vld [vmem:[#allocation3 + $0x5c] sm:$0xf]  ;;  %10256 = vmatpush3.bf16.msra.mxu1 %v10737_v19  ;;  %v5269_v19 = vld [vmem:[#allocation3 + $0x4] sm:$0xf] }
 0x2f3   : > { %v12903_v12 = vpop.f32.mrf.mxu1  ;;  %v10089_v55 = vpop.f32.mrf.mxu0  ;;  %10257 = vmatprep.subr.bf16.mxu1 %v10738_v44 }
 0x2f4   : > { %15322 = vst [vmem:[#allocation44_spill] sm:$0xff] %v12903_v12  ;;  %v12905_v8 = vadd.f32 %v10086_v13, %v3436_v52  ;;  %v609_v13 = vsel %vm11294_vm8, 0, %v608_v38 }
 0x2f5   : > { %v10049_v26 = vpop.f32.mrf.mxu1  ;;  %v3650_v42 = vpop.f32.mrf.mxu0  ;;  %610 = vst [vmem:[#allocation3 + $0x5c] sm:$0xf] %v609_v13  ;;  %v12933_v13 = vld [vmem:[#allocation11 + $0xd8] sm:$0xff]  }
 0x2f6   : > { %v3439_v16 = vadd.f32 %v10049_v26, %v12767_v48  ;;  %10258 = vmatpush3.bf16.msra.mxu1 %v10738_v44  ;;  %15324 = vst [vmem:[#allocation46_spill] sm:$0xff] %v12933_v13  ;;  %10291 = vmatprep.subr.bf16.mxu0 %v12933_v13  ;;  %v572_v13 = vld [vmem:[#allocation3 + $0x84] sm:$0x1] }
 0x2f7   : > { %v3394_v27 = vpop.f32.mrf.mxu1  ;;  %v10090_v52 = vpop.f32.mrf.mxu0 }
 0x2f8   : > { %v3437_v29 = vadd.f32 %v3394_v27, %v12772_v39  ;;  %v12911_v7 = vadd.f32 %v10089_v55, %v3439_v16  ;;  %v570_v39 = vsel %vm11266_vm5, 0, %v569_v31  ;;  %v5268_v55 = vld [vmem:[#allocation3] sm:$0xf] }
 0x2f9   : > { %v10050_v3 = vpop.f32.mrf.mxu1  ;;  %571 = vst [vmem:[#allocation3 + $0x78] sm:$0x1] %v570_v39  ;;  %v9148_v27 = vcombine.low %v5268_v55, %v5269_v19 }
 0x2fa   : > { %v3440_v48 = vadd.f32 %v10050_v3, %v12778_v37  ;;  %v12916_v57 = vadd.f32 %v3650_v42, %v3437_v29  ;;  %v566_v37 = vld [vmem:[#allocation3 + $0x6c] sm:$0x1]  ;;  %v617_v3 = vld [vmem:[#allocation3 + $0x80] sm:$0xf] }
 0x2fb   : > { %v12918_v26 = vpop.f32.mrf.mxu1  ;;  %v567_v42 = vsel %vm11266_vm5, 0, %v566_v37  ;;  %10259 = vmatprep.mubr.msk.bf16.mxu1 %vm1839_vm9, %v9148_v27 }
 0x2fc   : > { %15323 = vst [vmem:[#allocation45_spill] sm:$0xff] %v12918_v26  ;;  %v12920_v24 = vadd.f32 %v10090_v52, %v3440_v48  ;;  %568 = vst [vmem:[#allocation3 + $0x6c] sm:$0x1] %v567_v42  ;;  %v618_v48 = vsel %vm11294_vm8, 0, %v617_v3  ;;  %v12937_v52 = vpop.f32.mrf.mxu0  ;;  %v614_v3 = vld [vmem:[#allocation3 + $0x74] sm:$0xf] }
 0x2fd   : > { %v12924_v16 = vpop.f32.mrf.mxu1  ;;  %15325 = vst [vmem:[#allocation47_spill] sm:$0xff] %v12937_v52  ;;  %619 = vst [vmem:[#allocation3 + $0x80] sm:$0xf] %v618_v48  ;;  %v615_v26 = vsel %vm11294_vm8, 0, %v614_v3  ;;  %v575_v48 = vld [vmem:[#allocation3 + $0x90] sm:$0x1] }
 0x2fe   : > { %v12944_v39 = vpop.f32.mrf.mxu0  ;;  %616 = vst [vmem:[#allocation3 + $0x74] sm:$0xf] %v615_v26  ;;  %v576_v53 = vsel %vm11266_vm5, 0, %v575_v48 }
 0x2ff   : > { %v12928_v38 = vpop.f32.mrf.mxu1  ;;  %577 = vst [vmem:[#allocation3 + $0x90] sm:$0x1] %v576_v53 }
 0x300   : > { %v12951_v37 = vpop.f32.mrf.mxu0 }
 0x301   : > { %v12931_v29 = vpop.f32.mrf.mxu1  ;;  %15327 = vst [vmem:[#allocation49_spill] sm:$0xff] %v12951_v37 }
 0x303   : > { %v12939_v31 = vpop.f32.mrf.mxu1 }
 0x305   : > { %v12942_v44 = vpop.f32.mrf.mxu1 }
 0x307   : > { %v12946_v55 = vpop.f32.mrf.mxu1 }
 0x309   : > { %v10106_v19 = vpop.f32.mrf.mxu1 }
 0x30a   : > { %v12949_v27 = vadd.f32 %v10106_v19, %v12814_v10  ;;  %v573_v10 = vsel %vm11266_vm5, 0, %v572_v13  ;;  %v623_v19 = vld [vmem:[#allocation3 + $0x98] sm:$0xf] }
 0x30b   : > { %v12953_v42 = vpop.f32.mrf.mxu1  ;;  %574 = vst [vmem:[#allocation3 + $0x84] sm:$0x1] %v573_v10  ;;  %v624_v3 = vsel %vm11294_vm8, 0, %v623_v19 }
 0x30c   : > { %15326 = vst [vmem:[#allocation48_spill] sm:$0xff] %v12949_v27  ;;  %15328 = vst [vmem:[#allocation50_spill] sm:$0xff] %v12953_v42  ;;  %v12964_v27 = vpop.f32.mrf.mxu0 }
 0x30d   : > { %v10109_v52 = vpop.f32.mrf.mxu1  ;;  %625 = vst [vmem:[#allocation3 + $0x98] sm:$0xf] %v624_v3 }
 0x30e   : > { %v12958_v12 = vadd.f32 %v10109_v52, %v12818_v58  ;;  %v12974_v52 = vpop.f32.mrf.mxu0 }
 0x30f   : > { %v4023_v42 = vpop.f32.mrf.mxu1 }
 0x310   : > { %15329 = vst [vmem:[#allocation51_spill] sm:$0xff] %v12958_v12  ;;  %v12969_v37 = vadd.f32 %v4023_v42, %v12825_v34  ;;  %v620_v12 = vld [vmem:[#allocation3 + $0x8c] sm:$0xf]  ;;  %v12983_v19 = vpop.f32.mrf.mxu0 }
 0x311   : > { %v10110_v58 = vpop.f32.mrf.mxu1  ;;  %v621_v10 = vsel %vm11294_vm8, 0, %v620_v12  ;;  %v578_v12 = vld [vmem:[#allocation3 + $0x9c] sm:$0x1] }
 0x312   : > { %15330 = vst [vmem:[#allocation52_spill] sm:$0xff] %v12969_v37  ;;  %v12972_v26 = vadd.f32 %v10110_v58, %v12831_v33  ;;  %622 = vst [vmem:[#allocation3 + $0x8c] sm:$0xf] %v621_v10  ;;  %v581_v33 = vld [vmem:[#allocation3 + $0xa8] sm:$0x1]  ;;  %v579_v10 = vsel %vm11266_vm5, 0, %v578_v12 }
 0x313   : > { %v12976_v13 = vpop.f32.mrf.mxu1  ;;  %v582_v58 = vsel %vm11266_vm5, 0, %v581_v33  ;;  %580 = vst [vmem:[#allocation3 + $0x9c] sm:$0x1] %v579_v10  ;;  %v626_v10 = vld [vmem:[#allocation3 + $0xa4] sm:$0xf] }
 0x314   : > { %15331 = vst [vmem:[#allocation53_spill] sm:$0xff] %v12972_v26  ;;  %583 = vst [vmem:[#allocation3 + $0xa8] sm:$0x1] %v582_v58 }
 0x315   : > { %v10113_v48 = vpop.f32.mrf.mxu1 }
 0x316   : > { %v12979_v53 = vadd.f32 %v10113_v48, %v12839_v22  ;;  %v12993_v22 = vpop.f32.mrf.mxu0 }
 0x317   : > { %v4039_v34 = vpop.f32.mrf.mxu1 }
 0x318   : > { %15332 = vst [vmem:[#allocation54_spill] sm:$0xff] %v12979_v53  ;;  %v12986_v42 = vadd.f32 %v4039_v34, %v12846_v30  ;;  %v13002_v34 = vpop.f32.mrf.mxu0 }
 0x319   : > { %v10114_v3 = vpop.f32.mrf.mxu1 }
 0x31a   : > { %15333 = vst [vmem:[#allocation55_spill] sm:$0xff] %v12986_v42  ;;  %v12991_v26 = vadd.f32 %v10114_v3, %v12850_v32  ;;  %v629_v42 = vld [vmem:[#allocation3 + $0xb0] sm:$0xf]  ;;  %v13012_v12 = vpop.f32.mrf.mxu0 }
 0x31b   : > { %v12995_v48 = vpop.f32.mrf.mxu1  ;;  %v630_v3 = vsel %vm11294_vm8, 0, %v629_v42 }
 0x31c   : > { %15334 = vst [vmem:[#allocation56_spill] sm:$0xff] %v12991_v26  ;;  %631 = vst [vmem:[#allocation3 + $0xb0] sm:$0xf] %v630_v3 }
 0x31d   : > { %v10117_v53 = vpop.f32.mrf.mxu1 }
 0x31e   : > { %v13000_v30 = vadd.f32 %v10117_v53, %v12856_v35 }
 0x31f   : > { %v4055_v33 = vpop.f32.mrf.mxu1 }
 0x320   : > { %15335 = vst [vmem:[#allocation57_spill] sm:$0xff] %v13000_v30  ;;  %v13005_v32 = vadd.f32 %v4055_v33, %v12863_v43  ;;  %v587_v30 = vld [vmem:[#allocation3 + $0xc0] sm:$0x1]  ;;  %v627_v43 = vsel %vm11294_vm8, 0, %v626_v10  ;;  %v13023_v33 = vpop.f32.mrf.mxu0 }
 0x321   : > { %v10118_v58 = vpop.f32.mrf.mxu1  ;;  %v588_v42 = vsel %vm11266_vm5, 0, %v587_v30  ;;  %628 = vst [vmem:[#allocation3 + $0xa4] sm:$0xf] %v627_v43 }
 0x322   : > { %v13010_v26 = vadd.f32 %v10118_v58, %v12867_v15  ;;  %589 = vst [vmem:[#allocation3 + $0xc0] sm:$0x1] %v588_v42  ;;  %v584_v58 = vld [vmem:[#allocation3 + $0xb4] sm:$0x1]  ;;  %v13035_v30 = vpop.f32.mrf.mxu0 }
 0x323   : > { %v13014_v35 = vpop.f32.mrf.mxu1 }
 0x324   : > { %15336 = vst [vmem:[#allocation58_spill] sm:$0xff] %v13010_v26  ;;  %15337 = vst [vmem:[#allocation59_spill] sm:$0xff] %v13014_v35  ;;  %v635_v26 = vld [vmem:[#allocation3 + $0xc8] sm:$0xf] }
 0x325   : > { %v10121_v53 = vpop.f32.mrf.mxu1 }
 0x326   : > { %v13017_v37 = vadd.f32 %v10121_v53, %v12875_v2  ;;  %v585_v2 = vsel %vm11266_vm5, 0, %v584_v58  ;;  %v636_v53 = vsel %vm11294_vm8, 0, %v635_v26 }
 0x327   : > { %v4071_v15 = vpop.f32.mrf.mxu1  ;;  %586 = vst [vmem:[#allocation3 + $0xb4] sm:$0x1] %v585_v2  ;;  %637 = vst [vmem:[#allocation3 + $0xc8] sm:$0xf] %v636_v53  ;;  %v3154_v53 = vadd.f32 %v12646_v49, %v12652_v62  ;;  %v3158_v49 = vadd.f32 %v12664_v46, %v12670_v4  ;;  %v3166_v46 = vadd.f32 %v12700_v51, %v12706_v18  ;;  %v15342_v51 = vld [vmem:[#allocation34_spill] sm:$0xff] }
 0x328   : > { %v13026_v3 = vadd.f32 %v4071_v15, %v12880_v47  ;;  %v13042_v15 = vpop.f32.mrf.mxu0 }
 0x329   : > { %v10122_v35 = vpop.f32.mrf.mxu1 }
 0x32a   : > { %15338 = vst [vmem:[#allocation60_spill] sm:$0xff] %v13026_v3  ;;  %v13033_v10 = vadd.f32 %v10122_v35, %v12890_v41  ;;  %v13050_v35 = vpop.f32.mrf.mxu0 }
 0x32b   : > { %v13037_v43 = vpop.f32.mrf.mxu1 }
 0x32c   : > { %15339 = vst [vmem:[#allocation61_spill] sm:$0xff] %v13033_v10  ;;  %v13070_v62 = vpop.f32.mrf.mxu0 }
 0x32d   : > { %v10125_v47 = vpop.f32.mrf.mxu1 }
 0x32e   : > { %v13040_v42 = vadd.f32 %v10125_v47, %v12894_v60  ;;  %v2183_v60 = vadd.f32 %v12571_v6, %v12577_v11  ;;  %v3667_v47 = vadd.f32 %v12776_v61, %v12785_v36  ;;  %v632_v11 = vld [vmem:[#allocation3 + $0xbc] sm:$0xf]  ;;  %v3665_v36 = vadd.f32 %v12780_v56, %v12790_v50 }
 0x32f   : > { %v4087_v3 = vpop.f32.mrf.mxu1 }
 0x330   : > { %v13045_v58 = vadd.f32 %v4087_v3, %v12901_v63  ;;  %v2215_v3 = vadd.f32 %v12616_v25, %v12620_v45  ;;  %v4120_v61 = vadd.f32 %v12924_v16, %v3667_v47  ;;  %v3414_v25 = vadd.f32 %v12812_v17, %v3158_v49  ;;  %v15340_v17 = vld [vmem:[#allocation23_spill] sm:$0xff]  ;;  %v4279_v47 = vpop.f32.mrf.mxu0 }
 0x331   : > { %v10126_v26 = vpop.f32.mrf.mxu1  ;;  %v3162_v45 = vadd.f32 %v12682_v28, %v12688_v21  ;;  %v4118_v50 = vadd.f32 %v12928_v38, %v3665_v36  ;;  %v2231_v28 = vadd.f32 %v15340_v17, %v12636_v59  ;;  %v15341_v21 = vld [vmem:[#allocation39_spill] sm:$0xff]  ;;  %v15345_v38 = vld [vmem:[#allocation41_spill] sm:$0xff] }
 0x332   : > { %v13048_v41 = vadd.f32 %v10126_v26, %v12905_v8  ;;  %v2199_v8 = vadd.f32 %v12596_v40, %v12602_v5  ;;  %v3410_v26 = vadd.f32 %v12797_v20, %v3154_v53  ;;  %v633_v40 = vsel %vm11294_vm8, 0, %v632_v11  ;;  %v13086_v20 = vld [vmem:[#allocation11 + $0x38] sm:$0xff]   ;;  %v15344_v53 = vld [vmem:[#allocation37_spill] sm:$0xff] }
 0x333   : > { %v13052_v2 = vpop.f32.mrf.mxu1  ;;  %v2461_v5 = vadd.f32 %v12723_v54, %v2183_v60  ;;  %634 = vst [vmem:[#allocation3 + $0xbc] sm:$0xf] %v633_v40  ;;  %v3418_v16 = vadd.f32 %v15341_v21, %v3162_v45  ;;  %10331 = vmatprep.subr.bf16.mxu1 %v13086_v20  ;;  %v4360_v59 = vadd.f32 %v12944_v39, %v4120_v61  ;;  %v15349_v40 = vld [vmem:[#allocation29_spill] sm:$0xff]  ;;  %v15352_v21 = vld [vmem:[#allocation28_spill] sm:$0xff] }
 0x334   : > { %v2465_v56 = vadd.f32 %v12740_v23, %v2199_v8  ;;  %v3666_v18 = vadd.f32 %v15342_v51, %v3410_v26  ;;  %v15347_v8 = vld [vmem:[#allocation38_spill] sm:$0xff]  ;;  %v3670_v45 = vadd.f32 %v15349_v40, %v3414_v25  ;;  %v15351_v61 = vld [vmem:[#allocation49_spill] sm:$0xff] }
 0x335   : > { %v10129_v10 = vpop.f32.mrf.mxu1  ;;  %v15354_v25 = vld [vmem:[#allocation50_spill] sm:$0xff] }
 0x336   : > { %v13061_v63 = vadd.f32 %v10129_v10, %v12911_v7  ;;  %v15343_v10 = vld [vmem:[#allocation31_spill] sm:$0xff]  ;;  %v4119_v26 = vadd.f32 %v12939_v31, %v3666_v18  ;;  %v13124_v31 = vadd.f32 %v15352_v21, %v2215_v3  ;;  %v4123_v18 = vadd.f32 %v15354_v25, %v3670_v45  ;;  %v15360_v21 = vld [vmem:[#allocation52_spill] sm:$0xff] }
 0x337   : > { %v4103_v6 = vpop.f32.mrf.mxu1  ;;  %v3671_v60 = vadd.f32 %v15344_v53, %v15343_v10  ;;  %v15355_v10 = vld [vmem:[#allocation36_spill] sm:$0xff] }
 0x338   : > { %v13076_v7 = vadd.f32 %v4103_v6, %v12916_v57  ;;  %v3668_v57 = vadd.f32 %v12787_v14, %v12795_v1  ;;  %v3422_v14 = vadd.f32 %v15345_v38, %v3166_v46  ;;  %v15348_v6 = vld [vmem:[#allocation24_spill] sm:$0xff]  ;;  %v3674_v53 = vadd.f32 %v15355_v10, %v3418_v16 }
 0x339   : > { %v10130_v4 = vpop.f32.mrf.mxu1  ;;  %v3170_v11 = vadd.f32 %v15348_v6, %v2461_v5  ;;  %v4124_v36 = vadd.f32 %v12942_v44, %v3671_v60  ;;  %v4358_v5 = vadd.f32 %v15351_v61, %v4118_v50  ;;  %v15353_v44 = vld [vmem:[#allocation35_spill] sm:$0xff]  ;;  %v10154_v60 = vpop.f32.mrf.mxu0  ;;  %v15356_v38 = vld [vmem:[#allocation40_spill] sm:$0xff]  ;;  %v4359_v6 = vadd.f32 %v12974_v52, %v4119_v26 }
 0x33a   : > { %v13093_v54 = vadd.f32 %v10130_v4, %v12920_v24  ;;  %v4121_v1 = vadd.f32 %v12931_v29, %v3668_v57  ;;  %v15346_v24 = vld [vmem:[#allocation33_spill] sm:$0xff]  ;;  %v15350_v29 = vld [vmem:[#allocation26_spill] sm:$0xff]  ;;  %v13127_v51 = vadd.f32 %v15353_v44, %v2231_v28  ;;  %v15357_v28 = vld [vmem:[#allocation19_spill] sm:$0xff] }
 0x33b   : > { %v13101_v23 = vpop.f32.mrf.mxu1  ;;  %v3669_v49 = vadd.f32 %v15347_v8, %v15346_v24  ;;  %v13116_v4 = vld [vmem:[%s15121_s5] ss:$0 sm:$0xff]  ;;  %v13119_v57 = vadd.f32 %v15350_v29, %v2465_v56  ;;  %v3678_v24 = vadd.f32 %v15356_v38, %v3422_v14  ;;  %v4364_v40 = vadd.f32 %v12983_v19, %v4124_v36  ;;  %v15359_v52 = vld [vmem:[#allocation51_spill] sm:$0xff] }
 0x33c   : > { %v13134_v56 = vld [vmem:[%s15122_s6] ss:$0 sm:$0xff]  ;;  %v4361_v8 = vadd.f32 %v12964_v27, %v4121_v1  ;;  %v13156_v19 = vadd.f32 %v13023_v33, %v15359_v52  ;;  %v15362_v33 = vld [vmem:[#allocation54_spill] sm:$0xff] }
 0x33d   : > { %v10181_v46 = vpop.f32.mrf.mxu1  ;;  %v4122_v17 = vadd.f32 %v12946_v55, %v3669_v49  ;;  %v13140_v49 = vadd.f32 %v15357_v28, %v3170_v11  ;;  %v4131_v27 = vadd.f32 %v12995_v48, %v3678_v24  ;;  %v15358_v11 = vld [vmem:[#allocation48_spill] sm:$0xff]  ;;  %v13162_v48 = vadd.f32 %v13035_v30, %v15360_v21  ;;  %v15361_v44 = vld [vmem:[#allocation53_spill] sm:$0xff] }
 0x33e   : > { %v4600_v39 = vadd.f32 %v10181_v46, %v4360_v59  ;;  %v4127_v59 = vadd.f32 %v12976_v13, %v3674_v53  ;;  %v4365_v61 = vadd.f32 %v13002_v34, %v15358_v11  ;;  %v13152_v13 = vadd.f32 %v13012_v12, %v4123_v18 }
 0x33f   : > { %v4471_v55 = vpop.f32.mrf.mxu1  ;;  %v4362_v29 = vadd.f32 %v12993_v22, %v4122_v17  ;;  %v13166_v34 = vadd.f32 %v13042_v15, %v15361_v44  ;;  %v13173_v25 = vadd.f32 %v13070_v62, %v15362_v33  ;;  %v15364_v15 = vld [vmem:[#allocation56_spill] sm:$0xff] }
 0x340   : > { %v4638_v50 = vmul.f32 %v13116_v4, %v4600_v39  ;;  %v4598_v3 = vadd.f32 %v4471_v55, %v4358_v5  ;;  %v4282_v39 = vpop.f32.mrf.mxu0  ;;  %v13169_v12 = vadd.f32 %v13050_v35, %v4127_v59 }
 0x341   : > { %v10182_v16 = vpop.f32.mrf.mxu1  ;;  %v13183_v35 = vadd.f32 %v4282_v39, %v4131_v27 }
 0x342   : > { %v4676_v45 = vadd.f32 %v13134_v56, %v4638_v50  ;;  %v4636_v46 = vmul.f32 %v13116_v4, %v4598_v3  ;;  %v4601_v14 = vadd.f32 %v10182_v16, %v4361_v8  ;;  %v10157_v38 = vpop.f32.mrf.mxu0  ;;  %v15363_v50 = vld [vmem:[#allocation55_spill] sm:$0xff]  ;;  %v13181_v8 = vadd.f32 %v10154_v60, %v15364_v15  ;;  %v15365_v16 = vld [vmem:[#allocation57_spill] sm:$0xff] }
 0x343   : > { %v4474_v1 = vpop.f32.mrf.mxu1  ;;  %v13178_v3 = vadd.f32 %v4279_v47, %v15363_v50 }
 0x344   : > { %v4708_v26 = vmax.f32 %v4676_v45, 0.0  ;;  %v4674_v36 = vadd.f32 %v13134_v56, %v4636_v46  ;;  %v4639_v5 = vmul.f32 %v13116_v4, %v4601_v14  ;;  %v4599_v22 = vadd.f32 %v4474_v1, %v4359_v6 }
 0x345   : > { %v10185_v17 = vpop.f32.mrf.mxu1  ;;  %v13186_v6 = vadd.f32 %v10157_v38, %v15365_v16 }
 0x346   : > { %v9406_v18 = vpack.c.bf16 %v4708_v26, %v4708_v26  ;;  %v4706_v10 = vmax.f32 %v4674_v36, 0.0  ;;  %v4677_v53 = vadd.f32 %v13134_v56, %v4639_v5  ;;  %v4637_v55 = vmul.f32 %v13116_v4, %v4599_v22  ;;  %v5161_v26 = vld [vmem:[#allocation3 + $0x18] sm:$0xf] }
 0x347   : > { %v4604_v30 = vadd.f32 %v10185_v17, %v4364_v40  ;;  %v4487_v24 = vpop.f32.mrf.mxu1 }
 0x348   : > { %v4852_v28 = vshrl.u32 %v9406_v18, 16  ;;  %v9404_v62 = vpack.c.bf16 %v4706_v10, %v4706_v10  ;;  %v4709_v59 = vmax.f32 %v4677_v53, 0.0  ;;  %v4855_v45 = vshll.u32 %v9406_v18, 16  ;;  %v5154_v18 = vld [vmem:[#allocation3 + $0xc] sm:$0xf] }
 0x349   : > { %v4675_v46 = vadd.f32 %v13134_v56, %v4637_v55  ;;  %v4642_v40 = vmul.f32 %v13116_v4, %v4604_v30  ;;  %v4602_v14 = vadd.f32 %v4487_v24, %v4362_v29  ;;  %v10186_v1 = vpop.f32.mrf.mxu1 }
 0x34a   : > { %v4854_v47 = vrot.slane %v4852_v28, 7  ;;  %v4835_v11 = vshrl.u32 %v9404_v62, 16  ;;  %v4838_v52 = vshll.u32 %v9404_v62, 16  ;;  %v9407_v60 = vpack.c.bf16 %v4709_v59, %v4709_v59 }
 0x34b   : > { %v4707_v39 = vmax.f32 %v4675_v46, 0.0  ;;  %v4680_v27 = vadd.f32 %v13134_v56, %v4642_v40  ;;  %v4640_v36 = vmul.f32 %v13116_v4, %v4602_v14  ;;  %v4605_v5 = vadd.f32 %v10186_v1, %v4365_v61  ;;  %v4490_v22 = vpop.f32.mrf.mxu1  ;;  %v5165_v61 = vld [vmem:[#allocation3 + $0x20] sm:$0x1] }
 0x34c   : > { %v4857_v17 = vor.u32 %v4855_v45, %v4854_v47  ;;  %v4858_v21 = vrot.slane %v4854_v47, 4  ;;  %v4837_v44 = vrot.slane %v4835_v11, 7  ;;  %v4860_v33 = vshrl.u32 %v9407_v60, 16 }
 0x34d   : > { %v4863_v10 = vshll.u32 %v9407_v60, 16  ;;  %v9405_v29 = vpack.c.bf16 %v4707_v39, %v4707_v39  ;;  %v4712_v53 = vmax.f32 %v4680_v27, 0.0  ;;  %v4678_v55 = vadd.f32 %v13134_v56, %v4640_v36  ;;  %v10189_v38 = vpop.f32.mrf.mxu1 }
 0x34e   : > { %v5162_v30 = vsel %vm11294_vm8, %v4857_v17, %v5161_v26  ;;  %v4840_v24 = vor.u32 %v4838_v52, %v4837_v44  ;;  %v4841_v50 = vrot.slane %v4837_v44, 4  ;;  %v4862_v15 = vrot.slane %v4860_v33, 7  ;;  %v5158_v17 = vld [vmem:[#allocation3 + $0x14] sm:$0x1] }
 0x34f   : > { %5163 = vst [vmem:[#allocation3 + $0x18] sm:$0xf] %v5162_v30  ;;  %v4843_v28 = vshrl.u32 %v9405_v29, 16  ;;  %v4846_v62 = vshll.u32 %v9405_v29, 16  ;;  %v9410_v59 = vpack.c.bf16 %v4712_v53, %v4712_v53  ;;  %v4710_v16 = vmax.f32 %v4678_v55, 0.0  ;;  %v4503_v45 = vpop.f32.mrf.mxu1 }
 0x350   : > { %v5155_v46 = vsel %vm11294_vm8, %v4840_v24, %v5154_v18  ;;  %v4865_v40 = vor.u32 %v4863_v10, %v4862_v15  ;;  %v4867_v14 = vrot.slane %v4862_v15, 4  ;;  %v4643_v1 = vmul.f32 %v13116_v4, %v4605_v5  ;;  %v5175_v55 = vld [vmem:[#allocation3 + $0x30] sm:$0xf] }
 0x351   : > { %5156 = vst [vmem:[#allocation3 + $0xc] sm:$0xf] %v5155_v46  ;;  %v4845_v47 = vrot.slane %v4843_v28, 7  ;;  %v4886_v11 = vshrl.u32 %v9410_v59, 16  ;;  %v4889_v52 = vshll.u32 %v9410_v59, 16  ;;  %v9408_v60 = vpack.c.bf16 %v4710_v16, %v4710_v16  ;;  %v10190_v26 = vpop.f32.mrf.mxu1 }
 0x352   : > { %v4866_v27 = vsel %vm11422_vm11, %v4858_v21, %v4865_v40  ;;  %v5166_v36 = vsel %vm11266_vm5, %v4867_v14, %v5165_v61  ;;  %v4681_v44 = vadd.f32 %v13134_v56, %v4643_v1  ;;  %v4603_v33 = vadd.f32 %v4490_v22, %v13152_v13 }
 0x353   : > { %5164 = vst.msk [vmem:[#allocation3 + $0x1c] sm:$0xf] %vm423_vm6, %v4866_v27  ;;  %5167 = vst [vmem:[#allocation3 + $0x20] sm:$0x1] %v5166_v36  ;;  %v4848_v5 = vor.u32 %v4846_v62, %v4845_v47  ;;  %v4850_v18 = vrot.slane %v4845_v47, 4  ;;  %v4888_v10 = vrot.slane %v4886_v11, 7  ;;  %v4506_v53 = vpop.f32.mrf.mxu1  ;;  %v4608_v15 = vadd.f32 %v10189_v38, %v13156_v19 }
 0x354   : > { %v4869_v29 = vshrl.u32 %v9408_v60, 16  ;;  %v4872_v30 = vshll.u32 %v9408_v60, 16  ;;  %v4713_v24 = vmax.f32 %v4681_v44, 0.0  ;;  %v4641_v21 = vmul.f32 %v13116_v4, %v4603_v33  ;;  %v5168_v38 = vld [vmem:[#allocation3 + $0x24] sm:$0xf] }
 0x355   : > { %v4849_v61 = vsel %vm11422_vm11, %v4841_v50, %v4848_v5  ;;  %v5159_v13 = vsel %vm11266_vm5, %v4850_v18, %v5158_v17  ;;  %v4891_v22 = vor.u32 %v4889_v52, %v4888_v10  ;;  %v4892_v28 = vrot.slane %v4888_v10, 4  ;;  %v10193_v62 = vpop.f32.mrf.mxu1  ;;  %v5179_v5 = vld [vmem:[#allocation3 + $0x38] sm:$0x1] }
 0x356   : > { %5157 = vst.msk [vmem:[#allocation3 + $0x10] sm:$0xf] %vm423_vm6, %v4849_v61  ;;  %5160 = vst [vmem:[#allocation3 + $0x14] sm:$0x1] %v5159_v13  ;;  %v13212_v59 = vrot.slane %v4869_v29, 7  ;;  %v9411_v16 = vpack.c.bf16 %v4713_v24, %v4713_v24  ;;  %v4679_v46 = vadd.f32 %v13134_v56, %v4641_v21  ;;  %v4646_v40 = vmul.f32 %v13116_v4, %v4608_v15 }
 0x357   : > { %v5176_v19 = vsel %vm11294_vm8, %v4891_v22, %v5175_v55  ;;  %v4606_v50 = vadd.f32 %v4503_v45, %v13162_v48  ;;  %v4609_v14 = vadd.f32 %v10190_v26, %v13166_v34  ;;  %v4607_v1 = vadd.f32 %v4506_v53, %v13169_v12  ;;  %v4519_v47 = vpop.f32.mrf.mxu1 }
 0x358   : > { %5177 = vst [vmem:[#allocation3 + $0x30] sm:$0xf] %v5176_v19  ;;  %v4874_v11 = vor.u32 %v4872_v30, %v13212_v59  ;;  %v4875_v52 = vrot.slane %v13212_v59, 4  ;;  %v4894_v60 = vshrl.u32 %v9411_v16, 16  ;;  %v4897_v27 = vshll.u32 %v9411_v16, 16 }
 0x359   : > { %v4711_v36 = vmax.f32 %v4679_v46, 0.0  ;;  %v4684_v17 = vadd.f32 %v13134_v56, %v4646_v40  ;;  %v4644_v44 = vmul.f32 %v13116_v4, %v4606_v50  ;;  %v4647_v33 = vmul.f32 %v13116_v4, %v4609_v14  ;;  %v13226_v48 = vpop.f32.mrf.mxu1  ;;  %v13242_v40 = vpop.f32.mrf.mxu0 }
 0x35a   : > { %v5169_v34 = vsel %vm11294_vm8, %v4874_v11, %v5168_v38  ;;  %v4896_v12 = vrot.slane %v4894_v60, 7  ;;  %v4645_v45 = vmul.f32 %v13116_v4, %v4607_v1  ;;  %v4612_v26 = vadd.f32 %v10193_v62, %v13173_v25  ;;  %v5172_v1 = vld [vmem:[#allocation3 + $0x2c] sm:$0x1] }
 0x35b   : > { %5170 = vst [vmem:[#allocation3 + $0x24] sm:$0xf] %v5169_v34  ;;  %v9409_v18 = vpack.c.bf16 %v4711_v36, %v4711_v36  ;;  %v4716_v10 = vmax.f32 %v4684_v17, 0.0  ;;  %v4682_v29 = vadd.f32 %v13134_v56, %v4644_v44  ;;  %v4685_v53 = vadd.f32 %v13134_v56, %v4647_v33  ;;  %v13236_v15 = vpop.f32.mrf.mxu1 }
 0x35c   : > { %v4899_v55 = vor.u32 %v4897_v27, %v4896_v12  ;;  %v4901_v30 = vrot.slane %v4896_v12, 4  ;;  %v4683_v24 = vadd.f32 %v13134_v56, %v4645_v45  ;;  %v4650_v21 = vmul.f32 %v13116_v4, %v4612_v26  ;;  %v5189_v12 = vld [vmem:[#allocation3 + $0x48] sm:$0xf] }
 0x35d   : > { %v4877_v61 = vshrl.u32 %v9409_v18, 16  ;;  %v4880_v13 = vshll.u32 %v9409_v18, 16  ;;  %v9414_v22 = vpack.c.bf16 %v4716_v10, %v4716_v10  ;;  %v4714_v25 = vmax.f32 %v4682_v29, 0.0  ;;  %v10197_v36 = vpop.f32.mrf.mxu1  ;;  %v13247_v10 = vpop.f32.mrf.mxu0 }
 0x35e   : > { %v4900_v62 = vsel %vm11422_vm11, %v4892_v28, %v4899_v55  ;;  %v5180_v59 = vsel %vm11266_vm5, %v4901_v30, %v5179_v5  ;;  %v4717_v16 = vmax.f32 %v4685_v53, 0.0  ;;  %v4715_v46 = vmax.f32 %v4683_v24, 0.0 }
 0x35f   : > { %5178 = vst.msk [vmem:[#allocation3 + $0x34] sm:$0xf] %vm423_vm6, %v4900_v62  ;;  %5181 = vst [vmem:[#allocation3 + $0x38] sm:$0x1] %v5180_v59  ;;  %v4879_v19 = vrot.slane %v4877_v61, 7  ;;  %v4920_v38 = vshrl.u32 %v9414_v22, 16  ;;  %v9412_v14 = vpack.c.bf16 %v4714_v25, %v4714_v25  ;;  %v4688_v27 = vadd.f32 %v13134_v56, %v4650_v21  ;;  %v4535_v61 = vpop.f32.mrf.mxu1 }
 0x360   : > { %v4923_v50 = vshll.u32 %v9414_v22, 16  ;;  %v9415_v11 = vpack.c.bf16 %v4717_v16, %v4717_v16  ;;  %v9413_v60 = vpack.c.bf16 %v4715_v46, %v4715_v46  ;;  %v4610_v28 = vadd.f32 %v4519_v47, %v13178_v3  ;;  %v5182_v22 = vld [vmem:[#allocation3 + $0x3c] sm:$0xf]  ;;  %v5193_v25 = vld [vmem:[#allocation3 + $0x50] sm:$0x1] }
 0x361   : > { %v4882_v17 = vor.u32 %v4880_v13, %v4879_v19  ;;  %v4884_v44 = vrot.slane %v4879_v19, 4  ;;  %v4922_v33 = vrot.slane %v4920_v38, 7  ;;  %v4903_v34 = vshrl.u32 %v9412_v14, 16 }
 0x362   : > { %v4906_v45 = vshll.u32 %v9412_v14, 16  ;;  %v4928_v26 = vshrl.u32 %v9415_v11, 16  ;;  %v4931_v5 = vshll.u32 %v9415_v11, 16  ;;  %v4911_v18 = vshrl.u32 %v9413_v60, 16  ;;  %v13259_v14 = vpop.f32.mrf.mxu0 }
 0x363   : > { %v4883_v29 = vsel %vm11422_vm11, %v4875_v52, %v4882_v17  ;;  %v5173_v53 = vsel %vm11266_vm5, %v4884_v44, %v5172_v1  ;;  %v4925_v55 = vor.u32 %v4923_v50, %v4922_v33  ;;  %v4926_v3 = vrot.slane %v4922_v33, 4  ;;  %v5186_v50 = vld [vmem:[#allocation3 + $0x44] sm:$0x1]  ;;  %v13269_v44 = vld [vmem:[#allocation3 + $0x10] sm:$0xf]  ;;  %v13271_v33 = vpop.f32.mrf.mxu1 }
 0x364   : > { %5171 = vst.msk [vmem:[#allocation3 + $0x28] sm:$0xf] %vm423_vm6, %v4883_v29  ;;  %5174 = vst [vmem:[#allocation3 + $0x2c] sm:$0x1] %v5173_v53  ;;  %v4905_v47 = vrot.slane %v4903_v34, 7  ;;  %v4930_v30 = vrot.slane %v4928_v26, 7  ;;  %v4648_v52 = vmul.f32 %v13116_v4, %v4610_v28  ;;  %v4613_v59 = vadd.f32 %v13226_v48, %v13181_v8 }
 0x365   : > { %v4913_v24 = vrot.slane %v4911_v18, 7  ;;  %v4914_v21 = vshll.u32 %v9413_v60, 16  ;;  %v5190_v13 = vsel %vm11294_vm8, %v4925_v55, %v5189_v12  ;;  %v4720_v62 = vmax.f32 %v4688_v27, 0.0  ;;  %v13285_v55 = vld [vmem:[#allocation3 + $0xc] sm:$0xf] }
 0x366   : > { %5191 = vst [vmem:[#allocation3 + $0x48] sm:$0xf] %v5190_v13  ;;  %v4908_v16 = vor.u32 %v4906_v45, %v4905_v47  ;;  %v4909_v46 = vrot.slane %v4905_v47, 4  ;;  %v4933_v19 = vor.u32 %v4931_v5, %v4930_v30  ;;  %v4935_v38 = vrot.slane %v4930_v30, 4 }
 0x367   : > { %v4916_v1 = vor.u32 %v4914_v21, %v4913_v24  ;;  %v4918_v11 = vrot.slane %v4913_v24, 4  ;;  %v9418_v60 = vpack.c.bf16 %v4720_v62, %v4720_v62  ;;  %v4686_v17 = vadd.f32 %v13134_v56, %v4648_v52  ;;  %v5203_v21 = vld [vmem:[#allocation3 + $0x60] sm:$0xf]  ;;  %v15368_v52 = vld [vmem:[#allocation27_spill] sm:$0xff] }
 0x368   : > { %v5183_v27 = vsel %vm11294_vm8, %v4908_v16, %v5182_v22  ;;  %v4934_v28 = vsel %vm11422_vm11, %v4926_v3, %v4933_v19  ;;  %v5194_v8 = vsel %vm11266_vm5, %v4935_v38, %v5193_v25  ;;  %v4651_v48 = vmul.f32 %v13116_v4, %v4613_v59  ;;  %v13287_v3 = vpop.f32.mrf.mxu0  ;;  %v15369_v38 = vld [vmem:[#allocation32_spill] sm:$0xff] }
 0x369   : > { %5184 = vst [vmem:[#allocation3 + $0x3c] sm:$0xf] %v5183_v27  ;;  %5192 = vst.msk [vmem:[#allocation3 + $0x4c] sm:$0xf] %vm423_vm6, %v4934_v28  ;;  %v4917_v34 = vsel %vm11422_vm11, %v4909_v46, %v4916_v1  ;;  %v5187_v12 = vsel %vm11266_vm5, %v4918_v11, %v5186_v50  ;;  %v4954_v45 = vshrl.u32 %v9418_v60, 16  ;;  %v4374_v26 = vadd.f32 %v13242_v40, %v13005_v32  ;;  %v10759_v40 = vld [vmem:[#allocation11 + $0x30] sm:$0xff]  }
 0x36a   : > { %5195 = vst [vmem:[#allocation3 + $0x50] sm:$0x1] %v5194_v8  ;;  %5185 = vst.msk [vmem:[#allocation3 + $0x40] sm:$0xf] %vm423_vm6, %v4917_v34  ;;  %v4718_v5 = vmax.f32 %v4686_v17, 0.0  ;;  %v4689_v18 = vadd.f32 %v13134_v56, %v4651_v48  ;;  %v4611_v29 = vadd.f32 %v13236_v15, %v13183_v35  ;;  %v4616_v53 = vadd.f32 %v10197_v36, %v13186_v6  ;;  %v13295_v6 = vpop.f32.mrf.mxu1  ;;  %v15367_v15 = vld [vmem:[#allocation42_spill] sm:$0xff]  ;;  %v13311_v50 = vpop.f32.mrf.mxu0 }
 0x36b   : > { %5188 = vst [vmem:[#allocation3 + $0x44] sm:$0x1] %v5187_v12  ;;  %v13289_v47 = vrot.slane %v4954_v45, 7  ;;  %v4957_v30 = vshll.u32 %v9418_v60, 16  ;;  %v4614_v24 = vadd.f32 %v4535_v61, %v4374_v26  ;;  %v9112_v32 = vcombine.low %v13285_v55, %v13269_v44  ;;  %v15371_v34 = vld [vmem:[#allocation20_spill] sm:$0xff] }
 0x36c   : > { %v9416_v13 = vpack.c.bf16 %v4718_v5, %v4718_v5  ;;  %v4721_v22 = vmax.f32 %v4689_v18, 0.0  ;;  %v4649_v25 = vmul.f32 %v13116_v4, %v4611_v29  ;;  %v4654_v35 = vmul.f32 %v13116_v4, %v4616_v53  ;;  %v13319_v8 = vpop.f32.mrf.mxu1  ;;  %v5196_v45 = vld [vmem:[#allocation3 + $0x54] sm:$0xf] }
 0x36d   : > { %v3430_v36 = vadd.f32 %v15367_v15, %v13119_v57  ;;  %v4959_v62 = vor.u32 %v4957_v30, %v13289_v47  ;;  %v4652_v61 = vmul.f32 %v13116_v4, %v4614_v24  ;;  %10219 = vmatprep.mubr.msk.bf16.mxu0 %vm1839_vm9, %v9112_v32  ;;  %10260 = vmatmul.mubr.msk.bf16.vlgmr.msra.gmra.mxu1 %vm1839_vm9, %v9112_v32  ;;  %v15372_v24 = vld [vmem:[#allocation44_spill] sm:$0xff] }
 0x36e   : > { %v3178_v59 = vadd.f32 %v15368_v52, %v13124_v31  ;;  %v4937_v16 = vshrl.u32 %v9416_v13, 16  ;;  %v9419_v46 = vpack.c.bf16 %v4721_v22, %v4721_v22  ;;  %v4687_v19 = vadd.f32 %v13134_v56, %v4649_v25  ;;  %10332 = vmatpush3.bf16.msra.mxu1 %v13086_v20  ;;  %v10761_v31 = vld [vmem:[#allocation11 + $0x28] sm:$0xff]   ;;  %v4551_v52 = vpop.f32.mrf.mxu1 }
 0x36f   : > { %v13309_v57 = vadd.f32 %v15369_v38, %v13127_v51  ;;  %v5204_v1 = vsel %vm11294_vm8, %v4959_v62, %v5203_v21  ;;  %v4692_v11 = vadd.f32 %v13134_v56, %v4654_v35  ;;  %v4690_v60 = vadd.f32 %v13134_v56, %v4652_v61  ;;  %10333 = vmatprep.subr.bf16.mxu1 %v10759_v40  ;;  %v15370_v51 = vld [vmem:[#allocation22_spill] sm:$0xff]  ;;  %v13330_v21 = vpop.f32.mrf.mxu0  ;;  %v10763_v35 = vld [vmem:[#allocation11 + $0x20] sm:$0xff]  }
 0x370   : > { %5205 = vst [vmem:[#allocation3 + $0x60] sm:$0xf] %v5204_v1  ;;  %v13317_v17 = vrot.slane %v4937_v16, 7  ;;  %v4940_v27 = vshll.u32 %v9416_v13, 16  ;;  %v4962_v20 = vshrl.u32 %v9419_v46, 16  ;;  %v4719_v28 = vmax.f32 %v4687_v19, 0.0 }
 0x371   : > { %v3682_v48 = vadd.f32 %v15370_v51, %v13140_v49  ;;  %v13324_v12 = vadd.f32 %v15371_v34, %v3430_v36  ;;  %v4724_v26 = vmax.f32 %v4692_v11, 0.0  ;;  %v4722_v5 = vmax.f32 %v4690_v60, 0.0  ;;  %v5207_v49 = vld [vmem:[#allocation3 + $0x68] sm:$0x1]  ;;  %v13336_v19 = vld [vmem:[#allocation3 + $0x1c] sm:$0xf]  ;;  %v13344_v51 = vpop.f32.mrf.mxu0 }
 0x372   : > { %v4942_v18 = vor.u32 %v4940_v27, %v13317_v17  ;;  %v4964_v29 = vrot.slane %v4962_v20, 7  ;;  %v4965_v53 = vshll.u32 %v9419_v46, 16  ;;  %v9417_v30 = vpack.c.bf16 %v4719_v28, %v4719_v28  ;;  %10334 = vmatpush3.bf16.msra.mxu1 %v10759_v40  ;;  %v15373_v40 = vld [vmem:[#allocation59_spill] sm:$0xff] }
 0x373   : > { %v13328_v32 = vadd.f32 %v15372_v24, %v3178_v59  ;;  %v4960_v13 = vrot.slane %v13289_v47, 4  ;;  %v9422_v22 = vpack.c.bf16 %v4724_v26, %v4724_v26  ;;  %v9420_v25 = vpack.c.bf16 %v4722_v5, %v4722_v5  ;;  %10335 = vmatprep.subr.bf16.mxu1 %v10761_v31  ;;  %v15374_v47 = vld [vmem:[#allocation58_spill] sm:$0xff]  ;;  %v5200_v20 = vld [vmem:[#allocation3 + $0x5c] sm:$0x1]  ;;  %v5217_v28 = vld [vmem:[#allocation3 + $0x78] sm:$0xf] }
 0x374   : > { %v5197_v15 = vsel %vm11294_vm8, %v4942_v18, %v5196_v45  ;;  %v4967_v36 = vor.u32 %v4965_v53, %v4964_v29  ;;  %v4969_v62 = vrot.slane %v4964_v29, 4  ;;  %v4945_v61 = vshrl.u32 %v9417_v30, 16  ;;  %v13351_v26 = vld [vmem:[#allocation3 + $0x18] sm:$0xf]  ;;  %v5210_v53 = vld [vmem:[#allocation3 + $0x6c] sm:$0xf] }
 0x375   : > { %v4135_v16 = vadd.f32 %v15373_v40, %v3682_v48  ;;  %5198 = vst [vmem:[#allocation3 + $0x54] sm:$0xf] %v5197_v15  ;;  %v4988_v59 = vshrl.u32 %v9422_v22, 16  ;;  %v4971_v46 = vshrl.u32 %v9420_v25, 16  ;;  %v4377_v38 = vadd.f32 %v13247_v10, %v15374_v47  ;;  %v10746_v24 = vld [vmem:[#allocation11 + $0xd0] sm:$0xff]  }
 0x376   : > { %v4968_v1 = vsel %vm11422_vm11, %v4960_v13, %v4967_v36  ;;  %v5208_v11 = vsel %vm11266_vm5, %v4969_v62, %v5207_v49  ;;  %v4947_v60 = vrot.slane %v4945_v61, 7  ;;  %v4948_v27 = vshll.u32 %v9417_v30, 16  ;;  %10336 = vmatpush3.bf16.msra.mxu1 %v10761_v31  ;;  %v13358_v30 = vpop.f32.mrf.mxu1  ;;  %v15375_v36 = vld [vmem:[#allocation60_spill] sm:$0xff]  ;;  %v13375_v61 = vld [vmem:[#allocation3 + $0x28] sm:$0xf] }
 0x377   : > { %5206 = vst.msk [vmem:[#allocation3 + $0x64] sm:$0xf] %vm423_vm6, %v4968_v1  ;;  %5209 = vst [vmem:[#allocation3 + $0x68] sm:$0x1] %v5208_v11  ;;  %v13347_v48 = vrot.slane %v4988_v59, 7  ;;  %v4991_v34 = vshll.u32 %v9422_v22, 16  ;;  %10337 = vmatprep.subr.bf16.mxu1 %v10763_v35  ;;  %v13356_v31 = vcombine.low %v13351_v26, %v13336_v19  ;;  %v4375_v22 = vadd.f32 %v13259_v14, %v4135_v16 }
 0x378   : > { %v13349_v10 = vrot.slane %v4971_v46, 7  ;;  %v4974_v45 = vshll.u32 %v9420_v25, 16  ;;  %v4943_v5 = vrot.slane %v13317_v17, 4  ;;  %v4950_v18 = vor.u32 %v4948_v27, %v4947_v60  ;;  %v13377_v14 = vld [vmem:[#allocation11 + $0xf8] sm:$0xff]   ;;  %v4554_v27 = vpop.f32.mrf.mxu1 }
 0x379   : > { %v4952_v29 = vrot.slane %v4947_v60, 4  ;;  %v4993_v13 = vor.u32 %v4991_v34, %v13347_v48  ;;  %v4380_v25 = vadd.f32 %v13287_v3, %v13017_v37  ;;  %10220 = vmatmul.mubr.msk.bf16.vlgmr.msra.gmra.mxu0 %vm1839_vm9, %v13356_v31  ;;  %10263 = vmatprep.mubr.msk.bf16.mxu1 %vm1839_vm9, %v13356_v31  ;;  %v4378_v62 = vadd.f32 %v13311_v50, %v15375_v36  ;;  %v10165_v37 = vpop.f32.mrf.mxu0  ;;  %v15376_v16 = vld [vmem:[#allocation46_spill] sm:$0xff]  ;;  %v15377_v50 = vld [vmem:[#allocation45_spill] sm:$0xff]  ;;  %v13390_v60 = vld [vmem:[#allocation3 + $0x24] sm:$0xf] }
 0x37a   : > { %v4976_v49 = vor.u32 %v4974_v45, %v13349_v10  ;;  %v4951_v17 = vsel %vm11422_vm11, %v4943_v5, %v4950_v18  ;;  %10292 = vmatpush3.bf16.msra.mxu0 %v15376_v16  ;;  %v4617_v59 = vadd.f32 %v13271_v33, %v4377_v38  ;;  %10338 = vmatpush3.bf16.msra.mxu1 %v10763_v35  ;;  %v13412_v34 = vld [vmem:[#allocation3 + $0x34] sm:$0xf]  ;;  %v15379_v45 = vld [vmem:[#allocation47_spill] sm:$0xff]  ;;  %v6170_v39 = vshll.u32 %v13375_v61, 16 }
 0x37b   : > { %v5201_v15 = vsel %vm11266_vm5, %v4952_v29, %v5200_v20  ;;  %5199 = vst.msk [vmem:[#allocation3 + $0x58] sm:$0xf] %vm423_vm6, %v4951_v17  ;;  %v5218_v3 = vsel %vm11294_vm8, %v4993_v13, %v5217_v28  ;;  %v3438_v46 = vadd.f32 %v15377_v50, %v13309_v57  ;;  %v4615_v47 = vadd.f32 %v13295_v6, %v4375_v22  ;;  %v10751_v57 = vld [vmem:[#allocation11 + $0xc8] sm:$0xff]   ;;  %v13403_v38 = vpop.f32.mrf.mxu0  ;;  %v15378_v28 = vld [vmem:[#allocation43_spill] sm:$0xff]  ;;  %v15380_v22 = vld [vmem:[#allocation61_spill] sm:$0xff] }
 0x37c   : > { %5202 = vst [vmem:[#allocation3 + $0x5c] sm:$0x1] %v5201_v15  ;;  %v5211_v40 = vsel %vm11294_vm8, %v4976_v49, %v5210_v53  ;;  %5219 = vst [vmem:[#allocation3 + $0x78] sm:$0xf] %v5218_v3  ;;  %v4620_v1 = vadd.f32 %v13319_v8, %v4380_v25  ;;  %v4618_v11 = vadd.f32 %v4551_v52, %v4378_v62  ;;  %10293 = vmatprep.subr.bf16.mxu0 %v10746_v24  ;;  %v13420_v49 = vld [vmem:[#allocation3 + $0x30] sm:$0xf] }
 0x37d   : > { %5212 = vst [vmem:[#allocation3 + $0x6c] sm:$0xf] %v5211_v40  ;;  %v4139_v20 = vadd.f32 %v13037_v43, %v13324_v12  ;;  %v4655_v33 = vmul.f32 %v13116_v4, %v4617_v59  ;;  %v13397_v35 = vcombine.low %v13390_v60, %v13375_v61  ;;  %10411 = vmatprep.subr.bf16.mxu1 %v13377_v14  ;;  %v10756_v16 = vld [vmem:[#allocation11 + $0xc0] sm:$0xff]  }
 0x37e   : > { %v4653_v6 = vmul.f32 %v13116_v4, %v4615_v47  ;;  %v4658_v8 = vmul.f32 %v13116_v4, %v4620_v1  ;;  %v4656_v52 = vmul.f32 %v13116_v4, %v4618_v11  ;;  %v3690_v43 = vadd.f32 %v15378_v28, %v13328_v32  ;;  %v10205_v32 = vpop.f32.mrf.mxu1  ;;  %10294 = vmatpush3.bf16.msra.mxu0 %v10746_v24  ;;  %v13430_v24 = vpop.f32.mrf.mxu0 }
 0x37f   : > { %v4693_v12 = vadd.f32 %v13134_v56, %v4655_v33  ;;  %10223 = vmatprep.mubr.msk.bf16.mxu0 %vm1839_vm9, %v13397_v35  ;;  %10264 = vmatmul.mubr.msk.bf16.gmra.mxu1 %vm1839_vm9, %v13397_v35  ;;  %v13415_v5 = vadd.f32 %v15379_v45, %v3438_v46  ;;  %v4381_v25 = vadd.f32 %v13330_v21, %v15380_v22 }
 0x380   : > { %v4691_v18 = vadd.f32 %v13134_v56, %v4653_v6  ;;  %v4696_v29 = vadd.f32 %v13134_v56, %v4658_v8  ;;  %v4694_v53 = vadd.f32 %v13134_v56, %v4656_v52  ;;  %v4379_v17 = vadd.f32 %v13344_v51, %v4139_v20  ;;  %10295 = vmatprep.subr.bf16.mxu0 %v10751_v57  ;;  %v4567_v1 = vpop.f32.mrf.mxu1  ;;  %v13443_v8 = vld [vmem:[#allocation11 + $0x98] sm:$0xff]   ;;  %v4330_v52 = vpop.f32.mrf.mxu0 }
 0x381   : > { %v4725_v13 = vmax.f32 %v4693_v12, 0.0  ;;  %v4384_v15 = vadd.f32 %v10165_v37, %v13040_v42  ;;  %v13428_v40 = vcombine.low %v13420_v49, %v13412_v34  ;;  %v13433_v59 = vadd.f32 %v13052_v2, %v3690_v43 }
 0x382   : > { %v4723_v36 = vmax.f32 %v4691_v18, 0.0  ;;  %v4728_v62 = vmax.f32 %v4696_v29, 0.0  ;;  %v4726_v3 = vmax.f32 %v4694_v53, 0.0  ;;  %v4621_v21 = vadd.f32 %v13358_v30, %v4381_v25  ;;  %10296 = vmatpush3.bf16.msra.mxu0 %v10751_v57  ;;  %v5221_v18 = vld [vmem:[#allocation3 + $0x80] sm:$0x1]  ;;  %v13449_v25 = vpop.f32.mrf.mxu1 }
 0x383   : > { %v9423_v50 = vpack.c.bf16 %v4725_v13, %v4725_v13  ;;  %v4619_v51 = vadd.f32 %v4554_v27, %v4379_v17  ;;  %v4994_v42 = vrot.slane %v13347_v48, 4  ;;  %10224 = vmatmul.mubr.msk.bf16.gmra.mxu0 %vm1839_vm9, %v13428_v40  ;;  %10267 = vmatprep.mubr.msk.bf16.mxu1 %vm1839_vm9, %v13428_v40  ;;  %v5214_v53 = vld [vmem:[#allocation3 + $0x74] sm:$0x1]  ;;  %v4624_v22 = vadd.f32 %v10205_v32, %v4384_v15 }
 0x384   : > { %v9421_v37 = vpack.c.bf16 %v4723_v36, %v4723_v36  ;;  %v9426_v46 = vpack.c.bf16 %v4728_v62, %v4728_v62  ;;  %v9424_v47 = vpack.c.bf16 %v4726_v3, %v4726_v3  ;;  %v4659_v2 = vmul.f32 %v13116_v4, %v4621_v21  ;;  %10297 = vmatprep.subr.bf16.mxu0 %v10756_v16  ;;  %v5231_v62 = vld [vmem:[#allocation3 + $0x90] sm:$0xf] }
 0x385   : > { %v4996_v11 = vshrl.u32 %v9423_v50, 16  ;;  %v4999_v20 = vshll.u32 %v9423_v50, 16  ;;  %v4657_v33 = vmul.f32 %v13116_v4, %v4619_v51  ;;  %v4977_v21 = vrot.slane %v13349_v10, 4  ;;  %v13463_v10 = vld [vmem:[#allocation3 + $0x40] sm:$0xf] }
 0x386   : > { %v4979_v30 = vshrl.u32 %v9421_v37, 16  ;;  %v4982_v27 = vshll.u32 %v9421_v37, 16  ;;  %v5022_v48 = vshrl.u32 %v9426_v46, 16  ;;  %v5025_v6 = vshll.u32 %v9426_v46, 16  ;;  %10298 = vmatpush3.bf16.msra.mxu0 %v10756_v16 }
 0x387   : > { %v4998_v28 = vrot.slane %v4996_v11, 7  ;;  %v5005_v43 = vshrl.u32 %v9424_v47, 16  ;;  %v5008_v12 = vshll.u32 %v9424_v47, 16  ;;  %v4697_v45 = vadd.f32 %v13134_v56, %v4659_v2  ;;  %v5224_v47 = vld [vmem:[#allocation3 + $0x84] sm:$0xf]  ;;  %10371 = vmatprep.subr.bf16.mxu0 %v13443_v8  ;;  %v10169_v11 = vpop.f32.mrf.mxu0 }
 0x388   : > { %v4981_v29 = vrot.slane %v4979_v30, 7  ;;  %v13446_v13 = vrot.slane %v5022_v48, 7  ;;  %v4695_v57 = vadd.f32 %v13134_v56, %v4657_v33  ;;  %v4382_v16 = vadd.f32 %v13403_v38, %v13045_v58 }
 0x389   : > { %v5001_v17 = vor.u32 %v4999_v20, %v4998_v28  ;;  %v5003_v36 = vrot.slane %v4998_v28, 4  ;;  %v13451_v3 = vrot.slane %v5005_v43, 7  ;;  %v4729_v50 = vmax.f32 %v4697_v45, 0.0  ;;  %v13476_v28 = vld [vmem:[#allocation3 + $0x3c] sm:$0xf] }
 0x38a   : > { %v4984_v51 = vor.u32 %v4982_v27, %v4981_v29  ;;  %v4986_v37 = vrot.slane %v4981_v29, 4  ;;  %v5027_v46 = vor.u32 %v5025_v6, %v13446_v13  ;;  %v4570_v27 = vpop.f32.mrf.mxu1  ;;  %v4727_v38 = vmax.f32 %v4695_v57, 0.0  ;;  %v13478_v43 = vld [vmem:[#allocation3 + $0x4c] sm:$0xf] }
 0x38b   : > { %v5002_v32 = vsel %vm11422_vm11, %v4994_v42, %v5001_v17  ;;  %v5222_v15 = vsel %vm11266_vm5, %v5003_v36, %v5221_v18  ;;  %v5010_v20 = vor.u32 %v5008_v12, %v13451_v3  ;;  %v9427_v30 = vpack.c.bf16 %v4729_v50, %v4729_v50  ;;  %v13489_v17 = vld [vmem:[#allocation3 + $0x48] sm:$0xf] }
 0x38c   : > { %5220 = vst.msk [vmem:[#allocation3 + $0x7c] sm:$0xf] %vm423_vm6, %v5002_v32  ;;  %5223 = vst [vmem:[#allocation3 + $0x80] sm:$0x1] %v5222_v15  ;;  %v4985_v2 = vsel %vm11422_vm11, %v4977_v21, %v4984_v51  ;;  %v5215_v33 = vsel %vm11266_vm5, %v4986_v37, %v5214_v53  ;;  %v5232_v42 = vsel %vm11294_vm8, %v5027_v46, %v5231_v62  ;;  %v4343_v53 = vpop.f32.mrf.mxu0  ;;  %v5028_v46 = vrot.slane %v13446_v13, 4 }
 0x38d   : > { %5213 = vst.msk [vmem:[#allocation3 + $0x70] sm:$0xf] %vm423_vm6, %v4985_v2  ;;  %5216 = vst [vmem:[#allocation3 + $0x74] sm:$0x1] %v5215_v33  ;;  %v5225_v58 = vsel %vm11294_vm8, %v5010_v20, %v5224_v47  ;;  %v4662_v48 = vmul.f32 %v13116_v4, %v4624_v22  ;;  %v4622_v6 = vadd.f32 %v4567_v1, %v4382_v16  ;;  %v5030_v12 = vshrl.u32 %v9427_v30, 16 }
 0x38e   : > { %5233 = vst [vmem:[#allocation3 + $0x90] sm:$0xf] %v5232_v42  ;;  %5226 = vst [vmem:[#allocation3 + $0x84] sm:$0xf] %v5225_v58  ;;  %v13482_v45 = vcombine.low %v13476_v28, %v13463_v10  ;;  %v4385_v18 = vadd.f32 %v13430_v24, %v13048_v41  ;;  %v4383_v29 = vadd.f32 %v4330_v52, %v13433_v59  ;;  %v5033_v50 = vshll.u32 %v9427_v30, 16  ;;  %v10209_v24 = vpop.f32.mrf.mxu1 }
 0x38f   : > { %v9425_v57 = vpack.c.bf16 %v4727_v38, %v4727_v38  ;;  %v4700_v22 = vadd.f32 %v13134_v56, %v4662_v48  ;;  %v4660_v1 = vmul.f32 %v13116_v4, %v4622_v6  ;;  %v4388_v36 = vadd.f32 %v10169_v11, %v13061_v63  ;;  %v5235_v63 = vld [vmem:[#allocation3 + $0x98] sm:$0x1]  ;;  %v5228_v16 = vld [vmem:[#allocation3 + $0x8c] sm:$0x1] }
 0x390   : > { %v5032_v62 = vrot.slane %v5030_v12, 7  ;;  %10227 = vmatprep.mubr.msk.bf16.mxu0 %vm1839_vm9, %v13482_v45  ;;  %10268 = vmatmul.mubr.msk.bf16.gmra.mxu1 %vm1839_vm9, %v13482_v45  ;;  %v13498_v41 = vcombine.low %v13489_v17, %v13478_v43  ;;  %v4386_v59 = vadd.f32 %v4343_v53, %v13076_v7  ;;  %v13503_v52 = vadd.f32 %v13101_v23, %v13415_v5  ;;  %v4583_v33 = vpop.f32.mrf.mxu1 }
 0x391   : > { %v5013_v21 = vshrl.u32 %v9425_v57, 16  ;;  %v4732_v51 = vmax.f32 %v4700_v22, 0.0  ;;  %v4698_v37 = vadd.f32 %v13134_v56, %v4660_v1  ;;  %v5011_v47 = vrot.slane %v13451_v3, 4  ;;  %v5245_v1 = vld [vmem:[#allocation3 + $0xa8] sm:$0xf] }
 0x392   : > { %v5035_v11 = vor.u32 %v5033_v50, %v5032_v62  ;;  %v5037_v32 = vrot.slane %v5032_v62, 4  ;;  %10228 = vmatmul.mubr.msk.bf16.gmra.mxu0 %vm1839_vm9, %v13498_v41  ;;  %10271 = vmatprep.mubr.msk.bf16.mxu1 %vm1839_vm9, %v13498_v41  ;;  %v5016_v23 = vshll.u32 %v9425_v57, 16  ;;  %v4625_v3 = vadd.f32 %v13449_v25, %v4385_v18  ;;  %v10170_v50 = vpop.f32.mrf.mxu0 }
 0x393   : > { %v5015_v7 = vrot.slane %v5013_v21, 7  ;;  %v9430_v5 = vpack.c.bf16 %v4732_v51, %v4732_v51  ;;  %v4730_v15 = vmax.f32 %v4698_v37, 0.0  ;;  %v4623_v2 = vadd.f32 %v4570_v27, %v4383_v29  ;;  %v13526_v29 = vld [vmem:[#allocation3 + $0x58] sm:$0xf]  ;;  %v13540_v37 = vld [vmem:[#allocation3 + $0x54] sm:$0xf] }
 0x394   : > { %v5036_v20 = vsel %vm11422_vm11, %v5028_v46, %v5035_v11  ;;  %v5236_v13 = vsel %vm11266_vm5, %v5037_v32, %v5235_v63  ;;  %v4663_v6 = vmul.f32 %v13116_v4, %v4625_v3  ;;  %v4628_v53 = vadd.f32 %v10209_v24, %v4388_v36 }
 0x395   : > { %5234 = vst.msk [vmem:[#allocation3 + $0x94] sm:$0xf] %vm423_vm6, %v5036_v20  ;;  %5237 = vst [vmem:[#allocation3 + $0x98] sm:$0x1] %v5236_v13  ;;  %v5018_v42 = vor.u32 %v5016_v23, %v5015_v7  ;;  %v5020_v30 = vrot.slane %v5015_v7, 4  ;;  %v5056_v58 = vshrl.u32 %v9430_v5, 16  ;;  %v9428_v48 = vpack.c.bf16 %v4730_v15, %v4730_v15 }
 0x396   : > { %v5059_v38 = vshll.u32 %v9430_v5, 16  ;;  %v4661_v12 = vmul.f32 %v13116_v4, %v4623_v2  ;;  %v4626_v18 = vadd.f32 %v4583_v33, %v4386_v59  ;;  %v6113_v22 = vshrl.u32 %v13285_v55, 16  ;;  %v13536_v59 = vld [vmem:[%s15121_s5] ss:$0 sm:$0xff]  ;;  %v5238_v23 = vld [vmem:[#allocation3 + $0x9c] sm:$0xf] }
 0x397   : > { %v5019_v57 = vsel %vm11422_vm11, %v5011_v47, %v5018_v42  ;;  %v5229_v25 = vsel %vm11266_vm5, %v5020_v30, %v5228_v16  ;;  %v13524_v27 = vrot.slane %v5056_v58, 7  ;;  %v5039_v62 = vshrl.u32 %v9428_v48, 16  ;;  %v13552_v5 = vld [vmem:[%s15122_s6] ss:$0 sm:$0xff] }
 0x398   : > { %5227 = vst.msk [vmem:[#allocation3 + $0x88] sm:$0xf] %vm423_vm6, %v5019_v57  ;;  %5230 = vst [vmem:[#allocation3 + $0x8c] sm:$0x1] %v5229_v25  ;;  %v4701_v4 = vadd.f32 %v13134_v56, %v4663_v6  ;;  %v4699_v36 = vadd.f32 %v13134_v56, %v4661_v12  ;;  %v5042_v63 = vshll.u32 %v9428_v48, 16  ;;  %v4666_v21 = vmul.f32 %v13536_v59, %v4628_v53  ;;  %v10210_v25 = vpop.f32.mrf.mxu1 }
 0x399   : > { %v5061_v24 = vor.u32 %v5059_v38, %v13524_v27  ;;  %v4664_v51 = vmul.f32 %v13536_v59, %v4626_v18  ;;  %v5041_v46 = vrot.slane %v5039_v62, 7  ;;  %v13544_v56 = vcombine.low %v13540_v37, %v13526_v29  ;;  %v5249_v62 = vld [vmem:[#allocation3 + $0xb0] sm:$0x1] }
 0x39a   : > { %v4733_v47 = vmax.f32 %v4701_v4, 0.0  ;;  %v4731_v11 = vmax.f32 %v4699_v36, 0.0  ;;  %v6116_v32 = vshll.u32 %v13285_v55, 16  ;;  %v4704_v15 = vadd.f32 %v13552_v5, %v4666_v21  ;;  %v4346_v55 = vpop.f32.mrf.mxu0 }
 0x39b   : > { %v5246_v7 = vsel %vm11294_vm8, %v5061_v24, %v5245_v1  ;;  %v4702_v20 = vadd.f32 %v13552_v5, %v4664_v51  ;;  %v5044_v13 = vor.u32 %v5042_v63, %v5041_v46  ;;  %10231 = vmatprep.mubr.msk.bf16.mxu0 %vm1839_vm9, %v13544_v56  ;;  %10272 = vmatmul.mubr.msk.bf16.gmra.mxu1 %vm1839_vm9, %v13544_v56  ;;  %v13564_v6 = vrot.slane %v6113_v22, 4  ;;  %v5242_v24 = vld [vmem:[#allocation3 + $0xa4] sm:$0x1] }
 0x39c   : > { %5247 = vst [vmem:[#allocation3 + $0xa8] sm:$0xf] %v5246_v7  ;;  %v9431_v16 = vpack.c.bf16 %v4733_v47, %v4733_v47  ;;  %v9429_v3 = vpack.c.bf16 %v4731_v11, %v4731_v11  ;;  %v4736_v2 = vmax.f32 %v4704_v15, 0.0  ;;  %v4389_v42 = vadd.f32 %v10170_v50, %v13093_v54  ;;  %v13569_v11 = vld [vmem:[#allocation3 + $0x64] sm:$0xf] }
 0x39d   : > { %v4734_v33 = vmax.f32 %v4702_v20, 0.0  ;;  %v5239_v30 = vsel %vm11294_vm8, %v5044_v13, %v5238_v23  ;;  %v4387_v48 = vadd.f32 %v4346_v55, %v13503_v52  ;;  %v13566_v12 = vrot.slane %v6116_v32, 5  ;;  %v4586_v20 = vpop.f32.mrf.mxu1  ;;  %v13575_v13 = vld [vmem:[#allocation3 + $0x70] sm:$0xf]  ;;  %v5259_v55 = vld [vmem:[#allocation3 + $0xc0] sm:$0xf] }
 0x39e   : > { %v5064_v58 = vshrl.u32 %v9431_v16, 16  ;;  %v5047_v38 = vshrl.u32 %v9429_v3, 16  ;;  %5240 = vst [vmem:[#allocation3 + $0x9c] sm:$0xf] %v5239_v30  ;;  %v9434_v53 = vpack.c.bf16 %v4736_v2, %v4736_v2  ;;  %v5067_v1 = vshll.u32 %v9431_v16, 16 }
 0x39f   : > { %v9432_v57 = vpack.c.bf16 %v4734_v33, %v4734_v33  ;;  %v5050_v54 = vshll.u32 %v9429_v3, 16  ;;  %v5062_v36 = vrot.slane %v13524_v27, 4  ;;  %v5045_v50 = vrot.slane %v5041_v46, 4  ;;  %v5252_v2 = vld [vmem:[#allocation3 + $0xb4] sm:$0xf] }
 0x3a0   : > { %v5066_v18 = vrot.slane %v5064_v58, 7  ;;  %v5049_v4 = vrot.slane %v5047_v38, 7  ;;  %v5090_v63 = vshrl.u32 %v9434_v53, 16  ;;  %v5093_v7 = vshll.u32 %v9434_v53, 16  ;;  %v13591_v53 = vld [vmem:[#allocation3 + $0x60] sm:$0xf] }
 0x3a1   : > { %v5073_v21 = vshrl.u32 %v9432_v57, 16  ;;  %v5076_v15 = vshll.u32 %v9432_v57, 16  ;;  %v6122_v33 = vshll.u32 %v13269_v44, 16  ;;  %v6126_v30 = vshrl.u32 %v13269_v44, 16  ;;  %v13593_v57 = vld [vmem:[#allocation3 + $0x6c] sm:$0xf] }
 0x3a2   : > { %v5069_v52 = vor.u32 %v5067_v1, %v5066_v18  ;;  %v5071_v22 = vrot.slane %v5066_v18, 4  ;;  %v5052_v51 = vor.u32 %v5050_v54, %v5049_v4  ;;  %v5054_v47 = vrot.slane %v5049_v4, 4  ;;  %v13603_v4 = vld [vmem:[#allocation3 + $0x7c] sm:$0xf] }
 0x3a3   : > { %v13571_v32 = vrot.slane %v5090_v63, 7  ;;  %v13573_v23 = vrot.slane %v5073_v21, 7  ;;  %v13597_v18 = vcombine.low %v13591_v53, %v13569_v11  ;;  %v4629_v1 = vadd.f32 %v10210_v25, %v4389_v42  ;;  %v13617_v25 = vld [vmem:[#allocation3 + $0x78] sm:$0xf]  ;;  %v13633_v21 = vld [vmem:[#allocation3 + $0x88] sm:$0xf] }
 0x3a4   : > { %v5070_v27 = vsel %vm11422_vm11, %v5062_v36, %v5069_v52  ;;  %v5250_v46 = vsel %vm11266_vm5, %v5071_v22, %v5249_v62  ;;  %v5053_v16 = vsel %vm11422_vm11, %v5045_v50, %v5052_v51  ;;  %v5243_v3 = vsel %vm11266_vm5, %v5054_v47, %v5242_v24  ;;  %v13635_v52 = vld [vmem:[#allocation3] sm:$0xf] }
 0x3a5   : > { %5248 = vst.msk [vmem:[#allocation3 + $0xac] sm:$0xf] %vm423_vm6, %v5070_v27  ;;  %5251 = vst [vmem:[#allocation3 + $0xb0] sm:$0x1] %v5250_v46  ;;  %v5095_v58 = vor.u32 %v5093_v7, %v13571_v32  ;;  %v5078_v38 = vor.u32 %v5076_v15, %v13573_v23  ;;  %v4627_v44 = vadd.f32 %v4586_v20, %v4387_v48  ;;  %10232 = vmatmul.mubr.msk.bf16.gmra.mxu0 %vm1839_vm9, %v13597_v18  ;;  %v13642_v15 = vld [vmem:[#allocation3 + $0x84] sm:$0xf] }
 0x3a6   : > { %5241 = vst.msk [vmem:[#allocation3 + $0xa0] sm:$0xf] %vm423_vm6, %v5053_v16  ;;  %5244 = vst [vmem:[#allocation3 + $0xa4] sm:$0x1] %v5243_v3  ;;  %v13601_v62 = vcombine.low %v13593_v57, %v13575_v13  ;;  %v6119_v50 = vor.u32 %v13566_v12, %v13564_v6  ;;  %10275 = vmatprep.mubr.msk.bf16.mxu1 %vm1839_vm9, %v13597_v18  ;;  %v4667_v42 = vmul.f32 %v13536_v59, %v4629_v1  ;;  %v13629_v12 = vld [vmem:[#allocation3 + $0x14] sm:$0xf] }
 0x3a7   : > { %15381 = vst [vmem:[#allocation23_spill] sm:$0xff] %v13597_v18  ;;  %v5260_v54 = vsel %vm11294_vm8, %v5095_v58, %v5259_v55  ;;  %v5253_v36 = vsel %vm11294_vm8, %v5078_v38, %v5252_v2  ;;  %v4665_v48 = vmul.f32 %v13536_v59, %v4627_v44  ;;  %v13619_v24 = vrot.slane %v6122_v33, 5  ;;  %15384 = vst [vmem:[#allocation31_spill] sm:$0xff] %v13629_v12  ;;  %v13650_v46 = vld [vmem:[#allocation3 + $0x94] sm:$0xf] }
 0x3a8   : > { %15382 = vst [vmem:[#allocation39_spill] sm:$0xff] %v13601_v62  ;;  %5261 = vst [vmem:[#allocation3 + $0xc0] sm:$0xf] %v5260_v54  ;;  %v6128_v9 = vrot.slane %v6126_v30, 4  ;;  %10235 = vmatprep.mubr.msk.bf16.mxu0 %vm1839_vm9, %v13601_v62  ;;  %10276 = vmatmul.mubr.msk.bf16.gmra.mxu1 %vm1839_vm9, %v13601_v62  ;;  %v13627_v6 = vcombine.low %v13617_v25, %v13603_v4  ;;  %v4705_v63 = vadd.f32 %v13552_v5, %v4667_v42  ;;  %v13653_v2 = vld [vmem:[#allocation3 + $0x4] sm:$0xf] }
 0x3a9   : > { %5254 = vst [vmem:[#allocation3 + $0xb4] sm:$0xf] %v5253_v36  ;;  %v4703_v59 = vadd.f32 %v13552_v5, %v4665_v48  ;;  %15385 = vst [vmem:[#allocation37_spill] sm:$0xff] %v13635_v52  ;;  %v6089_v22 = vshrl.u32 %v13635_v52, 16  ;;  %v13640_v51 = vrot.slane %v6119_v50, 4  ;;  %v6132_v27 = vshll.u32 %v13629_v12, 16 }
 0x3aa   : > { %15383 = vst [vmem:[#allocation34_spill] sm:$0xff] %v13627_v6  ;;  %10279 = vmatprep.mubr.msk.bf16.mxu1 %vm1839_vm9, %v13627_v6  ;;  %v4737_v47 = vmax.f32 %v4705_v63, 0.0  ;;  %v6129_v20 = vor.u32 %v6128_v9, %v13619_v24  ;;  %v13648_v5 = vcombine.low %v13642_v15, %v13633_v21  ;;  %v6092_v16 = vshll.u32 %v13635_v52, 16  ;;  %15387 = vst [vmem:[#allocation33_spill] sm:$0xff] %v13653_v2  ;;  %v13656_v30 = vld [vmem:[#allocation3 + $0x90] sm:$0xf] }
 0x3ab   : > { %v4735_v7 = vmax.f32 %v4703_v59, 0.0  ;;  %v6102_v33 = vshrl.u32 %v13653_v2, 16  ;;  %15388 = vst [vmem:[#allocation38_spill] sm:$0xff] %v13656_v30  ;;  %v6091_v58 = vrot.slane %v6089_v22, 4  ;;  %v13666_v36 = vcombine.low %v13656_v30, %v13650_v46  ;;  %v13668_v50 = vld [vmem:[#allocation3 + $0x8] sm:$0xf] }
 0x3ac   : > { %15386 = vst [vmem:[#allocation41_spill] sm:$0xff] %v13648_v5  ;;  %v9435_v3 = vpack.c.bf16 %v4737_v47, %v4737_v47  ;;  %15390 = vst [vmem:[#allocation24_spill] sm:$0xff] %v13668_v50  ;;  %v13670_v42 = vrot.slane %v6129_v20, 4  ;;  %v13672_v48 = vrot.slane %v6132_v27, 5  ;;  %v5096_v9 = vrot.slane %v13571_v32, 4 }
 0x3ad   : > { %v9433_v55 = vpack.c.bf16 %v4735_v7, %v4735_v7  ;;  %10236 = vmatmul.mubr.msk.bf16.gmra.mxu0 %vm1839_vm9, %v13627_v6  ;;  %v5263_v59 = vld [vmem:[#allocation3 + $0xc8] sm:$0x1]  ;;  %v13681_v20 = vld [vmem:[#allocation3 + $0xa0] sm:$0xf]  ;;  %v6094_v27 = vrot.slane %v6092_v16, 5  ;;  %v5079_v1 = vrot.slane %v13573_v23, 4 }
 0x3ae   : > { %v5098_v44 = vshrl.u32 %v9435_v3, 16  ;;  %v5101_v63 = vshll.u32 %v9435_v3, 16  ;;  %10239 = vmatprep.mubr.msk.bf16.mxu0 %vm1839_vm9, %v13648_v5  ;;  %v5256_v32 = vld [vmem:[#allocation3 + $0xbc] sm:$0x1]  ;;  %v6098_v3 = vshll.u32 %v13653_v2, 16  ;;  %v6104_v52 = vrot.slane %v6102_v33, 4 }
 0x3af   : > { %v5081_v54 = vshrl.u32 %v9433_v55, 16  ;;  %v5084_v7 = vshll.u32 %v9433_v55, 16  ;;  %v6108_v12 = vshll.u32 %v13668_v50, 16  ;;  %v13692_v18 = vld [vmem:[#allocation3 + $0xac] sm:$0xf]  ;;  %v6095_v16 = vor.u32 %v6094_v27, %v6091_v58 }
 0x3b0   : > { %10280 = vmatmul.mubr.msk.bf16.gmra.mxu1 %vm1839_vm9, %v13648_v5  ;;  %v5100_v22 = vrot.slane %v5098_v44, 7  ;;  %v6100_v23 = vrot.slane %v6098_v3, 5  ;;  %v13704_v58 = vld [vmem:[#allocation3 + $0xa8] sm:$0xf]  ;;  %v6174_v3 = vshrl.u32 %v13375_v61, 16  ;;  %v9270_v2 = vrot.slane %v13351_v26, 9 }
 0x3b1   : > { %v5083_v47 = vrot.slane %v5081_v54, 7  ;;  %10283 = vmatprep.mubr.msk.bf16.mxu1 %vm1839_vm9, %v13666_v36  ;;  %v13686_v54 = vld [vmem:[#allocation3 + $0x9c] sm:$0xf]  ;;  %v6110_v30 = vrot.slane %v6108_v12, 5  ;;  %v6096_v12 = vrot.slane %v6095_v16, 4  ;;  %v13713_v0 = vcombine.low %v13704_v58, %v13692_v18 }
 0x3b2   : > { %v5103_v6 = vor.u32 %v5101_v63, %v5100_v22  ;;  %v5105_v62 = vrot.slane %v5100_v22, 4  ;;  %v13690_v55 = vcombine.low %v13686_v54, %v13681_v20 }
 0x3b3   : > { %v5086_v5 = vor.u32 %v5084_v7, %v5083_v47  ;;  %v5088_v44 = vrot.slane %v5083_v47, 4  ;;  %v6105_v7 = vor.u32 %v6104_v52, %v6100_v23 }
 0x3b4   : > { %v5104_v33 = vsel %vm11422_vm11, %v5096_v9, %v5103_v6  ;;  %v5264_v63 = vsel %vm11266_vm5, %v5105_v62, %v5263_v59  ;;  %v6137_v6 = vshrl.u32 %v13351_v26, 16  ;;  %v6140_v62 = vshll.u32 %v13351_v26, 16  ;;  %v5276_v59 = vld [vmem:[#allocation3 + $0x20] sm:$0xf] }
 0x3b5   : > { %v5087_v22 = vsel %vm11422_vm11, %v5079_v1, %v5086_v5  ;;  %v5257_v47 = vsel %vm11266_vm5, %v5088_v44, %v5256_v32  ;;  %5262 = vst.msk [vmem:[#allocation3 + $0xc4] sm:$0xf] %vm423_vm6, %v5104_v33  ;;  %5265 = vst [vmem:[#allocation3 + $0xc8] sm:$0x1] %v5264_v63  ;;  %10240 = vmatmul.mubr.msk.bf16.gmra.mxu0 %vm1839_vm9, %v13666_v36  ;;  %v6146_v5 = vshll.u32 %v13336_v19, 16  ;;  %v6150_v1 = vshrl.u32 %v13336_v19, 16 }
 0x3b6   : > { %5255 = vst.msk [vmem:[#allocation3 + $0xb8] sm:$0xf] %vm423_vm6, %v5087_v22  ;;  %5258 = vst [vmem:[#allocation3 + $0xbc] sm:$0x1] %v5257_v47  ;;  %v6161_v9 = vshrl.u32 %v13390_v60, 16  ;;  %10243 = vmatprep.mubr.msk.bf16.mxu0 %vm1839_vm9, %v13690_v55  ;;  %v6106_v52 = vrot.slane %v6105_v7, 4  ;;  %v6135_v63 = vsel %vm11873_vm1, %v13670_v42, %v13672_v48  ;;  %v6101_v47 = vsel %vm11873_vm1, %v6096_v12, %v6100_v23 }
 0x3b7   : > { %v6139_v27 = vrot.slane %v6137_v6, 4  ;;  %v6142_v32 = vrot.slane %v6140_v62, 5  ;;  %v6148_v44 = vrot.slane %v6146_v5, 5  ;;  %v6152_v16 = vrot.slane %v6150_v1, 4  ;;  %v13740_v48 = vld [vmem:[#allocation3 + $0xb4] sm:$0xf] }
 0x3b8   : > { %10284 = vmatmul.mubr.msk.bf16.gmra.mxu1 %vm1839_vm9, %v13690_v55  ;;  %v7338_v33 = vrot.slane %v13336_v19, 5  ;;  %v6164_v22 = vshll.u32 %v13390_v60, 16  ;;  %v6111_v61 = vsel %vm11873_vm1, %v6106_v52, %v6110_v30  ;;  %v13735_v7 = vrot.slane %v6170_v39, 5 }
 0x3b9   : > { %10287 = vmatprep.mubr.msk.bf16.mxu1 %vm1839_vm9, %v13713_v0  ;;  %v6153_v6 = vor.u32 %v6152_v16, %v6148_v44  ;;  %v7341_v5 = vrot.slane %v5276_v59, 5  ;;  %v6209_v19 = vshrl.u32 %v13476_v28, 16  ;;  %v6143_v1 = vor.u32 %v6142_v32, %v6139_v27 }
 0x3ba   : > { %v7340_v62 = vrot.slane %v7338_v33, 4  ;;  %v6156_v50 = vshll.u32 %v5276_v59, 16  ;;  %v6176_v42 = vrot.slane %v6174_v3, 4  ;;  %v6218_v60 = vshll.u32 %v13463_v10, 16 }
 0x3bb   : > { %v9190_v12 = vcombine.low %v6101_v47, %v6111_v61  ;;  %v6222_v52 = vshrl.u32 %v13463_v10, 16  ;;  %v6154_v59 = vrot.slane %v6153_v6, 4  ;;  %v7339_v26 = vsel %vm11783_vm14, %v9270_v2, %v7338_v33 }
 0x3bc   : > { %v7342_v39 = vsel %vm11783_vm14, %v7340_v62, %v7341_v5  ;;  %v6163_v27 = vrot.slane %v6161_v9, 4  ;;  %v6166_v32 = vrot.slane %v6164_v22, 5  ;;  %v6185_v47 = vshrl.u32 %v13420_v49, 16  ;;  %v13775_v62 = vld [vmem:[#allocation3 + $0x2c] sm:$0xf] }
 0x3bd   : > { %v13742_v23 = vld [vmem:[#allocation3 + $0xb8] sm:$0xf]  ;;  %10244 = vmatmul.mubr.msk.bf16.gmra.mxu0 %vm1839_vm9, %v13713_v0  ;;  %v13755_v3 = vcombine.low %v7339_v26, %v7342_v39  ;;  %v15393_v10 = vsel %vm11873_vm1, %v13640_v51, %v13619_v24  ;;  %v13765_v6 = vrot.slane %v6209_v19, 4  ;;  %v6144_v2 = vrot.slane %v6143_v1, 4  ;;  %15394 = vst [vmem:[#allocation26_spill] sm:$0xff] %v13775_v62 }
 0x3be   : > { %v13749_v16 = vcombine.low %v13740_v48, %v13742_v23  ;;  %v13763_v61 = vcombine.low %v15393_v10, %v6135_v63  ;;  %v6158_v9 = vrot.slane %v6156_v50, 5  ;;  %v6212_v33 = vshll.u32 %v13476_v28, 16  ;;  %v13781_v5 = vld [vmem:[#allocation3 + $0xc4] sm:$0xf]  ;;  %v13793_v26 = vld [vmem:[#allocation3 + $0xc0] sm:$0xf] }
 0x3bf   : > { %15392 = vst [vmem:[#allocation29_spill] sm:$0xff] %v13755_v3  ;;  %v13772_v22 = vrot.slane %v6218_v60, 5  ;;  %v6188_v24 = vshll.u32 %v13420_v49, 16  ;;  %v6194_v51 = vshll.u32 %v13412_v34, 16  ;;  %v13779_v63 = vrot.slane %v6222_v52, 4  ;;  %15396 = vst [vmem:[#allocation28_spill] sm:$0xff] %v13793_v26 }
 0x3c0   : > { %10247 = vmatprep.mubr.msk.bf16.mxu0 %vm1839_vm9, %v13749_v16  ;;  %10288 = vmatmul.mubr.msk.bf16.gmra.mxu1 %vm1839_vm9, %v13749_v16  ;;  %v6159_v19 = vsel %vm11873_vm1, %v6154_v59, %v6158_v9  ;;  %v6177_v50 = vor.u32 %v6176_v42, %v13735_v7  ;;  %v6198_v28 = vshrl.u32 %v13412_v34, 16  ;;  %v6257_v1 = vshrl.u32 %v13540_v37, 16  ;;  %v13788_v60 = vld [vmem:[#allocation3 + $0x38] sm:$0xf] }
 0x3c1   : > { %10339 = vmatprep.mubr.msk.bf16.mxu1 %vm1839_vm9, %v9190_v12  ;;  %15395 = vst [vmem:[#allocation49_spill] sm:$0xff] %v13788_v60  ;;  %v6187_v12 = vrot.slane %v6185_v47, 4  ;;  %v6190_v39 = vrot.slane %v6188_v24, 5  ;;  %v13790_v49 = vrot.slane %v6194_v51, 5  ;;  %v6260_v52 = vshll.u32 %v13540_v37, 16 }
 0x3c2   : > { %v6149_v10 = vsel %vm11873_vm1, %v6144_v2, %v6148_v44  ;;  %v6180_v59 = vshll.u32 %v13775_v62, 16  ;;  %v6200_v42 = vrot.slane %v6198_v28, 4  ;;  %v6266_v34 = vshll.u32 %v13526_v29, 16  ;;  %v10769_v44 = vld [vmem:[#allocation11 + $0xf0] sm:$0xff]  }
 0x3c3   : > { %v13801_v9 = vcombine.low %v13793_v26, %v13781_v5  ;;  %v13803_v47 = vcombine.low %v6149_v10, %v6159_v19  ;;  %v6167_v24 = vor.u32 %v6166_v32, %v6163_v27  ;;  %v6178_v51 = vrot.slane %v6177_v50, 4 }
 0x3c4   : > { %v6201_v37 = vor.u32 %v6200_v42, %v13790_v49  ;;  %v6242_v3 = vshll.u32 %v13478_v43, 16  ;;  %v6246_v30 = vshrl.u32 %v13478_v43, 16  ;;  %v6191_v2 = vor.u32 %v6190_v39, %v6187_v12  ;;  %v13822_v39 = vld [vmem:[#allocation3 + $0x44] sm:$0xf] }
 0x3c5   : > { %10248 = vmatmul.mubr.msk.bf16.gmra.mxu0 %vm1839_vm9, %v13801_v9  ;;  %v6204_v28 = vshll.u32 %v13788_v60, 16  ;;  %v6233_v62 = vshrl.u32 %v13489_v17, 16  ;;  %v6236_v19 = vshll.u32 %v13489_v17, 16  ;;  %v6214_v10 = vrot.slane %v6212_v33, 5  ;;  %v10770_v42 = vld [vmem:[#allocation11 + $0xe8] sm:$0xff]  }
 0x3c6   : > { %v13813_v27 = vrot.slane %v6257_v1, 4  ;;  %v6270_v32 = vshrl.u32 %v13526_v29, 16  ;;  %10299 = vmatprep.mubr.msk.bf16.mxu0 %vm1839_vm9, %v13356_v31  ;;  %v6182_v43 = vrot.slane %v6180_v59, 5  ;;  %v6168_v50 = vrot.slane %v6167_v24, 4  ;;  %v13835_v60 = vld [vmem:[#allocation3 + $0x50] sm:$0xf] }
 0x3c7   : > { %v6202_v12 = vrot.slane %v6201_v37, 4  ;;  %v13824_v17 = vrot.slane %v6242_v3, 5  ;;  %v6248_v33 = vrot.slane %v6246_v30, 4  ;;  %v13827_v29 = vrot.slane %v6260_v52, 5 }
 0x3c8   : > { %10340 = vmatmul.mubr.msk.bf16.vlgmr.msra.gmra.mxu1 %vm1839_vm9, %v13763_v61  ;;  %v13829_v1 = vrot.slane %v6266_v34, 5  ;;  %v6183_v31 = vsel %vm11873_vm1, %v6178_v51, %v6182_v43  ;;  %v6225_v59 = vor.u32 %v13779_v63, %v13772_v22  ;;  %v6192_v24 = vrot.slane %v6191_v2, 4  ;;  %v10765_v2 = vld [vmem:[#allocation11 + $0x90] sm:$0xff]  }
 0x3c9   : > { %10343 = vmatprep.mubr.msk.bf16.mxu1 %vm1839_vm9, %v13803_v47  ;;  %10412 = vmatpush3.bf16.msra.mxu1 %v13377_v14  ;;  %v6206_v37 = vrot.slane %v6204_v28, 5  ;;  %v6235_v3 = vrot.slane %v6233_v62, 4  ;;  %v6238_v30 = vrot.slane %v6236_v19, 5  ;;  %v13837_v26 = vrot.slane %v6270_v32, 4 }
 0x3ca   : > { %10413 = vmatprep.subr.bf16.mxu1 %v10769_v44  ;;  %v6305_v14 = vshrl.u32 %v13593_v57, 16  ;;  %v6215_v52 = vor.u32 %v6214_v10, %v13765_v6  ;;  %v6228_v34 = vshll.u32 %v13822_v39, 16  ;;  %v6173_v63 = vsel %vm11873_vm1, %v6168_v50, %v13735_v7 }
 0x3cb   : > { %v6207_v51 = vsel %vm11873_vm1, %v6202_v12, %v6206_v37  ;;  %v6249_v28 = vor.u32 %v6248_v33, %v13824_v17  ;;  %v6290_v62 = vshll.u32 %v13569_v11, 16  ;;  %v6314_v19 = vshll.u32 %v13575_v13, 16  ;;  %v10772_v12 = vld [vmem:[#allocation11 + $0xe0] sm:$0xff]   ;;  %v10766_v37 = vld [vmem:[#allocation11 + $0x88] sm:$0xff]  }
 0x3cc   : > { %v13850_v32 = vcombine.low %v6173_v63, %v6183_v31  ;;  %v6226_v6 = vrot.slane %v6225_v59, 4  ;;  %v6252_v10 = vshll.u32 %v13835_v60, 16  ;;  %v6197_v7 = vsel %vm11873_vm1, %v6192_v24, %v13790_v49 }
 0x3cd   : > { %10414 = vmatpush3.bf16.msra.mxu1 %v10769_v44  ;;  %10300 = vmatmul.mubr.msk.bf16.vlgmr.msra.gmra.mxu0 %vm1839_vm9, %v13397_v35  ;;  %v6239_v43 = vor.u32 %v6238_v30, %v6235_v3  ;;  %v6281_v50 = vshrl.u32 %v13591_v53, 16  ;;  %v6284_v44 = vshll.u32 %v13591_v53, 16  ;;  %v13863_v33 = vcombine.low %v6197_v7, %v6207_v51  ;;  %v13882_v51 = vld [vmem:[#allocation11 + $0xb8] sm:$0xff]  }
 0x3ce   : > { %10415 = vmatprep.subr.bf16.mxu1 %v10770_v42  ;;  %10372 = vmatpush3.bf16.msra.mxu0 %v13443_v8  ;;  %v6216_v31 = vrot.slane %v6215_v52, 4  ;;  %v6230_v59 = vrot.slane %v6228_v34, 5  ;;  %v6294_v35 = vshrl.u32 %v13569_v11, 16  ;;  %v6308_v49 = vshll.u32 %v13593_v57, 16  ;;  %v13870_v8 = vld [vmem:[#allocation3 + $0x5c] sm:$0xf] }
 0x3cf   : > { %10303 = vmatprep.mubr.msk.bf16.mxu0 %vm1839_vm9, %v13428_v40  ;;  %v6318_v24 = vshrl.u32 %v13575_v13, 16  ;;  %10373 = vmatprep.subr.bf16.mxu0 %v10765_v2  ;;  %v6250_v53 = vrot.slane %v6249_v28, 4  ;;  %v13872_v3 = vrot.slane %v6290_v62, 5  ;;  %v13874_v40 = vrot.slane %v6305_v14, 4 }
 0x3d0   : > { %10344 = vmatmul.mubr.msk.bf16.gmra.mxu1 %vm1839_vm9, %v13850_v32  ;;  %v6231_v11 = vsel %vm11873_vm1, %v6226_v6, %v6230_v59  ;;  %v6254_v57 = vrot.slane %v6252_v10, 5  ;;  %v6296_v30 = vrot.slane %v6294_v35, 4  ;;  %v6240_v13 = vrot.slane %v6239_v43, 4  ;;  %v13892_v6 = vld [vmem:[#allocation3 + $0x68] sm:$0xf]  ;;  %v10767_v43 = vld [vmem:[#allocation11 + $0x80] sm:$0xff]  }
 0x3d1   : > { %10347 = vmatprep.mubr.msk.bf16.mxu1 %vm1839_vm9, %v13863_v33  ;;  %10416 = vmatpush3.bf16.msra.mxu1 %v10770_v42  ;;  %v6273_v52 = vor.u32 %v13837_v26, %v13829_v1  ;;  %v6283_v34 = vrot.slane %v6281_v50, 4  ;;  %v6286_v63 = vrot.slane %v6284_v44, 5  ;;  %v13884_v14 = vrot.slane %v6314_v19, 5 }
 0x3d2   : > { %10417 = vmatprep.subr.bf16.mxu1 %v10772_v12  ;;  %v6221_v28 = vsel %vm11873_vm1, %v6216_v31, %v13772_v22  ;;  %10374 = vmatpush3.bf16.msra.mxu0 %v10765_v2  ;;  %v6263_v62 = vor.u32 %v13827_v29, %v13813_v27  ;;  %v6276_v42 = vshll.u32 %v13870_v8, 16  ;;  %v6255_v26 = vsel %vm11873_vm1, %v6250_v53, %v6254_v57  ;;  %v13919_v53 = vld [vmem:[#allocation3 + $0x74] sm:$0xf] }
 0x3d3   : > { %v6297_v10 = vor.u32 %v6296_v30, %v13872_v3  ;;  %10375 = vmatprep.subr.bf16.mxu0 %v10766_v37  ;;  %v6338_v19 = vshll.u32 %v13603_v4, 16  ;;  %v6342_v7 = vshrl.u32 %v13603_v4, 16  ;;  %v6320_v22 = vrot.slane %v6318_v24, 4 }
 0x3d4   : > { %v13899_v2 = vcombine.low %v6221_v28, %v6231_v11  ;;  %v6329_v27 = vshrl.u32 %v13617_v25, 16  ;;  %v6332_v29 = vshll.u32 %v13617_v25, 16  ;;  %v6245_v50 = vsel %vm11873_vm1, %v6240_v13, %v13824_v17 }
 0x3d5   : > { %10418 = vmatpush3.bf16.msra.mxu1 %v10772_v12  ;;  %10304 = vmatmul.mubr.msk.bf16.gmra.mxu0 %vm1839_vm9, %v13482_v45  ;;  %v6274_v44 = vrot.slane %v6273_v52, 4  ;;  %v6287_v31 = vor.u32 %v6286_v63, %v6283_v34  ;;  %v6300_v4 = vshll.u32 %v13892_v6, 16  ;;  %v6310_v59 = vrot.slane %v6308_v49, 5  ;;  %v13915_v45 = vld [vmem:[#allocation11 + $0x58] sm:$0xff]  }
 0x3d6   : > { %10491 = vmatprep.subr.bf16.mxu1 %v13882_v51  ;;  %v6353_v35 = vshrl.u32 %v13642_v15, 16  ;;  %10307 = vmatprep.mubr.msk.bf16.mxu0 %vm1839_vm9, %v13498_v41  ;;  %v13913_v25 = vcombine.low %v6245_v50, %v6255_v26  ;;  %v6264_v12 = vrot.slane %v6263_v62, 4  ;;  %v6278_v17 = vrot.slane %v6276_v42, 5  ;;  %v13936_v26 = vld [vmem:[#allocation3 + $0x80] sm:$0xf]  ;;  %v15397_v50 = vld [vmem:[#allocation38_spill] sm:$0xff] }
 0x3d7   : > { %10376 = vmatpush3.bf16.msra.mxu0 %v10766_v37  ;;  %v6298_v24 = vrot.slane %v6297_v10, 4  ;;  %v13921_v11 = vrot.slane %v6338_v19, 5  ;;  %v6344_v49 = vrot.slane %v6342_v7, 4  ;;  %v6356_v57 = vshll.u32 %v13642_v15, 16 }
 0x3d8   : > { %10348 = vmatmul.mubr.msk.bf16.gmra.mxu1 %vm1839_vm9, %v13899_v2  ;;  %10377 = vmatprep.subr.bf16.mxu0 %v10767_v43  ;;  %v6321_v41 = vor.u32 %v6320_v22, %v13884_v14  ;;  %v6331_v37 = vrot.slane %v6329_v27, 4  ;;  %v6334_v30 = vrot.slane %v6332_v29, 5  ;;  %v6362_v13 = vshll.u32 %v13633_v21, 16 }
 0x3d9   : > { %10351 = vmatprep.mubr.msk.bf16.mxu1 %vm1839_vm9, %v13913_v25  ;;  %v6279_v52 = vsel %vm11873_vm1, %v6274_v44, %v6278_v17  ;;  %v6288_v34 = vrot.slane %v6287_v31, 4  ;;  %v6302_v63 = vrot.slane %v6300_v4, 5  ;;  %v6366_v28 = vshrl.u32 %v13633_v21, 16 }
 0x3da   : > { %v6269_v15 = vsel %vm11873_vm1, %v6264_v12, %v13829_v1  ;;  %v6311_v62 = vor.u32 %v6310_v59, %v13874_v40  ;;  %v6324_v42 = vshll.u32 %v13919_v53, 16  ;;  %v6345_v19 = vor.u32 %v6344_v49, %v13921_v11  ;;  %v15398_v59 = vld [vmem:[#allocation23_spill] sm:$0xff] }
 0x3db   : > { %10378 = vmatpush3.bf16.msra.mxu0 %v10767_v43  ;;  %v6303_v10 = vsel %vm11873_vm1, %v6298_v24, %v6302_v63  ;;  %v6386_v7 = vshll.u32 %v13650_v46, 16  ;;  %v6390_v21 = vshrl.u32 %v13650_v46, 16  ;;  %v6401_v1 = vshrl.u32 %v13686_v54, 16  ;;  %v13970_v63 = vld [vmem:[#allocation3 + $0x8c] sm:$0xf] }
 0x3dc   : > { %10451 = vmatprep.subr.bf16.mxu0 %v13915_v45  ;;  %v13945_v22 = vcombine.low %v6269_v15, %v6279_v52  ;;  %v6322_v40 = vrot.slane %v6321_v41, 4  ;;  %v6335_v27 = vor.u32 %v6334_v30, %v6331_v37  ;;  %v6293_v43 = vsel %vm11873_vm1, %v6288_v34, %v13872_v3 }
 0x3dd   : > { %10308 = vmatmul.mubr.msk.bf16.gmra.mxu0 %vm1839_vm9, %v13544_v56  ;;  %v6348_v29 = vshll.u32 %v13936_v26, 16  ;;  %v6377_v44 = vshrl.u32 %v15397_v50, 16  ;;  %v6380_v46 = vshll.u32 %v15397_v50, 16  ;;  %v13955_v31 = vrot.slane %v6362_v13, 5 }
 0x3de   : > { %v6368_v4 = vrot.slane %v6366_v28, 4  ;;  %10311 = vmatprep.mubr.msk.bf16.mxu0 %vm1839_vm9, %v15398_v59  ;;  %v13959_v12 = vcombine.low %v6293_v43, %v6303_v10  ;;  %v6312_v17 = vrot.slane %v6311_v62, 4  ;;  %v6326_v56 = vrot.slane %v6324_v42, 5  ;;  %v15399_v43 = vld [vmem:[#allocation39_spill] sm:$0xff]  ;;  %v15400_v59 = vld [vmem:[#allocation34_spill] sm:$0xff] }
 0x3df   : > { %v6346_v3 = vrot.slane %v6345_v19, 4  ;;  %v13963_v24 = vrot.slane %v6386_v7, 5  ;;  %v6392_v49 = vrot.slane %v6390_v21, 4  ;;  %v6355_v41 = vrot.slane %v6353_v35, 4 }
 0x3e0   : > { %10352 = vmatmul.mubr.msk.bf16.gmra.mxu1 %vm1839_vm9, %v13945_v22  ;;  %v6358_v37 = vrot.slane %v6356_v57, 5  ;;  %v6404_v30 = vshll.u32 %v13686_v54, 16  ;;  %v6336_v13 = vrot.slane %v6335_v27, 4  ;;  %v6327_v52 = vsel %vm11873_vm1, %v6322_v40, %v6326_v56  ;;  %v13978_v57 = vld [vmem:[#allocation3 + $0x98] sm:$0xf] }
 0x3e1   : > { %10355 = vmatprep.mubr.msk.bf16.mxu1 %vm1839_vm9, %v13959_v12  ;;  %v6350_v34 = vrot.slane %v6348_v29, 5  ;;  %v6379_v28 = vrot.slane %v6377_v44, 4  ;;  %v6382_v15 = vrot.slane %v6380_v46, 5  ;;  %v6410_v62 = vshll.u32 %v13681_v20, 16 }
 0x3e2   : > { %v6414_v42 = vshrl.u32 %v13681_v20, 16  ;;  %v6317_v54 = vsel %vm11873_vm1, %v6312_v17, %v13884_v14  ;;  %v6369_v35 = vor.u32 %v6368_v4, %v13955_v31  ;;  %v6393_v19 = vor.u32 %v6392_v49, %v13963_v24 }
 0x3e3   : > { %v6351_v10 = vsel %vm11873_vm1, %v6346_v3, %v6350_v34  ;;  %v6434_v7 = vshll.u32 %v13692_v18, 16  ;;  %v6438_v21 = vshrl.u32 %v13692_v18, 16  ;;  %v13985_v40 = vcombine.low %v6317_v54, %v6327_v52 }
 0x3e4   : > { %v6341_v20 = vsel %vm11873_vm1, %v6336_v13, %v13921_v11  ;;  %v6359_v14 = vor.u32 %v6358_v37, %v6355_v41  ;;  %v6372_v27 = vshll.u32 %v13970_v63, 16  ;;  %v6383_v29 = vor.u32 %v6382_v15, %v6379_v28  ;;  %v14004_v28 = vld [vmem:[#allocation3 + $0xa4] sm:$0xf] }
 0x3e5   : > { %10312 = vmatmul.mubr.msk.bf16.gmra.mxu0 %vm1839_vm9, %v15399_v43  ;;  %v6396_v50 = vshll.u32 %v13978_v57, 16  ;;  %v6425_v44 = vshrl.u32 %v13704_v58, 16  ;;  %v6428_v46 = vshll.u32 %v13704_v58, 16  ;;  %v6412_v18 = vrot.slane %v6410_v62, 5 }
 0x3e6   : > { %v6416_v4 = vrot.slane %v6414_v42, 4  ;;  %10315 = vmatprep.mubr.msk.bf16.mxu0 %vm1839_vm9, %v15400_v59  ;;  %v13998_v17 = vcombine.low %v6341_v20, %v6351_v10  ;;  %v6370_v11 = vrot.slane %v6369_v35, 4  ;;  %v6394_v56 = vrot.slane %v6393_v19, 4 }
 0x3e7   : > { %v6436_v3 = vrot.slane %v6434_v7, 5  ;;  %v6440_v49 = vrot.slane %v6438_v21, 4  ;;  %v6403_v41 = vrot.slane %v6401_v1, 4  ;;  %v6406_v37 = vrot.slane %v6404_v30, 5  ;;  %v14010_v30 = vld [vmem:[#allocation3 + $0xb0] sm:$0xf] }
 0x3e8   : > { %10356 = vmatmul.mubr.msk.bf16.gmra.mxu1 %vm1839_vm9, %v13985_v40  ;;  %v6360_v58 = vrot.slane %v6359_v14, 4  ;;  %v6374_v13 = vrot.slane %v6372_v27, 5  ;;  %v6384_v52 = vrot.slane %v6383_v29, 4  ;;  %v6398_v34 = vrot.slane %v6396_v50, 5  ;;  %v15401_v27 = vld [vmem:[#allocation41_spill] sm:$0xff] }
 0x3e9   : > { %10359 = vmatprep.mubr.msk.bf16.mxu1 %vm1839_vm9, %v13998_v17  ;;  %v6427_v15 = vrot.slane %v6425_v44, 4  ;;  %v6430_v62 = vrot.slane %v6428_v46, 5  ;;  %v6458_v42 = vshll.u32 %v13742_v23, 16  ;;  %v6462_v54 = vshrl.u32 %v13742_v23, 16 }
 0x3ea   : > { %v6375_v35 = vsel %vm11873_vm1, %v6370_v11, %v6374_v13  ;;  %v6417_v1 = vor.u32 %v6416_v4, %v6412_v18  ;;  %v6449_v10 = vshrl.u32 %v13740_v48, 16  ;;  %v6399_v19 = vsel %vm11873_vm1, %v6394_v56, %v6398_v34 }
 0x3eb   : > { %v6441_v7 = vor.u32 %v6440_v49, %v6436_v3  ;;  %v6452_v21 = vshll.u32 %v13740_v48, 16  ;;  %v6365_v20 = vsel %vm11873_vm1, %v6360_v58, %v13955_v31  ;;  %v6407_v14 = vor.u32 %v6406_v37, %v6403_v41  ;;  %v14036_v58 = vld [vmem:[#allocation3 + $0xbc] sm:$0xf] }
 0x3ec   : > { %v6420_v23 = vshll.u32 %v14004_v28, 16  ;;  %v14022_v43 = vcombine.low %v6365_v20, %v6375_v35  ;;  %v6389_v29 = vsel %vm11873_vm1, %v6384_v52, %v13963_v24  ;;  %v6431_v50 = vor.u32 %v6430_v62, %v6427_v15  ;;  %v10774_v20 = vld [vmem:[#allocation11 + $0x50] sm:$0xff]  }
 0x3ed   : > { %10316 = vmatmul.mubr.msk.bf16.gmra.mxu0 %vm1839_vm9, %v15401_v27  ;;  %v6444_v44 = vshll.u32 %v14010_v30, 16  ;;  %v6460_v48 = vrot.slane %v6458_v42, 5  ;;  %v6464_v46 = vrot.slane %v6462_v54, 4  ;;  %v14030_v31 = vcombine.low %v6389_v29, %v6399_v19  ;;  %v14069_v19 = vld [vmem:[#allocation3 + $0xcc] sm:$0xf] }
 0x3ee   : > { %10319 = vmatprep.mubr.msk.bf16.mxu0 %vm1839_vm9, %v13666_v36  ;;  %v6418_v4 = vrot.slane %v6417_v1, 4  ;;  %v6442_v59 = vrot.slane %v6441_v7, 4  ;;  %v6451_v11 = vrot.slane %v6449_v10, 4  ;;  %v6454_v56 = vrot.slane %v6452_v21, 5  ;;  %v14071_v7 = vld [vmem:[#allocation3 + $0xd0] sm:$0xf] }
 0x3ef   : > { %v6408_v24 = vrot.slane %v6407_v14, 4  ;;  %v6422_v49 = vrot.slane %v6420_v23, 5  ;;  %v6432_v41 = vrot.slane %v6431_v50, 4  ;;  %v6446_v37 = vrot.slane %v6444_v44, 5  ;;  %v10780_v14 = vld [vmem:[#allocation11 + $0xa0] sm:$0xff]  }
 0x3f0   : > { %10360 = vmatmul.mubr.msk.bf16.gmra.mxu1 %vm1839_vm9, %v14022_v43  ;;  %v6465_v13 = vor.u32 %v6464_v46, %v6460_v48  ;;  %v6455_v15 = vor.u32 %v6454_v56, %v6451_v11  ;;  %v6468_v62 = vshll.u32 %v14036_v58, 16  ;;  %v9169_v21 = vcombine.low %v14069_v19, %v14071_v7 }
 0x3f1   : > { %10363 = vmatprep.mubr.msk.bf16.mxu1 %vm1839_vm9, %v14030_v31  ;;  %v6423_v36 = vsel %vm11873_vm1, %v6418_v4, %v6422_v49  ;;  %v6447_v52 = vsel %vm11873_vm1, %v6442_v59, %v6446_v37  ;;  %v6413_v34 = vsel %vm11873_vm1, %v6408_v24, %v6412_v18  ;;  %v6437_v54 = vsel %vm11873_vm1, %v6432_v41, %v6436_v3  ;;  %v14136_v41 = vld [vmem:[#allocation3 + $0xd4] sm:$0xf] }
 0x3f2   : > { %v14047_v42 = vcombine.low %v6413_v34, %v6423_v36  ;;  %v14053_v35 = vcombine.low %v6437_v54, %v6447_v52  ;;  %v6466_v1 = vrot.slane %v6465_v13, 4  ;;  %v6456_v18 = vrot.slane %v6455_v15, 4 }
 0x3f3   : > { %v6470_v10 = vrot.slane %v6468_v62, 5  ;;  %v7051_v27 = vshrl.u32 %v14069_v19, 16  ;;  %v7054_v29 = vshll.u32 %v14069_v19, 16  ;;  %v7070_v52 = vshll.u32 %v14136_v41, 16  ;;  %v10811_v62 = vld [vmem:[#allocation3 + $0x10] sm:$0xf] }
 0x3f4   : > { %v6461_v3 = vsel %vm11873_vm1, %v6456_v18, %v6460_v48  ;;  %v14131_v48 = vld [vmem:[#allocation3 + $0xc8] sm:$0xf]  ;;  %v7331_v54 = vrot.slane %v10811_v62, 5 }
 0x3f5   : > { %10320 = vmatmul.mubr.msk.bf16.gmra.mxu0 %vm1839_vm9, %v13690_v55  ;;  %v6471_v55 = vsel %vm11873_vm1, %v6466_v1, %v6470_v10  ;;  %v7053_v46 = vrot.slane %v7051_v27, 4  ;;  %v7056_v4 = vrot.slane %v7054_v29, 5  ;;  %v6814_v49 = vshll.u32 %v14131_v48, 16  ;;  %v15406_v27 = vld [vmem:[#allocation37_spill] sm:$0xff] }
 0x3f6   : > { %10323 = vmatprep.mubr.msk.bf16.mxu0 %vm1839_vm9, %v13713_v0  ;;  %v14065_v0 = vcombine.low %v6461_v3, %v6471_v55  ;;  %v7072_v10 = vrot.slane %v7070_v52, 5  ;;  %v9268_v29 = vrot.slane %v15406_v27, 9 }
 0x3f7   : > { %v7057_v36 = vor.u32 %v7056_v4, %v7053_v46  ;;  %v6816_v15 = vrot.slane %v6814_v49, 5 }
 0x3f8   : > { %10364 = vmatmul.mubr.msk.bf16.gmra.mxu1 %vm1839_vm9, %v14047_v42 }
 0x3f9   : > { %10367 = vmatprep.mubr.msk.bf16.mxu1 %vm1839_vm9, %v14053_v35 }
 0x3fd   : > { %10324 = vmatmul.mubr.msk.bf16.gmra.mxu0 %vm1839_vm9, %v13749_v16  ;;  %v10778_v16 = vld [vmem:[#allocation11 + $0xb0] sm:$0xff]  }
 0x3fe   : > { %10327 = vmatprep.mubr.msk.bf16.mxu0 %vm1839_vm9, %v13801_v9  ;;  %v10779_v9 = vld [vmem:[#allocation11 + $0xa8] sm:$0xff]  }
 0x400   : > { %10368 = vmatmul.mubr.msk.bf16.gmra.mxu1 %vm1839_vm9, %v14065_v0 }
 0x401   : > { %10419 = vmatprep.mubr.msk.bf16.mxu1 %vm1839_vm9, %v13803_v47 }
 0x405   : > { %10328 = vmatmul.mubr.msk.bf16.gmra.mxu0 %vm1839_vm9, %v9169_v21 }
 0x406   : > { %10379 = vmatprep.mubr.msk.bf16.mxu0 %vm1839_vm9, %v13763_v61  ;;  %v10775_v61 = vld [vmem:[#allocation11 + $0x48] sm:$0xff]  }
 0x408   : > { %10420 = vmatmul.mubr.msk.bf16.vlgmr.msra.gmra.mxu1 %vm1839_vm9, %v13850_v32 }
 0x409   : > { %10423 = vmatprep.mubr.msk.bf16.mxu1 %vm1839_vm9, %v13863_v33  ;;  %10492 = vmatpush3.bf16.msra.mxu1 %v13882_v51  ;;  %v6808_v51 = vshrl.u32 %v13781_v5, 16 }
 0x40a   : > { %10493 = vmatprep.subr.bf16.mxu1 %v10778_v16 }
 0x40b   : > { %v6810_v23 = vrot.slane %v6808_v51, 4 }
 0x40d   : > { %10494 = vmatpush3.bf16.msra.mxu1 %v10778_v16  ;;  %10380 = vmatmul.mubr.msk.bf16.vlgmr.msra.gmra.mxu0 %vm1839_vm9, %v13803_v47  ;;  %v10776_v47 = vld [vmem:[#allocation11 + $0x40] sm:$0xff]   ;;  %v7333_v16 = vrot.slane %v7331_v54, 4 }
 0x40e   : > { %10495 = vmatprep.subr.bf16.mxu1 %v10779_v9  ;;  %10452 = vmatpush3.bf16.msra.mxu0 %v13915_v45 }
 0x40f   : > { %10383 = vmatprep.mubr.msk.bf16.mxu0 %vm1839_vm9, %v13850_v32  ;;  %10453 = vmatprep.subr.bf16.mxu0 %v10774_v20  ;;  %v14102_v32 = vld [vmem:[#allocation11 + $0x118] sm:$0xff]  }
 0x410   : > { %10424 = vmatmul.mubr.msk.bf16.gmra.mxu1 %vm1839_vm9, %v13899_v2 }
 0x411   : > { %10427 = vmatprep.mubr.msk.bf16.mxu1 %vm1839_vm9, %v13913_v25  ;;  %10496 = vmatpush3.bf16.msra.mxu1 %v10779_v9  ;;  %v15403_v9 = vld [vmem:[#allocation33_spill] sm:$0xff] }
 0x412   : > { %10497 = vmatprep.subr.bf16.mxu1 %v10780_v14  ;;  %10454 = vmatpush3.bf16.msra.mxu0 %v10774_v20  ;;  %v7324_v20 = vrot.slane %v15403_v9, 5 }
 0x413   : > { %10455 = vmatprep.subr.bf16.mxu0 %v10775_v61 }
 0x415   : > { %10498 = vmatpush3.bf16.msra.mxu1 %v10780_v14  ;;  %10384 = vmatmul.mubr.msk.bf16.gmra.mxu0 %vm1839_vm9, %v13863_v33  ;;  %v6804_v33 = vshll.u32 %v13781_v5, 16  ;;  %v7064_v5 = vshrl.u32 %v14071_v7, 16 }
 0x416   : > { %10387 = vmatprep.mubr.msk.bf16.mxu0 %vm1839_vm9, %v13899_v2  ;;  %10456 = vmatpush3.bf16.msra.mxu0 %v10775_v61  ;;  %v15402_v2 = vld [vmem:[#allocation28_spill] sm:$0xff] }
 0x417   : > { %10457 = vmatprep.subr.bf16.mxu0 %v10776_v47  ;;  %v6795_v45 = vshrl.u32 %v15402_v2, 16  ;;  %v7066_v11 = vrot.slane %v7064_v5, 4 }
 0x418   : > { %10428 = vmatmul.mubr.msk.bf16.gmra.mxu1 %vm1839_vm9, %v13945_v22 }
 0x419   : > { %10431 = vmatprep.mubr.msk.bf16.mxu1 %vm1839_vm9, %v13959_v12  ;;  %v6797_v50 = vrot.slane %v6795_v45, 4  ;;  %v10812_v45 = vld [vmem:[#allocation3 + $0xc] sm:$0xf] }
 0x41a   : > { %10458 = vmatpush3.bf16.msra.mxu0 %v10776_v47  ;;  %v15404_v47 = vld [vmem:[#allocation31_spill] sm:$0xff] }
 0x41b   : > { %10531 = vmatprep.subr.bf16.mxu0 %v14102_v32 }
 0x41d   : > { %10388 = vmatmul.mubr.msk.bf16.gmra.mxu0 %vm1839_vm9, %v13913_v25  ;;  %v6798_v25 = vshll.u32 %v15402_v2, 16 }
 0x41e   : > { %10391 = vmatprep.mubr.msk.bf16.mxu0 %vm1839_vm9, %v13945_v22  ;;  %v6806_v22 = vrot.slane %v6804_v33, 5  ;;  %v7334_v33 = vrot.slane %v15404_v47, 5 }
 0x41f   : > { %v6800_v44 = vrot.slane %v6798_v25, 5  ;;  %v9269_v25 = vrot.slane %v10812_v45, 9 }
 0x420   : > { %10432 = vmatmul.mubr.msk.bf16.gmra.mxu1 %vm1839_vm9, %v13985_v40 }
 0x421   : > { %10435 = vmatprep.mubr.msk.bf16.mxu1 %vm1839_vm9, %v13998_v17  ;;  %v6801_v24 = vor.u32 %v6800_v44, %v6797_v50  ;;  %v7326_v50 = vrot.slane %v7324_v20, 4  ;;  %v15407_v44 = vld [vmem:[#allocation24_spill] sm:$0xff] }
 0x422   : > { %v7327_v38 = vrot.slane %v15407_v44, 5 }
 0x423   : > { %v6802_v34 = vrot.slane %v6801_v24, 4 }
 0x424   : > { %v7328_v52 = vsel %vm11783_vm14, %v7326_v50, %v7327_v38  ;;  %v10818_v38 = vld [vmem:[#allocation3 + $0x4c] sm:$0xf] }
 0x425   : > { %10392 = vmatmul.mubr.msk.bf16.gmra.mxu0 %vm1839_vm9, %v13959_v12  ;;  %v7060_v12 = vshll.u32 %v14071_v7, 16  ;;  %v6807_v3 = vsel %vm11873_vm1, %v6802_v34, %v6806_v22 }
 0x426   : > { %10395 = vmatprep.mubr.msk.bf16.mxu0 %vm1839_vm9, %v13985_v40  ;;  %v6811_v40 = vor.u32 %v6810_v23, %v6806_v22  ;;  %v7335_v23 = vsel %vm11783_vm14, %v7333_v16, %v7334_v33 }
 0x427   : > { %v7062_v59 = vrot.slane %v7060_v12, 5 }
 0x428   : > { %10436 = vmatmul.mubr.msk.bf16.gmra.mxu1 %vm1839_vm9, %v14022_v43  ;;  %v6812_v37 = vrot.slane %v6811_v40, 4  ;;  %v10813_v40 = vld [vmem:[#allocation3 + $0x28] sm:$0xf] }
 0x429   : > { %10439 = vmatprep.mubr.msk.bf16.mxu1 %vm1839_vm9, %v14030_v31  ;;  %v7067_v13 = vor.u32 %v7066_v11, %v7062_v59  ;;  %v7345_v46 = vrot.slane %v10813_v40, 5  ;;  %v7366_v40 = vrot.slane %v10818_v38, 5 }
 0x42a   : > { %v6817_v1 = vsel %vm11873_vm1, %v6812_v37, %v6816_v15 }
 0x42b   : > { %v7068_v18 = vrot.slane %v7067_v13, 4  ;;  %v9226_v21 = vcombine.low %v6807_v3, %v6817_v1  ;;  %v7325_v13 = vsel %vm11783_vm14, %v9268_v29, %v7324_v20  ;;  %v10816_v3 = vld [vmem:[#allocation3 + $0x40] sm:$0xf]  ;;  %v7362_v29 = vrot.slane %v13822_v39, 5 }
 0x42c   : > { %v7359_v16 = vrot.slane %v10816_v3, 5 }
 0x42d   : > { %v10261_v56 = vpop.f32.mrf.mxu1  ;;  %10396 = vmatmul.mubr.msk.bf16.gmra.mxu0 %vm1839_vm9, %v13998_v17 }
 0x42e   : > { %10399 = vmatprep.mubr.msk.bf16.mxu0 %vm1839_vm9, %v14022_v43  ;;  %v7058_v43 = vrot.slane %v7057_v36, 4  ;;  %v7361_v45 = vrot.slane %v7359_v16, 4 }
 0x42f   : > { %v5718_v17 = vpop.f32.mrf.mxu1 }
 0x430   : > { %10440 = vmatmul.mubr.msk.bf16.gmra.mxu1 %vm1839_vm9, %v14047_v42  ;;  %v7063_v61 = vsel %vm11873_vm1, %v7058_v43, %v7062_v59 }
 0x431   : > { %10443 = vmatprep.mubr.msk.bf16.mxu1 %vm1839_vm9, %v14053_v35  ;;  %v10262_v55 = vpop.f32.mrf.mxu1 }
 0x435   : > { %10400 = vmatmul.mubr.msk.bf16.gmra.mxu0 %vm1839_vm9, %v14030_v31  ;;  %v7073_v31 = vsel %vm11873_vm1, %v7068_v18, %v7072_v10  ;;  %v10815_v18 = vld [vmem:[#allocation3 + $0x24] sm:$0xf] }
 0x436   : > { %10403 = vmatprep.mubr.msk.bf16.mxu0 %vm1839_vm9, %v14047_v42  ;;  %v5721_v42 = vpop.f32.mrf.mxu1  ;;  %v9247_v12 = vcombine.low %v7063_v61, %v7073_v31  ;;  %v9271_v10 = vrot.slane %v10815_v18, 9 }
 0x438   : > { %10444 = vmatmul.mubr.msk.bf16.gmra.mxu1 %vm1839_vm9, %v14065_v0 }
 0x439   : > { %v10221_v14 = vpop.f32.mrf.mxu0  ;;  %10447 = vmatprep.mubr.msk.bf16.mxu1 %vm1839_vm9, %v9226_v21 }
 0x43a   : > { %v14162_v51 = vadd.f32 %v10261_v56, %v10221_v14  ;;  %v7332_v56 = vsel %vm11783_vm14, %v9269_v25, %v7331_v54  ;;  %v10814_v54 = vld [vmem:[#allocation3 + $0x34] sm:$0xf]  ;;  %v7346_v14 = vsel %vm11783_vm14, %v9271_v10, %v7345_v46 }
 0x43b   : > { %v5525_v2 = vpop.f32.mrf.mxu0  ;;  %v9285_v49 = vcombine.low %v7332_v56, %v7335_v23  ;;  %v7352_v1 = vrot.slane %v10814_v54, 5  ;;  %v15410_v23 = vld [vmem:[#allocation49_spill] sm:$0xff]  ;;  %v7369_v54 = vrot.slane %v13835_v60, 5  ;;  %v10823_v60 = vld [vmem:[#allocation3 + $0x54] sm:$0xf] }
 0x43c   : > { %v14167_v5 = vadd.f32 %v5718_v17, %v5525_v2  ;;  %v15408_v17 = vld [vmem:[#allocation26_spill] sm:$0xff]  ;;  %v15409_v2 = vld [vmem:[#allocation29_spill] sm:$0xff]  ;;  %v7355_v27 = vrot.slane %v15410_v23, 5 }
 0x43d   : > { %v10222_v4 = vpop.f32.mrf.mxu0  ;;  %10404 = vmatmul.mubr.msk.bf16.gmra.mxu0 %vm1839_vm9, %v14053_v35  ;;  %v7347_v35 = vrot.slane %v7345_v46, 4  ;;  %v7348_v34 = vrot.slane %v15408_v17, 5  ;;  %v7354_v33 = vrot.slane %v7352_v1, 4  ;;  %v10819_v46 = vld [vmem:[#allocation3 + $0x3c] sm:$0xf]  ;;  %v10782_v56 = vld [vmem:[#allocation11 + $0x110] sm:$0xff]  }
 0x43e   : > { %v14170_v59 = vadd.f32 %v10262_v55, %v10222_v4  ;;  %10407 = vmatprep.mubr.msk.bf16.mxu0 %vm1839_vm9, %v14065_v0  ;;  %v9284_v0 = vcombine.low %v7325_v13, %v7328_v52  ;;  %v9273_v4 = vrot.slane %v10819_v46, 9 }
 0x43f   : > { %v10265_v11 = vpop.f32.mrf.mxu1  ;;  %v5528_v24 = vpop.f32.mrf.mxu0  ;;  %v7349_v55 = vsel %vm11783_vm14, %v7347_v35, %v7348_v34  ;;  %v7356_v44 = vsel %vm11783_vm14, %v7354_v33, %v7355_v27  ;;  %v7368_v34 = vrot.slane %v7366_v40, 4  ;;  %v10784_v27 = vld [vmem:[#allocation11 + $0x100] sm:$0xff]  }
 0x440   : > { %v14178_v37 = vadd.f32 %v5721_v42, %v5528_v24  ;;  %10448 = vmatmul.mubr.msk.bf16.gmra.mxu1 %vm1839_vm9, %v9247_v12  ;;  %v14197_v47 = vcombine.low %v7346_v14, %v7349_v55  ;;  %v10817_v12 = vld [vmem:[#allocation3 + $0x30] sm:$0xf]  ;;  %v10820_v24 = vld [vmem:[#allocation3 + $0x58] sm:$0xf]  ;;  %v7360_v52 = vsel %vm11783_vm14, %v9273_v4, %v7359_v16  ;;  %v10821_v55 = vld [vmem:[#allocation3 + $0x48] sm:$0xf] }
 0x441   : > { %v5734_v36 = vpop.f32.mrf.mxu1  ;;  %10499 = vmatprep.mubr.msk.bf16.mxu1 %vm1839_vm9, %v9285_v49  ;;  %v9272_v50 = vrot.slane %v10817_v12, 9  ;;  %v9274_v3 = vrot.slane %v10821_v55, 9  ;;  %v7370_v16 = vsel %vm11783_vm14, %v7368_v34, %v7369_v54  ;;  %v10822_v14 = vld [vmem:[#allocation3 + $0x64] sm:$0xf]  ;;  %v10826_v34 = vld [vmem:[#allocation3 + $0x7c] sm:$0xf] }
 0x442   : > { %v10828_v54 = vld [vmem:[#allocation3 + $0x88] sm:$0xf] }
 0x443   : > { %v10225_v15 = vpop.f32.mrf.mxu0  ;;  %v10266_v62 = vpop.f32.mrf.mxu1  ;;  %v7353_v13 = vsel %vm11783_vm14, %v9272_v50, %v7352_v1  ;;  %v7376_v1 = vrot.slane %v13870_v8, 5  ;;  %v10824_v8 = vld [vmem:[#allocation3 + $0x70] sm:$0xf] }
 0x444   : > { %v14187_v43 = vadd.f32 %v10265_v11, %v10225_v15  ;;  %v7363_v11 = vsel %vm11783_vm14, %v7361_v45, %v7362_v29  ;;  %v14216_v39 = vcombine.low %v7353_v13, %v7356_v44  ;;  %v7387_v23 = vrot.slane %v10824_v8, 5  ;;  %v10825_v13 = vld [vmem:[#allocation3 + $0x60] sm:$0xf]  ;;  %v10830_v8 = vld [vmem:[#allocation3 + $0x94] sm:$0xf] }
 0x445   : > { %v5541_v9 = vpop.f32.mrf.mxu0  ;;  %10408 = vmatmul.mubr.msk.bf16.gmra.mxu0 %vm1839_vm9, %v9226_v21  ;;  %v5737_v31 = vpop.f32.mrf.mxu1  ;;  %v14223_v17 = vcombine.low %v7360_v52, %v7363_v11  ;;  %v7367_v29 = vsel %vm11783_vm14, %v9274_v3, %v7366_v40  ;;  %v9276_v52 = vrot.slane %v10825_v13, 9 }
 0x446   : > { %v14191_v20 = vadd.f32 %v5734_v36, %v5541_v9  ;;  %10459 = vmatprep.mubr.msk.bf16.mxu0 %vm1839_vm9, %v9284_v0  ;;  %v7373_v36 = vrot.slane %v10820_v24, 5  ;;  %v10783_v0 = vld [vmem:[#allocation11 + $0x108] sm:$0xff]   ;;  %v14245_v50 = vcombine.low %v7367_v29, %v7370_v16  ;;  %v7389_v40 = vrot.slane %v7387_v23, 4 }
 0x447   : > { %v10226_v61 = vpop.f32.mrf.mxu0 }
 0x448   : > { %v14199_v42 = vadd.f32 %v10266_v62, %v10226_v61  ;;  %10500 = vmatmul.mubr.msk.bf16.vlgmr.msra.gmra.mxu1 %vm1839_vm9, %v15409_v2  ;;  %v7380_v61 = vrot.slane %v10822_v14, 5 }
 0x449   : > { %v5544_v25 = vpop.f32.mrf.mxu0  ;;  %10503 = vmatprep.mubr.msk.bf16.mxu1 %vm1839_vm9, %v14197_v47 }
 0x44a   : > { %v14206_v21 = vadd.f32 %v5737_v31, %v5544_v25  ;;  %v9275_v31 = vrot.slane %v10823_v60, 9  ;;  %v7382_v11 = vrot.slane %v7380_v61, 4  ;;  %v7404_v60 = vrot.slane %v13970_v63, 5 }
 0x44c   : > { %v7374_v44 = vsel %vm11783_vm14, %v9275_v31, %v7373_v36 }
 0x44d   : > { %10460 = vmatmul.mubr.msk.bf16.vlgmr.msra.gmra.mxu0 %vm1839_vm9, %v9285_v49  ;;  %v7375_v49 = vrot.slane %v7373_v36, 4  ;;  %v7390_v36 = vrot.slane %v13919_v53, 5 }
 0x44e   : > { %10532 = vmatpush3.bf16.msra.mxu0 %v14102_v32  ;;  %10463 = vmatprep.mubr.msk.bf16.mxu0 %vm1839_vm9, %v15409_v2 }
 0x44f   : > { %10533 = vmatprep.subr.bf16.mxu0 %v10782_v56  ;;  %v7377_v33 = vsel %vm11783_vm14, %v7375_v49, %v7376_v1  ;;  %v10827_v49 = vld [vmem:[#allocation3 + $0x6c] sm:$0xf]  ;;  %v7401_v1 = vrot.slane %v10828_v54, 5  ;;  %v7418_v54 = vrot.slane %v14004_v28, 5 }
 0x450   : > { %v10269_v35 = vpop.f32.mrf.mxu1  ;;  %10504 = vmatmul.mubr.msk.bf16.gmra.mxu1 %vm1839_vm9, %v14216_v39  ;;  %v14251_v46 = vcombine.low %v7374_v44, %v7377_v33  ;;  %v10829_v33 = vld [vmem:[#allocation3 + $0x78] sm:$0xf] }
 0x451   : > { %10507 = vmatprep.mubr.msk.bf16.mxu1 %vm1839_vm9, %v14223_v17  ;;  %v7403_v14 = vrot.slane %v7401_v1, 4 }
 0x452   : > { %v10229_v15 = vpop.f32.mrf.mxu0  ;;  %v5750_v62 = vpop.f32.mrf.mxu1  ;;  %10534 = vmatpush3.bf16.msra.mxu0 %v10782_v56  ;;  %v7383_v56 = vrot.slane %v13892_v6, 5 }
 0x453   : > { %v14230_v32 = vadd.f32 %v10269_v35, %v10229_v15  ;;  %10535 = vmatprep.subr.bf16.mxu0 %v10783_v0  ;;  %v7394_v15 = vrot.slane %v10826_v34, 5  ;;  %v7405_v44 = vsel %vm11783_vm14, %v7403_v14, %v7404_v60 }
 0x454   : > { %v5557_v18 = vpop.f32.mrf.mxu0  ;;  %v10270_v10 = vpop.f32.mrf.mxu1  ;;  %v7384_v35 = vsel %vm11783_vm14, %v7382_v11, %v7383_v56 }
 0x455   : > { %v14235_v9 = vadd.f32 %v5750_v62, %v5557_v18  ;;  %10464 = vmatmul.mubr.msk.bf16.gmra.mxu0 %vm1839_vm9, %v14197_v47  ;;  %v9277_v62 = vrot.slane %v10827_v49, 9  ;;  %v7381_v18 = vsel %vm11783_vm14, %v9276_v52, %v7380_v61  ;;  %v7396_v16 = vrot.slane %v7394_v15, 4 }
 0x456   : > { %v10230_v45 = vpop.f32.mrf.mxu0  ;;  %v5753_v25 = vpop.f32.mrf.mxu1  ;;  %10467 = vmatprep.mubr.msk.bf16.mxu0 %vm1839_vm9, %v14216_v39  ;;  %10536 = vmatpush3.bf16.msra.mxu0 %v10783_v0  ;;  %v7391_v0 = vsel %vm11783_vm14, %v7389_v40, %v7390_v36  ;;  %v14269_v53 = vcombine.low %v7381_v18, %v7384_v35  ;;  %v7397_v61 = vrot.slane %v13936_v26, 5  ;;  %v7411_v49 = vrot.slane %v13978_v57, 5 }
 0x457   : > { %v14241_v12 = vadd.f32 %v10270_v10, %v10230_v45  ;;  %10537 = vmatprep.subr.bf16.mxu0 %v10784_v27  ;;  %v7388_v10 = vsel %vm11783_vm14, %v9277_v62, %v7387_v23  ;;  %v9278_v45 = vrot.slane %v10829_v33, 9  ;;  %v7408_v23 = vrot.slane %v10830_v8, 5 }
 0x458   : > { %v5560_v38 = vpop.f32.mrf.mxu0  ;;  %10508 = vmatmul.mubr.msk.bf16.gmra.mxu1 %vm1839_vm9, %v14245_v50  ;;  %v14275_v55 = vcombine.low %v7388_v10, %v7391_v0  ;;  %v10833_v10 = vld [vmem:[#allocation3 + $0x90] sm:$0xf] }
 0x459   : > { %v14253_v4 = vadd.f32 %v5753_v25, %v5560_v38  ;;  %10511 = vmatprep.mubr.msk.bf16.mxu1 %vm1839_vm9, %v14251_v46  ;;  %v7398_v25 = vsel %vm11783_vm14, %v7396_v16, %v7397_v61  ;;  %v10832_v38 = vld [vmem:[#allocation3 + $0xa0] sm:$0xf]  ;;  %v7395_v11 = vsel %vm11783_vm14, %v9278_v45, %v7394_v15  ;;  %v7410_v35 = vrot.slane %v7408_v23, 4  ;;  %v10834_v61 = vld [vmem:[#allocation3 + $0xac] sm:$0xf] }
 0x45a   : > { %10538 = vmatpush3.bf16.msra.mxu0 %v10784_v27  ;;  %v10831_v27 = vld [vmem:[#allocation3 + $0x84] sm:$0xf]  ;;  %v7415_v26 = vrot.slane %v10832_v38, 5  ;;  %v14291_v63 = vcombine.low %v7395_v11, %v7398_v25  ;;  %v9280_v16 = vrot.slane %v10833_v10, 9  ;;  %v7422_v60 = vrot.slane %v10834_v61, 5 }
 0x45b   : > { %v10273_v24 = vpop.f32.mrf.mxu1  ;;  %v9279_v29 = vrot.slane %v10831_v27, 9  ;;  %v7412_v14 = vsel %vm11783_vm14, %v7410_v35, %v7411_v49  ;;  %v10836_v25 = vld [vmem:[#allocation3 + $0xb8] sm:$0xf]  ;;  %v7432_v49 = vrot.slane %v14036_v58, 5  ;;  %v10837_v10 = vld [vmem:[#allocation3 + $0xa8] sm:$0xf] }
 0x45c   : > { %v7417_v15 = vrot.slane %v7415_v26, 4  ;;  %v7429_v8 = vrot.slane %v10836_v25, 5  ;;  %v10838_v61 = vld [vmem:[#allocation3 + $0xc4] sm:$0xf] }
 0x45d   : > { %v5766_v6 = vpop.f32.mrf.mxu1  ;;  %10468 = vmatmul.mubr.msk.bf16.gmra.mxu0 %vm1839_vm9, %v14223_v17  ;;  %v7402_v56 = vsel %vm11783_vm14, %v9279_v29, %v7401_v1 }
 0x45e   : > { %10471 = vmatprep.mubr.msk.bf16.mxu0 %vm1839_vm9, %v14245_v50  ;;  %v14299_v52 = vcombine.low %v7402_v56, %v7405_v44  ;;  %v7419_v45 = vsel %vm11783_vm14, %v7417_v15, %v7418_v54  ;;  %v7424_v56 = vrot.slane %v7422_v60, 4 }
 0x45f   : > { %v10274_v3 = vpop.f32.mrf.mxu1 }
 0x460   : > { %10512 = vmatmul.mubr.msk.bf16.gmra.mxu1 %vm1839_vm9, %v14269_v53 }
 0x461   : > { %10515 = vmatprep.mubr.msk.bf16.mxu1 %vm1839_vm9, %v14275_v55  ;;  %v5769_v31 = vpop.f32.mrf.mxu1 }
 0x465   : > { %v10233_v40 = vpop.f32.mrf.mxu0  ;;  %10472 = vmatmul.mubr.msk.bf16.gmra.mxu0 %vm1839_vm9, %v14251_v46 }
 0x466   : > { %v14295_v36 = vadd.f32 %v10273_v24, %v10233_v40  ;;  %10475 = vmatprep.mubr.msk.bf16.mxu0 %vm1839_vm9, %v14269_v53 }
 0x467   : > { %v5573_v34 = vpop.f32.mrf.mxu0 }
 0x468   : > { %v10277_v13 = vpop.f32.mrf.mxu1  ;;  %10516 = vmatmul.mubr.msk.bf16.gmra.mxu1 %vm1839_vm9, %v14291_v63  ;;  %v14304_v62 = vadd.f32 %v5766_v6, %v5573_v34  ;;  %v10835_v6 = vld [vmem:[#allocation3 + $0x9c] sm:$0xf]  ;;  %v7425_v34 = vrot.slane %v14010_v30, 5 }
 0x469   : > { %10519 = vmatprep.mubr.msk.bf16.mxu1 %vm1839_vm9, %v14299_v52  ;;  %v10234_v0 = vpop.f32.mrf.mxu0  ;;  %v9281_v33 = vrot.slane %v10835_v6, 9 }
 0x46a   : > { %v5782_v24 = vpop.f32.mrf.mxu1  ;;  %v14309_v1 = vadd.f32 %v10274_v3, %v10234_v0  ;;  %v7409_v3 = vsel %vm11783_vm14, %v9280_v16, %v7408_v23  ;;  %v7431_v23 = vrot.slane %v7429_v8, 4  ;;  %v9282_v16 = vrot.slane %v10837_v10, 9  ;;  %v10840_v10 = vld [vmem:[#allocation3 + $0xc0] sm:$0xf] }
 0x46b   : > { %v5576_v57 = vpop.f32.mrf.mxu0  ;;  %v14321_v44 = vcombine.low %v7409_v3, %v7412_v14  ;;  %v7416_v38 = vsel %vm11783_vm14, %v9281_v33, %v7415_v26  ;;  %v7426_v14 = vsel %vm11783_vm14, %v7424_v56, %v7425_v34 }
 0x46c   : > { %v10278_v18 = vpop.f32.mrf.mxu1  ;;  %v14315_v27 = vadd.f32 %v5769_v31, %v5576_v57  ;;  %v14329_v40 = vcombine.low %v7416_v38, %v7419_v45  ;;  %v7759_v57 = vrot.slane %v10838_v61, 5  ;;  %v7433_v33 = vsel %vm11783_vm14, %v7431_v23, %v7432_v49 }
 0x46d   : > { %v10237_v29 = vpop.f32.mrf.mxu0  ;;  %10476 = vmatmul.mubr.msk.bf16.gmra.mxu0 %vm1839_vm9, %v14275_v55  ;;  %v7423_v58 = vsel %vm11783_vm14, %v9282_v16, %v7422_v60  ;;  %v7762_v60 = vrot.slane %v14131_v48, 5  ;;  %v9320_v16 = vrot.slane %v10840_v10, 9 }
 0x46e   : > { %v5785_v28 = vpop.f32.mrf.mxu1  ;;  %v14325_v11 = vadd.f32 %v10277_v13, %v10237_v29  ;;  %10479 = vmatprep.mubr.msk.bf16.mxu0 %vm1839_vm9, %v14291_v63  ;;  %v14351_v3 = vcombine.low %v7423_v58, %v7426_v14 }
 0x46f   : > { %v5589_v35 = vpop.f32.mrf.mxu0  ;;  %v7760_v48 = vsel %vm11783_vm14, %v9320_v16, %v7759_v57 }
 0x470   : > { %v10281_v31 = vpop.f32.mrf.mxu1  ;;  %10520 = vmatmul.mubr.msk.bf16.gmra.mxu1 %vm1839_vm9, %v14321_v44  ;;  %v14334_v15 = vadd.f32 %v5782_v24, %v5589_v35  ;;  %v10839_v24 = vld [vmem:[#allocation3 + $0xb4] sm:$0xf]  ;;  %v7761_v35 = vrot.slane %v7759_v57, 4 }
 0x471   : > { %10523 = vmatprep.mubr.msk.bf16.mxu1 %vm1839_vm9, %v14329_v40  ;;  %v10238_v13 = vpop.f32.mrf.mxu0  ;;  %v9283_v6 = vrot.slane %v10839_v24, 9 }
 0x472   : > { %v5798_v26 = vpop.f32.mrf.mxu1  ;;  %v14339_v0 = vadd.f32 %v10278_v18, %v10238_v13  ;;  %v7763_v14 = vsel %vm11783_vm14, %v7761_v35, %v7762_v60 }
 0x473   : > { %v5592_v30 = vpop.f32.mrf.mxu0  ;;  %v7430_v29 = vsel %vm11783_vm14, %v9283_v6, %v7429_v8  ;;  %v14378_v6 = vcombine.low %v7760_v48, %v7763_v14 }
 0x474   : > { %v10282_v54 = vpop.f32.mrf.mxu1  ;;  %v14345_v45 = vadd.f32 %v5785_v28, %v5592_v30  ;;  %v14359_v56 = vcombine.low %v7430_v29, %v7433_v33 }
 0x475   : > { %v10241_v18 = vpop.f32.mrf.mxu0  ;;  %10480 = vmatmul.mubr.msk.bf16.gmra.mxu0 %vm1839_vm9, %v14299_v52 }
 0x476   : > { %v5801_v25 = vpop.f32.mrf.mxu1  ;;  %v14355_v38 = vadd.f32 %v10281_v31, %v10241_v18  ;;  %10483 = vmatprep.mubr.msk.bf16.mxu0 %vm1839_vm9, %v14321_v44 }
 0x477   : > { %v5605_v23 = vpop.f32.mrf.mxu0 }
 0x478   : > { %v10285_v28 = vpop.f32.mrf.mxu1  ;;  %10524 = vmatmul.mubr.msk.bf16.gmra.mxu1 %vm1839_vm9, %v14351_v3  ;;  %v14364_v34 = vadd.f32 %v5798_v26, %v5605_v23 }
 0x479   : > { %10527 = vmatprep.mubr.msk.bf16.mxu1 %vm1839_vm9, %v14359_v56  ;;  %v10242_v31 = vpop.f32.mrf.mxu0 }
 0x47a   : > { %v5814_v8 = vpop.f32.mrf.mxu1  ;;  %v14368_v13 = vadd.f32 %v10282_v54, %v10242_v31 }
 0x47b   : > { %v5608_v61 = vpop.f32.mrf.mxu0 }
 0x47c   : > { %v10286_v49 = vpop.f32.mrf.mxu1  ;;  %v14372_v30 = vadd.f32 %v5801_v25, %v5608_v61 }
 0x47d   : > { %v10245_v26 = vpop.f32.mrf.mxu0  ;;  %10484 = vmatmul.mubr.msk.bf16.gmra.mxu0 %vm1839_vm9, %v14329_v40 }
 0x47e   : > { %v5817_v24 = vpop.f32.mrf.mxu1  ;;  %v14380_v54 = vadd.f32 %v10285_v28, %v10245_v26  ;;  %10487 = vmatprep.mubr.msk.bf16.mxu0 %vm1839_vm9, %v14351_v3 }
 0x47f   : > { %v5621_v58 = vpop.f32.mrf.mxu0 }
 0x480   : > { %v10289_v33 = vpop.f32.mrf.mxu1  ;;  %10528 = vmatmul.mubr.msk.bf16.gmra.mxu1 %vm1839_vm9, %v14378_v6  ;;  %v14386_v25 = vadd.f32 %v5814_v8, %v5621_v58 }
 0x481   : > { %v10246_v57 = vpop.f32.mrf.mxu0 }
 0x482   : > { %v5830_v18 = vpop.f32.mrf.mxu1  ;;  %v14388_v29 = vadd.f32 %v10286_v49, %v10246_v57 }
 0x483   : > { %v5624_v23 = vpop.f32.mrf.mxu0 }
 0x484   : > { %v10290_v35 = vpop.f32.mrf.mxu1  ;;  %v14390_v60 = vadd.f32 %v5817_v24, %v5624_v23 }
 0x485   : > { %v10249_v31 = vpop.f32.mrf.mxu0  ;;  %10488 = vmatmul.mubr.msk.bf16.gmra.mxu0 %vm1839_vm9, %v14359_v56 }
 0x486   : > { %v5833_v28 = vpop.f32.mrf.mxu1  ;;  %v14394_v10 = vadd.f32 %v10289_v33, %v10249_v31  ;;  %10539 = vmatprep.mubr.msk.bf16.mxu0 %vm1839_vm9, %v15409_v2 }
 0x487   : > { %v5637_v16 = vpop.f32.mrf.mxu0 }
 0x488   : > { %v10341_v8 = vpop.f32.mrf.mxu1  ;;  %v14398_v14 = vadd.f32 %v5830_v18, %v5637_v16 }
 0x489   : > { %v10250_v61 = vpop.f32.mrf.mxu0 }
 0x48a   : > { %v6626_v49 = vpop.f32.mrf.mxu1  ;;  %v14400_v48 = vadd.f32 %v10290_v35, %v10250_v61 }
 0x48b   : > { %v5640_v26 = vpop.f32.mrf.mxu0 }
 0x48c   : > { %15411 = vst [vmem:[#allocation35_spill] sm:$0xff] %v14400_v48  ;;  %v10342_v24 = vpop.f32.mrf.mxu1  ;;  %v14402_v58 = vadd.f32 %v5833_v28, %v5640_v26 }
 0x48d   : > { %v10301_v23 = vpop.f32.mrf.mxu0  ;;  %10540 = vmatmul.mubr.msk.bf16.vlgmr.msra.gmra.mxu0 %vm1839_vm9, %v14197_v47 }
 0x48e   : > { %15412 = vst [vmem:[#allocation50_spill] sm:$0xff] %v14402_v58  ;;  %v6629_v57 = vpop.f32.mrf.mxu1  ;;  %v6049_v33 = vadd.f32 %v10301_v23, %v14162_v51  ;;  %10543 = vmatprep.mubr.msk.bf16.mxu0 %vm1839_vm9, %v14216_v39 }
 0x48f   : > { %v5920_v2 = vpop.f32.mrf.mxu0 }
 0x490   : > { %v10345_v18 = vpop.f32.mrf.mxu1  ;;  %v6047_v31 = vadd.f32 %v5920_v2, %v14167_v5  ;;  %v14410_v35 = vadd.f32 %v10341_v8, %v6049_v33 }
 0x491   : > { %v10302_v16 = vpop.f32.mrf.mxu0 }
 0x492   : > { %v6642_v61 = vpop.f32.mrf.mxu1  ;;  %v6050_v28 = vadd.f32 %v10302_v16, %v14170_v59  ;;  %v14413_v26 = vadd.f32 %v6626_v49, %v6047_v31 }
 0x493   : > { %v5923_v58 = vpop.f32.mrf.mxu0 }
 0x494   : > { %v10346_v48 = vpop.f32.mrf.mxu1  ;;  %v6048_v47 = vadd.f32 %v5923_v58, %v14178_v37  ;;  %v14416_v51 = vadd.f32 %v10342_v24, %v6050_v28 }
 0x495   : > { %v10305_v23 = vpop.f32.mrf.mxu0  ;;  %10544 = vmatmul.mubr.msk.bf16.gmra.mxu0 %vm1839_vm9, %v14223_v17 }
 0x496   : > { %v6645_v39 = vpop.f32.mrf.mxu1  ;;  %v6053_v5 = vadd.f32 %v10305_v23, %v14187_v43  ;;  %10547 = vmatprep.mubr.msk.bf16.mxu0 %vm1839_vm9, %v14245_v50  ;;  %v14423_v8 = vadd.f32 %v6629_v57, %v6048_v47 }
 0x497   : > { %v5936_v59 = vpop.f32.mrf.mxu0 }
 0x498   : > { %v10349_v49 = vpop.f32.mrf.mxu1  ;;  %v6051_v33 = vadd.f32 %v5936_v59, %v14191_v20  ;;  %v14426_v2 = vadd.f32 %v10345_v18, %v6053_v5 }
 0x499   : > { %v10306_v37 = vpop.f32.mrf.mxu0 }
 0x49a   : > { %v6658_v24 = vpop.f32.mrf.mxu1  ;;  %v6054_v58 = vadd.f32 %v10306_v37, %v14199_v42  ;;  %v14429_v31 = vadd.f32 %v6642_v61, %v6051_v33 }
 0x49b   : > { %v5939_v17 = vpop.f32.mrf.mxu0 }
 0x49c   : > { %v10350_v16 = vpop.f32.mrf.mxu1  ;;  %v6052_v43 = vadd.f32 %v5939_v17, %v14206_v21  ;;  %v14432_v28 = vadd.f32 %v10346_v48, %v6054_v58 }
 0x49d   : > { %v10309_v50 = vpop.f32.mrf.mxu0  ;;  %10548 = vmatmul.mubr.msk.bf16.gmra.mxu0 %vm1839_vm9, %v14251_v46 }
 0x49e   : > { %v6661_v57 = vpop.f32.mrf.mxu1  ;;  %v6057_v20 = vadd.f32 %v10309_v50, %v14230_v32  ;;  %10551 = vmatprep.mubr.msk.bf16.mxu0 %vm1839_vm9, %v14269_v53  ;;  %v14439_v18 = vadd.f32 %v6645_v39, %v6052_v43 }
 0x49f   : > { %v5952_v42 = vpop.f32.mrf.mxu0 }
 0x4a0   : > { %v10353_v61 = vpop.f32.mrf.mxu1  ;;  %v6055_v47 = vadd.f32 %v5952_v42, %v14235_v9  ;;  %v14442_v23 = vadd.f32 %v10349_v49, %v6057_v20 }
 0x4a1   : > { %v10310_v21 = vpop.f32.mrf.mxu0 }
 0x4a2   : > { %v6674_v48 = vpop.f32.mrf.mxu1  ;;  %v6058_v5 = vadd.f32 %v10310_v21, %v14241_v12  ;;  %v14445_v59 = vadd.f32 %v6658_v24, %v6055_v47 }
 0x4a3   : > { %v5955_v46 = vpop.f32.mrf.mxu0 }
 0x4a4   : > { %v10354_v33 = vpop.f32.mrf.mxu1  ;;  %v6056_v32 = vadd.f32 %v5955_v46, %v14253_v4  ;;  %v14448_v37 = vadd.f32 %v10350_v16, %v6058_v5 }
 0x4a5   : > { %v10313_v53 = vpop.f32.mrf.mxu0  ;;  %10552 = vmatmul.mubr.msk.bf16.gmra.mxu0 %vm1839_vm9, %v14275_v55 }
 0x4a6   : > { %v6677_v39 = vpop.f32.mrf.mxu1  ;;  %v6061_v9 = vadd.f32 %v10313_v53, %v14295_v36  ;;  %10555 = vmatprep.mubr.msk.bf16.mxu0 %vm1839_vm9, %v14291_v63  ;;  %v14455_v49 = vadd.f32 %v6661_v57, %v6056_v32 }
 0x4a7   : > { %v5968_v12 = vpop.f32.mrf.mxu0 }
 0x4a8   : > { %v10357_v24 = vpop.f32.mrf.mxu1  ;;  %v6059_v58 = vadd.f32 %v5968_v12, %v14304_v62  ;;  %v14458_v17 = vadd.f32 %v10353_v61, %v6061_v9 }
 0x4a9   : > { %v10314_v4 = vpop.f32.mrf.mxu0 }
 0x4aa   : > { %v6690_v16 = vpop.f32.mrf.mxu1  ;;  %v6062_v43 = vadd.f32 %v10314_v4, %v14309_v1  ;;  %v14461_v50 = vadd.f32 %v6674_v48, %v6059_v58 }
 0x4ab   : > { %v5971_v55 = vpop.f32.mrf.mxu0 }
 0x4ac   : > { %v10358_v20 = vpop.f32.mrf.mxu1  ;;  %v6060_v36 = vadd.f32 %v5971_v55, %v14315_v27  ;;  %v14464_v42 = vadd.f32 %v10354_v33, %v6062_v43  ;;  %v8002_v55 = vrot.slane %v14136_v41, 5 }
 0x4ad   : > { %v10317_v63 = vpop.f32.mrf.mxu0  ;;  %10556 = vmatmul.mubr.msk.bf16.gmra.mxu0 %vm1839_vm9, %v14299_v52 }
 0x4ae   : > { %v6693_v57 = vpop.f32.mrf.mxu1  ;;  %v6065_v62 = vadd.f32 %v10317_v63, %v14325_v11  ;;  %10559 = vmatprep.mubr.msk.bf16.mxu0 %vm1839_vm9, %v14321_v44  ;;  %v14471_v61 = vadd.f32 %v6677_v39, %v6060_v36 }
 0x4af   : > { %v5984_v1 = vpop.f32.mrf.mxu0 }
 0x4b0   : > { %v10361_v47 = vpop.f32.mrf.mxu1  ;;  %v6063_v21 = vadd.f32 %v5984_v1, %v14334_v15  ;;  %v14474_v48 = vadd.f32 %v10357_v24, %v6065_v62 }
 0x4b1   : > { %v10318_v27 = vpop.f32.mrf.mxu0 }
 0x4b2   : > { %v6706_v5 = vpop.f32.mrf.mxu1  ;;  %v6066_v46 = vadd.f32 %v10318_v27, %v14339_v0  ;;  %v14477_v33 = vadd.f32 %v6690_v16, %v6063_v21  ;;  %v7999_v0 = vrot.slane %v14071_v7, 5 }
 0x4b3   : > { %v5987_v52 = vpop.f32.mrf.mxu0 }
 0x4b4   : > { %v10362_v32 = vpop.f32.mrf.mxu1  ;;  %v6064_v11 = vadd.f32 %v5987_v52, %v14345_v45  ;;  %v14480_v53 = vadd.f32 %v10358_v20, %v6066_v46 }
 0x4b5   : > { %v10321_v44 = vpop.f32.mrf.mxu0  ;;  %10560 = vmatmul.mubr.msk.bf16.gmra.mxu0 %vm1839_vm9, %v14329_v40  ;;  %v9342_v40 = vrot.slane %v14069_v19, 9 }
 0x4b6   : > { %v6709_v39 = vpop.f32.mrf.mxu1  ;;  %v6069_v15 = vadd.f32 %v10321_v44, %v14355_v38  ;;  %10563 = vmatprep.mubr.msk.bf16.mxu0 %vm1839_vm9, %v14351_v3  ;;  %v14488_v9 = vadd.f32 %v6693_v57, %v6064_v11  ;;  %v8001_v38 = vrot.slane %v7999_v0, 4 }
 0x4b7   : > { %v6000_v12 = vpop.f32.mrf.mxu0  ;;  %v8000_v41 = vsel %vm11783_vm14, %v9342_v40, %v7999_v0 }
 0x4b8   : > { %v10365_v24 = vpop.f32.mrf.mxu1  ;;  %v6067_v45 = vadd.f32 %v6000_v12, %v14364_v34  ;;  %v14491_v58 = vadd.f32 %v10361_v47, %v6069_v15 }
 0x4b9   : > { %v10322_v4 = vpop.f32.mrf.mxu0 }
 0x4ba   : > { %v6722_v16 = vpop.f32.mrf.mxu1  ;;  %v6070_v43 = vadd.f32 %v10322_v4, %v14368_v13  ;;  %v14496_v3 = vadd.f32 %v6706_v5, %v6067_v45  ;;  %v8003_v13 = vsel %vm11783_vm14, %v8001_v38, %v8002_v55 }
 0x4bb   : > { %v6003_v7 = vpop.f32.mrf.mxu0  ;;  %v9343_v27 = vcombine.low %v8000_v41, %v8003_v13 }
 0x4bc   : > { %v10366_v20 = vpop.f32.mrf.mxu1  ;;  %v6068_v36 = vadd.f32 %v6003_v7, %v14372_v30  ;;  %v14499_v63 = vadd.f32 %v10362_v32, %v6070_v43 }
 0x4bd   : > { %v10325_v34 = vpop.f32.mrf.mxu0  ;;  %10564 = vmatmul.mubr.msk.bf16.gmra.mxu0 %vm1839_vm9, %v14359_v56 }
 0x4be   : > { %v6725_v57 = vpop.f32.mrf.mxu1  ;;  %v6073_v19 = vadd.f32 %v10325_v34, %v14380_v54  ;;  %10567 = vmatprep.mubr.msk.bf16.mxu0 %vm1839_vm9, %v14378_v6  ;;  %v14510_v62 = vadd.f32 %v6709_v39, %v6068_v36 }
 0x4bf   : > { %v6016_v30 = vpop.f32.mrf.mxu0 }
 0x4c0   : > { %v10369_v1 = vpop.f32.mrf.mxu1  ;;  %v6071_v47 = vadd.f32 %v6016_v30, %v14386_v25  ;;  %v14513_v21 = vadd.f32 %v10365_v24, %v6073_v19 }
 0x4c1   : > { %v10326_v56 = vpop.f32.mrf.mxu0 }
 0x4c2   : > { %v6738_v54 = vpop.f32.mrf.mxu1  ;;  %v6074_v5 = vadd.f32 %v10326_v56, %v14388_v29  ;;  %v14516_v6 = vadd.f32 %v6722_v16, %v6071_v47 }
 0x4c3   : > { %v6019_v46 = vpop.f32.mrf.mxu0 }
 0x4c4   : > { %v10370_v52 = vpop.f32.mrf.mxu1  ;;  %v6072_v22 = vadd.f32 %v6019_v46, %v14390_v60  ;;  %v14519_v32 = vadd.f32 %v10366_v20, %v6074_v5  ;;  %v15413_v60 = vld [vmem:[#allocation35_spill] sm:$0xff] }
 0x4c5   : > { %v10329_v11 = vpop.f32.mrf.mxu0  ;;  %10568 = vmatmul.mubr.msk.bf16.gmra.mxu0 %vm1839_vm9, %v9343_v27 }
 0x4c6   : > { %v6741_v44 = vpop.f32.mrf.mxu1  ;;  %v6077_v25 = vadd.f32 %v10329_v11, %v14394_v10  ;;  %v14523_v39 = vadd.f32 %v6725_v57, %v6072_v22  ;;  %v15414_v10 = vld [vmem:[#allocation50_spill] sm:$0xff] }
 0x4c7   : > { %v6032_v15 = vpop.f32.mrf.mxu0 }
 0x4c8   : > { %v14525_v0 = vpop.f32.mrf.mxu1  ;;  %v6075_v29 = vadd.f32 %v6032_v15, %v14398_v14  ;;  %v14528_v12 = vadd.f32 %v10369_v1, %v6077_v25 }
 0x4c9   : > { %v10330_v24 = vpop.f32.mrf.mxu0 }
 0x4ca   : > { %v14530_v45 = vpop.f32.mrf.mxu1  ;;  %v6078_v4 = vadd.f32 %v10330_v24, %v15413_v60  ;;  %v14533_v16 = vadd.f32 %v6738_v54, %v6075_v29 }
 0x4cb   : > { %v6035_v40 = vpop.f32.mrf.mxu0 }
 0x4cc   : > { %v14535_v43 = vpop.f32.mrf.mxu1  ;;  %v6076_v38 = vadd.f32 %v6035_v40, %v15414_v10  ;;  %v14538_v55 = vadd.f32 %v10370_v52, %v6078_v4 }
 0x4cd   : > { %v10381_v7 = vpop.f32.mrf.mxu0 }
 0x4ce   : > { %v14540_v20 = vpop.f32.mrf.mxu1  ;;  %v14543_v14 = vadd.f32 %v10381_v7, %v14410_v35  ;;  %v14545_v36 = vadd.f32 %v6741_v44, %v6076_v38 }
 0x4cf   : > { %v6882_v34 = vpop.f32.mrf.mxu0 }
 0x4d0   : > { %v14547_v57 = vpop.f32.mrf.mxu1  ;;  %v14550_v19 = vadd.f32 %v6882_v34, %v14413_v26 }
 0x4d1   : > { %v10382_v41 = vpop.f32.mrf.mxu0 }
 0x4d2   : > { %v14552_v13 = vpop.f32.mrf.mxu1  ;;  %v14555_v30 = vadd.f32 %v10382_v41, %v14416_v51 }
 0x4d3   : > { %v6885_v1 = vpop.f32.mrf.mxu0 }
 0x4d4   : > { %v14557_v47 = vpop.f32.mrf.mxu1  ;;  %v14560_v35 = vadd.f32 %v6885_v1, %v14423_v8 }
 0x4d5   : > { %v10385_v56 = vpop.f32.mrf.mxu0 }
 0x4d6   : > { %v14562_v27 = vpop.f32.mrf.mxu1  ;;  %v14565_v54 = vadd.f32 %v10385_v56, %v14426_v2 }
 0x4d7   : > { %v6898_v26 = vpop.f32.mrf.mxu0 }
 0x4d8   : > { %v14567_v5 = vpop.f32.mrf.mxu1  ;;  %v14570_v46 = vadd.f32 %v6898_v26, %v14429_v31 }
 0x4d9   : > { %v10386_v51 = vpop.f32.mrf.mxu0 }
 0x4da   : > { %v14572_v52 = vpop.f32.mrf.mxu1  ;;  %v14575_v22 = vadd.f32 %v10386_v51, %v14432_v28 }
 0x4db   : > { %v6901_v8 = vpop.f32.mrf.mxu0 }
 0x4dc   : > { %v14577_v11 = vpop.f32.mrf.mxu1  ;;  %v14580_v44 = vadd.f32 %v6901_v8, %v14439_v18 }
 0x4dd   : > { %v10389_v2 = vpop.f32.mrf.mxu0 }
 0x4de   : > { %v14582_v25 = vpop.f32.mrf.mxu1  ;;  %v14585_v15 = vadd.f32 %v10389_v2, %v14442_v23 }
 0x4df   : > { %v6914_v31 = vpop.f32.mrf.mxu0 }
 0x4e0   : > { %v14587_v29 = vpop.f32.mrf.mxu1  ;;  %v14590_v24 = vadd.f32 %v6914_v31, %v14445_v59 }
 0x4e1   : > { %v10390_v28 = vpop.f32.mrf.mxu0 }
 0x4e2   : > { %v14592_v60 = vpop.f32.mrf.mxu1  ;;  %v14595_v4 = vadd.f32 %v10390_v28, %v14448_v37 }
 0x4e3   : > { %v6917_v18 = vpop.f32.mrf.mxu0 }
 0x4e4   : > { %v14597_v40 = vpop.f32.mrf.mxu1  ;;  %v14600_v10 = vadd.f32 %v6917_v18, %v14455_v49 }
 0x4e5   : > { %v10393_v23 = vpop.f32.mrf.mxu0 }
 0x4e6   : > { %v14602_v38 = vpop.f32.mrf.mxu1  ;;  %v14605_v7 = vadd.f32 %v10393_v23, %v14458_v17 }
 0x4e7   : > { %v6930_v59 = vpop.f32.mrf.mxu0 }
 0x4e8   : > { %v14607_v34 = vpop.f32.mrf.mxu1  ;;  %v14610_v41 = vadd.f32 %v6930_v59, %v14461_v50 }
 0x4e9   : > { %v10394_v37 = vpop.f32.mrf.mxu0 }
 0x4ea   : > { %v14612_v1 = vpop.f32.mrf.mxu1  ;;  %v14615_v56 = vadd.f32 %v10394_v37, %v14464_v42 }
 0x4eb   : > { %v6933_v49 = vpop.f32.mrf.mxu0 }
 0x4ec   : > { %v14617_v26 = vpop.f32.mrf.mxu1  ;;  %v14620_v51 = vadd.f32 %v6933_v49, %v14471_v61 }
 0x4ed   : > { %15415 = vst [vmem:[#allocation36_spill] sm:$0xff] %v14617_v26  ;;  %v10397_v17 = vpop.f32.mrf.mxu0 }
 0x4ee   : > { %v14622_v8 = vpop.f32.mrf.mxu1  ;;  %v14625_v2 = vadd.f32 %v10397_v17, %v14474_v48 }
 0x4ef   : > { %15416 = vst [vmem:[#allocation40_spill] sm:$0xff] %v14622_v8  ;;  %v6946_v50 = vpop.f32.mrf.mxu0 }
 0x4f0   : > { %v14627_v31 = vpop.f32.mrf.mxu1  ;;  %v14630_v28 = vadd.f32 %v6946_v50, %v14477_v33 }
 0x4f1   : > { %15417 = vst [vmem:[#allocation19_spill] sm:$0xff] %v14627_v31  ;;  %v10398_v42 = vpop.f32.mrf.mxu0 }
 0x4f2   : > { %v14632_v18 = vpop.f32.mrf.mxu1  ;;  %v14635_v23 = vadd.f32 %v10398_v42, %v14480_v53 }
 0x4f3   : > { %15418 = vst [vmem:[#allocation48_spill] sm:$0xff] %v14632_v18  ;;  %v6949_v61 = vpop.f32.mrf.mxu0 }
 0x4f4   : > { %15419 = vst [vmem:[#allocation51_spill] sm:$0xff] %v14635_v23  ;;  %v14637_v59 = vpop.f32.mrf.mxu1  ;;  %v14640_v37 = vadd.f32 %v6949_v61, %v14488_v9 }
 0x4f5   : > { %15420 = vst [vmem:[#allocation52_spill] sm:$0xff] %v14637_v59  ;;  %v10401_v48 = vpop.f32.mrf.mxu0 }
 0x4f6   : > { %15421 = vst [vmem:[#allocation53_spill] sm:$0xff] %v14640_v37  ;;  %v14642_v49 = vpop.f32.mrf.mxu1  ;;  %v14645_v17 = vadd.f32 %v10401_v48, %v14491_v58 }
 0x4f7   : > { %15422 = vst [vmem:[#allocation54_spill] sm:$0xff] %v14642_v49  ;;  %v6962_v33 = vpop.f32.mrf.mxu0 }
 0x4f8   : > { %15423 = vst [vmem:[#allocation55_spill] sm:$0xff] %v14645_v17  ;;  %v14647_v50 = vpop.f32.mrf.mxu1  ;;  %v14650_v18 = vadd.f32 %v6962_v33, %v14496_v3 }
 0x4f9   : > { %15424 = vst [vmem:[#allocation56_spill] sm:$0xff] %v14647_v50  ;;  %v10402_v53 = vpop.f32.mrf.mxu0 }
 0x4fa   : > { %15425 = vst [vmem:[#allocation57_spill] sm:$0xff] %v14650_v18  ;;  %v14652_v42 = vpop.f32.mrf.mxu1  ;;  %v14655_v59 = vadd.f32 %v10402_v53, %v14499_v63 }
 0x4fb   : > { %15426 = vst [vmem:[#allocation21_spill] sm:$0xff] %v14652_v42  ;;  %v6965_v9 = vpop.f32.mrf.mxu0 }
 0x4fc   : > { %15427 = vst [vmem:[#allocation42_spill] sm:$0xff] %v14655_v59  ;;  %v14657_v61 = vpop.f32.mrf.mxu1  ;;  %v14660_v49 = vadd.f32 %v6965_v9, %v14510_v62 }
 0x4fd   : > { %15428 = vst [vmem:[#allocation27_spill] sm:$0xff] %v14657_v61  ;;  %v10405_v58 = vpop.f32.mrf.mxu0 }
 0x4fe   : > { %15429 = vst [vmem:[#allocation32_spill] sm:$0xff] %v14660_v49  ;;  %v14662_v48 = vpop.f32.mrf.mxu1  ;;  %v14665_v50 = vadd.f32 %v10405_v58, %v14513_v21 }
 0x4ff   : > { %15430 = vst [vmem:[#allocation22_spill] sm:$0xff] %v14662_v48  ;;  %v6978_v3 = vpop.f32.mrf.mxu0 }
 0x500   : > { %15431 = vst [vmem:[#allocation20_spill] sm:$0xff] %v14665_v50  ;;  %v14667_v33 = vpop.f32.mrf.mxu1  ;;  %v14670_v42 = vadd.f32 %v6978_v3, %v14516_v6 }
 0x501   : > { %15432 = vst [vmem:[#allocation44_spill] sm:$0xff] %v14667_v33  ;;  %v10406_v63 = vpop.f32.mrf.mxu0 }
 0x502   : > { %15433 = vst [vmem:[#allocation59_spill] sm:$0xff] %v14670_v42  ;;  %v14672_v53 = vpop.f32.mrf.mxu1  ;;  %v14675_v61 = vadd.f32 %v10406_v63, %v14519_v32 }
 0x503   : > { %15434 = vst [vmem:[#allocation58_spill] sm:$0xff] %v14672_v53  ;;  %v6981_v62 = vpop.f32.mrf.mxu0 }
 0x504   : > { %15435 = vst [vmem:[#allocation60_spill] sm:$0xff] %v14675_v61  ;;  %v14678_v9 = vadd.f32 %v6981_v62, %v14523_v39  ;;  %v14680_v49 = vpop.f32.mrf.mxu1 }
 0x505   : > { %v10409_v48 = vpop.f32.mrf.mxu0  ;;  %15437 = vst [vmem:[#allocation45_spill] sm:$0xff] %v14680_v49 }
 0x506   : > { %15436 = vst [vmem:[#allocation46_spill] sm:$0xff] %v14678_v9  ;;  %v14683_v21 = vadd.f32 %v10409_v48, %v14528_v12  ;;  %v14688_v33 = vpop.f32.mrf.mxu1 }
 0x507   : > { %v6994_v58 = vpop.f32.mrf.mxu0  ;;  %15440 = vst [vmem:[#allocation61_spill] sm:$0xff] %v14688_v33 }
 0x508   : > { %15438 = vst [vmem:[#allocation43_spill] sm:$0xff] %v14683_v21  ;;  %v14686_v6 = vadd.f32 %v6994_v58, %v14533_v16  ;;  %v10501_v62 = vpop.f32.mrf.mxu1 }
 0x509   : > { %v10410_v3 = vpop.f32.mrf.mxu0 }
 0x50a   : > { %15439 = vst [vmem:[#allocation47_spill] sm:$0xff] %v14686_v6  ;;  %v14691_v32 = vadd.f32 %v10410_v3, %v14538_v55  ;;  %v7828_v9 = vpop.f32.mrf.mxu1 }
 0x50b   : > { %v6997_v63 = vpop.f32.mrf.mxu0 }
 0x50c   : > { %15441 = vst [vmem:[#allocation30_spill] sm:$0xff] %v14691_v32  ;;  %v14694_v39 = vadd.f32 %v6997_v63, %v14545_v36  ;;  %v14696_v21 = vpop.f32.mrf.mxu1 }
 0x50d   : > { %v10461_v53 = vpop.f32.mrf.mxu0 }
 0x50e   : > { %15442 = vst [vmem:[#allocation38_spill] sm:$0xff] %v14694_v39  ;;  %v14700_v6 = vpop.f32.mrf.mxu1 }
 0x50f   : > { %v7588_v49 = vpop.f32.mrf.mxu0 }
 0x510   : > { %v14706_v3 = vpop.f32.mrf.mxu1 }
 0x511   : > { %v10462_v12 = vpop.f32.mrf.mxu0 }
 0x512   : > { %v14712_v39 = vpop.f32.mrf.mxu1 }
 0x513   : > { %v7591_v48 = vpop.f32.mrf.mxu0 }
 0x514   : > { %v14718_v42 = vpop.f32.mrf.mxu1 }
 0x515   : > { %v10465_v16 = vpop.f32.mrf.mxu0 }
 0x516   : > { %v14724_v18 = vpop.f32.mrf.mxu1 }
 0x517   : > { %v14698_v58 = vpop.f32.mrf.mxu0  ;;  %15447 = vst [vmem:[#allocation28_spill] sm:$0xff] %v14724_v18 }
 0x518   : > { %v14730_v8 = vpop.f32.mrf.mxu1 }
 0x519   : > { %v14702_v33 = vpop.f32.mrf.mxu0  ;;  %15450 = vst [vmem:[#allocation25_spill] sm:$0xff] %v14730_v8 }
 0x51b   : > { %v14704_v55 = vpop.f32.mrf.mxu0 }
 0x51d   : > { %v14708_v36 = vpop.f32.mrf.mxu0 }
 0x51f   : > { %v14710_v63 = vpop.f32.mrf.mxu0 }
 0x521   : > { %v14714_v32 = vpop.f32.mrf.mxu0 }
 0x522   : > { %15443 = vst [vmem:[#allocation23_spill] sm:$0xff] %v14714_v32  ;;  %v14736_v32 = vpop.f32.mrf.mxu1 }
 0x523   : > { %v14716_v61 = vpop.f32.mrf.mxu0  ;;  %15453 = vst [vmem:[#allocation26_spill] sm:$0xff] %v14736_v32 }
 0x524   : > { %15444 = vst [vmem:[#allocation39_spill] sm:$0xff] %v14716_v61 }
 0x525   : > { %v14720_v50 = vpop.f32.mrf.mxu0 }
 0x526   : > { %15445 = vst [vmem:[#allocation34_spill] sm:$0xff] %v14720_v50  ;;  %v14742_v50 = vpop.f32.mrf.mxu1 }
 0x527   : > { %v14722_v59 = vpop.f32.mrf.mxu0  ;;  %15456 = vst [vmem:[#allocation35_spill] sm:$0xff] %v14742_v50 }
 0x528   : > { %15446 = vst [vmem:[#allocation41_spill] sm:$0xff] %v14722_v59 }
 0x529   : > { %v14726_v31 = vpop.f32.mrf.mxu0 }
 0x52a   : > { %15448 = vst [vmem:[#allocation33_spill] sm:$0xff] %v14726_v31  ;;  %v14748_v31 = vpop.f32.mrf.mxu1 }
 0x52b   : > { %v14728_v17 = vpop.f32.mrf.mxu0 }
 0x52c   : > { %15449 = vst [vmem:[#allocation31_spill] sm:$0xff] %v14728_v17 }
 0x52d   : > { %v14732_v37 = vpop.f32.mrf.mxu0 }
 0x52e   : > { %15451 = vst [vmem:[#allocation37_spill] sm:$0xff] %v14732_v37  ;;  %v14754_v37 = vpop.f32.mrf.mxu1 }
 0x52f   : > { %v14734_v26 = vpop.f32.mrf.mxu0  ;;  %15461 = vst [vmem:[#allocation65_spill] sm:$0xff] %v14754_v37 }
 0x530   : > { %15452 = vst [vmem:[#allocation24_spill] sm:$0xff] %v14734_v26 }
 0x531   : > { %v14738_v61 = vpop.f32.mrf.mxu0 }
 0x532   : > { %15454 = vst [vmem:[#allocation29_spill] sm:$0xff] %v14738_v61  ;;  %v14760_v61 = vpop.f32.mrf.mxu1 }
 0x533   : > { %v14740_v23 = vpop.f32.mrf.mxu0  ;;  %15464 = vst [vmem:[#allocation68_spill] sm:$0xff] %v14760_v61 }
 0x534   : > { %15455 = vst [vmem:[#allocation49_spill] sm:$0xff] %v14740_v23 }
 0x535   : > { %v14744_v59 = vpop.f32.mrf.mxu0 }
 0x536   : > { %15457 = vst [vmem:[#allocation50_spill] sm:$0xff] %v14744_v59  ;;  %v14766_v59 = vpop.f32.mrf.mxu1 }
 0x537   : > { %v14746_v18 = vpop.f32.mrf.mxu0  ;;  %15467 = vst [vmem:[#allocation71_spill] sm:$0xff] %v14766_v59 }
 0x538   : > { %15458 = vst [vmem:[#allocation62_spill] sm:$0xff] %v14746_v18 }
 0x539   : > { %v14750_v17 = vpop.f32.mrf.mxu0 }
 0x53a   : > { %15459 = vst [vmem:[#allocation63_spill] sm:$0xff] %v14750_v17  ;;  %v7267_v17 = vadd.f32 %v14525_v0, %v14543_v14  ;;  %v7266_v0 = vadd.f32 %v14540_v20, %v14560_v35 }
 0x53b   : > { %v14752_v8 = vpop.f32.mrf.mxu0 }
 0x53c   : > { %15460 = vst [vmem:[#allocation64_spill] sm:$0xff] %v14752_v8  ;;  %v7717_v37 = vadd.f32 %v10461_v53, %v7267_v17  ;;  %v8383_v17 = vld [vmem:[#allocation4 + $0x1] ss:$2 sm:$0xff] }
 0x53d   : > { %v14756_v26 = vpop.f32.mrf.mxu0 }
 0x53e   : > { %15462 = vst [vmem:[#allocation66_spill] sm:$0xff] %v14756_v26  ;;  %v7265_v26 = vadd.f32 %v14530_v45, %v14550_v19  ;;  %v7957_v14 = vadd.f32 %v10501_v62, %v7717_v37  ;;  %v7271_v45 = vadd.f32 %v14547_v57, %v14565_v54  ;;  %v7272_v37 = vadd.f32 %v14557_v47, %v14575_v22  ;;  %v14804_v54 = vld [vmem:[%s15125_s9] ss:$0 sm:$0xff] }
 0x53f   : > { %v14758_v32 = vpop.f32.mrf.mxu0  ;;  %v7270_v57 = vadd.f32 %v14562_v27, %v14580_v44  ;;  %v7273_v27 = vadd.f32 %v14572_v52, %v14590_v24  ;;  %v7276_v22 = vadd.f32 %v14577_v11, %v14595_v4  ;;  %v14817_v44 = vadd.f32 %v14582_v25, %v14600_v10 }
 0x540   : > { %15463 = vst [vmem:[#allocation67_spill] sm:$0xff] %v14758_v32  ;;  %v14776_v32 = vpop.f32.mrf.mxu1  ;;  %v7721_v35 = vadd.f32 %v10465_v16, %v7271_v45  ;;  %v7722_v16 = vadd.f32 %v14702_v33, %v7272_v37  ;;  %v7279_v52 = vadd.f32 %v14587_v29, %v14605_v7  ;;  %v14839_v29 = vadd.f32 %v14597_v40, %v14615_v56  ;;  %v15472_v37 = vld [vmem:[#allocation28_spill] sm:$0xff] }
 0x541   : > { %v14762_v23 = vpop.f32.mrf.mxu0  ;;  %v14853_v40 = vadd.f32 %v14607_v34, %v14625_v2 }
 0x542   : > { %15465 = vst [vmem:[#allocation69_spill] sm:$0xff] %v14762_v23  ;;  %v7715_v23 = vadd.f32 %v7588_v49, %v7265_v26  ;;  %v14788_v19 = vpop.f32.mrf.mxu1  ;;  %v14793_v26 = vld [vmem:[%s15124_s8] ss:$0 sm:$0xff]  ;;  %v7269_v49 = vadd.f32 %v14552_v13, %v14570_v46  ;;  %v7961_v25 = vadd.f32 %v14706_v3, %v7721_v35  ;;  %v7962_v56 = vadd.f32 %v14718_v42, %v7722_v16  ;;  %v15471_v35 = vld [vmem:[#allocation36_spill] sm:$0xff] }
 0x543   : > { %v14764_v50 = vpop.f32.mrf.mxu0 }
 0x544   : > { %15466 = vst [vmem:[#allocation70_spill] sm:$0xff] %v14764_v50  ;;  %v7268_v50 = vadd.f32 %v14535_v43, %v14555_v30  ;;  %v7716_v30 = vadd.f32 %v7591_v48, %v7266_v0  ;;  %v7955_v20 = vadd.f32 %v7828_v9, %v7715_v23  ;;  %v8407_v9 = vld [vmem:[#allocation4 + $0x2] ss:$2 sm:$0xff]  ;;  %v7719_v47 = vadd.f32 %v14698_v58, %v7269_v49 }
 0x545   : > { %v14768_v18 = vpop.f32.mrf.mxu0 }
 0x546   : > { %15468 = vst [vmem:[#allocation72_spill] sm:$0xff] %v14768_v18  ;;  %v7718_v18 = vadd.f32 %v10462_v12, %v7268_v50  ;;  %v7275_v12 = vadd.f32 %v14567_v5, %v14585_v15  ;;  %v7956_v48 = vadd.f32 %v14700_v6, %v7716_v30  ;;  %v14835_v6 = vadd.f32 %v14592_v60, %v14610_v41 }
 0x547   : > { %v14772_v8 = vpop.f32.mrf.mxu0  ;;  %v7959_v3 = vadd.f32 %v14712_v39, %v7719_v47  ;;  %v14849_v60 = vadd.f32 %v14602_v38, %v14620_v51  ;;  %v14861_v38 = vadd.f32 %v14612_v1, %v14630_v28  ;;  %v15470_v51 = vld [vmem:[#allocation51_spill] sm:$0xff]  ;;  %v15474_v1 = vld [vmem:[#allocation53_spill] sm:$0xff]  ;;  %v15475_v28 = vld [vmem:[#allocation40_spill] sm:$0xff] }
 0x548   : > { %15469 = vst [vmem:[#allocation73_spill] sm:$0xff] %v14772_v8  ;;  %v8367_v8 = vld [vmem:[#allocation4] ss:$2 sm:$0xff]  ;;  %v7958_v23 = vadd.f32 %v14696_v21, %v7718_v18  ;;  %v7725_v30 = vadd.f32 %v14708_v36, %v7275_v12  ;;  %v7723_v36 = vadd.f32 %v14710_v63, %v7273_v27  ;;  %v14865_v34 = vadd.f32 %v15471_v35, %v15470_v51 }
 0x549   : > { %v14778_v61 = vpop.f32.mrf.mxu0  ;;  %v8398_v62 = vmax.f32 %v8367_v8, %v8383_v17  ;;  %v14819_v8 = vpop.f32.mrf.mxu1  ;;  %v15477_v47 = vld [vmem:[#allocation19_spill] sm:$0xff]  ;;  %v15488_v35 = vld [vmem:[#allocation20_spill] sm:$0xff] }
 0x54b   : > { %v14782_v59 = vpop.f32.mrf.mxu0  ;;  %v14827_v24 = vmax.f32 %v8398_v62, %v8407_v9  ;;  %v14841_v7 = vpop.f32.mrf.mxu1  ;;  %v15476_v9 = vld [vmem:[#allocation55_spill] sm:$0xff] }
 0x54c   : > { %v14879_v27 = vadd.f32 %v15477_v47, %v15476_v9  ;;  %v15494_v47 = vld [vmem:[#allocation27_spill] sm:$0xff] }
 0x54d   : > { %v10541_v43 = vpop.f32.mrf.mxu0  ;;  %v14867_v2 = vpop.f32.mrf.mxu1 }
 0x54e   : > { %v8197_v50 = vadd.f32 %v10541_v43, %v7957_v14  ;;  %v7720_v14 = vadd.f32 %v14704_v55, %v7270_v57 }
 0x54f   : > { %v8068_v53 = vpop.f32.mrf.mxu0 }
 0x550   : > { %v8235_v13 = vmul.f32 %v14793_v26, %v8197_v50  ;;  %v8195_v46 = vadd.f32 %v8068_v53, %v7955_v20  ;;  %v7960_v57 = vadd.f32 %v15472_v37, %v7720_v14 }
 0x551   : > { %v10542_v5 = vpop.f32.mrf.mxu0 }
 0x552   : > { %v8273_v15 = vadd.f32 %v14804_v54, %v8235_v13  ;;  %v8233_v18 = vmul.f32 %v14793_v26, %v8195_v46  ;;  %v8198_v21 = vadd.f32 %v10542_v5, %v7958_v23  ;;  %v15473_v13 = vld [vmem:[#allocation23_spill] sm:$0xff]  ;;  %v14875_v23 = vadd.f32 %v15475_v28, %v15474_v1 }
 0x553   : > { %v8071_v11 = vpop.f32.mrf.mxu0  ;;  %v7726_v46 = vadd.f32 %v15473_v13, %v7276_v22  ;;  %v15479_v22 = vld [vmem:[#allocation57_spill] sm:$0xff]  ;;  %v15491_v28 = vld [vmem:[#allocation59_spill] sm:$0xff] }
 0x554   : > { %v8305_v4 = vmax.f32 %v8273_v15, 0.0  ;;  %v8271_v10 = vadd.f32 %v14804_v54, %v8233_v18  ;;  %v8236_v58 = vmul.f32 %v14793_v26, %v8198_v21  ;;  %v8196_v0 = vadd.f32 %v8071_v11, %v7956_v48  ;;  %v15478_v15 = vld [vmem:[#allocation25_spill] sm:$0xff] }
 0x555   : > { %v10545_v33 = vpop.f32.mrf.mxu0  ;;  %v7965_v18 = vadd.f32 %v15478_v15, %v7725_v30  ;;  %v15495_v15 = vld [vmem:[#allocation46_spill] sm:$0xff] }
 0x556   : > { %8337 = vst [vmem:[#allocation4 + $0x31] sm:$0xff] %v8305_v4  ;;  %v8303_v17 = vmax.f32 %v8271_v10, 0.0  ;;  %v8274_v45 = vadd.f32 %v14804_v54, %v8236_v58  ;;  %v8234_v43 = vmul.f32 %v14793_v26, %v8196_v0  ;;  %v8201_v55 = vadd.f32 %v10545_v33, %v7961_v25  ;;  %v14884_v25 = vpop.f32.mrf.mxu1  ;;  %v15480_v4 = vld [vmem:[#allocation48_spill] sm:$0xff]  ;;  %v15481_v58 = vld [vmem:[#allocation42_spill] sm:$0xff] }
 0x557   : > { %v8084_v41 = vpop.f32.mrf.mxu0  ;;  %v14888_v10 = vadd.f32 %v15480_v4, %v15479_v22  ;;  %v15482_v0 = vld [vmem:[#allocation52_spill] sm:$0xff]  ;;  %v15499_v22 = vld [vmem:[#allocation41_spill] sm:$0xff] }
 0x558   : > { %8335 = vst [vmem:[#allocation4 + $0x19] sm:$0xff] %v8303_v17  ;;  %v8306_v39 = vmax.f32 %v8274_v45, 0.0  ;;  %v8272_v49 = vadd.f32 %v14804_v54, %v8234_v43  ;;  %v8239_v50 = vmul.f32 %v14793_v26, %v8201_v55  ;;  %v8199_v20 = vadd.f32 %v8084_v41, %v7959_v3  ;;  %v15483_v33 = vld [vmem:[#allocation32_spill] sm:$0xff]  ;;  %v15484_v3 = vld [vmem:[#allocation54_spill] sm:$0xff]  ;;  %v14911_v1 = vpop.f32.mrf.mxu1 }
 0x559   : > { %v10546_v42 = vpop.f32.mrf.mxu0  ;;  %v14892_v14 = vadd.f32 %v15482_v0, %v15481_v58  ;;  %v14896_v17 = vadd.f32 %v15484_v3, %v15483_v33  ;;  %v15485_v43 = vld [vmem:[#allocation26_spill] sm:$0xff]  ;;  %v7727_v4 = vadd.f32 %v15499_v22, %v14835_v6  ;;  %v15500_v3 = vld [vmem:[#allocation33_spill] sm:$0xff]  ;;  %v15504_v6 = vld [vmem:[#allocation31_spill] sm:$0xff] }
 0x55a   : > { %8338 = vst [vmem:[#allocation4 + $0x39] sm:$0xff] %v8306_v39  ;;  %v8304_v53 = vmax.f32 %v8272_v49, 0.0  ;;  %v8277_v62 = vadd.f32 %v14804_v54, %v8239_v50  ;;  %v8237_v12 = vmul.f32 %v14793_v26, %v8199_v20  ;;  %v8202_v63 = vadd.f32 %v10546_v42, %v7962_v56  ;;  %v15486_v49 = vld [vmem:[#allocation39_spill] sm:$0xff]  ;;  %v15487_v20 = vld [vmem:[#allocation34_spill] sm:$0xff]  ;;  %v15489_v42 = vld [vmem:[#allocation56_spill] sm:$0xff] }
 0x55b   : > { %v8087_v5 = vpop.f32.mrf.mxu0  ;;  %v7963_v55 = vadd.f32 %v15485_v43, %v7723_v36  ;;  %v7724_v50 = vadd.f32 %v15486_v49, %v14817_v44  ;;  %v7729_v51 = vadd.f32 %v15487_v20, %v7279_v52  ;;  %v14906_v37 = vadd.f32 %v15489_v42, %v15488_v35  ;;  %v15492_v44 = vld [vmem:[#allocation21_spill] sm:$0xff]  ;;  %v15493_v52 = vld [vmem:[#allocation60_spill] sm:$0xff]  ;;  %v15501_v43 = vld [vmem:[#allocation47_spill] sm:$0xff] }
 0x55c   : > { %8336 = vst [vmem:[#allocation4 + $0x21] sm:$0xff] %v8304_v53  ;;  %v8309_v21 = vmax.f32 %v8277_v62, 0.0  ;;  %v8275_v48 = vadd.f32 %v14804_v54, %v8237_v12  ;;  %v8240_v16 = vmul.f32 %v14793_v26, %v8202_v63  ;;  %v8200_v11 = vadd.f32 %v8087_v5, %v7960_v57  ;;  %v15490_v53 = vld [vmem:[#allocation35_spill] sm:$0xff]  ;;  %v15503_v49 = vld [vmem:[#allocation65_spill] sm:$0xff] }
 0x55d   : > { %v10549_v45 = vpop.f32.mrf.mxu0  ;;  %v7966_v62 = vadd.f32 %v15490_v53, %v7726_v46  ;;  %v14915_v9 = vadd.f32 %v15492_v44, %v15491_v28  ;;  %v14919_v5 = vadd.f32 %v15494_v47, %v15493_v52  ;;  %v7969_v20 = vadd.f32 %v15503_v49, %v7729_v51  ;;  %v15506_v52 = vld [vmem:[#allocation30_spill] sm:$0xff] }
 0x55e   : > { %8341 = vst [vmem:[#allocation4 + $0x61] sm:$0xff] %v8309_v21  ;;  %v8307_v30 = vmax.f32 %v8275_v48, 0.0  ;;  %v8278_v41 = vadd.f32 %v14804_v54, %v8240_v16  ;;  %v8238_v56 = vmul.f32 %v14793_v26, %v8200_v11  ;;  %v8205_v39 = vadd.f32 %v10549_v45, %v7965_v18  ;;  %v15496_v18 = vld [vmem:[#allocation22_spill] sm:$0xff]  ;;  %v15497_v21 = vld [vmem:[#allocation43_spill] sm:$0xff]  ;;  %v15498_v48 = vld [vmem:[#allocation44_spill] sm:$0xff] }
 0x55f   : > { %v8100_v57 = vpop.f32.mrf.mxu0  ;;  %v14923_v46 = vadd.f32 %v15496_v18, %v15495_v15  ;;  %v14927_v16 = vadd.f32 %v15498_v48, %v15497_v21  ;;  %v7730_v45 = vadd.f32 %v15500_v3, %v14839_v29  ;;  %v7728_v35 = vadd.f32 %v15504_v6, %v14849_v60  ;;  %v15507_v60 = vld [vmem:[#allocation45_spill] sm:$0xff] }
 0x560   : > { %8339 = vst [vmem:[#allocation4 + $0x49] sm:$0xff] %v8307_v30  ;;  %v8310_v36 = vmax.f32 %v8278_v41, 0.0  ;;  %v8276_v12 = vadd.f32 %v14804_v54, %v8238_v56  ;;  %v8243_v63 = vmul.f32 %v14793_v26, %v8205_v39  ;;  %v8203_v13 = vadd.f32 %v8100_v57, %v7963_v55  ;;  %v15502_v55 = vld [vmem:[#allocation58_spill] sm:$0xff] }
 0x561   : > { %v10550_v11 = vpop.f32.mrf.mxu0  ;;  %v14937_v30 = vadd.f32 %v15502_v55, %v15501_v43  ;;  %v7964_v56 = vadd.f32 %v14748_v31, %v7724_v50  ;;  %v14952_v47 = vadd.f32 %v15507_v60, %v15506_v52  ;;  %v7968_v6 = vadd.f32 %v14776_v32, %v7728_v35  ;;  %v15513_v52 = vld [vmem:[#allocation50_spill] sm:$0xff] }
 0x562   : > { %8342 = vst [vmem:[#allocation4 + $0x69] sm:$0xff] %v8310_v36  ;;  %v8281_v58 = vadd.f32 %v14804_v54, %v8243_v63  ;;  %v8241_v0 = vmul.f32 %v14793_v26, %v8203_v13  ;;  %v8206_v33 = vadd.f32 %v10550_v11, %v7966_v62  ;;  %v8308_v57 = vmax.f32 %v8276_v12, 0.0  ;;  %v15505_v62 = vld [vmem:[#allocation37_spill] sm:$0xff]  ;;  %v14946_v36 = vpop.f32.mrf.mxu1 }
 0x563   : > { %v8430_v41 = vld [vmem:[#allocation4 + $0x18] ss:$2 sm:$0xff]  ;;  %v8103_v39 = vpop.f32.mrf.mxu0  ;;  %v7733_v29 = vadd.f32 %v15505_v62, %v14853_v40  ;;  %v8385_v13 = vld [vmem:[#allocation4 + $0x31] ss:$2 sm:$0xff]  ;;  %v15508_v40 = vld [vmem:[#allocation68_spill] sm:$0xff]  ;;  %v7737_v60 = vadd.f32 %v15513_v52, %v14879_v27 }
 0x564   : > { %v8445_v42 = vmax.f32 %v14827_v24, %v8430_v41  ;;  %v8313_v53 = vmax.f32 %v8281_v58, 0.0  ;;  %v8369_v63 = vld [vmem:[#allocation4 + $0x30] ss:$2 sm:$0xff]  ;;  %v8454_v28 = vld [vmem:[#allocation4 + $0x19] ss:$2 sm:$0xff]  ;;  %v8279_v31 = vadd.f32 %v14804_v54, %v8241_v0  ;;  %v8244_v50 = vmul.f32 %v14793_v26, %v8206_v33  ;;  %8340 = vst [vmem:[#allocation4 + $0x51] sm:$0xff] %v8308_v57 }
 0x565   : > { %v8204_v51 = vadd.f32 %v8103_v39, %v7964_v56  ;;  %v10553_v44 = vpop.f32.mrf.mxu0  ;;  %v7967_v15 = vadd.f32 %v15508_v40, %v7727_v4  ;;  %v8478_v18 = vld [vmem:[#allocation4 + $0x1a] ss:$2 sm:$0xff]  ;;  %v8399_v33 = vmax.f32 %v8369_v63, %v8385_v13  ;;  %v14961_v39 = vpop.f32.mrf.mxu1 }
 0x566   : > { %v8469_v24 = vmax.f32 %v8445_v42, %v8454_v28  ;;  %8345 = vst [vmem:[#allocation4 + $0x91] sm:$0xff] %v8313_v53  ;;  %v8209_v12 = vadd.f32 %v10553_v44, %v7969_v20  ;;  %v8311_v21 = vmax.f32 %v8279_v31, 0.0  ;;  %v8282_v48 = vadd.f32 %v14804_v54, %v8244_v50  ;;  %v15509_v58 = vld [vmem:[#allocation71_spill] sm:$0xff]  ;;  %v15510_v41 = vld [vmem:[#allocation24_spill] sm:$0xff]  ;;  %v8502_v4 = vld [vmem:[#allocation4 + $0x30] ss:$2 sm:$0xff] }
 0x567   : > { %v8242_v11 = vmul.f32 %v14793_v26, %v8204_v51  ;;  %v8116_v22 = vpop.f32.mrf.mxu0  ;;  %v7970_v0 = vadd.f32 %v15509_v58, %v7730_v45  ;;  %v7731_v56 = vadd.f32 %v15510_v41, %v14861_v38  ;;  %v7973_v45 = vadd.f32 %v14788_v19, %v7733_v29  ;;  %v15511_v42 = vld [vmem:[#allocation29_spill] sm:$0xff] }
 0x568   : > { %v8493_v3 = vmax.f32 %v8469_v24, %v8478_v18  ;;  %v8247_v43 = vmul.f32 %v14793_v26, %v8209_v12  ;;  %v8207_v55 = vadd.f32 %v8116_v22, %v7967_v15  ;;  %8343 = vst [vmem:[#allocation4 + $0x79] sm:$0xff] %v8311_v21  ;;  %v7734_v57 = vadd.f32 %v15511_v42, %v14865_v34  ;;  %v15512_v38 = vld [vmem:[#allocation49_spill] sm:$0xff]  ;;  %v14976_v24 = vpop.f32.mrf.mxu1 }
 0x569   : > { %v8280_v49 = vadd.f32 %v14804_v54, %v8242_v11  ;;  %v10554_v20 = vpop.f32.mrf.mxu0  ;;  %v7732_v13 = vadd.f32 %v15512_v38, %v14875_v23  ;;  %v8409_v28 = vld [vmem:[#allocation4 + $0x32] ss:$2 sm:$0xff]  ;;  %v8526_v31 = vld [vmem:[#allocation4 + $0x31] ss:$2 sm:$0xff]  ;;  %v8314_v50 = vmax.f32 %v8282_v48, 0.0  ;;  %v7971_v21 = vadd.f32 %v14819_v8, %v7731_v56 }
 0x56a   : > { %v8517_v53 = vmax.f32 %v8493_v3, %v8502_v4  ;;  %v8285_v62 = vadd.f32 %v14804_v54, %v8247_v43  ;;  %v8245_v63 = vmul.f32 %v14793_v26, %v8207_v55  ;;  %v8210_v44 = vadd.f32 %v10554_v20, %v7970_v0  ;;  %v8550_v12 = vld [vmem:[#allocation4 + $0x32] ss:$2 sm:$0xff]  ;;  %v8387_v22 = vld [vmem:[#allocation4 + $0x61] ss:$2 sm:$0xff]  ;;  %v14994_v42 = vpop.f32.mrf.mxu1 }
 0x56b   : > { %v8312_v51 = vmax.f32 %v8280_v49, 0.0  ;;  %v8119_v32 = vpop.f32.mrf.mxu0  ;;  %v8423_v35 = vmax.f32 %v8399_v33, %v8409_v28  ;;  %v8432_v40 = vld [vmem:[#allocation4 + $0x48] ss:$2 sm:$0xff]  ;;  %8346 = vst [vmem:[#allocation4 + $0x99] sm:$0xff] %v8314_v50  ;;  %v15514_v33 = vld [vmem:[#allocation62_spill] sm:$0xff]  ;;  %v7974_v49 = vadd.f32 %v14841_v7, %v7734_v57 }
 0x56c   : > { %v8541_v19 = vmax.f32 %v8517_v53, %v8526_v31  ;;  %v8317_v29 = vmax.f32 %v8285_v62, 0.0  ;;  %v8283_v34 = vadd.f32 %v14804_v54, %v8245_v63  ;;  %v8248_v23 = vmul.f32 %v14793_v26, %v8210_v44  ;;  %v8371_v11 = vld [vmem:[#allocation4 + $0x60] ss:$2 sm:$0xff]  ;;  %v8456_v43 = vld [vmem:[#allocation4 + $0x49] ss:$2 sm:$0xff] }
 0x56d   : > { %8344 = vst [vmem:[#allocation4 + $0x81] sm:$0xff] %v8312_v51  ;;  %v8208_v15 = vadd.f32 %v8119_v32, %v7968_v6  ;;  %v10557_v18 = vpop.f32.mrf.mxu0  ;;  %v8446_v58 = vmax.f32 %v8423_v35, %v8432_v40  ;;  %v7735_v3 = vadd.f32 %v15514_v33, %v14888_v10  ;;  %v7972_v6 = vadd.f32 %v14867_v2, %v7732_v13  ;;  %v15515_v10 = vld [vmem:[#allocation63_spill] sm:$0xff]  ;;  %v8480_v62 = vld [vmem:[#allocation4 + $0x4a] ss:$2 sm:$0xff] }
 0x56e   : > { %v8565_v48 = vmax.f32 %v8541_v19, %v8550_v12  ;;  %8349 = vst [vmem:[#allocation4 + $0xc1] sm:$0xff] %v8317_v29  ;;  %v8315_v0 = vmax.f32 %v8283_v34, 0.0  ;;  %v8213_v27 = vadd.f32 %v10557_v18, %v7973_v45  ;;  %v8286_v55 = vadd.f32 %v14804_v54, %v8248_v23  ;;  %v15516_v31 = vld [vmem:[#allocation64_spill] sm:$0xff]  ;;  %v15518_v23 = vld [vmem:[#allocation67_spill] sm:$0xff]  ;;  %v10526_v18 = vpop.f32.mrf.mxu1 }
 0x56f   : > { %v8246_v41 = vmul.f32 %v14793_v26, %v8208_v15  ;;  %v8132_v4 = vpop.f32.mrf.mxu0  ;;  %v8470_v8 = vmax.f32 %v8446_v58, %v8456_v43  ;;  %v7738_v45 = vadd.f32 %v15515_v10, %v14892_v14  ;;  %v8400_v53 = vmax.f32 %v8371_v11, %v8387_v22  ;;  %v8504_v51 = vld [vmem:[#allocation4 + $0x60] ss:$2 sm:$0xff]  ;;  %v15520_v10 = vld [vmem:[#allocation38_spill] sm:$0xff] }
 0x570   : > { %8347 = vst [vmem:[#allocation4 + $0xa9] sm:$0xff] %v8315_v0  ;;  %v8251_v56 = vmul.f32 %v14793_v26, %v8213_v27  ;;  %v8211_v20 = vadd.f32 %v8132_v4, %v7971_v21  ;;  %8573 = vst [vmem:[%s14989_s30] sm:$0xff] %v8565_v48  ;;  %v8318_v7 = vmax.f32 %v8286_v55, 0.0  ;;  %v7977_v13 = vadd.f32 %v14884_v25, %v7737_v60  ;;  %v8411_v19 = vld [vmem:[#allocation4 + $0x62] ss:$2 sm:$0xff]  ;;  %v15517_v60 = vld [vmem:[#allocation66_spill] sm:$0xff] }
 0x571   : > { %v8284_v57 = vadd.f32 %v14804_v54, %v8246_v41  ;;  %v10558_v63 = vpop.f32.mrf.mxu0  ;;  %v8494_v38 = vmax.f32 %v8470_v8, %v8480_v62  ;;  %v7736_v50 = vadd.f32 %v15516_v31, %v14896_v17  ;;  %v7975_v35 = vadd.f32 %v14911_v1, %v7735_v3  ;;  %v8528_v48 = vld [vmem:[#allocation4 + $0x61] ss:$2 sm:$0xff]  ;;  %v8552_v3 = vld [vmem:[#allocation4 + $0x62] ss:$2 sm:$0xff] }
 0x572   : > { %v8249_v28 = vmul.f32 %v14793_v26, %v8211_v20  ;;  %v8214_v2 = vadd.f32 %v10558_v63, %v7974_v49  ;;  %8350 = vst [vmem:[#allocation4 + $0xc9] sm:$0xff] %v8318_v7  ;;  %v8289_v44 = vadd.f32 %v14804_v54, %v8251_v56  ;;  %v8373_v34 = vld [vmem:[#allocation4 + $0x90] ss:$2 sm:$0xff]  ;;  %v8389_v52 = vld [vmem:[#allocation4 + $0x91] ss:$2 sm:$0xff]  ;;  %v7741_v17 = vadd.f32 %v15517_v60, %v14906_v37 }
 0x573   : > { %v8316_v14 = vmax.f32 %v8284_v57, 0.0  ;;  %v8135_v32 = vpop.f32.mrf.mxu0  ;;  %v8518_v29 = vmax.f32 %v8494_v38, %v8504_v51  ;;  %v7739_v15 = vadd.f32 %v15518_v23, %v14915_v9  ;;  %v8424_v21 = vmax.f32 %v8400_v53, %v8411_v19  ;;  %v15519_v4 = vld [vmem:[#allocation69_spill] sm:$0xff] }
 0x574   : > { %v8287_v12 = vadd.f32 %v14804_v54, %v8249_v28  ;;  %v8252_v40 = vmul.f32 %v14793_v26, %v8214_v2  ;;  %v8212_v25 = vadd.f32 %v8135_v32, %v7972_v6  ;;  %v7978_v11 = vadd.f32 %v14946_v36, %v7738_v45  ;;  %v8434_v58 = vld [vmem:[#allocation4 + $0x78] ss:$2 sm:$0xff]  ;;  %v8458_v56 = vld [vmem:[#allocation4 + $0x79] ss:$2 sm:$0xff]  ;;  %v15015_v6 = vpop.f32.mrf.mxu1  ;;  %v15521_v45 = vld [vmem:[#allocation61_spill] sm:$0xff] }
 0x575   : > { %8348 = vst [vmem:[#allocation4 + $0xb1] sm:$0xff] %v8316_v14  ;;  %v10561_v1 = vpop.f32.mrf.mxu0  ;;  %v8542_v22 = vmax.f32 %v8518_v29, %v8528_v48  ;;  %v8401_v43 = vmax.f32 %v8373_v34, %v8389_v52  ;;  %v8447_v37 = vmax.f32 %v8424_v21, %v8434_v58  ;;  %v8321_v55 = vmax.f32 %v8289_v44, 0.0  ;;  %v8482_v38 = vld [vmem:[#allocation4 + $0x7a] ss:$2 sm:$0xff]  ;;  %v8530_v60 = vld [vmem:[#allocation4 + $0x91] ss:$2 sm:$0xff] }
 0x576   : > { %v8290_v0 = vadd.f32 %v14804_v54, %v8252_v40  ;;  %v8250_v27 = vmul.f32 %v14793_v26, %v8212_v25  ;;  %v8217_v33 = vadd.f32 %v10561_v1, %v7977_v13  ;;  %v8319_v41 = vmax.f32 %v8287_v12, 0.0  ;;  %v8506_v34 = vld [vmem:[#allocation4 + $0x90] ss:$2 sm:$0xff] }
 0x577   : > { %v8148_v9 = vpop.f32.mrf.mxu0  ;;  %v7742_v49 = vadd.f32 %v15519_v4, %v14919_v5  ;;  %v8566_v8 = vmax.f32 %v8542_v22, %v8552_v3  ;;  %v15019_v53 = vadd.f32 %v15521_v45, %v15520_v10  ;;  %v8471_v62 = vmax.f32 %v8447_v37, %v8458_v56  ;;  %8353 = vst [vmem:[#allocation4 + $0xf1] sm:$0xff] %v8321_v55  ;;  %v8413_v5 = vld [vmem:[#allocation4 + $0x92] ss:$2 sm:$0xff] }
 0x578   : > { %v8322_v20 = vmax.f32 %v8290_v0, 0.0  ;;  %v8255_v36 = vmul.f32 %v14793_v26, %v8217_v33  ;;  %8351 = vst [vmem:[#allocation4 + $0xd9] sm:$0xff] %v8319_v41  ;;  %v8288_v7 = vadd.f32 %v14804_v54, %v8250_v27  ;;  %v8215_v57 = vadd.f32 %v8148_v9, %v7975_v35  ;;  %v15522_v35 = vld [vmem:[#allocation70_spill] sm:$0xff] }
 0x579   : > { %v10562_v63 = vpop.f32.mrf.mxu0  ;;  %v7976_v13 = vadd.f32 %v14961_v39, %v7736_v50  ;;  %v7981_v31 = vadd.f32 %v14976_v24, %v7741_v17  ;;  %8574 = vst [vmem:[%s14989_s30 + $0x8] sm:$0xff] %v8566_v8  ;;  %v8425_v51 = vmax.f32 %v8401_v43, %v8413_v5  ;;  %v8495_v14 = vmax.f32 %v8471_v62, %v8482_v38  ;;  %v10529_v39 = vpop.f32.mrf.mxu1  ;;  %v15523_v24 = vld [vmem:[#allocation72_spill] sm:$0xff]  ;;  %v8554_v43 = vld [vmem:[#allocation4 + $0x92] ss:$2 sm:$0xff] }
 0x57a   : > { %8354 = vst [vmem:[#allocation4 + $0xf9] sm:$0xff] %v8322_v20  ;;  %v8293_v28 = vadd.f32 %v14804_v54, %v8255_v36  ;;  %v8218_v2 = vadd.f32 %v10562_v63, %v7978_v11  ;;  %v8253_v44 = vmul.f32 %v14793_v26, %v8215_v57  ;;  %v7979_v19 = vadd.f32 %v14994_v42, %v7739_v15  ;;  %v8375_v23 = vld [vmem:[#allocation4 + $0xc0] ss:$2 sm:$0xff]  ;;  %v8391_v42 = vld [vmem:[#allocation4 + $0xc1] ss:$2 sm:$0xff] }
 0x57b   : > { %v8151_v32 = vpop.f32.mrf.mxu0  ;;  %v7740_v29 = vadd.f32 %v15522_v35, %v14923_v46  ;;  %v7982_v25 = vadd.f32 %v10526_v18, %v7742_v49  ;;  %v7745_v50 = vadd.f32 %v15523_v24, %v14927_v16  ;;  %v8519_v17 = vmax.f32 %v8495_v14, %v8506_v34  ;;  %v15524_v18 = vld [vmem:[#allocation73_spill] sm:$0xff]  ;;  %v7940_v49 = vpop.f32.mrf.mxu1  ;;  %v8508_v45 = vld [vmem:[#allocation4 + $0xc0] ss:$2 sm:$0xff] }
 0x57c   : > { %v8436_v52 = vld [vmem:[#allocation4 + $0xa8] ss:$2 sm:$0xff]  ;;  %v8256_v12 = vmul.f32 %v14793_v26, %v8218_v2  ;;  %v8216_v40 = vadd.f32 %v8151_v32, %v7976_v13  ;;  %v8320_v48 = vmax.f32 %v8288_v7, 0.0  ;;  %v8460_v15 = vld [vmem:[#allocation4 + $0xa9] ss:$2 sm:$0xff]  ;;  %v8325_v11 = vmax.f32 %v8293_v28, 0.0 }
 0x57d   : > { %v8448_v21 = vmax.f32 %v8425_v51, %v8436_v52  ;;  %v10565_v1 = vpop.f32.mrf.mxu0  ;;  %v8291_v46 = vadd.f32 %v14804_v54, %v8253_v44  ;;  %v7743_v0 = vadd.f32 %v15524_v18, %v14937_v30  ;;  %v8543_v27 = vmax.f32 %v8519_v17, %v8530_v60  ;;  %v8484_v37 = vld [vmem:[#allocation4 + $0xaa] ss:$2 sm:$0xff] }
 0x57e   : > { %v8294_v22 = vadd.f32 %v14804_v54, %v8256_v12  ;;  %v8254_v58 = vmul.f32 %v14793_v26, %v8216_v40  ;;  %8352 = vst [vmem:[#allocation4 + $0xe1] sm:$0xff] %v8320_v48  ;;  %v8221_v33 = vadd.f32 %v10565_v1, %v7981_v31  ;;  %8357 = vst [vmem:[#allocation4 + $0x121] sm:$0xff] %v8325_v11  ;;  %v8415_v63 = vld [vmem:[#allocation4 + $0xc2] ss:$2 sm:$0xff]  ;;  %v8532_v31 = vld [vmem:[#allocation4 + $0xc1] ss:$2 sm:$0xff] }
 0x57f   : > { %v8472_v16 = vmax.f32 %v8448_v21, %v8460_v15  ;;  %v8164_v3 = vpop.f32.mrf.mxu0  ;;  %v8323_v55 = vmax.f32 %v8291_v46, 0.0  ;;  %v8567_v8 = vmax.f32 %v8543_v27, %v8554_v43  ;;  %v8402_v56 = vmax.f32 %v8375_v23, %v8391_v42  ;;  %v8556_v12 = vld [vmem:[#allocation4 + $0xc2] ss:$2 sm:$0xff] }
 0x580   : > { %v8326_v41 = vmax.f32 %v8294_v22, 0.0  ;;  %v8292_v9 = vadd.f32 %v14804_v54, %v8254_v58  ;;  %v8219_v4 = vadd.f32 %v8164_v3, %v7979_v19  ;;  %v8259_v30 = vmul.f32 %v14793_v26, %v8221_v33  ;;  %v10530_v19 = vpop.f32.mrf.mxu1 }
 0x581   : > { %v8496_v20 = vmax.f32 %v8472_v16, %v8484_v37  ;;  %v10566_v36 = vpop.f32.mrf.mxu0  ;;  %v7746_v10 = vadd.f32 %v14778_v61, %v14952_v47  ;;  %8355 = vst [vmem:[#allocation4 + $0x109] sm:$0xff] %v8323_v55  ;;  %v7980_v57 = vadd.f32 %v15015_v6, %v7740_v29  ;;  %v7985_v13 = vadd.f32 %v10529_v39, %v7745_v50  ;;  %v8377_v51 = vld [vmem:[#allocation4 + $0xf0] ss:$2 sm:$0xff]  ;;  %v8393_v14 = vld [vmem:[#allocation4 + $0xf1] ss:$2 sm:$0xff] }
 0x582   : > { %8358 = vst [vmem:[#allocation4 + $0x129] sm:$0xff] %v8326_v41  ;;  %v8257_v62 = vmul.f32 %v14793_v26, %v8219_v4  ;;  %v8222_v7 = vadd.f32 %v10566_v36, %v7982_v25  ;;  %v8324_v38 = vmax.f32 %v8292_v9, 0.0  ;;  %v8297_v28 = vadd.f32 %v14804_v54, %v8259_v30  ;;  %8575 = vst [vmem:[%s14989_s30 + $0x10] sm:$0xff] %v8567_v8  ;;  %v7943_v11 = vpop.f32.mrf.mxu1  ;;  %v8417_v58 = vld [vmem:[#allocation4 + $0xf2] ss:$2 sm:$0xff] }
 0x583   : > { %v8520_v5 = vmax.f32 %v8496_v20, %v8508_v45  ;;  %v8167_v2 = vpop.f32.mrf.mxu0  ;;  %v7983_v32 = vadd.f32 %v7940_v49, %v7743_v0  ;;  %v7744_v6 = vadd.f32 %v14782_v59, %v15019_v53  ;;  %v8426_v35 = vmax.f32 %v8402_v56, %v8415_v63  ;;  %v8510_v43 = vld [vmem:[#allocation4 + $0xf0] ss:$2 sm:$0xff]  ;;  %v8534_v45 = vld [vmem:[#allocation4 + $0xf1] ss:$2 sm:$0xff] }
 0x584   : > { %v8295_v61 = vadd.f32 %v14804_v54, %v8257_v62  ;;  %v8260_v47 = vmul.f32 %v14793_v26, %v8222_v7  ;;  %v8220_v44 = vadd.f32 %v8167_v2, %v7980_v57  ;;  %8356 = vst [vmem:[#allocation4 + $0x111] sm:$0xff] %v8324_v38  ;;  %v8329_v34 = vmax.f32 %v8297_v28, 0.0  ;;  %v8558_v2 = vld [vmem:[#allocation4 + $0xf2] ss:$2 sm:$0xff] }
 0x585   : > { %v8544_v29 = vmax.f32 %v8520_v5, %v8532_v31  ;;  %v10569_v52 = vpop.f32.mrf.mxu0  ;;  %v8438_v40 = vld [vmem:[#allocation4 + $0xd8] ss:$2 sm:$0xff]  ;;  %v7986_v50 = vadd.f32 %v10530_v19, %v7746_v10  ;;  %v8403_v17 = vmax.f32 %v8377_v51, %v8393_v14  ;;  %v8462_v53 = vld [vmem:[#allocation4 + $0xd9] ss:$2 sm:$0xff]  ;;  %v7984_v33 = vadd.f32 %v7943_v11, %v7744_v6 }
 0x586   : > { %v8298_v25 = vadd.f32 %v14804_v54, %v8260_v47  ;;  %v8258_v39 = vmul.f32 %v14793_v26, %v8220_v44  ;;  %v8225_v24 = vadd.f32 %v10569_v52, %v7985_v13  ;;  %v8449_v23 = vmax.f32 %v8426_v35, %v8438_v40  ;;  %8361 = vst [vmem:[#allocation4 + $0x151] sm:$0xff] %v8329_v34  ;;  %v8486_v18 = vld [vmem:[#allocation4 + $0xda] ss:$2 sm:$0xff] }
 0x587   : > { %v8568_v60 = vmax.f32 %v8544_v29, %v8556_v12  ;;  %v8327_v21 = vmax.f32 %v8295_v61, 0.0  ;;  %v8180_v59 = vpop.f32.mrf.mxu0  ;;  %v8427_v3 = vmax.f32 %v8403_v17, %v8417_v58 }
 0x588   : > { %v8330_v48 = vmax.f32 %v8298_v25, 0.0  ;;  %v8296_v1 = vadd.f32 %v14804_v54, %v8258_v39  ;;  %v8263_v42 = vmul.f32 %v14793_v26, %v8225_v24  ;;  %v8223_v15 = vadd.f32 %v8180_v59, %v7983_v32 }
 0x589   : > { %v8473_v46 = vmax.f32 %v8449_v23, %v8462_v53  ;;  %8359 = vst [vmem:[#allocation4 + $0x139] sm:$0xff] %v8327_v21  ;;  %v10570_v22 = vpop.f32.mrf.mxu0  ;;  %8576 = vst [vmem:[%s14989_s30 + $0x18] sm:$0xff] %v8568_v60  ;;  %v8379_v9 = vld [vmem:[#allocation4 + $0x120] ss:$2 sm:$0xff]  ;;  %v8395_v4 = vld [vmem:[#allocation4 + $0x121] ss:$2 sm:$0xff] }
 0x58a   : > { %8362 = vst [vmem:[#allocation4 + $0x159] sm:$0xff] %v8330_v48  ;;  %v8301_v0 = vadd.f32 %v14804_v54, %v8263_v42  ;;  %v8261_v27 = vmul.f32 %v14793_v26, %v8223_v15  ;;  %v8226_v16 = vadd.f32 %v10570_v22, %v7986_v50  ;;  %v8328_v55 = vmax.f32 %v8296_v1, 0.0  ;;  %v8419_v47 = vld [vmem:[#allocation4 + $0x122] ss:$2 sm:$0xff]  ;;  %v8536_v19 = vld [vmem:[#allocation4 + $0x121] ss:$2 sm:$0xff] }
 0x58b   : > { %v8497_v37 = vmax.f32 %v8473_v46, %v8486_v18  ;;  %v8183_v41 = vpop.f32.mrf.mxu0  ;;  %v8440_v49 = vld [vmem:[#allocation4 + $0x108] ss:$2 sm:$0xff]  ;;  %v8464_v62 = vld [vmem:[#allocation4 + $0x109] ss:$2 sm:$0xff]  ;;  %v8404_v38 = vmax.f32 %v8379_v9, %v8395_v4 }
 0x58c   : > { %v8299_v8 = vadd.f32 %v14804_v54, %v8261_v27  ;;  %v8264_v56 = vmul.f32 %v14793_v26, %v8226_v16  ;;  %v8224_v20 = vadd.f32 %v8183_v41, %v7984_v33  ;;  %v8450_v36 = vmax.f32 %v8427_v3, %v8440_v49  ;;  %8360 = vst [vmem:[#allocation4 + $0x141] sm:$0xff] %v8328_v55  ;;  %v8488_v13 = vld [vmem:[#allocation4 + $0x10a] ss:$2 sm:$0xff] }
 0x58d   : > { %v8521_v30 = vmax.f32 %v8497_v37, %v8510_v43  ;;  %v8333_v10 = vmax.f32 %v8301_v0, 0.0  ;;  %v8512_v44 = vld [vmem:[#allocation4 + $0x120] ss:$2 sm:$0xff]  ;;  %v8428_v32 = vmax.f32 %v8404_v38, %v8419_v47 }
 0x58e   : > { %v8331_v7 = vmax.f32 %v8299_v8, 0.0  ;;  %v8302_v57 = vadd.f32 %v14804_v54, %v8264_v56  ;;  %v8262_v63 = vmul.f32 %v14793_v26, %v8224_v20  ;;  %v8474_v28 = vmax.f32 %v8450_v36, %v8464_v62  ;;  %v8560_v40 = vld [vmem:[#allocation4 + $0x122] ss:$2 sm:$0xff] }
 0x58f   : > { %v8545_v5 = vmax.f32 %v8521_v30, %v8534_v45  ;;  %8365 = vst [vmem:[#allocation4 + $0x181] sm:$0xff] %v8333_v10 }
 0x590   : > { %8363 = vst [vmem:[#allocation4 + $0x169] sm:$0xff] %v8331_v7  ;;  %v8334_v31 = vmax.f32 %v8302_v57, 0.0  ;;  %v8300_v51 = vadd.f32 %v14804_v54, %v8262_v63  ;;  %v8498_v61 = vmax.f32 %v8474_v28, %v8488_v13 }
 0x591   : > { %v8569_v14 = vmax.f32 %v8545_v5, %v8558_v2  ;;  %v8381_v35 = vld [vmem:[#allocation4 + $0x150] ss:$2 sm:$0xff]  ;;  %v8397_v29 = vld [vmem:[#allocation4 + $0x151] ss:$2 sm:$0xff] }
 0x592   : > { %8366 = vst [vmem:[#allocation4 + $0x189] sm:$0xff] %v8334_v31  ;;  %v8522_v6 = vmax.f32 %v8498_v61, %v8512_v44  ;;  %v8332_v26 = vmax.f32 %v8300_v51, 0.0  ;;  %v8405_v39 = vmax.f32 %v8381_v35, %v8397_v29  ;;  %v8421_v17 = vld [vmem:[#allocation4 + $0x152] ss:$2 sm:$0xff]  ;;  %v8538_v53 = vld [vmem:[#allocation4 + $0x151] ss:$2 sm:$0xff] }
 0x593   : > { %8577 = vst [vmem:[%s14989_s30 + $0x20] sm:$0xff] %v8569_v14  ;;  %v8442_v34 = vld [vmem:[#allocation4 + $0x138] ss:$2 sm:$0xff]  ;;  %v8466_v25 = vld [vmem:[#allocation4 + $0x139] ss:$2 sm:$0xff] }
 0x594   : > { %v8546_v52 = vmax.f32 %v8522_v6, %v8536_v19  ;;  %v8451_v12 = vmax.f32 %v8428_v32, %v8442_v34  ;;  %8364 = vst [vmem:[#allocation4 + $0x171] sm:$0xff] %v8332_v26  ;;  %v8490_v50 = vld [vmem:[#allocation4 + $0x13a] ss:$2 sm:$0xff]  ;;  %v8429_v21 = vmax.f32 %v8405_v39, %v8421_v17 }
 0x595   : > { %v8514_v23 = vld [vmem:[#allocation4 + $0x150] ss:$2 sm:$0xff] }
 0x596   : > { %v8570_v54 = vmax.f32 %v8546_v52, %v8560_v40  ;;  %v8475_v24 = vmax.f32 %v8451_v12, %v8466_v25  ;;  %v8562_v15 = vld [vmem:[#allocation4 + $0x152] ss:$2 sm:$0xff] }
 0x598   : > { %v8499_v60 = vmax.f32 %v8475_v24, %v8490_v50  ;;  %8578 = vst [vmem:[%s14989_s30 + $0x28] sm:$0xff] %v8570_v54 }
 0x599   : > { %v8516_v0 = vld [vmem:[#allocation4 + $0x180] ss:$2 sm:$0xff]  ;;  %v8540_v16 = vld [vmem:[#allocation4 + $0x181] ss:$2 sm:$0xff] }
 0x59a   : > { %v8523_v59 = vmax.f32 %v8499_v60, %v8514_v23  ;;  %v8564_v3 = vld [vmem:[#allocation4 + $0x182] ss:$2 sm:$0xff] }
 0x59b   : > { %v8444_v48 = vld [vmem:[#allocation4 + $0x168] ss:$2 sm:$0xff]  ;;  %v8468_v11 = vld [vmem:[#allocation4 + $0x169] ss:$2 sm:$0xff] }
 0x59c   : > { %v8547_v1 = vmax.f32 %v8523_v59, %v8538_v53  ;;  %v8452_v42 = vmax.f32 %v8429_v21, %v8444_v48  ;;  %v8492_v58 = vld [vmem:[#allocation4 + $0x16a] ss:$2 sm:$0xff] }
 0x59e   : > { %v8571_v46 = vmax.f32 %v8547_v1, %v8562_v15  ;;  %v8476_v22 = vmax.f32 %v8452_v42, %v8468_v11 }
 0x5a0   : > { %v8500_v18 = vmax.f32 %v8476_v22, %v8492_v58  ;;  %8579 = vst [vmem:[%s14989_s30 + $0x30] sm:$0xff] %v8571_v46 }
 0x5a2   : > { %v8524_v27 = vmax.f32 %v8500_v18, %v8516_v0 }
 0x5a4   : > { %v8548_v33 = vmax.f32 %v8524_v27, %v8540_v16 }
 0x5a6   : > { %v8572_v43 = vmax.f32 %v8548_v33, %v8564_v3 }
 0x5a8   : > { %8580 = vst [vmem:[%s14989_s30 + $0x38] sm:$0xff] %v8572_v43 }
 0x5a9   : > { %10960 = shalt.err (!%p10957_p10)
}
 0x5aa   : > { %s10961_s12 = scalar_lea.hbm %s15070_s23, 1024  ;;  %s10965_s21 = scalar_lea.hbm %s15126_s10, 2048 }
 0x5ab   : > { %p10962_p6 = scmp.ne.s32.totalorder %s15070_s23, %s10961_s12  ;;  %p10966_p3 = scmp.lt.s32.totalorder %s15070_s23, %s15126_s10 }
 0x5ac   : > { %p10967_p11 = scmp.lt.s32.totalorder %s10965_s21, %s10961_s12 }
 0x5ad   : > { %p10963_p4 = pnand %p10962_p6, %p15525_p1 }
 0x5ae   : > { %p10968_p5 = por %p10967_p11, %p10966_p3 }
 0x5af   : > { %p10964_p8 = pneg %p10963_p4 }
 0x5b1   : > { %p10969_p7 = pnand %p10968_p5, %p10964_p8 }
 0x5b3   : > { %10972 = shalt.err (!%p10969_p7)
}
 0x5b4   : > { %s11031_s24 = smov 128   ;;  %s11032_s27 = smov 8  }
 0x5b5   : > { %10589 = dma.vmem_to_hbm [thread:$0]  (%p15525_p1), %s15072_s18, 1024, %s15070_s23, %s8582_s4, %s11031_s24, %s11031_s24, %s11032_s27  }
 0x5b6 PF: > { %s8610_s29 = sand.u32 1, %s11007_s13   ;;  %p15526_p12 = scmp.ne.s32.totalorder %s15187_s20, 0 }
 0x5b7   : > { %p15527_p9 = scmp.ge.s32.totalorder %s11019_s16, 2  ;;  %s8611_s17 = scalar_lea.sflag [#allocation7], %s8610_s29 }
 0x5b9   : > { %p10606_p13 = pnand %p15527_p9, %p15526_p12 }
 0x5bb   : > { %p10607_p0 = pneg %p10606_p13 }
 0x5bd   : > { %11002 = dma.done.wait (%p10607_p0), %s8611_s17, 1024  }
 0x5be   : > { %11004 = vsyncadd (%p10607_p0), %s8611_s17, 4294966272  ;;  %s15528_s22 = sld [smem:[#allocation18_spill]]  ;;  %p25_p2 = scmp.ge.s32.totalorder %s11177_s26, 4  }
 0x5bf   : > { %s15529_s13 = smov %s11011_s14  ;;  %s15530_s14 = smov %s11015_s15 }
 0x5c0   : > { %s15532_s16 = smov %s11177_s26  ;;  %27 = sbr.rel (!%p25_p2) target bundleno = 11 (0xb), region = 209 }
 0x5c4   : > { %s15531_s15 = smov %s15528_s22 }
 0x5c5   :  { %8616 = vsyncpa [#allocation6], 1 }
 0x5c6   :  { %8618 = vsyncpa [#allocation6 + $0x1], 1 }
 0x5c7   :  { %8619 = vsyncpa [#allocation9], 1 }
 0x5c8   :  { %8620 = vsyncpa [#allocation12], 1 }
 0x5c9   :  { %8621 = vsyncpa [#allocation7], 1 }
 0x5ca   :  { %8623 = vsyncpa [#allocation7 + $0x1], 1 }

</bundles_post_ra>
